<compile_context>
chip_gen: v5e
topology: v5e:2x2
jax: 0.10.0
libtpu: 0.0.40
codegen_flags: <defaults>
</compile_context>

<pallas_src>
import jax
import jax.numpy as jnp
import numpy as np
from jax import lax
from jax.experimental import pallas as pl
from jax.experimental.pallas import tpu as pltpu

# fixed architecture constants (from the PyTorch module)
C1, C2, C3 = 32, 64, 64          # conv output channels
K1, K2, K3 = 5, 5, 4             # conv kernel widths (width-stride 3 each)
CONV_S = 3
POOL_K, POOL_S = 3, 2
GRP = POOL_S * CONV_S            # 6: input columns consumed per pooled output position
SUPER = GRP * GRP                # 36: raw columns consumed per group of 6 pooled-1 positions
X0W = SUPER + K1                 # 41: raw-column window feeding one group of 6 pooled-1 positions
PH = 256                         # lane-padded width of one conv1 pool-phase block (6*C1=192 -> 256)


def _geometry(W):
    wc1 = (W - K1) // CONV_S + 1
    wp1 = (wc1 - POOL_K) // POOL_S + 1
    wc2 = (wp1 - K2) // CONV_S + 1
    wp2 = (wc2 - POOL_K) // POOL_S + 1
    wc3 = (wp2 - K3) // CONV_S + 1
    wp3 = (wc3 - POOL_K) // POOL_S + 1
    return wc1, wp1, wc2, wp2, wc3, wp3


def _make_kernel(*, H, NG1, P2, NQ3, P3):
    R = H                        # independent conv rows handled per grid step (one sample)
    PC = P3 * C3                 # flatten block per h (p-major, c-minor)

    def kernel(x0_ref, w1_ref, b1_ref, w2_ref, b2_ref, w3_ref, b3_ref,
               wf1_ref, bf1_ref, wo_ref, bo_ref, out_ref):
        f32 = jnp.float32
        x0 = x0_ref[0]                                   # (NG1*R, 41)

        # ---- conv1 + pool1: ONE fused matmul over the 3 pool-phase weight blocks
        #      (each 256 lanes -> vreg-aligned slices); bias/ReLU deferred past the max.
        z = jnp.dot(x0, w1_ref[...], preferred_element_type=f32)      # (NG1*R, 3*PH)
        x1 = jnp.maximum(jnp.maximum(z[:, 0:PH], z[:, PH:2 * PH]), z[:, 2 * PH:3 * PH])
        x1 = jnp.maximum(x1 + b1_ref[...], 0.0)          # (NG1*R, PH); padding lanes stay 0

        # ---- conv2 + pool2: even / odd conv positions.  Row shifts only on the small
        #      (NG1*R, C2) outputs, never on x1.  Bias/ReLU deferred past the pool max.
        yev = jnp.dot(x1, w2_ref[0], preferred_element_type=f32)      # (NG1*R, C2)
        od0 = jnp.dot(x1, w2_ref[1], preferred_element_type=f32)
        od1 = jnp.dot(x1, w2_ref[2], preferred_element_type=f32)
        yod = od0[:P2 * R, :] + od1[R:(P2 + 1) * R, :]
        p2 = jnp.maximum(jnp.maximum(yev[:P2 * R, :], yod), yev[R:(P2 + 1) * R, :])
        p2 = jnp.maximum(p2 + b2_ref[...], 0.0)          # (P2*R, C2) = pooled2

        # ---- conv3 + pool3: one matmul per tap (lane-aligned, no mid-vreg slices),
        #      shifted row adds; bias/ReLU deferred past the pool max.
        taps = [jnp.dot(p2, w3_ref[k], preferred_element_type=f32) for k in range(K3)]
        conv3 = []
        for q in range(NQ3):
            acc = taps[0][CONV_S * q * R:(CONV_S * q + 1) * R, :]
            for k in range(1, K3):
                m = (CONV_S * q + k) * R
                acc = acc + taps[k][m:m + R, :]
            conv3.append(acc)
        b3 = b3_ref[...]
        pool3 = [jnp.maximum(jnp.maximum(jnp.maximum(conv3[2 * p], conv3[2 * p + 1]),
                                         conv3[2 * p + 2]) + b3, 0.0)
                 for p in range(P3)]
        y = jnp.concatenate(pool3, axis=1)               # (R, P3*C3), lanes = (p, c)

        # ---- flatten: move the H rows into lanes -> one lane-dense (1, H*P3*C3) row.
        #      Feature order (h, p, c); wf1 rows were pre-permuted at pack time to match.
        #      (No scratch, no masked-store loop, no reload.)
        flat = jnp.concatenate([y[h:h + 1, :] for h in range(R)], axis=1)   # (1, H*PC)

        # ---- fc1 + ReLU + out ----
        hid = jnp.maximum(
            jnp.dot(flat, wf1_ref[...], preferred_element_type=f32) + bf1_ref[...], 0.0)
        out_ref[0] = (jnp.dot(hid, wo_ref[...], preferred_element_type=f32)
                      + bo_ref[...])

    return kernel


def cnn_forward(x, packed):
    N, Cin, H, W = x.shape
    assert Cin == 1
    _, _, _, wp2, _, wp3 = _geometry(W)
    fc_in = C3 * H * wp3
    assert packed["wf1"].shape[0] == fc_in               # nn.Linear(4096, hidden) constraint
    out_size = packed["wo"].shape[1]

    P2, P3 = wp2, wp3
    NG1 = P2 + 1                 # groups of 6 pooled-1 positions produced (last is partial)
    NQ3 = 2 * P3 + 1             # conv3 positions consumed by the final pool
    WPAD = SUPER * (NG1 - 1) + X0W

    # cheap one-time trace-level prep of the tiny raw input: per-sample channel-last
    # rows, zero-pad the width, gather the 41-wide raw window per pooled-1 group.
    xr = x.reshape(N, H, W).astype(jnp.float32)
    if WPAD >= W:
        xr = jnp.pad(xr, ((0, 0), (0, 0), (0, WPAD - W)))
    else:
        xr = xr[:, :, :WPAD]
    cols = (SUPER * jnp.arange(NG1))[:, None] + jnp.arange(X0W)[None, :]
    x0 = jnp.transpose(xr[:, :, cols], (0, 2, 1, 3)).reshape(N, NG1 * H, X0W)

    kernel = _make_kernel(H=H, NG1=NG1, P2=P2, NQ3=NQ3, P3=P3)

    def _bcast(shape):
        nd = len(shape)
        return pl.BlockSpec(shape, lambda n, _nd=nd: (0,) * _nd)

    weights = (packed["w1"], packed["b1"], packed["w2"], packed["b2"],
               packed["w3"], packed["b3"], packed["wf1"], packed["bf1"],
               packed["wo"], packed["bo"])

    out = pl.pallas_call(
        kernel,
        out_shape=jax.ShapeDtypeStruct((N, 1, out_size), jnp.float32),
        grid=(N,),                                    # batch is independent -> megacore on v7x
        in_specs=[pl.BlockSpec((1, NG1 * H, X0W), lambda n: (n, 0, 0))]
                 + [_bcast(w.shape) for w in weights],
        out_specs=pl.BlockSpec((1, 1, out_size), lambda n: (n, 0, 0)),
        compiler_params=pltpu.CompilerParams(
            dimension_semantics=("parallel",),
            vmem_limit_bytes=32 * 1024 * 1024),
    )(x0, *weights)
    return out.reshape(N, out_size)


def pack_params(params, H, W):
    """One-time (outside jit) repack of torch-layout params into the kernel's matrices."""
    wc1, wp1, wc2, wp2, wc3, wp3 = _geometry(W)
    hidden = params["w_fc1"].shape[1]
    assert params["w_fc1"].shape[0] == C3 * H * wp3, "nn.Linear(4096, ...) constraint"
    # Geometry invariants the group packing / zero-padding trick relies on.
    assert wc1 == 2 * wp1 + 1 and wc2 == 2 * wp2 + 1 and wc3 == 2 * wp3 + 1
    assert wp1 == GRP * wp2 + (GRP - 1)

    # conv1: single (41, 3*PH) matrix; pool phase w occupies lanes [w*PH, w*PH + 6*C1).
    # Row d = 6*j + 3*w + k feeds lane block j with conv tap k.
    w_c1 = np.asarray(params["w_c1"], np.float32)            # (K1, C1), rows = tap k
    w1 = np.zeros((X0W, 3 * PH), np.float32)
    for w in range(3):
        for j in range(GRP):
            for k in range(K1):
                w1[GRP * j + CONV_S * w + k,
                   w * PH + j * C1: w * PH + (j + 1) * C1] = w_c1[k]
    b1 = np.zeros((1, PH), np.float32)
    b1[0, :GRP * C1] = np.tile(np.asarray(params["b_c1"], np.float32), GRP)

    # conv2: even-position matrix + two halves of the odd-position matrix, each padded
    # to PH input rows (rows >= 6*C1 are zero, matching x1's zero padding lanes).
    w_c2 = np.asarray(params["w_c2"], np.float32)             # (K2*C1, C2), rows = k*C1+ci
    w2e = np.zeros((PH, C2), np.float32)
    w2e[:K2 * C1] = w_c2
    w2o0 = np.zeros((PH, C2), np.float32)
    w2o0[3 * C1:GRP * C1] = w_c2[:3 * C1]
    w2o1 = np.zeros((PH, C2), np.float32)
    w2o1[:2 * C1] = w_c2[3 * C1:K2 * C1]
    w2 = np.stack([w2e, w2o0, w2o1], axis=0)                  # (3, PH, C2)

    # conv3: one (C2, C3) matrix per tap (lane-aligned outputs in the kernel).
    w_c3 = np.asarray(params["w_c3"], np.float32)             # (K3*C2, C3), rows = k*C2+ci
    w3 = w_c3.reshape(K3, C2, C3)

    # fc1: permute rows from torch flatten order (c, h, p) to kernel order (h, p, c).
    wf = np.asarray(params["w_fc1"], np.float32).reshape(C3, H, wp3, hidden)
    wf1 = np.transpose(wf, (1, 2, 0, 3)).reshape(C3 * H * wp3, hidden)

    return dict(
        w1=jnp.asarray(w1), b1=jnp.asarray(b1),
        w2=jnp.asarray(w2), b2=jnp.asarray(np.asarray(params["b_c2"], np.float32)[None, :]),
        w3=jnp.asarray(w3), b3=jnp.asarray(np.asarray(params["b_c3"], np.float32)[None, :]),
        wf1=jnp.asarray(wf1),
        bf1=jnp.asarray(np.asarray(params["b_fc1"], np.float32)[None, :]),
        wo=jnp.asarray(params["w_out"], jnp.float32),
        bo=jnp.asarray(np.asarray(params["b_out"], np.float32)[None, :]))


def init_params(key, hidden_size, output_size):
    """Torch-equivalent layouts: conv weights as (K*Cin, Cout) with
    w[k*Cin + ci, co] == torch_w[co, ci, 0, k]; linear weights as (in, out)."""
    ks = jax.random.split(key, 10)

    def uinit(k, shape, fan_in):
        bound = 1.0 / (float(fan_in) ** 0.5)
        return jax.random.uniform(k, shape, jnp.float32, -bound, bound)

    return dict(
        w_c1=uinit(ks[0], (K1 * 1, C1), K1 * 1),    b_c1=uinit(ks[1], (C1,), K1 * 1),
        w_c2=uinit(ks[2], (K2 * C1, C2), K2 * C1),  b_c2=uinit(ks[3], (C2,), K2 * C1),
        w_c3=uinit(ks[4], (K3 * C2, C3), K3 * C2),  b_c3=uinit(ks[5], (C3,), K3 * C2),
        w_fc1=uinit(ks[6], (4096, hidden_size), 4096),
        b_fc1=uinit(ks[7], (hidden_size,), 4096),
        w_out=uinit(ks[8], (hidden_size, output_size), hidden_size),
        b_out=uinit(ks[9], (output_size,), hidden_size),
    )


def _ref_forward(x, params):
    """Pure-XLA reference (mirrors the PyTorch forward) used to validate the kernel."""
    hi = lax.Precision.HIGHEST

    def conv(h, w_kc, b, cin, cout, k):
        w = jnp.transpose(w_kc.reshape(k, cin, cout), (2, 1, 0))[:, :, None, :]  # OIHW
        y = lax.conv_general_dilated(h, w, window_strides=(1, CONV_S), padding="VALID",
                                     dimension_numbers=("NCHW", "OIHW", "NCHW"),
                                     precision=hi)
        return jax.nn.relu(y + b[None, :, None, None])

    def pool(h):
        return lax.reduce_window(h, -jnp.inf, lax.max,
                                 (1, 1, 1, POOL_K), (1, 1, 1, POOL_S), "VALID")

    h = pool(conv(x, params["w_c1"], params["b_c1"], 1, C1, K1))
    h = pool(conv(h, params["w_c2"], params["b_c2"], C1, C2, K2))
    h = pool(conv(h, params["w_c3"], params["b_c3"], C2, C3, K3))
    flat = h.reshape(x.shape[0], -1)
    hid = jax.nn.relu(jnp.dot(flat, params["w_fc1"], precision=hi) + params["b_fc1"])
    return jnp.dot(hid, params["w_out"], precision=hi) + params["b_out"]


if __name__ == "__main__":
    key = jax.random.PRNGKey(0)
    kx, kp = jax.random.split(key)
    N, H, W = 2, 16, 1043            # 64 * H * wp3 == 4096, as nn.Linear(4096, ...) requires
    hidden_size, output_size = 50, 9

    x = jax.random.normal(kx, (N, 1, H, W), dtype=jnp.float32)
    params = init_params(kp, hidden_size, output_size)
    packed = pack_params(params, H, W)

    y = jax.jit(cnn_forward)(x, packed)
    y = jax.block_until_ready(y)
    assert y.shape == (N, output_size) and y.dtype == jnp.float32

    # sanity check against a pure-XLA reference of the same forward pass
    y_ref = jax.block_until_ready(jax.jit(_ref_forward)(x, params))
    np.testing.assert_allclose(np.asarray(y), np.asarray(y_ref), rtol=2e-2, atol=2e-2)
    print("KERNEL_OK")
</pallas_src>

<mosaic_0001>
module attributes {stable_mosaic.version = 11 : i64} {
  func.func @kernel(%arg0: i32, %arg1: memref<1x464x41xf32, #tpu.memory_space<vmem>>, %arg2: memref<41x768xf32, #tpu.memory_space<vmem>>, %arg3: memref<1x256xf32, #tpu.memory_space<vmem>>, %arg4: memref<3x256x64xf32, #tpu.memory_space<vmem>>, %arg5: memref<1x64xf32, #tpu.memory_space<vmem>>, %arg6: memref<4x64x64xf32, #tpu.memory_space<vmem>>, %arg7: memref<1x64xf32, #tpu.memory_space<vmem>>, %arg8: memref<4096x50xf32, #tpu.memory_space<vmem>>, %arg9: memref<1x50xf32, #tpu.memory_space<vmem>>, %arg10: memref<50x9xf32, #tpu.memory_space<vmem>>, %arg11: memref<1x9xf32, #tpu.memory_space<vmem>>, %arg12: memref<1x1x9xf32, #tpu.memory_space<vmem>>) attributes {dimension_semantics = [#tpu.dimension_semantics<parallel>], iteration_bounds = array<i64: 2>, scalar_prefetch = 0 : i64, scratch_operands = 0 : i64, tpu.core_type = #tpu.core_type<tc>, window_params = [{transform_indices = @transform_0, window_bounds = array<i64: 1, 464, 41>}, {pipeline_mode = #tpu.pipeline_mode<synchronous>, transform_indices = @transform_1, window_bounds = array<i64: 41, 768>}, {pipeline_mode = #tpu.pipeline_mode<synchronous>, transform_indices = @transform_2, window_bounds = array<i64: 1, 256>}, {pipeline_mode = #tpu.pipeline_mode<synchronous>, transform_indices = @transform_3, window_bounds = array<i64: 3, 256, 64>}, {pipeline_mode = #tpu.pipeline_mode<synchronous>, transform_indices = @transform_4, window_bounds = array<i64: 1, 64>}, {pipeline_mode = #tpu.pipeline_mode<synchronous>, transform_indices = @transform_5, window_bounds = array<i64: 4, 64, 64>}, {pipeline_mode = #tpu.pipeline_mode<synchronous>, transform_indices = @transform_6, window_bounds = array<i64: 1, 64>}, {pipeline_mode = #tpu.pipeline_mode<synchronous>, transform_indices = @transform_7, window_bounds = array<i64: 4096, 50>}, {pipeline_mode = #tpu.pipeline_mode<synchronous>, transform_indices = @transform_8, window_bounds = array<i64: 1, 50>}, {pipeline_mode = #tpu.pipeline_mode<synchronous>, transform_indices = @transform_9, window_bounds = array<i64: 50, 9>}, {pipeline_mode = #tpu.pipeline_mode<synchronous>, transform_indices = @transform_10, window_bounds = array<i64: 1, 9>}, {transform_indices = @transform_11, window_bounds = array<i64: 1, 1, 9>}]} {
    %c0 = arith.constant 0 : index
    %c0_0 = arith.constant 0 : index
    %c0_1 = arith.constant 0 : index
    %0 = vector.load %arg1[%c0, %c0_0, %c0_1] : memref<1x464x41xf32, #tpu.memory_space<vmem>>, vector<1x464x41xf32>
    %1 = vector.shape_cast %0 : vector<1x464x41xf32> to vector<464x41xf32>
    %c0_2 = arith.constant 0 : index
    %c0_3 = arith.constant 0 : index
    %2 = vector.load %arg2[%c0_2, %c0_3] : memref<41x768xf32, #tpu.memory_space<vmem>>, vector<41x768xf32>
    %cst = arith.constant dense<0.000000e+00> : vector<464x768xf32>
    %3 = tpu.matmul %1, %2, %cst {dimension_numbers = #tpu.dot_dimension_numbers<[1], [0], [0], [1], [0, 0, 1, 1], [], []>} : vector<464x41xf32>, vector<41x768xf32>, vector<464x768xf32> -> vector<464x768xf32>
    %4 = vector.extract_strided_slice %3 {offsets = [0, 0], sizes = [464, 256], strides = [1, 1]} : vector<464x768xf32> to vector<464x256xf32>
    %5 = vector.extract_strided_slice %3 {offsets = [0, 256], sizes = [464, 256], strides = [1, 1]} : vector<464x768xf32> to vector<464x256xf32>
    %6 = arith.maximumf %4, %5 : vector<464x256xf32>
    %7 = vector.extract_strided_slice %3 {offsets = [0, 512], sizes = [464, 256], strides = [1, 1]} : vector<464x768xf32> to vector<464x256xf32>
    %8 = arith.maximumf %6, %7 : vector<464x256xf32>
    %c0_4 = arith.constant 0 : index
    %c0_5 = arith.constant 0 : index
    %9 = vector.load %arg3[%c0_4, %c0_5] : memref<1x256xf32, #tpu.memory_space<vmem>>, vector<1x256xf32>
    %10 = vector.broadcast %9 : vector<1x256xf32> to vector<464x256xf32>
    %11 = arith.addf %8, %10 : vector<464x256xf32>
    %cst_6 = arith.constant 0.000000e+00 : f32
    %12 = vector.broadcast %cst_6 : f32 to vector<464x256xf32>
    %13 = arith.maximumf %11, %12 : vector<464x256xf32>
    %c0_7 = arith.constant 0 : index
    %c0_8 = arith.constant 0 : index
    %c0_9 = arith.constant 0 : index
    %14 = vector.load %arg4[%c0_7, %c0_8, %c0_9] : memref<3x256x64xf32, #tpu.memory_space<vmem>>, vector<1x256x64xf32>
    %15 = vector.shape_cast %14 : vector<1x256x64xf32> to vector<256x64xf32>
    %cst_10 = arith.constant dense<0.000000e+00> : vector<464x64xf32>
    %16 = tpu.matmul %13, %15, %cst_10 {dimension_numbers = #tpu.dot_dimension_numbers<[1], [0], [0], [1], [0, 0, 1, 1], [], []>} : vector<464x256xf32>, vector<256x64xf32>, vector<464x64xf32> -> vector<464x64xf32>
    %c1 = arith.constant 1 : index
    %c0_11 = arith.constant 0 : index
    %c0_12 = arith.constant 0 : index
    %17 = vector.load %arg4[%c1, %c0_11, %c0_12] : memref<3x256x64xf32, #tpu.memory_space<vmem>>, vector<1x256x64xf32>
    %18 = vector.shape_cast %17 : vector<1x256x64xf32> to vector<256x64xf32>
    %cst_13 = arith.constant dense<0.000000e+00> : vector<464x64xf32>
    %19 = tpu.matmul %13, %18, %cst_13 {dimension_numbers = #tpu.dot_dimension_numbers<[1], [0], [0], [1], [0, 0, 1, 1], [], []>} : vector<464x256xf32>, vector<256x64xf32>, vector<464x64xf32> -> vector<464x64xf32>
    %c2 = arith.constant 2 : index
    %c0_14 = arith.constant 0 : index
    %c0_15 = arith.constant 0 : index
    %20 = vector.load %arg4[%c2, %c0_14, %c0_15] : memref<3x256x64xf32, #tpu.memory_space<vmem>>, vector<1x256x64xf32>
    %21 = vector.shape_cast %20 : vector<1x256x64xf32> to vector<256x64xf32>
    %cst_16 = arith.constant dense<0.000000e+00> : vector<464x64xf32>
    %22 = tpu.matmul %13, %21, %cst_16 {dimension_numbers = #tpu.dot_dimension_numbers<[1], [0], [0], [1], [0, 0, 1, 1], [], []>} : vector<464x256xf32>, vector<256x64xf32>, vector<464x64xf32> -> vector<464x64xf32>
    %23 = vector.extract_strided_slice %19 {offsets = [0, 0], sizes = [448, 64], strides = [1, 1]} : vector<464x64xf32> to vector<448x64xf32>
    %24 = vector.extract_strided_slice %22 {offsets = [16, 0], sizes = [448, 64], strides = [1, 1]} : vector<464x64xf32> to vector<448x64xf32>
    %25 = arith.addf %23, %24 : vector<448x64xf32>
    %26 = vector.extract_strided_slice %16 {offsets = [0, 0], sizes = [448, 64], strides = [1, 1]} : vector<464x64xf32> to vector<448x64xf32>
    %27 = arith.maximumf %26, %25 : vector<448x64xf32>
    %28 = vector.extract_strided_slice %16 {offsets = [16, 0], sizes = [448, 64], strides = [1, 1]} : vector<464x64xf32> to vector<448x64xf32>
    %29 = arith.maximumf %27, %28 : vector<448x64xf32>
    %c0_17 = arith.constant 0 : index
    %c0_18 = arith.constant 0 : index
    %30 = vector.load %arg5[%c0_17, %c0_18] : memref<1x64xf32, #tpu.memory_space<vmem>>, vector<1x64xf32>
    %31 = vector.broadcast %30 : vector<1x64xf32> to vector<448x64xf32>
    %32 = arith.addf %29, %31 : vector<448x64xf32>
    %cst_19 = arith.constant 0.000000e+00 : f32
    %33 = vector.broadcast %cst_19 : f32 to vector<448x64xf32>
    %34 = arith.maximumf %32, %33 : vector<448x64xf32>
    %c0_20 = arith.constant 0 : index
    %c0_21 = arith.constant 0 : index
    %c0_22 = arith.constant 0 : index
    %35 = vector.load %arg6[%c0_20, %c0_21, %c0_22] : memref<4x64x64xf32, #tpu.memory_space<vmem>>, vector<1x64x64xf32>
    %36 = vector.shape_cast %35 : vector<1x64x64xf32> to vector<64x64xf32>
    %cst_23 = arith.constant dense<0.000000e+00> : vector<448x64xf32>
    %37 = tpu.matmul %34, %36, %cst_23 {dimension_numbers = #tpu.dot_dimension_numbers<[1], [0], [0], [1], [0, 0, 1, 1], [], []>} : vector<448x64xf32>, vector<64x64xf32>, vector<448x64xf32> -> vector<448x64xf32>
    %c1_24 = arith.constant 1 : index
    %c0_25 = arith.constant 0 : index
    %c0_26 = arith.constant 0 : index
    %38 = vector.load %arg6[%c1_24, %c0_25, %c0_26] : memref<4x64x64xf32, #tpu.memory_space<vmem>>, vector<1x64x64xf32>
    %39 = vector.shape_cast %38 : vector<1x64x64xf32> to vector<64x64xf32>
    %cst_27 = arith.constant dense<0.000000e+00> : vector<448x64xf32>
    %40 = tpu.matmul %34, %39, %cst_27 {dimension_numbers = #tpu.dot_dimension_numbers<[1], [0], [0], [1], [0, 0, 1, 1], [], []>} : vector<448x64xf32>, vector<64x64xf32>, vector<448x64xf32> -> vector<448x64xf32>
    %c2_28 = arith.constant 2 : index
    %c0_29 = arith.constant 0 : index
    %c0_30 = arith.constant 0 : index
    %41 = vector.load %arg6[%c2_28, %c0_29, %c0_30] : memref<4x64x64xf32, #tpu.memory_space<vmem>>, vector<1x64x64xf32>
    %42 = vector.shape_cast %41 : vector<1x64x64xf32> to vector<64x64xf32>
    %cst_31 = arith.constant dense<0.000000e+00> : vector<448x64xf32>
    %43 = tpu.matmul %34, %42, %cst_31 {dimension_numbers = #tpu.dot_dimension_numbers<[1], [0], [0], [1], [0, 0, 1, 1], [], []>} : vector<448x64xf32>, vector<64x64xf32>, vector<448x64xf32> -> vector<448x64xf32>
    %c3 = arith.constant 3 : index
    %c0_32 = arith.constant 0 : index
    %c0_33 = arith.constant 0 : index
    %44 = vector.load %arg6[%c3, %c0_32, %c0_33] : memref<4x64x64xf32, #tpu.memory_space<vmem>>, vector<1x64x64xf32>
    %45 = vector.shape_cast %44 : vector<1x64x64xf32> to vector<64x64xf32>
    %cst_34 = arith.constant dense<0.000000e+00> : vector<448x64xf32>
    %46 = tpu.matmul %34, %45, %cst_34 {dimension_numbers = #tpu.dot_dimension_numbers<[1], [0], [0], [1], [0, 0, 1, 1], [], []>} : vector<448x64xf32>, vector<64x64xf32>, vector<448x64xf32> -> vector<448x64xf32>
    %47 = vector.extract_strided_slice %37 {offsets = [0, 0], sizes = [16, 64], strides = [1, 1]} : vector<448x64xf32> to vector<16x64xf32>
    %48 = vector.extract_strided_slice %40 {offsets = [16, 0], sizes = [16, 64], strides = [1, 1]} : vector<448x64xf32> to vector<16x64xf32>
    %49 = arith.addf %47, %48 : vector<16x64xf32>
    %50 = vector.extract_strided_slice %43 {offsets = [32, 0], sizes = [16, 64], strides = [1, 1]} : vector<448x64xf32> to vector<16x64xf32>
    %51 = arith.addf %49, %50 : vector<16x64xf32>
    %52 = vector.extract_strided_slice %46 {offsets = [48, 0], sizes = [16, 64], strides = [1, 1]} : vector<448x64xf32> to vector<16x64xf32>
    %53 = arith.addf %51, %52 : vector<16x64xf32>
    %54 = vector.extract_strided_slice %37 {offsets = [48, 0], sizes = [16, 64], strides = [1, 1]} : vector<448x64xf32> to vector<16x64xf32>
    %55 = vector.extract_strided_slice %40 {offsets = [64, 0], sizes = [16, 64], strides = [1, 1]} : vector<448x64xf32> to vector<16x64xf32>
    %56 = arith.addf %54, %55 : vector<16x64xf32>
    %57 = vector.extract_strided_slice %43 {offsets = [80, 0], sizes = [16, 64], strides = [1, 1]} : vector<448x64xf32> to vector<16x64xf32>
    %58 = arith.addf %56, %57 : vector<16x64xf32>
    %59 = vector.extract_strided_slice %46 {offsets = [96, 0], sizes = [16, 64], strides = [1, 1]} : vector<448x64xf32> to vector<16x64xf32>
    %60 = arith.addf %58, %59 : vector<16x64xf32>
    %61 = vector.extract_strided_slice %37 {offsets = [96, 0], sizes = [16, 64], strides = [1, 1]} : vector<448x64xf32> to vector<16x64xf32>
    %62 = vector.extract_strided_slice %40 {offsets = [112, 0], sizes = [16, 64], strides = [1, 1]} : vector<448x64xf32> to vector<16x64xf32>
    %63 = arith.addf %61, %62 : vector<16x64xf32>
    %64 = vector.extract_strided_slice %43 {offsets = [128, 0], sizes = [16, 64], strides = [1, 1]} : vector<448x64xf32> to vector<16x64xf32>
    %65 = arith.addf %63, %64 : vector<16x64xf32>
    %66 = vector.extract_strided_slice %46 {offsets = [144, 0], sizes = [16, 64], strides = [1, 1]} : vector<448x64xf32> to vector<16x64xf32>
    %67 = arith.addf %65, %66 : vector<16x64xf32>
    %68 = vector.extract_strided_slice %37 {offsets = [144, 0], sizes = [16, 64], strides = [1, 1]} : vector<448x64xf32> to vector<16x64xf32>
    %69 = vector.extract_strided_slice %40 {offsets = [160, 0], sizes = [16, 64], strides = [1, 1]} : vector<448x64xf32> to vector<16x64xf32>
    %70 = arith.addf %68, %69 : vector<16x64xf32>
    %71 = vector.extract_strided_slice %43 {offsets = [176, 0], sizes = [16, 64], strides = [1, 1]} : vector<448x64xf32> to vector<16x64xf32>
    %72 = arith.addf %70, %71 : vector<16x64xf32>
    %73 = vector.extract_strided_slice %46 {offsets = [192, 0], sizes = [16, 64], strides = [1, 1]} : vector<448x64xf32> to vector<16x64xf32>
    %74 = arith.addf %72, %73 : vector<16x64xf32>
    %75 = vector.extract_strided_slice %37 {offsets = [192, 0], sizes = [16, 64], strides = [1, 1]} : vector<448x64xf32> to vector<16x64xf32>
    %76 = vector.extract_strided_slice %40 {offsets = [208, 0], sizes = [16, 64], strides = [1, 1]} : vector<448x64xf32> to vector<16x64xf32>
    %77 = arith.addf %75, %76 : vector<16x64xf32>
    %78 = vector.extract_strided_slice %43 {offsets = [224, 0], sizes = [16, 64], strides = [1, 1]} : vector<448x64xf32> to vector<16x64xf32>
    %79 = arith.addf %77, %78 : vector<16x64xf32>
    %80 = vector.extract_strided_slice %46 {offsets = [240, 0], sizes = [16, 64], strides = [1, 1]} : vector<448x64xf32> to vector<16x64xf32>
    %81 = arith.addf %79, %80 : vector<16x64xf32>
    %82 = vector.extract_strided_slice %37 {offsets = [240, 0], sizes = [16, 64], strides = [1, 1]} : vector<448x64xf32> to vector<16x64xf32>
    %83 = vector.extract_strided_slice %40 {offsets = [256, 0], sizes = [16, 64], strides = [1, 1]} : vector<448x64xf32> to vector<16x64xf32>
    %84 = arith.addf %82, %83 : vector<16x64xf32>
    %85 = vector.extract_strided_slice %43 {offsets = [272, 0], sizes = [16, 64], strides = [1, 1]} : vector<448x64xf32> to vector<16x64xf32>
    %86 = arith.addf %84, %85 : vector<16x64xf32>
    %87 = vector.extract_strided_slice %46 {offsets = [288, 0], sizes = [16, 64], strides = [1, 1]} : vector<448x64xf32> to vector<16x64xf32>
    %88 = arith.addf %86, %87 : vector<16x64xf32>
    %89 = vector.extract_strided_slice %37 {offsets = [288, 0], sizes = [16, 64], strides = [1, 1]} : vector<448x64xf32> to vector<16x64xf32>
    %90 = vector.extract_strided_slice %40 {offsets = [304, 0], sizes = [16, 64], strides = [1, 1]} : vector<448x64xf32> to vector<16x64xf32>
    %91 = arith.addf %89, %90 : vector<16x64xf32>
    %92 = vector.extract_strided_slice %43 {offsets = [320, 0], sizes = [16, 64], strides = [1, 1]} : vector<448x64xf32> to vector<16x64xf32>
    %93 = arith.addf %91, %92 : vector<16x64xf32>
    %94 = vector.extract_strided_slice %46 {offsets = [336, 0], sizes = [16, 64], strides = [1, 1]} : vector<448x64xf32> to vector<16x64xf32>
    %95 = arith.addf %93, %94 : vector<16x64xf32>
    %96 = vector.extract_strided_slice %37 {offsets = [336, 0], sizes = [16, 64], strides = [1, 1]} : vector<448x64xf32> to vector<16x64xf32>
    %97 = vector.extract_strided_slice %40 {offsets = [352, 0], sizes = [16, 64], strides = [1, 1]} : vector<448x64xf32> to vector<16x64xf32>
    %98 = arith.addf %96, %97 : vector<16x64xf32>
    %99 = vector.extract_strided_slice %43 {offsets = [368, 0], sizes = [16, 64], strides = [1, 1]} : vector<448x64xf32> to vector<16x64xf32>
    %100 = arith.addf %98, %99 : vector<16x64xf32>
    %101 = vector.extract_strided_slice %46 {offsets = [384, 0], sizes = [16, 64], strides = [1, 1]} : vector<448x64xf32> to vector<16x64xf32>
    %102 = arith.addf %100, %101 : vector<16x64xf32>
    %103 = vector.extract_strided_slice %37 {offsets = [384, 0], sizes = [16, 64], strides = [1, 1]} : vector<448x64xf32> to vector<16x64xf32>
    %104 = vector.extract_strided_slice %40 {offsets = [400, 0], sizes = [16, 64], strides = [1, 1]} : vector<448x64xf32> to vector<16x64xf32>
    %105 = arith.addf %103, %104 : vector<16x64xf32>
    %106 = vector.extract_strided_slice %43 {offsets = [416, 0], sizes = [16, 64], strides = [1, 1]} : vector<448x64xf32> to vector<16x64xf32>
    %107 = arith.addf %105, %106 : vector<16x64xf32>
    %108 = vector.extract_strided_slice %46 {offsets = [432, 0], sizes = [16, 64], strides = [1, 1]} : vector<448x64xf32> to vector<16x64xf32>
    %109 = arith.addf %107, %108 : vector<16x64xf32>
    %c0_35 = arith.constant 0 : index
    %c0_36 = arith.constant 0 : index
    %110 = vector.load %arg7[%c0_35, %c0_36] : memref<1x64xf32, #tpu.memory_space<vmem>>, vector<1x64xf32>
    %111 = arith.maximumf %53, %60 : vector<16x64xf32>
    %112 = arith.maximumf %111, %67 : vector<16x64xf32>
    %113 = vector.broadcast %110 : vector<1x64xf32> to vector<16x64xf32>
    %114 = arith.addf %112, %113 : vector<16x64xf32>
    %cst_37 = arith.constant 0.000000e+00 : f32
    %115 = vector.broadcast %cst_37 : f32 to vector<16x64xf32>
    %116 = arith.maximumf %114, %115 : vector<16x64xf32>
    %117 = arith.maximumf %67, %74 : vector<16x64xf32>
    %118 = arith.maximumf %117, %81 : vector<16x64xf32>
    %119 = vector.broadcast %110 : vector<1x64xf32> to vector<16x64xf32>
    %120 = arith.addf %118, %119 : vector<16x64xf32>
    %cst_38 = arith.constant 0.000000e+00 : f32
    %121 = vector.broadcast %cst_38 : f32 to vector<16x64xf32>
    %122 = arith.maximumf %120, %121 : vector<16x64xf32>
    %123 = arith.maximumf %81, %88 : vector<16x64xf32>
    %124 = arith.maximumf %123, %95 : vector<16x64xf32>
    %125 = vector.broadcast %110 : vector<1x64xf32> to vector<16x64xf32>
    %126 = arith.addf %124, %125 : vector<16x64xf32>
    %cst_39 = arith.constant 0.000000e+00 : f32
    %127 = vector.broadcast %cst_39 : f32 to vector<16x64xf32>
    %128 = arith.maximumf %126, %127 : vector<16x64xf32>
    %129 = arith.maximumf %95, %102 : vector<16x64xf32>
    %130 = arith.maximumf %129, %109 : vector<16x64xf32>
    %131 = vector.broadcast %110 : vector<1x64xf32> to vector<16x64xf32>
    %132 = arith.addf %130, %131 : vector<16x64xf32>
    %cst_40 = arith.constant 0.000000e+00 : f32
    %133 = vector.broadcast %cst_40 : f32 to vector<16x64xf32>
    %134 = arith.maximumf %132, %133 : vector<16x64xf32>
    %135 = tpu.concatenate %116, %122, %128, %134 in 1 : vector<16x64xf32>, vector<16x64xf32>, vector<16x64xf32>, vector<16x64xf32> -> vector<16x256xf32>
    %136 = vector.extract_strided_slice %135 {offsets = [0, 0], sizes = [1, 256], strides = [1, 1]} : vector<16x256xf32> to vector<1x256xf32>
    %137 = vector.extract_strided_slice %135 {offsets = [1, 0], sizes = [1, 256], strides = [1, 1]} : vector<16x256xf32> to vector<1x256xf32>
    %138 = vector.extract_strided_slice %135 {offsets = [2, 0], sizes = [1, 256], strides = [1, 1]} : vector<16x256xf32> to vector<1x256xf32>
    %139 = vector.extract_strided_slice %135 {offsets = [3, 0], sizes = [1, 256], strides = [1, 1]} : vector<16x256xf32> to vector<1x256xf32>
    %140 = vector.extract_strided_slice %135 {offsets = [4, 0], sizes = [1, 256], strides = [1, 1]} : vector<16x256xf32> to vector<1x256xf32>
    %141 = vector.extract_strided_slice %135 {offsets = [5, 0], sizes = [1, 256], strides = [1, 1]} : vector<16x256xf32> to vector<1x256xf32>
    %142 = vector.extract_strided_slice %135 {offsets = [6, 0], sizes = [1, 256], strides = [1, 1]} : vector<16x256xf32> to vector<1x256xf32>
    %143 = vector.extract_strided_slice %135 {offsets = [7, 0], sizes = [1, 256], strides = [1, 1]} : vector<16x256xf32> to vector<1x256xf32>
    %144 = vector.extract_strided_slice %135 {offsets = [8, 0], sizes = [1, 256], strides = [1, 1]} : vector<16x256xf32> to vector<1x256xf32>
    %145 = vector.extract_strided_slice %135 {offsets = [9, 0], sizes = [1, 256], strides = [1, 1]} : vector<16x256xf32> to vector<1x256xf32>
    %146 = vector.extract_strided_slice %135 {offsets = [10, 0], sizes = [1, 256], strides = [1, 1]} : vector<16x256xf32> to vector<1x256xf32>
    %147 = vector.extract_strided_slice %135 {offsets = [11, 0], sizes = [1, 256], strides = [1, 1]} : vector<16x256xf32> to vector<1x256xf32>
    %148 = vector.extract_strided_slice %135 {offsets = [12, 0], sizes = [1, 256], strides = [1, 1]} : vector<16x256xf32> to vector<1x256xf32>
    %149 = vector.extract_strided_slice %135 {offsets = [13, 0], sizes = [1, 256], strides = [1, 1]} : vector<16x256xf32> to vector<1x256xf32>
    %150 = vector.extract_strided_slice %135 {offsets = [14, 0], sizes = [1, 256], strides = [1, 1]} : vector<16x256xf32> to vector<1x256xf32>
    %151 = vector.extract_strided_slice %135 {offsets = [15, 0], sizes = [1, 256], strides = [1, 1]} : vector<16x256xf32> to vector<1x256xf32>
    %152 = tpu.concatenate %136, %137, %138, %139, %140, %141, %142, %143, %144, %145, %146, %147, %148, %149, %150, %151 in 1 : vector<1x256xf32>, vector<1x256xf32>, vector<1x256xf32>, vector<1x256xf32>, vector<1x256xf32>, vector<1x256xf32>, vector<1x256xf32>, vector<1x256xf32>, vector<1x256xf32>, vector<1x256xf32>, vector<1x256xf32>, vector<1x256xf32>, vector<1x256xf32>, vector<1x256xf32>, vector<1x256xf32>, vector<1x256xf32> -> vector<1x4096xf32>
    %c0_41 = arith.constant 0 : index
    %c0_42 = arith.constant 0 : index
    %153 = vector.load %arg8[%c0_41, %c0_42] : memref<4096x50xf32, #tpu.memory_space<vmem>>, vector<4096x50xf32>
    %cst_43 = arith.constant dense<0.000000e+00> : vector<1x50xf32>
    %154 = tpu.matmul %152, %153, %cst_43 {dimension_numbers = #tpu.dot_dimension_numbers<[1], [0], [0], [1], [0, 0, 1, 1], [], []>} : vector<1x4096xf32>, vector<4096x50xf32>, vector<1x50xf32> -> vector<1x50xf32>
    %c0_44 = arith.constant 0 : index
    %c0_45 = arith.constant 0 : index
    %155 = vector.load %arg9[%c0_44, %c0_45] : memref<1x50xf32, #tpu.memory_space<vmem>>, vector<1x50xf32>
    %156 = arith.addf %154, %155 : vector<1x50xf32>
    %cst_46 = arith.constant 0.000000e+00 : f32
    %157 = vector.broadcast %cst_46 : f32 to vector<1x50xf32>
    %158 = arith.maximumf %156, %157 : vector<1x50xf32>
    %c0_47 = arith.constant 0 : index
    %c0_48 = arith.constant 0 : index
    %159 = vector.load %arg10[%c0_47, %c0_48] : memref<50x9xf32, #tpu.memory_space<vmem>>, vector<50x9xf32>
    %cst_49 = arith.constant dense<0.000000e+00> : vector<1x9xf32>
    %160 = tpu.matmul %158, %159, %cst_49 {dimension_numbers = #tpu.dot_dimension_numbers<[1], [0], [0], [1], [0, 0, 1, 1], [], []>} : vector<1x50xf32>, vector<50x9xf32>, vector<1x9xf32> -> vector<1x9xf32>
    %c0_50 = arith.constant 0 : index
    %c0_51 = arith.constant 0 : index
    %161 = vector.load %arg11[%c0_50, %c0_51] : memref<1x9xf32, #tpu.memory_space<vmem>>, vector<1x9xf32>
    %162 = arith.addf %160, %161 : vector<1x9xf32>
    %c0_52 = arith.constant 0 : index
    %c0_53 = arith.constant 0 : index
    %c0_54 = arith.constant 0 : index
    %163 = vector.load %arg12[%c0_52, %c0_53, %c0_54] : memref<1x1x9xf32, #tpu.memory_space<vmem>>, vector<1x1x9xf32>
    %164 = vector.shape_cast %163 : vector<1x1x9xf32> to vector<1x9xf32>
    %165 = vector.shape_cast %162 : vector<1x9xf32> to vector<1x1x9xf32>
    tpu.vector_store %arg12[%c0_52, %c0_53, %c0_54], %165 {strides = array<i32>} : memref<1x1x9xf32, #tpu.memory_space<vmem>>, vector<1x1x9xf32>,
    return
  }
  func.func @transform_0(%arg0: i32) -> (i32, i32, i32) {
    %c0_i32 = arith.constant 0 : i32
    %c0_i32_0 = arith.constant 0 : i32
    %c0_i32_1 = arith.constant 0 : i32
    return %arg0, %c0_i32, %c0_i32_0 : i32, i32, i32
  }
  func.func @transform_1(%arg0: i32) -> (i32, i32) {
    %c0_i32 = arith.constant 0 : i32
    %c0_i32_0 = arith.constant 0 : i32
    %c0_i32_1 = arith.constant 0 : i32
    return %c0_i32, %c0_i32_0 : i32, i32
  }
  func.func @transform_2(%arg0: i32) -> (i32, i32) {
    %c0_i32 = arith.constant 0 : i32
    %c0_i32_0 = arith.constant 0 : i32
    %c0_i32_1 = arith.constant 0 : i32
    return %c0_i32, %c0_i32_0 : i32, i32
  }
  func.func @transform_3(%arg0: i32) -> (i32, i32, i32) {
    %c0_i32 = arith.constant 0 : i32
    %c0_i32_0 = arith.constant 0 : i32
    %c0_i32_1 = arith.constant 0 : i32
    %c0_i32_2 = arith.constant 0 : i32
    return %c0_i32, %c0_i32_0, %c0_i32_1 : i32, i32, i32
  }
  func.func @transform_4(%arg0: i32) -> (i32, i32) {
    %c0_i32 = arith.constant 0 : i32
    %c0_i32_0 = arith.constant 0 : i32
    %c0_i32_1 = arith.constant 0 : i32
    return %c0_i32, %c0_i32_0 : i32, i32
  }
  func.func @transform_5(%arg0: i32) -> (i32, i32, i32) {
    %c0_i32 = arith.constant 0 : i32
    %c0_i32_0 = arith.constant 0 : i32
    %c0_i32_1 = arith.constant 0 : i32
    %c0_i32_2 = arith.constant 0 : i32
    return %c0_i32, %c0_i32_0, %c0_i32_1 : i32, i32, i32
  }
  func.func @transform_6(%arg0: i32) -> (i32, i32) {
    %c0_i32 = arith.constant 0 : i32
    %c0_i32_0 = arith.constant 0 : i32
    %c0_i32_1 = arith.constant 0 : i32
    return %c0_i32, %c0_i32_0 : i32, i32
  }
  func.func @transform_7(%arg0: i32) -> (i32, i32) {
    %c0_i32 = arith.constant 0 : i32
    %c0_i32_0 = arith.constant 0 : i32
    %c0_i32_1 = arith.constant 0 : i32
    return %c0_i32, %c0_i32_0 : i32, i32
  }
  func.func @transform_8(%arg0: i32) -> (i32, i32) {
    %c0_i32 = arith.constant 0 : i32
    %c0_i32_0 = arith.constant 0 : i32
    %c0_i32_1 = arith.constant 0 : i32
    return %c0_i32, %c0_i32_0 : i32, i32
  }
  func.func @transform_9(%arg0: i32) -> (i32, i32) {
    %c0_i32 = arith.constant 0 : i32
    %c0_i32_0 = arith.constant 0 : i32
    %c0_i32_1 = arith.constant 0 : i32
    return %c0_i32, %c0_i32_0 : i32, i32
  }
  func.func @transform_10(%arg0: i32) -> (i32, i32) {
    %c0_i32 = arith.constant 0 : i32
    %c0_i32_0 = arith.constant 0 : i32
    %c0_i32_1 = arith.constant 0 : i32
    return %c0_i32, %c0_i32_0 : i32, i32
  }
  func.func @transform_11(%arg0: i32) -> (i32, i32, i32) {
    %c0_i32 = arith.constant 0 : i32
    %c0_i32_0 = arith.constant 0 : i32
    %c0_i32_1 = arith.constant 0 : i32
    return %arg0, %c0_i32, %c0_i32_0 : i32, i32, i32
  }
}

</mosaic_0001>

<bundles_post_ra>
// kernel: cnn_forward.1
= control target key start
LH: loop header
LB: loop body
LE: loop exit
PB: predicated region body
PF: predicated region fallthrough
CT: control target
= control target key end

     0   :  { %16 = vsyncpa [#allocation3], 0  ;;  %s12747_s0 = inlined_call_operand.vmem [shape: f32[2,464,41], index: 0, kind: input, shape index: {}]   ;;  %s12748_s1 = inlined_call_operand.vmem [shape: f32[41,768], index: 1, kind: input, shape index: {}]   ;;  %s12749_s2 = inlined_call_operand.vmem [shape: f32[1,256], index: 2, kind: input, shape index: {}]   ;;  %s12750_s3 = inlined_call_operand.vmem [shape: f32[3,256,64], index: 3, kind: input, shape index: {}]   ;;  %s12751_s4 = inlined_call_operand.vmem [shape: f32[1,64], index: 4, kind: input, shape index: {}]   ;;  %s12752_s5 = inlined_call_operand.vmem [shape: f32[4,64,64], index: 5, kind: input, shape index: {}]   ;;  %s12753_s6 = inlined_call_operand.vmem [shape: f32[1,64], index: 6, kind: input, shape index: {}]   ;;  %s12754_s7 = inlined_call_operand.vmem [shape: f32[4096,50], index: 7, kind: input, shape index: {}]   ;;  %s12755_s8 = inlined_call_operand.vmem [shape: f32[1,50], index: 8, kind: input, shape index: {}]   ;;  %s12756_s9 = inlined_call_operand.vmem [shape: f32[50,9], index: 9, kind: input, shape index: {}]   ;;  %s12757_s10 = inlined_call_operand.vmem [shape: f32[1,9], index: 10, kind: input, shape index: {}]   ;;  %s12758_s11 = inlined_call_operand.hbm [shape: f32[2,1,9], index: 11, kind: output, shape index: {}]  }
   0x1   :  { %18 = vsyncpa [#allocation3 + $0x1], 0  ;;  %s6943_s17 = smov 0   ;;  %s6945_s18 = smov 0  }
   0x2   :  { %s6947_s19 = smov 0   ;;  %s6949_s20 = smov 0  }
   0x3 LB: > { %13077 = sst [smem:[#allocation5_spill]] %s6876_s19  ;;  %s6964_s21 = sadd.s32 4294967295, %s6880_s20   ;;  %s6880_s20 = sphi %s6949_s20, %s13945_s20   ;;  %s6876_s19 = sphi %s6947_s19, %s13942_s19   ;;  %s6872_s18 = sphi %s6945_s18, %s13944_s18   ;;  %s6868_s17 = sphi %s6943_s17, %s13943_s17  }
   0x4   : > { %s6030_s22 = sadd.s32 4294967294, %s6880_s20   ;;  %s6968_s23 = sadd.s32 1, %s6880_s20  }
   0x5   : > { %s267_s24 = sadd.s32 1, %s6876_s19  ;;  %s264_s25 = ssub.s32 %s6880_s20, %s6968_s23 }
   0x6   : > { %p277_p0 = scmp.ne.s32.totalorder %s6876_s19, %s6872_s18  ;;  %p265_p1 = scmp.eq.s32.totalorder %s264_s25, 0 }
   0x7   : > { %p278_p2 = scmp.eq.s32.totalorder %s6964_s21, 1  ;;  %p283_p3 = scmp.ne.s32.totalorder %s6872_s18, %s6868_s17 }
   0x8   : > { %p284_p4 = scmp.eq.s32.totalorder %s6030_s22, 1  ;;  %p6033_p7 = scmp.ge.s32.totalorder %s6880_s20, 1 }
   0x9   : > { %s6979_s26 = scalar_select %p265_p1, %s6876_s19, %s267_s24  }
   0xa   : > { %p6981_p5 = por %p278_p2, %p277_p0  ;;  %p6985_p6 = por %p284_p4, %p283_p3 }
   0xb   : > { %13078 = sst [smem:[#allocation6_spill]] %s6979_s26  ;;  %p340_p8 = scmp.lt.s32.totalorder %s6880_s20, 3 }
   0xd   : > { %p341_p9 = pnand %p6033_p7, %p340_p8 }
   0xf   : > { %344 = sbr.rel (%p341_p9) target bundleno = 2725 (0xaa5), region = 64 }
  0x14   : > { %v472_v0 = vld [vmem:[%s12748_s1 + $0xf0] sm:$0x1]  ;;  %vm653_vm0 = vcmask 1040384   ;;  %v473_v1 = vld [vmem:[%s12748_s1 + $0xf8] sm:$0x1]  ;;  %v466_v2 = vld [vmem:[%s12748_s1 + $0xc0] sm:$0xff]  ;;  %s5971_s15 = scalar_lea.hbm %s12758_s11, %s6964_s21 }
  0x15   : > { %6035 = vmatpush.msk.msra.mxu0 %vm653_vm0, %v472_v0  ;;  %6094 = vmatpush.msk.msra.mxu1 %vm653_vm0, %v473_v1  ;;  %v475_v3 = vld [vmem:[%s12748_s1 + $0x108] sm:$0x1]  ;;  %v469_v5 = vld [vmem:[%s12748_s1 + $0xd8] sm:$0xff]  ;;  %p379_p10 = scmp.lt.s32.totalorder %s6964_s21, 1  ;;  %v460_v6 = vld [vmem:[%s12748_s1 + $0x90] sm:$0xff]  ;;  %vm478_vm1 = vcmask 334848  }
  0x16   : > { %v467_v4 = vld [vmem:[%s12748_s1 + $0xc8] sm:$0xff]  ;;  %6212 = vmatpush.msk.msra.mxu3 %vm653_vm0, %v475_v3  ;;  %v461_v7 = vld [vmem:[%s12748_s1 + $0x98] sm:$0xff]  ;;  %v454_v9 = vld [vmem:[%s12748_s1 + $0x60] sm:$0xff]  ;;  %vm3816_vm2 = vcmask 523264   ;;  %s6882_s26 = smov 64   ;;  %vm5936_vm3 = vcmask 1041408  }
  0x17   : > { %683 = vmatpush.msra.mxu0 %v466_v2  ;;  %874 = vmatpush.msra.mxu1 %v467_v4  ;;  %v463_v8 = vld [vmem:[%s12748_s1 + $0xa8] sm:$0xff]  ;;  %s380_s24 = scalar_select %p379_p10, %s6964_s21, 1  ;;  %v474_v11 = vld [vmem:[%s12748_s1 + $0x100] sm:$0x1]  ;;  %v457_v12 = vld [vmem:[%s12748_s1 + $0x78] sm:$0xff]  ;;  %vm5932_vm4 = vcmask 408576  }
  0x18   : > { %1256 = vmatpush.msra.mxu3 %v469_v5  ;;  %v455_v10 = vld [vmem:[%s12748_s1 + $0x68] sm:$0xff]  ;;  %v448_v13 = vld [vmem:[%s12748_s1 + $0x30] sm:$0xff]  ;;  %v449_v14 = vld [vmem:[%s12748_s1 + $0x38] sm:$0xff]  ;;  %6153 = vmatpush.msk.msra.mxu2 %vm653_vm0, %v474_v11  ;;  %s5975_s12 = sshll.u32 %s5971_s15, 4  ;;  %vm5960_vm5 = vcmask 65536   ;;  %s6838_s14 = scalar_lea.hbm %s12758_s11, 2  ;;  %s5976_s12 = int_to_ptr.hbm [resolvable:$true] %s5975_s12 }
  0x19   : > { %684 = vmatpush.msra.mxu0 %v460_v6  ;;  %875 = vmatpush.msra.mxu1 %v461_v7  ;;  %s6705_s16 = smul.u32 464, %s380_s24  ;;  %v468_v15 = vld [vmem:[%s12748_s1 + $0xd0] sm:$0xff]  ;;  %v451_v16 = vld [vmem:[%s12748_s1 + $0x48] sm:$0xff]  ;;  %v462_v17 = vld [vmem:[%s12748_s1 + $0xa0] sm:$0xff]  ;;  %s6832_s13 = sshra.s32 %s5976_s12, 4  ;;  %s6833_s13 = int_to_ptr.hbm [resolvable:$true] %s6832_s13 }
  0x1a   : > { %1257 = vmatpush.msra.mxu3 %v463_v8  ;;  %v442_v18 = vld [vmem:[%s12748_s1] sm:$0xff]  ;;  %v443_v19 = vld [vmem:[%s12748_s1 + $0x8] sm:$0xff]  ;;  %1065 = vmatpush.msra.mxu2 %v468_v15  ;;  %v445_v20 = vld [vmem:[%s12748_s1 + $0x18] sm:$0xff]  ;;  %s6834_s24 = scalar_lea.hbm %s6833_s13, 1  ;;  %p6839_p0 = scmp.lt.s32.totalorder %s6833_s13, %s12758_s11 }
  0x1b   : > { %685 = vmatpush.msra.mxu0 %v454_v9  ;;  %876 = vmatpush.msra.mxu1 %v455_v10  ;;  %s7051_s19 = scalar_lea.vmem %s12747_s0, %s6705_s16  ;;  %v456_v22 = vld [vmem:[%s12748_s1 + $0x70] sm:$0xff]  ;;  %v450_v23 = vld [vmem:[%s12748_s1 + $0x40] sm:$0xff]  ;;  %v477_v31 = vld [vmem:[%s12748_s1 + $0x118] sm:$0x1]  ;;  %p6835_p11 = scmp.ne.s32.totalorder %s6833_s13, %s6834_s24 }
  0x1c   : > { %1258 = vmatpush.msra.mxu3 %v457_v12  ;;  %v384_v21 = vld [vmem:[%s7051_s19] sm:$0xff]  ;;  %1066 = vmatpush.msra.mxu2 %v462_v17  ;;  %v444_v24 = vld [vmem:[%s12748_s1 + $0x10] sm:$0xff]  ;;  %v385_v25 = vld [vmem:[%s7051_s19 + $0x8] sm:$0xff]  ;;  %p6840_p1 = scmp.lt.s32.totalorder %s6838_s14, %s6834_s24 }
  0x1d   : > { %686 = vmatpush.msra.mxu0 %v448_v13  ;;  %877 = vmatpush.msra.mxu1 %v449_v14  ;;  %v386_v26 = vld [vmem:[%s7051_s19 + $0x10] sm:$0xff]  ;;  %v387_v27 = vld [vmem:[%s7051_s19 + $0x18] sm:$0xff]  ;;  %v388_v28 = vld [vmem:[%s7051_s19 + $0x20] sm:$0xff]  ;;  %p6836_p12 = pnand %p6835_p11, %p6981_p5 }
  0x1e   : > { %1259 = vmatpush.msra.mxu3 %v451_v16  ;;  %1067 = vmatpush.msra.mxu2 %v456_v22  ;;  %v389_v29 = vld [vmem:[%s7051_s19 + $0x28] sm:$0xff]  ;;  %v390_v30 = vld [vmem:[%s7051_s19 + $0x30] sm:$0xff]  ;;  %v391_v32 = vld [vmem:[%s7051_s19 + $0x38] sm:$0xff]  ;;  %p6841_p2 = por %p6840_p1, %p6839_p0 }
  0x1f   : > { %687 = vmatpush.msra.mxu0 %v442_v18  ;;  %878 = vmatpush.msra.mxu1 %v443_v19  ;;  %v392_v33 = vld [vmem:[%s7051_s19 + $0x40] sm:$0xff]  ;;  %v476_v34 = vld [vmem:[%s12748_s1 + $0x110] sm:$0x1]  ;;  %v393_v35 = vld [vmem:[%s7051_s19 + $0x48] sm:$0xff]  ;;  %p6837_p13 = pneg %p6836_p12 }
  0x20   : > { %1260 = vmatpush.msra.mxu3 %v445_v20  ;;  %6036 = vmatmul.msk.f32.vlgmr.msra.gmra.mxu0 %vm478_vm1, %v384_v21  ;;  %v394_v36 = vld [vmem:[%s7051_s19 + $0x50] sm:$0xff]  ;;  %v395_v37 = vld [vmem:[%s7051_s19 + $0x58] sm:$0xff]  ;;  %v396_v38 = vld [vmem:[%s7051_s19 + $0x60] sm:$0xff] }
  0x21   : > { %6095 = vmatmul.msk.f32.vlgmr.msra.gmra.mxu1 %vm478_vm1, %v384_v21  ;;  %6213 = vmatmul.msk.f32.vlgmr.msra.gmra.mxu3 %vm478_vm1, %v384_v21  ;;  %v397_v39 = vld [vmem:[%s7051_s19 + $0x68] sm:$0xff]  ;;  %v398_v40 = vld [vmem:[%s7051_s19 + $0x70] sm:$0xff]  ;;  %v399_v41 = vld [vmem:[%s7051_s19 + $0x78] sm:$0xff]  ;;  %p6842_p3 = pnand %p6841_p2, %p6837_p13 }
  0x22   : > { %1068 = vmatpush.msra.mxu2 %v450_v23  ;;  %6330 = vmatpush.msk.msrb.mxu1 %vm653_vm0, %v477_v31  ;;  %v400_v43 = vld [vmem:[%s7051_s19 + $0x80] sm:$0xff]  ;;  %v471_v45 = vld [vmem:[%s12748_s1 + $0xe8] sm:$0xff]  ;;  %v402_v56 = vld [vmem:[%s7051_s19 + $0x90] sm:$0xff] }
  0x23   : > { %6271 = vmatpush.msk.msrb.mxu0 %vm653_vm0, %v476_v34  ;;  %v401_v49 = vld [vmem:[%s7051_s19 + $0x88] sm:$0xff]  ;;  %v470_v58 = vld [vmem:[%s12748_s1 + $0xe0] sm:$0xff]  ;;  %v403_v0 = vld [vmem:[%s7051_s19 + $0x98] sm:$0xff] }
  0x24   : > { %1069 = vmatpush.msra.mxu2 %v444_v24  ;;  %1638 = vmatpush.msrb.mxu1 %v471_v45  ;;  %v404_v7 = vld [vmem:[%s7051_s19 + $0xa0] sm:$0xff]  ;;  %v405_v14 = vld [vmem:[%s7051_s19 + $0xa8] sm:$0xff] }
  0x25   : > { %6154 = vmatmul.msk.f32.vlgmr.msra.gmra.mxu2 %vm478_vm1, %v384_v21  ;;  %1447 = vmatpush.msrb.mxu0 %v470_v58  ;;  %v406_v21 = vld [vmem:[%s7051_s19 + $0xb0] sm:$0xff]  ;;  %v409_v45 = vld [vmem:[%s7051_s19 + $0xc8] sm:$0xff] }
  0x26   : > { %v413_v5 = vld [vmem:[%s7051_s19 + $0xe8] sm:$0xff] }
  0x27   : > { %v2317_v12 = vld [vmem:[%s12750_s3 + $0xe8] sm:$0xff] }
  0x28   : > { %6037 = vmatmul.msk.f32.gmra.mxu0 %vm478_vm1, %v385_v25 }
  0x29   : > { %6096 = vmatmul.msk.f32.gmra.mxu1 %vm478_vm1, %v385_v25  ;;  %6214 = vmatmul.msk.f32.gmra.mxu3 %vm478_vm1, %v385_v25 }
  0x2d   : > { %6155 = vmatmul.msk.f32.gmra.mxu2 %vm478_vm1, %v385_v25 }
  0x30   : > { %6038 = vmatmul.msk.f32.gmra.mxu0 %vm478_vm1, %v386_v26 }
  0x31   : > { %6097 = vmatmul.msk.f32.gmra.mxu1 %vm478_vm1, %v386_v26  ;;  %6215 = vmatmul.msk.f32.gmra.mxu3 %vm478_vm1, %v386_v26 }
  0x35   : > { %6156 = vmatmul.msk.f32.gmra.mxu2 %vm478_vm1, %v386_v26 }
  0x38   : > { %6039 = vmatmul.msk.f32.gmra.mxu0 %vm478_vm1, %v387_v27 }
  0x39   : > { %6098 = vmatmul.msk.f32.gmra.mxu1 %vm478_vm1, %v387_v27  ;;  %6216 = vmatmul.msk.f32.gmra.mxu3 %vm478_vm1, %v387_v27 }
  0x3d   : > { %6157 = vmatmul.msk.f32.gmra.mxu2 %vm478_vm1, %v387_v27 }
  0x40   : > { %6040 = vmatmul.msk.f32.gmra.mxu0 %vm478_vm1, %v388_v28 }
  0x41   : > { %6099 = vmatmul.msk.f32.gmra.mxu1 %vm478_vm1, %v388_v28  ;;  %6217 = vmatmul.msk.f32.gmra.mxu3 %vm478_vm1, %v388_v28 }
  0x45   : > { %6158 = vmatmul.msk.f32.gmra.mxu2 %vm478_vm1, %v388_v28  ;;  %v407_v28 = vld [vmem:[%s7051_s19 + $0xb8] sm:$0xff] }
  0x48   : > { %6041 = vmatmul.msk.f32.gmra.mxu0 %vm478_vm1, %v389_v29 }
  0x49   : > { %6100 = vmatmul.msk.f32.gmra.mxu1 %vm478_vm1, %v389_v29  ;;  %6218 = vmatmul.msk.f32.gmra.mxu3 %vm478_vm1, %v389_v29 }
  0x4d   : > { %6159 = vmatmul.msk.f32.gmra.mxu2 %vm478_vm1, %v389_v29 }
  0x50   : > { %6042 = vmatmul.msk.f32.gmra.mxu0 %vm478_vm1, %v390_v30 }
  0x51   : > { %6101 = vmatmul.msk.f32.gmra.mxu1 %vm478_vm1, %v390_v30  ;;  %6219 = vmatmul.msk.f32.gmra.mxu3 %vm478_vm1, %v390_v30 }
  0x55   : > { %6160 = vmatmul.msk.f32.gmra.mxu2 %vm478_vm1, %v390_v30  ;;  %v2319_v30 = vld [vmem:[%s12750_s3 + $0xf8] sm:$0xff] }
  0x56   : > { %2511 = vmatpush.msrb.mxu3 %v2319_v30 }
  0x58   : > { %6043 = vmatmul.msk.f32.gmra.mxu0 %vm478_vm1, %v391_v32 }
  0x59   : > { %6102 = vmatmul.msk.f32.gmra.mxu1 %vm478_vm1, %v391_v32  ;;  %6220 = vmatmul.msk.f32.gmra.mxu3 %vm478_vm1, %v391_v32 }
  0x5d   : > { %6161 = vmatmul.msk.f32.gmra.mxu2 %vm478_vm1, %v391_v32  ;;  %v2302_v32 = vld [vmem:[%s12750_s3 + $0x70] sm:$0xff] }
  0x60   : > { %6044 = vmatmul.msk.f32.gmra.mxu0 %vm478_vm1, %v392_v33 }
  0x61   : > { %6103 = vmatmul.msk.f32.gmra.mxu1 %vm478_vm1, %v392_v33  ;;  %6221 = vmatmul.msk.f32.gmra.mxu3 %vm478_vm1, %v392_v33 }
  0x65   : > { %6162 = vmatmul.msk.f32.gmra.mxu2 %vm478_vm1, %v392_v33 }
  0x68   : > { %6045 = vmatmul.msk.f32.gmra.mxu0 %vm478_vm1, %v393_v35 }
  0x69   : > { %6104 = vmatmul.msk.f32.gmra.mxu1 %vm478_vm1, %v393_v35  ;;  %6222 = vmatmul.msk.f32.gmra.mxu3 %vm478_vm1, %v393_v35 }
  0x6d   : > { %6163 = vmatmul.msk.f32.gmra.mxu2 %vm478_vm1, %v393_v35 }
  0x70   : > { %6046 = vmatmul.msk.f32.gmra.mxu0 %vm478_vm1, %v394_v36 }
  0x71   : > { %6105 = vmatmul.msk.f32.gmra.mxu1 %vm478_vm1, %v394_v36  ;;  %6223 = vmatmul.msk.f32.gmra.mxu3 %vm478_vm1, %v394_v36 }
  0x75   : > { %6164 = vmatmul.msk.f32.gmra.mxu2 %vm478_vm1, %v394_v36  ;;  %v408_v36 = vld [vmem:[%s7051_s19 + $0xc0] sm:$0xff] }
  0x78   : > { %6047 = vmatmul.msk.f32.gmra.mxu0 %vm478_vm1, %v395_v37 }
  0x79   : > { %6106 = vmatmul.msk.f32.gmra.mxu1 %vm478_vm1, %v395_v37  ;;  %6224 = vmatmul.msk.f32.gmra.mxu3 %vm478_vm1, %v395_v37 }
  0x7d   : > { %6165 = vmatmul.msk.f32.gmra.mxu2 %vm478_vm1, %v395_v37 }
  0x80   : > { %6048 = vmatmul.msk.f32.gmra.mxu0 %vm478_vm1, %v396_v38 }
  0x81   : > { %6107 = vmatmul.msk.f32.gmra.mxu1 %vm478_vm1, %v396_v38  ;;  %6225 = vmatmul.msk.f32.gmra.mxu3 %vm478_vm1, %v396_v38 }
  0x85   : > { %6166 = vmatmul.msk.f32.gmra.mxu2 %vm478_vm1, %v396_v38 }
  0x88   : > { %6049 = vmatmul.msk.f32.gmra.mxu0 %vm478_vm1, %v397_v39 }
  0x89   : > { %6108 = vmatmul.msk.f32.gmra.mxu1 %vm478_vm1, %v397_v39  ;;  %6226 = vmatmul.msk.f32.gmra.mxu3 %vm478_vm1, %v397_v39 }
  0x8d   : > { %6167 = vmatmul.msk.f32.gmra.mxu2 %vm478_vm1, %v397_v39 }
  0x90   : > { %6050 = vmatmul.msk.f32.gmra.mxu0 %vm478_vm1, %v398_v40 }
  0x91   : > { %6109 = vmatmul.msk.f32.gmra.mxu1 %vm478_vm1, %v398_v40  ;;  %6227 = vmatmul.msk.f32.gmra.mxu3 %vm478_vm1, %v398_v40 }
  0x95   : > { %6168 = vmatmul.msk.f32.gmra.mxu2 %vm478_vm1, %v398_v40 }
  0x98   : > { %6051 = vmatmul.msk.f32.gmra.mxu0 %vm478_vm1, %v399_v41 }
  0x99   : > { %6110 = vmatmul.msk.f32.gmra.mxu1 %vm478_vm1, %v399_v41  ;;  %6228 = vmatmul.msk.f32.gmra.mxu3 %vm478_vm1, %v399_v41 }
  0x9d   : > { %v7161_v42 = vpop.f32.mrf.mxu0  ;;  %6169 = vmatmul.msk.f32.gmra.mxu2 %vm478_vm1, %v399_v41 }
  0x9e   : > { %v7164_v44 = vpop.f32.mrf.mxu1 }
  0xa0   : > { %6052 = vmatmul.msk.f32.gmra.mxu0 %vm478_vm1, %v400_v43 }
  0xa1   : > { %6111 = vmatmul.msk.f32.gmra.mxu1 %vm478_vm1, %v400_v43  ;;  %6229 = vmatmul.msk.f32.gmra.mxu3 %vm478_vm1, %v400_v43 }
  0xa4   : > { %v7173_v46 = vpop.f32.mrf.mxu3 }
  0xa5   : > { %v7177_v48 = vpop.f32.mrf.mxu0  ;;  %6170 = vmatmul.msk.f32.gmra.mxu2 %vm478_vm1, %v400_v43 }
  0xa6   : > { %v7180_v50 = vpop.f32.mrf.mxu1 }
  0xa8   : > { %6053 = vmatmul.msk.f32.gmra.mxu0 %vm478_vm1, %v401_v49  ;;  %v7186_v51 = vpop.f32.mrf.mxu2 }
  0xa9   : > { %6112 = vmatmul.msk.f32.gmra.mxu1 %vm478_vm1, %v401_v49  ;;  %6230 = vmatmul.msk.f32.gmra.mxu3 %vm478_vm1, %v401_v49 }
  0xac   : > { %v7190_v53 = vpop.f32.mrf.mxu3 }
  0xad   : > { %v7194_v55 = vpop.f32.mrf.mxu0  ;;  %6171 = vmatmul.msk.f32.gmra.mxu2 %vm478_vm1, %v401_v49 }
  0xae   : > { %v7197_v57 = vpop.f32.mrf.mxu1 }
  0xb0   : > { %6054 = vmatmul.msk.f32.gmra.mxu0 %vm478_vm1, %v402_v56  ;;  %v7206_v59 = vpop.f32.mrf.mxu2 }
  0xb1   : > { %6113 = vmatmul.msk.f32.gmra.mxu1 %vm478_vm1, %v402_v56  ;;  %6231 = vmatmul.msk.f32.gmra.mxu3 %vm478_vm1, %v402_v56 }
  0xb4   : > { %v7210_v61 = vpop.f32.mrf.mxu3 }
  0xb5   : > { %v7214_v63 = vpop.f32.mrf.mxu0  ;;  %6172 = vmatmul.msk.f32.gmra.mxu2 %vm478_vm1, %v402_v56  ;;  %v2303_v56 = vld [vmem:[%s12750_s3 + $0x78] sm:$0xff] }
  0xb6   : > { %v7217_v1 = vpop.f32.mrf.mxu1  ;;  %2320 = vmatpush.msrb.mxu2 %v2303_v56 }
  0xb8   : > { %6055 = vmatmul.msk.f32.gmra.mxu0 %vm478_vm1, %v403_v0  ;;  %v7223_v2 = vpop.f32.mrf.mxu2  ;;  %2321 = vmatpush.msrb.mxu2 %v2302_v32 }
  0xb9   : > { %6114 = vmatmul.msk.f32.gmra.mxu1 %vm478_vm1, %v403_v0  ;;  %6232 = vmatmul.msk.f32.gmra.mxu3 %vm478_vm1, %v403_v0 }
  0xbc   : > { %v7227_v4 = vpop.f32.mrf.mxu3 }
  0xbd   : > { %v7231_v6 = vpop.f32.mrf.mxu0  ;;  %6173 = vmatmul.msk.f32.gmra.mxu2 %vm478_vm1, %v403_v0 }
  0xbe   : > { %v7234_v8 = vpop.f32.mrf.mxu1 }
  0xc0   : > { %6056 = vmatmul.msk.f32.gmra.mxu0 %vm478_vm1, %v404_v7  ;;  %v7240_v9 = vpop.f32.mrf.mxu2 }
  0xc1   : > { %6115 = vmatmul.msk.f32.gmra.mxu1 %vm478_vm1, %v404_v7  ;;  %6233 = vmatmul.msk.f32.gmra.mxu3 %vm478_vm1, %v404_v7 }
  0xc4   : > { %v7244_v11 = vpop.f32.mrf.mxu3 }
  0xc5   : > { %v7248_v13 = vpop.f32.mrf.mxu0  ;;  %6174 = vmatmul.msk.f32.gmra.mxu2 %vm478_vm1, %v404_v7 }
  0xc6   : > { %v7251_v15 = vpop.f32.mrf.mxu1 }
  0xc8   : > { %6057 = vmatmul.msk.f32.gmra.mxu0 %vm478_vm1, %v405_v14  ;;  %v7257_v16 = vpop.f32.mrf.mxu2 }
  0xc9   : > { %6116 = vmatmul.msk.f32.gmra.mxu1 %vm478_vm1, %v405_v14  ;;  %6234 = vmatmul.msk.f32.gmra.mxu3 %vm478_vm1, %v405_v14 }
  0xcc   : > { %v7261_v18 = vpop.f32.mrf.mxu3 }
  0xcd   : > { %v7265_v20 = vpop.f32.mrf.mxu0  ;;  %6175 = vmatmul.msk.f32.gmra.mxu2 %vm478_vm1, %v405_v14 }
  0xce   : > { %v7268_v22 = vpop.f32.mrf.mxu1 }
  0xd0   : > { %6058 = vmatmul.msk.f32.gmra.mxu0 %vm478_vm1, %v406_v21  ;;  %v7274_v23 = vpop.f32.mrf.mxu2 }
  0xd1   : > { %6117 = vmatmul.msk.f32.gmra.mxu1 %vm478_vm1, %v406_v21  ;;  %6235 = vmatmul.msk.f32.gmra.mxu3 %vm478_vm1, %v406_v21 }
  0xd4   : > { %v7278_v25 = vpop.f32.mrf.mxu3 }
  0xd5   : > { %v7282_v27 = vpop.f32.mrf.mxu0  ;;  %6176 = vmatmul.msk.f32.gmra.mxu2 %vm478_vm1, %v406_v21 }
  0xd6   : > { %v7285_v29 = vpop.f32.mrf.mxu1 }
  0xd8   : > { %6059 = vmatmul.msk.f32.gmra.mxu0 %vm478_vm1, %v407_v28  ;;  %v7294_v31 = vpop.f32.mrf.mxu2 }
  0xd9   : > { %6118 = vmatmul.msk.f32.gmra.mxu1 %vm478_vm1, %v407_v28  ;;  %6236 = vmatmul.msk.f32.gmra.mxu3 %vm478_vm1, %v407_v28 }
  0xdc   : > { %v7298_v33 = vpop.f32.mrf.mxu3 }
  0xdd   : > { %v7302_v35 = vpop.f32.mrf.mxu0  ;;  %6177 = vmatmul.msk.f32.gmra.mxu2 %vm478_vm1, %v407_v28  ;;  %v410_v28 = vld [vmem:[%s7051_s19 + $0xd0] sm:$0xff] }
  0xde   : > { %v7305_v37 = vpop.f32.mrf.mxu1 }
  0xe0   : > { %6060 = vmatmul.msk.f32.gmra.mxu0 %vm478_vm1, %v408_v36  ;;  %v7311_v38 = vpop.f32.mrf.mxu2 }
  0xe1   : > { %6119 = vmatmul.msk.f32.gmra.mxu1 %vm478_vm1, %v408_v36  ;;  %6237 = vmatmul.msk.f32.gmra.mxu3 %vm478_vm1, %v408_v36 }
  0xe4   : > { %v7315_v40 = vpop.f32.mrf.mxu3 }
  0xe5   : > { %v7319_v43 = vpop.f32.mrf.mxu0  ;;  %6178 = vmatmul.msk.f32.gmra.mxu2 %vm478_vm1, %v408_v36  ;;  %v465_v36 = vld [vmem:[%s12748_s1 + $0xb8] sm:$0xff] }
  0xe6   : > { %v7322_v49 = vpop.f32.mrf.mxu1  ;;  %1639 = vmatpush.msrb.mxu1 %v465_v36  ;;  %v2318_v36 = vld [vmem:[%s12750_s3 + $0xf0] sm:$0xff] }
  0xe7   : > { %2512 = vmatpush.msrb.mxu3 %v2318_v36  ;;  %v464_v36 = vld [vmem:[%s12748_s1 + $0xb0] sm:$0xff] }
  0xe8   : > { %6061 = vmatmul.msk.f32.gmra.mxu0 %vm478_vm1, %v409_v45  ;;  %v7331_v58 = vpop.f32.mrf.mxu2 }
  0xe9   : > { %6120 = vmatmul.msk.f32.gmra.mxu1 %vm478_vm1, %v409_v45  ;;  %6238 = vmatmul.msk.f32.gmra.mxu3 %vm478_vm1, %v409_v45 }
  0xea   : > { %1448 = vmatpush.msrb.mxu0 %v464_v36  ;;  %2513 = vmatpush.msrb.mxu3 %v2317_v12 }
  0xec   : > { %v7335_v7 = vpop.f32.mrf.mxu3 }
  0xed   : > { %v7339_v21 = vpop.f32.mrf.mxu0  ;;  %6179 = vmatmul.msk.f32.gmra.mxu2 %vm478_vm1, %v409_v45  ;;  %v411_v45 = vld [vmem:[%s7051_s19 + $0xd8] sm:$0xff] }
  0xee   : > { %v7342_v30 = vpop.f32.mrf.mxu1 }
  0xf0   : > { %6062 = vmatmul.msk.f32.gmra.mxu0 %vm478_vm1, %v410_v28  ;;  %v7351_v56 = vpop.f32.mrf.mxu2 }
  0xf1   : > { %6121 = vmatmul.msk.f32.gmra.mxu1 %vm478_vm1, %v410_v28  ;;  %6239 = vmatmul.msk.f32.gmra.mxu3 %vm478_vm1, %v410_v28 }
  0xf4   : > { %v7355_v41 = vpop.f32.mrf.mxu3 }
  0xf5   : > { %v7359_v34 = vpop.f32.mrf.mxu0  ;;  %6180 = vmatmul.msk.f32.gmra.mxu2 %vm478_vm1, %v410_v28  ;;  %v412_v28 = vld [vmem:[%s7051_s19 + $0xe0] sm:$0xff] }
  0xf6   : > { %v7365_v39 = vpop.f32.mrf.mxu1 }
  0xf8   : > { %6063 = vmatmul.msk.f32.gmra.mxu0 %vm478_vm1, %v411_v45  ;;  %v7371_v14 = vpop.f32.mrf.mxu2 }
  0xf9   : > { %6122 = vmatmul.msk.f32.gmra.mxu1 %vm478_vm1, %v411_v45  ;;  %6240 = vmatmul.msk.f32.gmra.mxu3 %vm478_vm1, %v411_v45 }
  0xfc   : > { %v7375_v26 = vpop.f32.mrf.mxu3 }
  0xfd   : > { %v7379_v19 = vpop.f32.mrf.mxu0  ;;  %6181 = vmatmul.msk.f32.gmra.mxu2 %vm478_vm1, %v411_v45 }
  0xfe   : > { %v7385_v24 = vpop.f32.mrf.mxu1 }
 0x100   : > { %6064 = vmatmul.msk.f32.gmra.mxu0 %vm478_vm1, %v412_v28  ;;  %v7394_v0 = vpop.f32.mrf.mxu2 }
 0x101   : > { %6123 = vmatmul.msk.f32.gmra.mxu1 %vm478_vm1, %v412_v28  ;;  %6241 = vmatmul.msk.f32.gmra.mxu3 %vm478_vm1, %v412_v28 }
 0x104   : > { %v7398_v36 = vpop.f32.mrf.mxu3 }
 0x105   : > { %13081 = vst [vmem:[#allocation7_spill] sm:$0xff] %v7398_v36  ;;  %v7402_v17 = vpop.f32.mrf.mxu0  ;;  %6182 = vmatmul.msk.f32.gmra.mxu2 %vm478_vm1, %v412_v28  ;;  %v414_v28 = vld [vmem:[%s7051_s19 + $0xf0] sm:$0xff] }
 0x106   : > { %13082 = vst [vmem:[#allocation8_spill] sm:$0xff] %v7402_v17  ;;  %v7405_v10 = vpop.f32.mrf.mxu1  ;;  %v2301_v17 = vld [vmem:[%s12750_s3 + $0x68] sm:$0xff] }
 0x107   : > { %13083 = vst [vmem:[#allocation9_spill] sm:$0xff] %v7405_v10  ;;  %2322 = vmatpush.msrb.mxu2 %v2301_v17 }
 0x108   : > { %6065 = vmatmul.msk.f32.gmra.mxu0 %vm478_vm1, %v413_v5  ;;  %v7411_v32 = vpop.f32.mrf.mxu2 }
 0x109   : > { %6124 = vmatmul.msk.f32.gmra.mxu1 %vm478_vm1, %v413_v5  ;;  %6242 = vmatmul.msk.f32.gmra.mxu3 %vm478_vm1, %v413_v5 }
 0x10c   : > { %v7415_v62 = vpop.f32.mrf.mxu3 }
 0x10d   : > { %13084 = vst [vmem:[#allocation10_spill] sm:$0xff] %v7415_v62  ;;  %v7419_v3 = vpop.f32.mrf.mxu0  ;;  %6183 = vmatmul.msk.f32.gmra.mxu2 %vm478_vm1, %v413_v5  ;;  %v415_v62 = vld [vmem:[%s7051_s19 + $0xf8] sm:$0xff] }
 0x10e   : > { %13085 = vst [vmem:[#allocation11_spill] sm:$0xff] %v7419_v3  ;;  %v7422_v54 = vpop.f32.mrf.mxu1 }
 0x10f   : > { %13086 = vst [vmem:[#allocation12_spill] sm:$0xff] %v7422_v54 }
 0x110   : > { %6066 = vmatmul.msk.f32.gmra.mxu0 %vm478_vm1, %v414_v28  ;;  %v7431_v60 = vpop.f32.mrf.mxu2 }
 0x111   : > { %6125 = vmatmul.msk.f32.gmra.mxu1 %vm478_vm1, %v414_v28  ;;  %6243 = vmatmul.msk.f32.gmra.mxu3 %vm478_vm1, %v414_v28  ;;  %13087 = vst [vmem:[#allocation13_spill] sm:$0xff] %v7431_v60 }
 0x114   : > { %v7435_v47 = vpop.f32.mrf.mxu3 }
 0x115   : > { %13088 = vst [vmem:[#allocation14_spill] sm:$0xff] %v7435_v47  ;;  %v7439_v52 = vpop.f32.mrf.mxu0  ;;  %6184 = vmatmul.msk.f32.gmra.mxu2 %vm478_vm1, %v414_v28  ;;  %v416_v28 = vld [vmem:[%s7051_s19 + $0x100] sm:$0xff] }
 0x116   : > { %13089 = vst [vmem:[#allocation15_spill] sm:$0xff] %v7439_v52  ;;  %v7442_v10 = vpop.f32.mrf.mxu1  ;;  %v2316_v52 = vld [vmem:[%s12750_s3 + $0xe0] sm:$0xff] }
 0x117   : > { %13090 = vst [vmem:[#allocation16_spill] sm:$0xff] %v7442_v10  ;;  %2514 = vmatpush.msrb.mxu3 %v2316_v52  ;;  %v419_v52 = vld [vmem:[%s7051_s19 + $0x118] sm:$0xff]  ;;  %v458_v10 = vld [vmem:[%s12748_s1 + $0x80] sm:$0xff] }
 0x118   : > { %6067 = vmatmul.msk.f32.gmra.mxu0 %vm478_vm1, %v415_v62  ;;  %v7448_v12 = vpop.f32.mrf.mxu2 }
 0x119   : > { %6126 = vmatmul.msk.f32.gmra.mxu1 %vm478_vm1, %v415_v62  ;;  %6244 = vmatmul.msk.f32.gmra.mxu3 %vm478_vm1, %v415_v62  ;;  %13091 = vst [vmem:[#allocation17_spill] sm:$0xff] %v7448_v12 }
 0x11a   : > { %1449 = vmatpush.msrb.mxu0 %v458_v10 }
 0x11c   : > { %v7452_v60 = vpop.f32.mrf.mxu3 }
 0x11d   : > { %13092 = vst [vmem:[#allocation18_spill] sm:$0xff] %v7452_v60  ;;  %v7456_v47 = vpop.f32.mrf.mxu0  ;;  %6185 = vmatmul.msk.f32.gmra.mxu2 %vm478_vm1, %v415_v62  ;;  %v417_v62 = vld [vmem:[%s7051_s19 + $0x108] sm:$0xff] }
 0x11e   : > { %13093 = vst [vmem:[#allocation19_spill] sm:$0xff] %v7456_v47  ;;  %v7459_v54 = vpop.f32.mrf.mxu1 }
 0x11f   : > { %13094 = vst [vmem:[#allocation20_spill] sm:$0xff] %v7459_v54 }
 0x120   : > { %6068 = vmatmul.msk.f32.gmra.mxu0 %vm478_vm1, %v416_v28  ;;  %v7468_v45 = vpop.f32.mrf.mxu2 }
 0x121   : > { %6127 = vmatmul.msk.f32.gmra.mxu1 %vm478_vm1, %v416_v28  ;;  %6245 = vmatmul.msk.f32.gmra.mxu3 %vm478_vm1, %v416_v28  ;;  %13095 = vst [vmem:[#allocation21_spill] sm:$0xff] %v7468_v45 }
 0x124   : > { %v7472_v60 = vpop.f32.mrf.mxu3 }
 0x125   : > { %13096 = vst [vmem:[#allocation22_spill] sm:$0xff] %v7472_v60  ;;  %v7476_v12 = vpop.f32.mrf.mxu0  ;;  %6186 = vmatmul.msk.f32.gmra.mxu2 %vm478_vm1, %v416_v28  ;;  %v418_v28 = vld [vmem:[%s7051_s19 + $0x110] sm:$0xff] }
 0x126   : > { %13097 = vst [vmem:[#allocation23_spill] sm:$0xff] %v7476_v12  ;;  %v7479_v3 = vpop.f32.mrf.mxu1  ;;  %v2300_v12 = vld [vmem:[%s12750_s3 + $0x60] sm:$0xff] }
 0x127   : > { %13098 = vst [vmem:[#allocation24_spill] sm:$0xff] %v7479_v3  ;;  %2323 = vmatpush.msrb.mxu2 %v2300_v12 }
 0x128   : > { %6069 = vmatmul.msk.f32.gmra.mxu0 %vm478_vm1, %v417_v62  ;;  %v7485_v17 = vpop.f32.mrf.mxu2 }
 0x129   : > { %6128 = vmatmul.msk.f32.gmra.mxu1 %vm478_vm1, %v417_v62  ;;  %6246 = vmatmul.msk.f32.gmra.mxu3 %vm478_vm1, %v417_v62  ;;  %13099 = vst [vmem:[#allocation25_spill] sm:$0xff] %v7485_v17 }
 0x12c   : > { %v7489_v45 = vpop.f32.mrf.mxu3 }
 0x12d   : > { %13100 = vst [vmem:[#allocation26_spill] sm:$0xff] %v7489_v45  ;;  %v7493_v60 = vpop.f32.mrf.mxu0  ;;  %6187 = vmatmul.msk.f32.gmra.mxu2 %vm478_vm1, %v417_v62 }
 0x12e   : > { %13101 = vst [vmem:[#allocation27_spill] sm:$0xff] %v7493_v60  ;;  %v7496_v54 = vpop.f32.mrf.mxu1 }
 0x12f   : > { %13102 = vst [vmem:[#allocation28_spill] sm:$0xff] %v7496_v54  ;;  %v459_v54 = vld [vmem:[%s12748_s1 + $0x88] sm:$0xff] }
 0x130   : > { %6070 = vmatmul.msk.f32.gmra.mxu0 %vm478_vm1, %v418_v28  ;;  %v7505_v5 = vpop.f32.mrf.mxu2  ;;  %1640 = vmatpush.msrb.mxu1 %v459_v54 }
 0x131   : > { %6129 = vmatmul.msk.f32.gmra.mxu1 %vm478_vm1, %v418_v28  ;;  %6247 = vmatmul.msk.f32.gmra.mxu3 %vm478_vm1, %v418_v28  ;;  %13103 = vst [vmem:[#allocation29_spill] sm:$0xff] %v7505_v5 }
 0x134   : > { %v7509_v45 = vpop.f32.mrf.mxu3 }
 0x135   : > { %13104 = vst [vmem:[#allocation30_spill] sm:$0xff] %v7509_v45  ;;  %v7513_v17 = vpop.f32.mrf.mxu0  ;;  %6188 = vmatmul.msk.f32.gmra.mxu2 %vm478_vm1, %v418_v28  ;;  %v420_v28 = vld [vmem:[%s7051_s19 + $0x120] sm:$0xff] }
 0x136   : > { %13105 = vst [vmem:[#allocation31_spill] sm:$0xff] %v7513_v17  ;;  %v7516_v62 = vpop.f32.mrf.mxu1  ;;  %v422_v17 = vld [vmem:[%s7051_s19 + $0x130] sm:$0xff] }
 0x137   : > { %13106 = vst [vmem:[#allocation32_spill] sm:$0xff] %v7516_v62 }
 0x138   : > { %6071 = vmatmul.msk.f32.gmra.mxu0 %vm478_vm1, %v419_v52  ;;  %v7522_v47 = vpop.f32.mrf.mxu2 }
 0x139   : > { %6130 = vmatmul.msk.f32.gmra.mxu1 %vm478_vm1, %v419_v52  ;;  %6248 = vmatmul.msk.f32.gmra.mxu3 %vm478_vm1, %v419_v52  ;;  %13107 = vst [vmem:[#allocation33_spill] sm:$0xff] %v7522_v47  ;;  %v2315_v47 = vld [vmem:[%s12750_s3 + $0xd8] sm:$0xff] }
 0x13a   : > { %2515 = vmatpush.msrb.mxu3 %v2315_v47 }
 0x13c   : > { %v7526_v5 = vpop.f32.mrf.mxu3 }
 0x13d   : > { %13108 = vst [vmem:[#allocation34_spill] sm:$0xff] %v7526_v5  ;;  %v7530_v45 = vpop.f32.mrf.mxu0  ;;  %6189 = vmatmul.msk.f32.gmra.mxu2 %vm478_vm1, %v419_v52  ;;  %v421_v52 = vld [vmem:[%s7051_s19 + $0x128] sm:$0xff] }
 0x13e   : > { %13109 = vst [vmem:[#allocation35_spill] sm:$0xff] %v7530_v45  ;;  %v7539_v36 = vpop.f32.mrf.mxu1  ;;  %v6774_v45 = vld [vmem:[%s7051_s19 + $0x80] sm:$0xff] }
 0x13f   : > { %13110 = vst [vmem:[#allocation36_spill] sm:$0xff] %v7539_v36 }
 0x140   : > { %6072 = vmatmul.msk.f32.gmra.mxu0 %vm478_vm1, %v420_v28  ;;  %v7545_v3 = vpop.f32.mrf.mxu2 }
 0x141   : > { %6131 = vmatmul.msk.f32.gmra.mxu1 %vm478_vm1, %v420_v28  ;;  %6249 = vmatmul.msk.f32.gmra.mxu3 %vm478_vm1, %v420_v28  ;;  %13111 = vst [vmem:[#allocation37_spill] sm:$0xff] %v7545_v3 }
 0x144   : > { %v7549_v5 = vpop.f32.mrf.mxu3 }
 0x145   : > { %13112 = vst [vmem:[#allocation38_spill] sm:$0xff] %v7549_v5  ;;  %v7553_v12 = vpop.f32.mrf.mxu0  ;;  %6190 = vmatmul.msk.f32.gmra.mxu2 %vm478_vm1, %v420_v28  ;;  %v2299_v28 = vld [vmem:[%s12750_s3 + $0x58] sm:$0xff] }
 0x146   : > { %13113 = vst [vmem:[#allocation39_spill] sm:$0xff] %v7553_v12  ;;  %v7556_v62 = vpop.f32.mrf.mxu1  ;;  %2324 = vmatpush.msrb.mxu2 %v2299_v28  ;;  %v424_v12 = vld [vmem:[%s7051_s19 + $0x140] sm:$0xff] }
 0x147   : > { %13114 = vst [vmem:[#allocation40_spill] sm:$0xff] %v7556_v62 }
 0x148   : > { %6073 = vmatmul.msk.f32.gmra.mxu0 %vm478_vm1, %v421_v52  ;;  %v7565_v3 = vpop.f32.mrf.mxu2 }
 0x149   : > { %6132 = vmatmul.msk.f32.gmra.mxu1 %vm478_vm1, %v421_v52  ;;  %6250 = vmatmul.msk.f32.gmra.mxu3 %vm478_vm1, %v421_v52  ;;  %13115 = vst [vmem:[#allocation41_spill] sm:$0xff] %v7565_v3 }
 0x14c   : > { %v7569_v5 = vpop.f32.mrf.mxu3 }
 0x14d   : > { %13116 = vst [vmem:[#allocation42_spill] sm:$0xff] %v7569_v5  ;;  %v7573_v36 = vpop.f32.mrf.mxu0  ;;  %6191 = vmatmul.msk.f32.gmra.mxu2 %vm478_vm1, %v421_v52  ;;  %v423_v52 = vld [vmem:[%s7051_s19 + $0x138] sm:$0xff]  ;;  %v2314_v5 = vld [vmem:[%s12750_s3 + $0xd0] sm:$0xff] }
 0x14e   : > { %13117 = vst [vmem:[#allocation43_spill] sm:$0xff] %v7573_v36  ;;  %v7579_v60 = vpop.f32.mrf.mxu1  ;;  %2516 = vmatpush.msrb.mxu3 %v2314_v5 }
 0x14f   : > { %13118 = vst [vmem:[#allocation44_spill] sm:$0xff] %v7579_v60 }
 0x150   : > { %6074 = vmatmul.msk.f32.gmra.mxu0 %vm478_vm1, %v422_v17  ;;  %v7585_v10 = vpop.f32.mrf.mxu2 }
 0x151   : > { %6133 = vmatmul.msk.f32.gmra.mxu1 %vm478_vm1, %v422_v17  ;;  %6251 = vmatmul.msk.f32.gmra.mxu3 %vm478_vm1, %v422_v17  ;;  %13119 = vst [vmem:[#allocation45_spill] sm:$0xff] %v7585_v10 }
 0x154   : > { %v7589_v54 = vpop.f32.mrf.mxu3 }
 0x155   : > { %13120 = vst [vmem:[#allocation46_spill] sm:$0xff] %v7589_v54  ;;  %v7593_v47 = vpop.f32.mrf.mxu0  ;;  %6192 = vmatmul.msk.f32.gmra.mxu2 %vm478_vm1, %v422_v17 }
 0x156   : > { %13121 = vst [vmem:[#allocation47_spill] sm:$0xff] %v7593_v47  ;;  %v7596_v62 = vpop.f32.mrf.mxu1  ;;  %v426_v47 = vld [vmem:[%s7051_s19 + $0x150] sm:$0xff] }
 0x157   : > { %13122 = vst [vmem:[#allocation48_spill] sm:$0xff] %v7596_v62 }
 0x158   : > { %6075 = vmatmul.msk.f32.gmra.mxu0 %vm478_vm1, %v423_v52  ;;  %v7605_v10 = vpop.f32.mrf.mxu2 }
 0x159   : > { %6134 = vmatmul.msk.f32.gmra.mxu1 %vm478_vm1, %v423_v52  ;;  %6252 = vmatmul.msk.f32.gmra.mxu3 %vm478_vm1, %v423_v52  ;;  %13123 = vst [vmem:[#allocation49_spill] sm:$0xff] %v7605_v10 }
 0x15c   : > { %v7609_v54 = vpop.f32.mrf.mxu3 }
 0x15d   : > { %13124 = vst [vmem:[#allocation50_spill] sm:$0xff] %v7609_v54  ;;  %v7613_v60 = vpop.f32.mrf.mxu0  ;;  %6193 = vmatmul.msk.f32.gmra.mxu2 %vm478_vm1, %v423_v52  ;;  %v425_v52 = vld [vmem:[%s7051_s19 + $0x148] sm:$0xff] }
 0x15e   : > { %13125 = vst [vmem:[#allocation51_spill] sm:$0xff] %v7613_v60  ;;  %v7616_v3 = vpop.f32.mrf.mxu1  ;;  %v2298_v60 = vld [vmem:[%s12750_s3 + $0x50] sm:$0xff] }
 0x15f   : > { %13126 = vst [vmem:[#allocation52_spill] sm:$0xff] %v7616_v3  ;;  %2325 = vmatpush.msrb.mxu2 %v2298_v60 }
 0x160   : > { %6076 = vmatmul.msk.f32.gmra.mxu0 %vm478_vm1, %v424_v12  ;;  %v7622_v28 = vpop.f32.mrf.mxu2 }
 0x161   : > { %6135 = vmatmul.msk.f32.gmra.mxu1 %vm478_vm1, %v424_v12  ;;  %6253 = vmatmul.msk.f32.gmra.mxu3 %vm478_vm1, %v424_v12  ;;  %13127 = vst [vmem:[#allocation53_spill] sm:$0xff] %v7622_v28 }
 0x164   : > { %v7626_v10 = vpop.f32.mrf.mxu3 }
 0x165   : > { %13128 = vst [vmem:[#allocation54_spill] sm:$0xff] %v7626_v10  ;;  %v7630_v54 = vpop.f32.mrf.mxu0  ;;  %6194 = vmatmul.msk.f32.gmra.mxu2 %vm478_vm1, %v424_v12 }
 0x166   : > { %13129 = vst [vmem:[#allocation55_spill] sm:$0xff] %v7630_v54  ;;  %v7633_v62 = vpop.f32.mrf.mxu1 }
 0x167   : > { %13130 = vst [vmem:[#allocation56_spill] sm:$0xff] %v7633_v62 }
 0x168   : > { %6077 = vmatmul.msk.f32.gmra.mxu0 %vm478_vm1, %v425_v52  ;;  %v7642_v28 = vpop.f32.mrf.mxu2 }
 0x169   : > { %6136 = vmatmul.msk.f32.gmra.mxu1 %vm478_vm1, %v425_v52  ;;  %6254 = vmatmul.msk.f32.gmra.mxu3 %vm478_vm1, %v425_v52  ;;  %13131 = vst [vmem:[#allocation57_spill] sm:$0xff] %v7642_v28 }
 0x16c   : > { %v7646_v10 = vpop.f32.mrf.mxu3 }
 0x16d   : > { %13132 = vst [vmem:[#allocation58_spill] sm:$0xff] %v7646_v10  ;;  %v7650_v3 = vpop.f32.mrf.mxu0  ;;  %6195 = vmatmul.msk.f32.gmra.mxu2 %vm478_vm1, %v425_v52  ;;  %v427_v52 = vld [vmem:[%s7051_s19 + $0x158] sm:$0xff] }
 0x16e   : > { %13133 = vst [vmem:[#allocation59_spill] sm:$0xff] %v7650_v3  ;;  %v7653_v36 = vpop.f32.mrf.mxu1  ;;  %v2313_v3 = vld [vmem:[%s12750_s3 + $0xc8] sm:$0xff] }
 0x16f   : > { %13134 = vst [vmem:[#allocation60_spill] sm:$0xff] %v7653_v36  ;;  %2517 = vmatpush.msrb.mxu3 %v2313_v3  ;;  %v453_v36 = vld [vmem:[%s12748_s1 + $0x58] sm:$0xff] }
 0x170   : > { %6078 = vmatmul.msk.f32.gmra.mxu0 %vm478_vm1, %v426_v47  ;;  %v7659_v5 = vpop.f32.mrf.mxu2  ;;  %1641 = vmatpush.msrb.mxu1 %v453_v36 }
 0x171   : > { %6137 = vmatmul.msk.f32.gmra.mxu1 %vm478_vm1, %v426_v47  ;;  %6255 = vmatmul.msk.f32.gmra.mxu3 %vm478_vm1, %v426_v47  ;;  %13135 = vst [vmem:[#allocation61_spill] sm:$0xff] %v7659_v5 }
 0x174   : > { %v7663_v28 = vpop.f32.mrf.mxu3 }
 0x175   : > { %13136 = vst [vmem:[#allocation62_spill] sm:$0xff] %v7663_v28  ;;  %v7667_v10 = vpop.f32.mrf.mxu0  ;;  %6196 = vmatmul.msk.f32.gmra.mxu2 %vm478_vm1, %v426_v47  ;;  %v428_v47 = vld [vmem:[%s7051_s19 + $0x160] sm:$0xff] }
 0x176   : > { %13137 = vst [vmem:[#allocation63_spill] sm:$0xff] %v7667_v10  ;;  %v7670_v62 = vpop.f32.mrf.mxu1 }
 0x177   : > { %13138 = vst [vmem:[#allocation64_spill] sm:$0xff] %v7670_v62 }
 0x178   : > { %6079 = vmatmul.msk.f32.gmra.mxu0 %vm478_vm1, %v427_v52  ;;  %v7679_v17 = vpop.f32.mrf.mxu2 }
 0x179   : > { %6138 = vmatmul.msk.f32.gmra.mxu1 %vm478_vm1, %v427_v52  ;;  %6256 = vmatmul.msk.f32.gmra.mxu3 %vm478_vm1, %v427_v52  ;;  %13139 = vst [vmem:[#allocation65_spill] sm:$0xff] %v7679_v17 }
 0x17c   : > { %v7683_v28 = vpop.f32.mrf.mxu3 }
 0x17d   : > { %13140 = vst [vmem:[#allocation66_spill] sm:$0xff] %v7683_v28  ;;  %v7687_v5 = vpop.f32.mrf.mxu0  ;;  %6197 = vmatmul.msk.f32.gmra.mxu2 %vm478_vm1, %v427_v52  ;;  %v429_v52 = vld [vmem:[%s7051_s19 + $0x168] sm:$0xff] }
 0x17e   : > { %13141 = vst [vmem:[#allocation67_spill] sm:$0xff] %v7687_v5  ;;  %v7690_v54 = vpop.f32.mrf.mxu1 }
 0x17f   : > { %13142 = vst [vmem:[#allocation68_spill] sm:$0xff] %v7690_v54 }
 0x180   : > { %6080 = vmatmul.msk.f32.gmra.mxu0 %vm478_vm1, %v428_v47  ;;  %v7696_v60 = vpop.f32.mrf.mxu2 }
 0x181   : > { %6139 = vmatmul.msk.f32.gmra.mxu1 %vm478_vm1, %v428_v47  ;;  %6257 = vmatmul.msk.f32.gmra.mxu3 %vm478_vm1, %v428_v47  ;;  %13143 = vst [vmem:[#allocation69_spill] sm:$0xff] %v7696_v60  ;;  %v430_v60 = vld [vmem:[%s7051_s19 + $0x170] sm:$0xff] }
 0x184   : > { %v7700_v17 = vpop.f32.mrf.mxu3 }
 0x185   : > { %13144 = vst [vmem:[#allocation70_spill] sm:$0xff] %v7700_v17  ;;  %v7704_v28 = vpop.f32.mrf.mxu0  ;;  %6198 = vmatmul.msk.f32.gmra.mxu2 %vm478_vm1, %v428_v47  ;;  %v452_v17 = vld [vmem:[%s12748_s1 + $0x50] sm:$0xff] }
 0x186   : > { %13145 = vst [vmem:[#allocation71_spill] sm:$0xff] %v7704_v28  ;;  %v7707_v62 = vpop.f32.mrf.mxu1  ;;  %1450 = vmatpush.msrb.mxu0 %v452_v17  ;;  %v432_v17 = vld [vmem:[%s7051_s19 + $0x180] sm:$0xff] }
 0x187   : > { %13146 = vst [vmem:[#allocation72_spill] sm:$0xff] %v7707_v62  ;;  %v2297_v62 = vld [vmem:[%s12750_s3 + $0x48] sm:$0xff] }
 0x188   : > { %6081 = vmatmul.msk.f32.gmra.mxu0 %vm478_vm1, %v429_v52  ;;  %v7719_v12 = vpop.f32.mrf.mxu2  ;;  %2326 = vmatpush.msrb.mxu2 %v2297_v62  ;;  %v2296_v62 = vld [vmem:[%s12750_s3 + $0x40] sm:$0xff] }
 0x189   : > { %6140 = vmatmul.msk.f32.gmra.mxu1 %vm478_vm1, %v429_v52  ;;  %6258 = vmatmul.msk.f32.gmra.mxu3 %vm478_vm1, %v429_v52  ;;  %13147 = vst [vmem:[#allocation73_spill] sm:$0xff] %v7719_v12 }
 0x18a   : > { %2327 = vmatpush.msrb.mxu2 %v2296_v62  ;;  %v436_v62 = vld [vmem:[%s7051_s19 + $0x1a0] sm:$0xff] }
 0x18c   : > { %v7723_v54 = vpop.f32.mrf.mxu3 }
 0x18d   : > { %13148 = vst [vmem:[#allocation74_spill] sm:$0xff] %v7723_v54  ;;  %v7727_v47 = vpop.f32.mrf.mxu0  ;;  %6199 = vmatmul.msk.f32.gmra.mxu2 %vm478_vm1, %v429_v52  ;;  %v431_v52 = vld [vmem:[%s7051_s19 + $0x178] sm:$0xff] }
 0x18e   : > { %13149 = vst [vmem:[#allocation75_spill] sm:$0xff] %v7727_v47  ;;  %v7730_v10 = vpop.f32.mrf.mxu1  ;;  %v433_v47 = vld [vmem:[%s7051_s19 + $0x188] sm:$0xff] }
 0x18f   : > { %13150 = vst [vmem:[#allocation76_spill] sm:$0xff] %v7730_v10 }
 0x190   : > { %6082 = vmatmul.msk.f32.gmra.mxu0 %vm478_vm1, %v430_v60  ;;  %v7736_v36 = vpop.f32.mrf.mxu2 }
 0x191   : > { %6141 = vmatmul.msk.f32.gmra.mxu1 %vm478_vm1, %v430_v60  ;;  %6259 = vmatmul.msk.f32.gmra.mxu3 %vm478_vm1, %v430_v60  ;;  %13151 = vst [vmem:[#allocation77_spill] sm:$0xff] %v7736_v36 }
 0x194   : > { %v7740_v12 = vpop.f32.mrf.mxu3 }
 0x195   : > { %13152 = vst [vmem:[#allocation78_spill] sm:$0xff] %v7740_v12  ;;  %v7744_v54 = vpop.f32.mrf.mxu0  ;;  %6200 = vmatmul.msk.f32.gmra.mxu2 %vm478_vm1, %v430_v60  ;;  %v2312_v12 = vld [vmem:[%s12750_s3 + $0xc0] sm:$0xff] }
 0x196   : > { %13153 = vst [vmem:[#allocation79_spill] sm:$0xff] %v7744_v54  ;;  %v7750_v5 = vpop.f32.mrf.mxu1  ;;  %2518 = vmatpush.msrb.mxu3 %v2312_v12 }
 0x197   : > { %13154 = vst [vmem:[#allocation80_spill] sm:$0xff] %v7750_v5 }
 0x198   : > { %6083 = vmatmul.msk.f32.gmra.mxu0 %vm478_vm1, %v431_v52  ;;  %v7759_v3 = vpop.f32.mrf.mxu2 }
 0x199   : > { %6142 = vmatmul.msk.f32.gmra.mxu1 %vm478_vm1, %v431_v52  ;;  %6260 = vmatmul.msk.f32.gmra.mxu3 %vm478_vm1, %v431_v52  ;;  %13155 = vst [vmem:[#allocation81_spill] sm:$0xff] %v7759_v3 }
 0x19c   : > { %v7763_v10 = vpop.f32.mrf.mxu3 }
 0x19d   : > { %13156 = vst [vmem:[#allocation82_spill] sm:$0xff] %v7763_v10  ;;  %v7767_v36 = vpop.f32.mrf.mxu0  ;;  %6201 = vmatmul.msk.f32.gmra.mxu2 %vm478_vm1, %v431_v52 }
 0x19e   : > { %13157 = vst [vmem:[#allocation83_spill] sm:$0xff] %v7767_v36  ;;  %v7770_v60 = vpop.f32.mrf.mxu1 }
 0x19f   : > { %13158 = vst [vmem:[#allocation84_spill] sm:$0xff] %v7770_v60 }
 0x1a0   : > { %6084 = vmatmul.msk.f32.gmra.mxu0 %vm478_vm1, %v432_v17  ;;  %v7779_v3 = vpop.f32.mrf.mxu2 }
 0x1a1   : > { %6143 = vmatmul.msk.f32.gmra.mxu1 %vm478_vm1, %v432_v17  ;;  %6261 = vmatmul.msk.f32.gmra.mxu3 %vm478_vm1, %v432_v17  ;;  %13159 = vst [vmem:[#allocation85_spill] sm:$0xff] %v7779_v3 }
 0x1a4   : > { %v7783_v10 = vpop.f32.mrf.mxu3 }
 0x1a5   : > { %13160 = vst [vmem:[#allocation86_spill] sm:$0xff] %v7783_v10  ;;  %v7787_v5 = vpop.f32.mrf.mxu0  ;;  %6202 = vmatmul.msk.f32.gmra.mxu2 %vm478_vm1, %v432_v17  ;;  %v434_v17 = vld [vmem:[%s7051_s19 + $0x190] sm:$0xff]  ;;  %v2311_v10 = vld [vmem:[%s12750_s3 + $0xb8] sm:$0xff] }
 0x1a6   : > { %13161 = vst [vmem:[#allocation87_spill] sm:$0xff] %v7787_v5  ;;  %v7790_v28 = vpop.f32.mrf.mxu1  ;;  %2519 = vmatpush.msrb.mxu3 %v2311_v10 }
 0x1a7   : > { %13162 = vst [vmem:[#allocation88_spill] sm:$0xff] %v7790_v28 }
 0x1a8   : > { %6085 = vmatmul.msk.f32.gmra.mxu0 %vm478_vm1, %v433_v47  ;;  %v7796_v12 = vpop.f32.mrf.mxu2 }
 0x1a9   : > { %6144 = vmatmul.msk.f32.gmra.mxu1 %vm478_vm1, %v433_v47  ;;  %6262 = vmatmul.msk.f32.gmra.mxu3 %vm478_vm1, %v433_v47  ;;  %13163 = vst [vmem:[#allocation89_spill] sm:$0xff] %v7796_v12 }
 0x1ac   : > { %v7800_v52 = vpop.f32.mrf.mxu3 }
 0x1ad   : > { %13164 = vst [vmem:[#allocation90_spill] sm:$0xff] %v7800_v52  ;;  %v7804_v60 = vpop.f32.mrf.mxu0  ;;  %6203 = vmatmul.msk.f32.gmra.mxu2 %vm478_vm1, %v433_v47  ;;  %v435_v47 = vld [vmem:[%s7051_s19 + $0x198] sm:$0xff] }
 0x1ae   : > { %13165 = vst [vmem:[#allocation91_spill] sm:$0xff] %v7804_v60  ;;  %v7807_v3 = vpop.f32.mrf.mxu1 }
 0x1af   : > { %13166 = vst [vmem:[#allocation92_spill] sm:$0xff] %v7807_v3 }
 0x1b0   : > { %6086 = vmatmul.msk.f32.gmra.mxu0 %vm478_vm1, %v434_v17  ;;  %v7816_v12 = vpop.f32.mrf.mxu2 }
 0x1b1   : > { %6145 = vmatmul.msk.f32.gmra.mxu1 %vm478_vm1, %v434_v17  ;;  %6263 = vmatmul.msk.f32.gmra.mxu3 %vm478_vm1, %v434_v17  ;;  %13167 = vst [vmem:[#allocation93_spill] sm:$0xff] %v7816_v12 }
 0x1b5   : > { %v7820_v3 = vpop.f32.mrf.mxu0  ;;  %6204 = vmatmul.msk.f32.gmra.mxu2 %vm478_vm1, %v434_v17 }
 0x1b6   : > { %13168 = vst [vmem:[#allocation94_spill] sm:$0xff] %v7820_v3  ;;  %v7823_v60 = vpop.f32.mrf.mxu1 }
 0x1b7   : > { %13169 = vst [vmem:[#allocation95_spill] sm:$0xff] %v7823_v60 }
 0x1b8   : > { %6087 = vmatmul.msk.f32.gmra.mxu0 %vm478_vm1, %v435_v47 }
 0x1b9   : > { %6146 = vmatmul.msk.f32.gmra.mxu1 %vm478_vm1, %v435_v47  ;;  %6264 = vmatmul.msk.f32.gmra.mxu3 %vm478_vm1, %v435_v47 }
 0x1bd   : > { %v7829_v52 = vpop.f32.mrf.mxu0  ;;  %6205 = vmatmul.msk.f32.gmra.mxu2 %vm478_vm1, %v435_v47  ;;  %v438_v47 = vld [vmem:[%s7051_s19 + $0x1b0] sm:$0xff] }
 0x1be   : > { %13170 = vst [vmem:[#allocation96_spill] sm:$0xff] %v7829_v52  ;;  %v7832_v28 = vpop.f32.mrf.mxu1  ;;  %v437_v52 = vld [vmem:[%s7051_s19 + $0x1a8] sm:$0xff] }
 0x1bf   : > { %13171 = vst [vmem:[#allocation97_spill] sm:$0xff] %v7832_v28 }
 0x1c0   : > { %6088 = vmatmul.msk.f32.gmra.mxu0 %vm478_vm1, %v436_v62 }
 0x1c1   : > { %6147 = vmatmul.msk.f32.gmra.mxu1 %vm478_vm1, %v436_v62  ;;  %6265 = vmatmul.msk.f32.gmra.mxu3 %vm478_vm1, %v436_v62 }
 0x1c5   : > { %v7841_v17 = vpop.f32.mrf.mxu0  ;;  %6206 = vmatmul.msk.f32.gmra.mxu2 %vm478_vm1, %v436_v62  ;;  %v446_v62 = vld [vmem:[%s12748_s1 + $0x20] sm:$0xff] }
 0x1c6   : > { %13172 = vst [vmem:[#allocation98_spill] sm:$0xff] %v7841_v17  ;;  %v7844_v60 = vpop.f32.mrf.mxu1  ;;  %v2295_v17 = vld [vmem:[%s12750_s3 + $0x38] sm:$0xff]  ;;  %1451 = vmatpush.msrb.mxu0 %v446_v62 }
 0x1c7   : > { %13173 = vst [vmem:[#allocation99_spill] sm:$0xff] %v7844_v60  ;;  %v447_v60 = vld [vmem:[%s12748_s1 + $0x28] sm:$0xff]  ;;  %2328 = vmatpush.msrb.mxu2 %v2295_v17  ;;  %v440_v17 = vld [vmem:[%s7051_s19 + $0x1c0] sm:$0xff] }
 0x1c8   : > { %6089 = vmatmul.msk.f32.gmra.mxu0 %vm478_vm1, %v437_v52  ;;  %1642 = vmatpush.msrb.mxu1 %v447_v60  ;;  %v2310_v60 = vld [vmem:[%s12750_s3 + $0xb0] sm:$0xff] }
 0x1c9   : > { %6148 = vmatmul.msk.f32.gmra.mxu1 %vm478_vm1, %v437_v52  ;;  %6266 = vmatmul.msk.f32.gmra.mxu3 %vm478_vm1, %v437_v52 }
 0x1ca   : > { %2520 = vmatpush.msrb.mxu3 %v2310_v60 }
 0x1cd   : > { %v7850_v10 = vpop.f32.mrf.mxu0  ;;  %6207 = vmatmul.msk.f32.gmra.mxu2 %vm478_vm1, %v437_v52 }
 0x1ce   : > { %13174 = vst [vmem:[#allocation100_spill] sm:$0xff] %v7850_v10  ;;  %v7853_v28 = vpop.f32.mrf.mxu1  ;;  %v439_v10 = vld [vmem:[%s7051_s19 + $0x1b8] sm:$0xff] }
 0x1cf   : > { %13175 = vst [vmem:[#allocation101_spill] sm:$0xff] %v7853_v28 }
 0x1d0   : > { %6090 = vmatmul.msk.f32.gmra.mxu0 %vm478_vm1, %v438_v47 }
 0x1d1   : > { %6149 = vmatmul.msk.f32.gmra.mxu1 %vm478_vm1, %v438_v47  ;;  %6267 = vmatmul.msk.f32.gmra.mxu3 %vm478_vm1, %v438_v47 }
 0x1d5   : > { %v7868_v28 = vpop.f32.mrf.mxu0  ;;  %6208 = vmatmul.msk.f32.gmra.mxu2 %vm478_vm1, %v438_v47 }
 0x1d6   : > { %13176 = vst [vmem:[#allocation102_spill] sm:$0xff] %v7868_v28  ;;  %v7871_v3 = vpop.f32.mrf.mxu1  ;;  %v6759_v28 = vld [vmem:[%s7051_s19 + $0x8] sm:$0xff] }
 0x1d7   : > { %13177 = vst [vmem:[#allocation103_spill] sm:$0xff] %v7871_v3 }
 0x1d8   : > { %6091 = vmatmul.msk.f32.gmra.mxu0 %vm478_vm1, %v439_v10 }
 0x1d9   : > { %6150 = vmatmul.msk.f32.gmra.mxu1 %vm478_vm1, %v439_v10  ;;  %6268 = vmatmul.msk.f32.gmra.mxu3 %vm478_vm1, %v439_v10 }
 0x1dd   : > { %v7877_v52 = vpop.f32.mrf.mxu0  ;;  %6209 = vmatmul.msk.f32.gmra.mxu2 %vm478_vm1, %v439_v10  ;;  %v2294_v10 = vld [vmem:[%s12750_s3 + $0x30] sm:$0xff] }
 0x1de   : > { %13178 = vst [vmem:[#allocation104_spill] sm:$0xff] %v7877_v52  ;;  %v7883_v62 = vpop.f32.mrf.mxu1  ;;  %v441_v52 = vld [vmem:[%s7051_s19 + $0x1c8] sm:$0xff]  ;;  %2329 = vmatpush.msrb.mxu2 %v2294_v10 }
 0x1df   : > { %13179 = vst [vmem:[#allocation105_spill] sm:$0xff] %v7883_v62  ;;  %v2309_v10 = vld [vmem:[%s12750_s3 + $0xa8] sm:$0xff] }
 0x1e0   : > { %6092 = vmatmul.msk.f32.gmra.mxu0 %vm478_vm1, %v440_v17  ;;  %2521 = vmatpush.msrb.mxu3 %v2309_v10  ;;  %v6761_v10 = vld [vmem:[%s7051_s19 + $0x18] sm:$0xff] }
 0x1e1   : > { %6151 = vmatmul.msk.f32.gmra.mxu1 %vm478_vm1, %v440_v17  ;;  %6269 = vmatmul.msk.f32.gmra.mxu3 %vm478_vm1, %v440_v17 }
 0x1e5   : > { %v7889_v47 = vpop.f32.mrf.mxu0  ;;  %6210 = vmatmul.msk.f32.gmra.mxu2 %vm478_vm1, %v440_v17 }
 0x1e6   : > { %13180 = vst [vmem:[#allocation106_spill] sm:$0xff] %v7889_v47  ;;  %v7892_v3 = vpop.f32.mrf.mxu1 }
 0x1e7   : > { %13181 = vst [vmem:[#allocation107_spill] sm:$0xff] %v7892_v3  ;;  %v6758_v3 = vld [vmem:[%s7051_s19] sm:$0xff] }
 0x1e8   : > { %6093 = vmatmul.msk.f32.gmra.mxu0 %vm478_vm1, %v441_v52 }
 0x1e9   : > { %6152 = vmatmul.msk.f32.gmra.mxu1 %vm478_vm1, %v441_v52  ;;  %6270 = vmatmul.msk.f32.gmra.mxu3 %vm478_vm1, %v441_v52 }
 0x1ed   : > { %v7901_v60 = vpop.f32.mrf.mxu0  ;;  %6211 = vmatmul.msk.f32.gmra.mxu2 %vm478_vm1, %v441_v52 }
 0x1ee   : > { %13182 = vst [vmem:[#allocation108_spill] sm:$0xff] %v7901_v60  ;;  %v7903_v47 = vpop.f32.mrf.mxu1 }
 0x1ef   : > { %13183 = vst [vmem:[#allocation109_spill] sm:$0xff] %v7903_v47 }
 0x1f0   : > { %6272 = vmatmul.msk.f32.vlgmr.msrb.gmra.mxu0 %vm478_vm1, %v6758_v3 }
 0x1f1   : > { %6331 = vmatmul.msk.f32.vlgmr.msrb.gmra.mxu1 %vm478_vm1, %v6758_v3  ;;  %v6760_v3 = vld [vmem:[%s7051_s19 + $0x10] sm:$0xff] }
 0x1f5   : > { %v7909_v17 = vpop.f32.mrf.mxu0 }
 0x1f6   : > { %13184 = vst [vmem:[#allocation110_spill] sm:$0xff] %v7909_v17  ;;  %v7911_v62 = vpop.f32.mrf.mxu1 }
 0x1f7   : > { %13185 = vst [vmem:[#allocation111_spill] sm:$0xff] %v7911_v62 }
 0x1f8   : > { %6273 = vmatmul.msk.f32.gmra.mxu0 %vm478_vm1, %v6759_v28 }
 0x1f9   : > { %6332 = vmatmul.msk.f32.gmra.mxu1 %vm478_vm1, %v6759_v28  ;;  %v2293_v28 = vld [vmem:[%s12750_s3 + $0x28] sm:$0xff] }
 0x1fa   : > { %2330 = vmatpush.msrb.mxu2 %v2293_v28 }
 0x1fd   : > { %v7919_v52 = vpop.f32.mrf.mxu0 }
 0x1fe   : > { %13186 = vst [vmem:[#allocation112_spill] sm:$0xff] %v7919_v52  ;;  %v7921_v47 = vpop.f32.mrf.mxu1  ;;  %v7935_v52 = vpop.f32.mrf.mxu2 }
 0x1ff   : > { %13187 = vst [vmem:[#allocation113_spill] sm:$0xff] %v7921_v47  ;;  %v7938_v47 = vpop.f32.mrf.mxu3 }
 0x200   : > { %6274 = vmatmul.msk.f32.gmra.mxu0 %vm478_vm1, %v6760_v3  ;;  %13190 = vst [vmem:[#allocation116_spill] sm:$0xff] %v7935_v52 }
 0x201   : > { %6333 = vmatmul.msk.f32.gmra.mxu1 %vm478_vm1, %v6760_v3  ;;  %13191 = vst [vmem:[#allocation117_spill] sm:$0xff] %v7938_v47 }
 0x205   : > { %v7926_v62 = vpop.f32.mrf.mxu0 }
 0x206   : > { %13188 = vst [vmem:[#allocation114_spill] sm:$0xff] %v7926_v62  ;;  %v7928_v17 = vpop.f32.mrf.mxu1  ;;  %v7947_v28 = vpop.f32.mrf.mxu2 }
 0x207   : > { %13189 = vst [vmem:[#allocation115_spill] sm:$0xff] %v7928_v17  ;;  %v6762_v17 = vld [vmem:[%s7051_s19 + $0x20] sm:$0xff]  ;;  %v7949_v60 = vpop.f32.mrf.mxu3 }
 0x208   : > { %6275 = vmatmul.msk.f32.gmra.mxu0 %vm478_vm1, %v6761_v10  ;;  %13194 = vst [vmem:[#allocation120_spill] sm:$0xff] %v7947_v28 }
 0x209   : > { %6334 = vmatmul.msk.f32.gmra.mxu1 %vm478_vm1, %v6761_v10  ;;  %13195 = vst [vmem:[#allocation121_spill] sm:$0xff] %v7949_v60  ;;  %v2308_v10 = vld [vmem:[%s12750_s3 + $0xa0] sm:$0xff] }
 0x20a   : > { %2522 = vmatpush.msrb.mxu3 %v2308_v10 }
 0x20d   : > { %v7940_v3 = vpop.f32.mrf.mxu0 }
 0x20e   : > { %13192 = vst [vmem:[#allocation118_spill] sm:$0xff] %v7940_v3  ;;  %v7942_v62 = vpop.f32.mrf.mxu1 }
 0x20f   : > { %13193 = vst [vmem:[#allocation119_spill] sm:$0xff] %v7942_v62  ;;  %v6763_v62 = vld [vmem:[%s7051_s19 + $0x28] sm:$0xff]  ;;  %v7965_v60 = vpop.f32.mrf.mxu3 }
 0x210   : > { %6276 = vmatmul.msk.f32.gmra.mxu0 %vm478_vm1, %v6762_v17  ;;  %13200 = vst [vmem:[#allocation126_spill] sm:$0xff] %v7965_v60 }
 0x211   : > { %6335 = vmatmul.msk.f32.gmra.mxu1 %vm478_vm1, %v6762_v17  ;;  %v7961_v17 = vpop.f32.mrf.mxu2 }
 0x212   : > { %13198 = vst [vmem:[#allocation124_spill] sm:$0xff] %v7961_v17  ;;  %v6766_v17 = vld [vmem:[%s7051_s19 + $0x40] sm:$0xff] }
 0x215   : > { %v7951_v12 = vpop.f32.mrf.mxu0 }
 0x216   : > { %13196 = vst [vmem:[#allocation122_spill] sm:$0xff] %v7951_v12  ;;  %v7953_v52 = vpop.f32.mrf.mxu1 }
 0x217   : > { %13197 = vst [vmem:[#allocation123_spill] sm:$0xff] %v7953_v52  ;;  %v6764_v52 = vld [vmem:[%s7051_s19 + $0x30] sm:$0xff]  ;;  %v7981_v60 = vpop.f32.mrf.mxu3 }
 0x218   : > { %6277 = vmatmul.msk.f32.gmra.mxu0 %vm478_vm1, %v6763_v62  ;;  %13205 = vst [vmem:[#allocation131_spill] sm:$0xff] %v7981_v60 }
 0x219   : > { %6336 = vmatmul.msk.f32.gmra.mxu1 %vm478_vm1, %v6763_v62  ;;  %v2292_v62 = vld [vmem:[%s12750_s3 + $0x20] sm:$0xff] }
 0x21a   : > { %2331 = vmatpush.msrb.mxu2 %v2292_v62 }
 0x21d   : > { %v7963_v3 = vpop.f32.mrf.mxu0 }
 0x21e   : > { %13199 = vst [vmem:[#allocation125_spill] sm:$0xff] %v7963_v3  ;;  %v7967_v12 = vpop.f32.mrf.mxu1  ;;  %v7979_v3 = vpop.f32.mrf.mxu2 }
 0x21f   : > { %13201 = vst [vmem:[#allocation127_spill] sm:$0xff] %v7967_v12  ;;  %v6765_v12 = vld [vmem:[%s7051_s19 + $0x38] sm:$0xff]  ;;  %v7995_v62 = vpop.f32.mrf.mxu3 }
 0x220   : > { %6278 = vmatmul.msk.f32.gmra.mxu0 %vm478_vm1, %v6764_v52  ;;  %13204 = vst [vmem:[#allocation130_spill] sm:$0xff] %v7979_v3 }
 0x221   : > { %6337 = vmatmul.msk.f32.gmra.mxu1 %vm478_vm1, %v6764_v52  ;;  %13209 = vst [vmem:[#allocation135_spill] sm:$0xff] %v7995_v62 }
 0x225   : > { %v7972_v10 = vpop.f32.mrf.mxu0 }
 0x226   : > { %13202 = vst [vmem:[#allocation128_spill] sm:$0xff] %v7972_v10  ;;  %v7977_v28 = vpop.f32.mrf.mxu1 }
 0x227   : > { %13203 = vst [vmem:[#allocation129_spill] sm:$0xff] %v7977_v28  ;;  %v7992_v28 = vpop.f32.mrf.mxu2 }
 0x228   : > { %6279 = vmatmul.msk.f32.gmra.mxu0 %vm478_vm1, %v6765_v12  ;;  %13208 = vst [vmem:[#allocation134_spill] sm:$0xff] %v7992_v28  ;;  %v6768_v28 = vld [vmem:[%s7051_s19 + $0x50] sm:$0xff] }
 0x229   : > { %6338 = vmatmul.msk.f32.gmra.mxu1 %vm478_vm1, %v6765_v12  ;;  %v2307_v12 = vld [vmem:[%s12750_s3 + $0x98] sm:$0xff] }
 0x22a   : > { %2523 = vmatpush.msrb.mxu3 %v2307_v12  ;;  %v2291_v12 = vld [vmem:[%s12750_s3 + $0x18] sm:$0xff] }
 0x22b   : > { %2332 = vmatpush.msrb.mxu2 %v2291_v12  ;;  %v2290_v12 = vld [vmem:[%s12750_s3 + $0x10] sm:$0xff] }
 0x22d   : > { %v7986_v52 = vpop.f32.mrf.mxu0  ;;  %2333 = vmatpush.msrb.mxu2 %v2290_v12 }
 0x22e   : > { %13206 = vst [vmem:[#allocation132_spill] sm:$0xff] %v7986_v52  ;;  %v7988_v10 = vpop.f32.mrf.mxu1 }
 0x22f   : > { %13207 = vst [vmem:[#allocation133_spill] sm:$0xff] %v7988_v10  ;;  %v6767_v10 = vld [vmem:[%s7051_s19 + $0x48] sm:$0xff]  ;;  %v8007_v52 = vpop.f32.mrf.mxu2 }
 0x230   : > { %6280 = vmatmul.msk.f32.gmra.mxu0 %vm478_vm1, %v6766_v17  ;;  %13212 = vst [vmem:[#allocation138_spill] sm:$0xff] %v8007_v52 }
 0x231   : > { %6339 = vmatmul.msk.f32.gmra.mxu1 %vm478_vm1, %v6766_v17  ;;  %v8009_v17 = vpop.f32.mrf.mxu3 }
 0x232   : > { %13213 = vst [vmem:[#allocation139_spill] sm:$0xff] %v8009_v17 }
 0x235   : > { %v7997_v60 = vpop.f32.mrf.mxu0 }
 0x236   : > { %13210 = vst [vmem:[#allocation136_spill] sm:$0xff] %v7997_v60  ;;  %v8002_v3 = vpop.f32.mrf.mxu1 }
 0x237   : > { %13211 = vst [vmem:[#allocation137_spill] sm:$0xff] %v8002_v3 }
 0x238   : > { %6281 = vmatmul.msk.f32.gmra.mxu0 %vm478_vm1, %v6767_v10 }
 0x239   : > { %6340 = vmatmul.msk.f32.gmra.mxu1 %vm478_vm1, %v6767_v10  ;;  %v8021_v10 = vpop.f32.mrf.mxu2  ;;  %v8025_v17 = vpop.f32.mrf.mxu3 }
 0x23a   : > { %13216 = vst [vmem:[#allocation142_spill] sm:$0xff] %v8021_v10 }
 0x23b   : > { %13218 = vst [vmem:[#allocation144_spill] sm:$0xff] %v8025_v17  ;;  %v6770_v17 = vld [vmem:[%s7051_s19 + $0x60] sm:$0xff] }
 0x23d   : > { %v8011_v62 = vpop.f32.mrf.mxu0 }
 0x23e   : > { %13214 = vst [vmem:[#allocation140_spill] sm:$0xff] %v8011_v62  ;;  %v8013_v60 = vpop.f32.mrf.mxu1 }
 0x23f   : > { %13215 = vst [vmem:[#allocation141_spill] sm:$0xff] %v8013_v60  ;;  %v6769_v60 = vld [vmem:[%s7051_s19 + $0x58] sm:$0xff] }
 0x240   : > { %6282 = vmatmul.msk.f32.gmra.mxu0 %vm478_vm1, %v6768_v28 }
 0x241   : > { %6341 = vmatmul.msk.f32.gmra.mxu1 %vm478_vm1, %v6768_v28  ;;  %v8036_v47 = vpop.f32.mrf.mxu2 }
 0x242   : > { %13222 = vst [vmem:[#allocation148_spill] sm:$0xff] %v8036_v47 }
 0x245   : > { %v8023_v3 = vpop.f32.mrf.mxu0 }
 0x246   : > { %13217 = vst [vmem:[#allocation143_spill] sm:$0xff] %v8023_v3  ;;  %v8027_v62 = vpop.f32.mrf.mxu1  ;;  %v2306_v3 = vld [vmem:[%s12750_s3 + $0x90] sm:$0xff] }
 0x247   : > { %13219 = vst [vmem:[#allocation145_spill] sm:$0xff] %v8027_v62  ;;  %v8044_v62 = vpop.f32.mrf.mxu3  ;;  %2524 = vmatpush.msrb.mxu3 %v2306_v3 }
 0x248   : > { %6283 = vmatmul.msk.f32.gmra.mxu0 %vm478_vm1, %v6769_v60  ;;  %13223 = vst [vmem:[#allocation149_spill] sm:$0xff] %v8044_v62  ;;  %v6771_v62 = vld [vmem:[%s7051_s19 + $0x68] sm:$0xff] }
 0x249   : > { %6342 = vmatmul.msk.f32.gmra.mxu1 %vm478_vm1, %v6769_v60  ;;  %v2289_v60 = vld [vmem:[%s12750_s3 + $0x8] sm:$0xff] }
 0x24a   : > { %2334 = vmatpush.msrb.mxu2 %v2289_v60  ;;  %v8067_v60 = vpop.f32.mrf.mxu2 }
 0x24b   : > { %13226 = vst [vmem:[#allocation152_spill] sm:$0xff] %v8067_v60 }
 0x24d   : > { %v8032_v28 = vpop.f32.mrf.mxu0 }
 0x24e   : > { %13220 = vst [vmem:[#allocation146_spill] sm:$0xff] %v8032_v28  ;;  %v8034_v52 = vpop.f32.mrf.mxu1  ;;  %v2288_v28 = vld [vmem:[%s12750_s3] sm:$0xff] }
 0x24f   : > { %13221 = vst [vmem:[#allocation147_spill] sm:$0xff] %v8034_v52  ;;  %v2305_v52 = vld [vmem:[%s12750_s3 + $0x88] sm:$0xff]  ;;  %2335 = vmatpush.msrb.mxu2 %v2288_v28  ;;  %v6772_v28 = vld [vmem:[%s7051_s19 + $0x70] sm:$0xff] }
 0x250   : > { %6284 = vmatmul.msk.f32.gmra.mxu0 %vm478_vm1, %v6770_v17  ;;  %2525 = vmatpush.msrb.mxu3 %v2305_v52  ;;  %v8070_v52 = vpop.f32.mrf.mxu3 }
 0x251   : > { %6343 = vmatmul.msk.f32.gmra.mxu1 %vm478_vm1, %v6770_v17  ;;  %v2304_v17 = vld [vmem:[%s12750_s3 + $0x80] sm:$0xff]  ;;  %13227 = vst [vmem:[#allocation153_spill] sm:$0xff] %v8070_v52 }
 0x252   : > { %2526 = vmatpush.msrb.mxu3 %v2304_v17  ;;  %v8079_v17 = vpop.f32.mrf.mxu2 }
 0x253   : > { %13230 = vst [vmem:[#allocation156_spill] sm:$0xff] %v8079_v17 }
 0x255   : > { %v8061_v3 = vpop.f32.mrf.mxu0 }
 0x256   : > { %13224 = vst [vmem:[#allocation150_spill] sm:$0xff] %v8061_v3  ;;  %v8063_v12 = vpop.f32.mrf.mxu1 }
 0x257   : > { %13225 = vst [vmem:[#allocation151_spill] sm:$0xff] %v8063_v12 }
 0x258   : > { %6285 = vmatmul.msk.f32.gmra.mxu0 %vm478_vm1, %v6771_v62  ;;  %v8081_v12 = vpop.f32.mrf.mxu3 }
 0x259   : > { %6344 = vmatmul.msk.f32.gmra.mxu1 %vm478_vm1, %v6771_v62  ;;  %13231 = vst [vmem:[#allocation157_spill] sm:$0xff] %v8081_v12  ;;  %v6773_v62 = vld [vmem:[%s7051_s19 + $0x78] sm:$0xff] }
 0x25d   : > { %v8072_v47 = vpop.f32.mrf.mxu0 }
 0x25e   : > { %13228 = vst [vmem:[#allocation154_spill] sm:$0xff] %v8072_v47  ;;  %v8074_v10 = vpop.f32.mrf.mxu1 }
 0x25f   : > { %13229 = vst [vmem:[#allocation155_spill] sm:$0xff] %v8074_v10  ;;  %v2050_v10 = vld [vmem:[%s12749_s2] sm:$0x3] }
 0x260   : > { %6286 = vmatmul.msk.f32.gmra.mxu0 %vm478_vm1, %v6772_v28  ;;  %v8093_v47 = vperm.slane %v2050_v10, 0  ;;  %v8097_v12 = vperm.slane %v2050_v10, 1  ;;  %v8099_v52 = vpop.f32.mrf.mxu3 }
 0x261   : > { %6345 = vmatmul.msk.f32.gmra.mxu1 %vm478_vm1, %v6772_v28  ;;  %v8095_v28 = vpop.f32.mrf.mxu2  ;;  %13235 = vst [vmem:[#allocation161_spill] sm:$0xff] %v8099_v52 }
 0x262   : > { %13234 = vst [vmem:[#allocation160_spill] sm:$0xff] %v8095_v28 }
 0x265   : > { %v8083_v3 = vpop.f32.mrf.mxu0 }
 0x266   : > { %13232 = vst [vmem:[#allocation158_spill] sm:$0xff] %v8083_v3  ;;  %v8085_v60 = vpop.f32.mrf.mxu1 }
 0x267   : > { %13233 = vst [vmem:[#allocation159_spill] sm:$0xff] %v8085_v60  ;;  %v13236_v60 = vmax.f32 %v7161_v42, %v7186_v51 }
 0x268   : > { %6287 = vmatmul.msk.f32.gmra.mxu0 %vm478_vm1, %v6773_v62 }
 0x269   : > { %6346 = vmatmul.msk.f32.gmra.mxu1 %vm478_vm1, %v6773_v62  ;;  %v13237_v62 = vmax.f32 %v7164_v44, %v7173_v46  ;;  %v13238_v44 = vmax.f32 %v7177_v48, %v7206_v59 }
 0x26d   : > { %v1453_v17 = vpop.f32.mrf.mxu0 }
 0x26e   : > { %v1934_v3 = vmax.f32 %v13236_v60, %v1453_v17  ;;  %v1644_v5 = vpop.f32.mrf.mxu1  ;;  %v6775_v60 = vld [vmem:[%s7051_s19 + $0x88] sm:$0xff] }
 0x26f   : > { %v1935_v36 = vmax.f32 %v13237_v62, %v1644_v5  ;;  %v8121_v5 = vpop.f32.mrf.mxu2 }
 0x270   : > { %v2056_v54 = vadd.f32 %v8093_v47, %v1934_v3  ;;  %6288 = vmatmul.msk.f32.gmra.mxu0 %vm478_vm1, %v6774_v45 }
 0x271   : > { %v2057_v10 = vadd.f32 %v8097_v12, %v1935_v36  ;;  %6347 = vmatmul.msk.f32.gmra.mxu1 %vm478_vm1, %v6774_v45  ;;  %v13239_v36 = vmax.f32 %v7180_v50, %v7190_v53  ;;  %v13240_v53 = vmax.f32 %v7194_v55, %v7223_v2 }
 0x272   : > { %v8112_v52 = vmax.f32 %v2056_v54, 0.0  ;;  %v8126_v54 = vpop.f32.mrf.mxu3 }
 0x273   : > { %v8114_v28 = vmax.f32 %v2057_v10, 0.0 }
 0x274   : > { %2336 = vmatmul.f32.vlgmr.msrb.gmra.mxu2 %v8112_v52 }
 0x275   : > { %2527 = vmatmul.f32.vlgmr.msrb.gmra.mxu3 %v8114_v28  ;;  %v1456_v42 = vpop.f32.mrf.mxu0 }
 0x276   : > { %v1936_v46 = vmax.f32 %v13238_v44, %v1456_v42  ;;  %v1647_v51 = vpop.f32.mrf.mxu1  ;;  %v13241_v42 = vmax.f32 %v7197_v57, %v7210_v61  ;;  %v13242_v61 = vmax.f32 %v7214_v63, %v7240_v9 }
 0x277   : > { %v1937_v45 = vmax.f32 %v13239_v36, %v1647_v51  ;;  %v6776_v51 = vld [vmem:[%s7051_s19 + $0x90] sm:$0xff]  ;;  %v8148_v36 = vpop.f32.mrf.mxu2 }
 0x278   : > { %v2058_v3 = vadd.f32 %v8093_v47, %v1936_v46  ;;  %6289 = vmatmul.msk.f32.gmra.mxu0 %vm478_vm1, %v6775_v60 }
 0x279   : > { %v2059_v17 = vadd.f32 %v8097_v12, %v1937_v45  ;;  %6348 = vmatmul.msk.f32.gmra.mxu1 %vm478_vm1, %v6775_v60 }
 0x27a   : > { %v8133_v48 = vmax.f32 %v2058_v3, 0.0  ;;  %v8152_v3 = vpop.f32.mrf.mxu3 }
 0x27b   : > { %v8135_v59 = vmax.f32 %v2059_v17, 0.0 }
 0x27c   : > { %2339 = vmatmul.f32.gmra.mxu2 %v8133_v48 }
 0x27d   : > { %2530 = vmatmul.f32.gmra.mxu3 %v8135_v59  ;;  %v1459_v50 = vpop.f32.mrf.mxu0 }
 0x27e   : > { %v1938_v62 = vmax.f32 %v13240_v53, %v1459_v50  ;;  %v1650_v10 = vpop.f32.mrf.mxu1  ;;  %v13243_v50 = vmax.f32 %v7217_v1, %v7227_v4  ;;  %v13244_v4 = vmax.f32 %v7231_v6, %v7257_v16  ;;  %v13246_v16 = vmax.f32 %v7248_v13, %v7274_v23 }
 0x27f   : > { %v1939_v44 = vmax.f32 %v13241_v42, %v1650_v10  ;;  %v6777_v10 = vld [vmem:[%s7051_s19 + $0x98] sm:$0xff] }
 0x280   : > { %v2060_v46 = vadd.f32 %v8093_v47, %v1938_v62  ;;  %6290 = vmatmul.msk.f32.gmra.mxu0 %vm478_vm1, %v6776_v51 }
 0x281   : > { %v2061_v45 = vadd.f32 %v8097_v12, %v1939_v44  ;;  %6349 = vmatmul.msk.f32.gmra.mxu1 %vm478_vm1, %v6776_v51 }
 0x282   : > { %v8154_v55 = vmax.f32 %v2060_v46, 0.0  ;;  %v8173_v46 = vpop.f32.mrf.mxu2  ;;  %v8177_v9 = vpop.f32.mrf.mxu3 }
 0x283   : > { %v8156_v2 = vmax.f32 %v2061_v45, 0.0 }
 0x284   : > { %2342 = vmatmul.f32.gmra.mxu2 %v8154_v55 }
 0x285   : > { %2533 = vmatmul.f32.gmra.mxu3 %v8156_v2  ;;  %v1462_v57 = vpop.f32.mrf.mxu0 }
 0x286   : > { %v1940_v60 = vmax.f32 %v13242_v61, %v1462_v57  ;;  %v1653_v17 = vpop.f32.mrf.mxu1  ;;  %v13245_v57 = vmax.f32 %v7234_v8, %v7244_v11 }
 0x287   : > { %v1941_v53 = vmax.f32 %v13243_v50, %v1653_v17  ;;  %v6778_v17 = vld [vmem:[%s7051_s19 + $0xa0] sm:$0xff] }
 0x288   : > { %v2062_v62 = vadd.f32 %v8093_v47, %v1940_v60  ;;  %6291 = vmatmul.msk.f32.gmra.mxu0 %vm478_vm1, %v6777_v10 }
 0x289   : > { %v2063_v42 = vadd.f32 %v8097_v12, %v1941_v53  ;;  %6350 = vmatmul.msk.f32.gmra.mxu1 %vm478_vm1, %v6777_v10 }
 0x28a   : > { %v8171_v44 = vmax.f32 %v2062_v62, 0.0  ;;  %v8197_v6 = vpop.f32.mrf.mxu2  ;;  %v8200_v11 = vpop.f32.mrf.mxu3 }
 0x28b   : > { %v8175_v63 = vmax.f32 %v2063_v42, 0.0 }
 0x28c   : > { %2345 = vmatmul.f32.gmra.mxu2 %v8171_v44 }
 0x28d   : > { %2536 = vmatmul.f32.gmra.mxu3 %v8175_v63  ;;  %v1465_v1 = vpop.f32.mrf.mxu0 }
 0x28e   : > { %v1942_v51 = vmax.f32 %v13244_v4, %v1465_v1  ;;  %v1656_v45 = vpop.f32.mrf.mxu1  ;;  %v13247_v1 = vmax.f32 %v7251_v15, %v7261_v18  ;;  %v13248_v15 = vmax.f32 %v7265_v20, %v7294_v31 }
 0x28f   : > { %v1943_v61 = vmax.f32 %v13245_v57, %v1656_v45  ;;  %v6779_v45 = vld [vmem:[%s7051_s19 + $0xa8] sm:$0xff] }
 0x290   : > { %v2064_v60 = vadd.f32 %v8093_v47, %v1942_v51  ;;  %6292 = vmatmul.msk.f32.gmra.mxu0 %vm478_vm1, %v6778_v17 }
 0x291   : > { %v2065_v50 = vadd.f32 %v8097_v12, %v1943_v61  ;;  %6351 = vmatmul.msk.f32.gmra.mxu1 %vm478_vm1, %v6778_v17 }
 0x292   : > { %v8192_v53 = vmax.f32 %v2064_v60, 0.0  ;;  %v8222_v17 = vpop.f32.mrf.mxu2 }
 0x293   : > { %v8194_v62 = vmax.f32 %v2065_v50, 0.0  ;;  %v13249_v50 = vmax.f32 %v7268_v22, %v7278_v25  ;;  %v13250_v25 = vmax.f32 %v7282_v27, %v7311_v38  ;;  %v6452_v27 = vld [vmem:[%s12750_s3 + $0x2f8] sm:$0xff] }
 0x294   : > { %2348 = vmatmul.f32.gmra.mxu2 %v8192_v53  ;;  %3335 = vmatpush.msra.mxu3 %v6452_v27 }
 0x295   : > { %2539 = vmatmul.f32.gmra.mxu3 %v8194_v62  ;;  %v1468_v8 = vpop.f32.mrf.mxu0 }
 0x296   : > { %v1944_v10 = vmax.f32 %v13246_v16, %v1468_v8  ;;  %v1659_v42 = vpop.f32.mrf.mxu1  ;;  %v8227_v16 = vpop.f32.mrf.mxu3 }
 0x297   : > { %v1945_v4 = vmax.f32 %v13247_v1, %v1659_v42  ;;  %v6780_v42 = vld [vmem:[%s7051_s19 + $0xb0] sm:$0xff] }
 0x298   : > { %v2066_v51 = vadd.f32 %v8093_v47, %v1944_v10  ;;  %6293 = vmatmul.msk.f32.gmra.mxu0 %vm478_vm1, %v6779_v45 }
 0x299   : > { %v2067_v57 = vadd.f32 %v8097_v12, %v1945_v4  ;;  %6352 = vmatmul.msk.f32.gmra.mxu1 %vm478_vm1, %v6779_v45  ;;  %v13251_v45 = vmax.f32 %v7285_v29, %v7298_v33 }
 0x29a   : > { %v8213_v61 = vmax.f32 %v2066_v51, 0.0 }
 0x29b   : > { %v8215_v60 = vmax.f32 %v2067_v57, 0.0 }
 0x29c   : > { %2351 = vmatmul.f32.gmra.mxu2 %v8213_v61 }
 0x29d   : > { %2542 = vmatmul.f32.gmra.mxu3 %v8215_v60  ;;  %v1471_v13 = vpop.f32.mrf.mxu0 }
 0x29e   : > { %v1946_v18 = vmax.f32 %v13248_v15, %v1471_v13  ;;  %v1662_v23 = vpop.f32.mrf.mxu1  ;;  %v6781_v15 = vld [vmem:[%s7051_s19 + $0xb8] sm:$0xff]  ;;  %v8256_v38 = vpop.f32.mrf.mxu3 }
 0x29f   : > { %v1947_v8 = vmax.f32 %v13249_v50, %v1662_v23 }
 0x2a0   : > { %v2068_v10 = vadd.f32 %v8093_v47, %v1946_v18  ;;  %6294 = vmatmul.msk.f32.gmra.mxu0 %vm478_vm1, %v6780_v42  ;;  %v8249_v18 = vpop.f32.mrf.mxu2 }
 0x2a1   : > { %v2069_v1 = vadd.f32 %v8097_v12, %v1947_v8  ;;  %6353 = vmatmul.msk.f32.gmra.mxu1 %vm478_vm1, %v6780_v42  ;;  %v13252_v8 = vmax.f32 %v7302_v35, %v7331_v58 }
 0x2a2   : > { %v8234_v20 = vmax.f32 %v2068_v10, 0.0 }
 0x2a3   : > { %v8236_v31 = vmax.f32 %v2069_v1, 0.0  ;;  %v13253_v1 = vmax.f32 %v7305_v37, %v7315_v40  ;;  %v13254_v40 = vmax.f32 %v7319_v43, %v7351_v56  ;;  %v6436_v43 = vld [vmem:[%s12750_s3 + $0x278] sm:$0xff] }
 0x2a4   : > { %2354 = vmatmul.f32.gmra.mxu2 %v8234_v20 }
 0x2a5   : > { %2545 = vmatmul.f32.gmra.mxu3 %v8236_v31  ;;  %v1474_v22 = vpop.f32.mrf.mxu0  ;;  %3146 = vmatpush.msra.mxu2 %v6436_v43 }
 0x2a6   : > { %v1948_v4 = vmax.f32 %v13250_v25, %v1474_v22  ;;  %v1665_v51 = vpop.f32.mrf.mxu1  ;;  %v8281_v58 = vpop.f32.mrf.mxu3 }
 0x2a7   : > { %v1949_v57 = vmax.f32 %v13251_v45, %v1665_v51 }
 0x2a8   : > { %v2070_v13 = vadd.f32 %v8093_v47, %v1948_v4  ;;  %6295 = vmatmul.msk.f32.gmra.mxu0 %vm478_vm1, %v6781_v15  ;;  %v6782_v4 = vld [vmem:[%s7051_s19 + $0xc0] sm:$0xff] }
 0x2a9   : > { %v2071_v23 = vadd.f32 %v8097_v12, %v1949_v57  ;;  %6354 = vmatmul.msk.f32.gmra.mxu1 %vm478_vm1, %v6781_v15  ;;  %v8277_v57 = vpop.f32.mrf.mxu2 }
 0x2aa   : > { %v8258_v29 = vmax.f32 %v2070_v13, 0.0 }
 0x2ab   : > { %v8260_v33 = vmax.f32 %v2071_v23, 0.0  ;;  %v13255_v23 = vmax.f32 %v7322_v49, %v7335_v7 }
 0x2ac   : > { %2357 = vmatmul.f32.gmra.mxu2 %v8258_v29 }
 0x2ad   : > { %2548 = vmatmul.f32.gmra.mxu3 %v8260_v33  ;;  %v1477_v50 = vpop.f32.mrf.mxu0 }
 0x2ae   : > { %v1950_v10 = vmax.f32 %v13252_v8, %v1477_v50  ;;  %v1668_v42 = vpop.f32.mrf.mxu1  ;;  %v6783_v8 = vld [vmem:[%s7051_s19 + $0xc8] sm:$0xff] }
 0x2af   : > { %v1951_v22 = vmax.f32 %v13253_v1, %v1668_v42  ;;  %v8307_v1 = vpop.f32.mrf.mxu3 }
 0x2b0   : > { %v2072_v25 = vadd.f32 %v8093_v47, %v1950_v10  ;;  %6296 = vmatmul.msk.f32.gmra.mxu0 %vm478_vm1, %v6782_v4 }
 0x2b1   : > { %v2073_v51 = vadd.f32 %v8097_v12, %v1951_v22  ;;  %6355 = vmatmul.msk.f32.gmra.mxu1 %vm478_vm1, %v6782_v4  ;;  %v8304_v49 = vpop.f32.mrf.mxu2  ;;  %v13256_v22 = vmax.f32 %v7339_v21, %v7371_v14  ;;  %v6451_v14 = vld [vmem:[%s12750_s3 + $0x2f0] sm:$0xff]  ;;  %v13258_v21 = vmax.f32 %v7359_v34, %v7394_v0  ;;  %v6420_v34 = vld [vmem:[%s12750_s3 + $0x1f8] sm:$0xff] }
 0x2b2   : > { %v8275_v45 = vmax.f32 %v2072_v25, 0.0  ;;  %3336 = vmatpush.msra.mxu3 %v6451_v14  ;;  %2924 = vmatpush.msra.mxu1 %v6420_v34 }
 0x2b3   : > { %v8279_v35 = vmax.f32 %v2073_v51, 0.0  ;;  %v13257_v51 = vmax.f32 %v7342_v30, %v7355_v41 }
 0x2b4   : > { %2360 = vmatmul.f32.gmra.mxu2 %v8275_v45 }
 0x2b5   : > { %2551 = vmatmul.f32.gmra.mxu3 %v8279_v35  ;;  %v1480_v37 = vpop.f32.mrf.mxu0 }
 0x2b6   : > { %v1952_v13 = vmax.f32 %v13254_v40, %v1480_v37  ;;  %v1671_v15 = vpop.f32.mrf.mxu1 }
 0x2b7   : > { %v1953_v27 = vmax.f32 %v13255_v23, %v1671_v15 }
 0x2b8   : > { %v2074_v50 = vadd.f32 %v8093_v47, %v1952_v13  ;;  %6297 = vmatmul.msk.f32.gmra.mxu0 %vm478_vm1, %v6783_v8  ;;  %v6784_v13 = vld [vmem:[%s7051_s19 + $0xd0] sm:$0xff] }
 0x2b9   : > { %v2075_v10 = vadd.f32 %v8097_v12, %v1953_v27  ;;  %6356 = vmatmul.msk.f32.gmra.mxu1 %vm478_vm1, %v6783_v8  ;;  %v8332_v8 = vpop.f32.mrf.mxu2 }
 0x2ba   : > { %v8299_v56 = vmax.f32 %v2074_v50, 0.0 }
 0x2bb   : > { %v8301_v42 = vmax.f32 %v2075_v10, 0.0  ;;  %v13259_v10 = vmax.f32 %v7365_v39, %v7375_v26 }
 0x2bc   : > { %2363 = vmatmul.f32.gmra.mxu2 %v8299_v56 }
 0x2bd   : > { %2554 = vmatmul.f32.gmra.mxu3 %v8301_v42  ;;  %v1483_v7 = vpop.f32.mrf.mxu0 }
 0x2be   : > { %v1954_v25 = vmax.f32 %v13256_v22, %v1483_v7  ;;  %v1674_v4 = vpop.f32.mrf.mxu1  ;;  %v8337_v7 = vpop.f32.mrf.mxu3 }
 0x2bf   : > { %v1955_v37 = vmax.f32 %v13257_v51, %v1674_v4  ;;  %v13260_v51 = vmax.f32 %v7379_v19, %v7411_v32  ;;  %v6435_v19 = vld [vmem:[%s12750_s3 + $0x270] sm:$0xff] }
 0x2c0   : > { %v2076_v40 = vadd.f32 %v8093_v47, %v1954_v25  ;;  %6298 = vmatmul.msk.f32.gmra.mxu0 %vm478_vm1, %v6784_v13  ;;  %v6785_v25 = vld [vmem:[%s7051_s19 + $0xd8] sm:$0xff]  ;;  %3147 = vmatpush.msra.mxu2 %v6435_v19 }
 0x2c1   : > { %v2077_v15 = vadd.f32 %v8097_v12, %v1955_v37  ;;  %6357 = vmatmul.msk.f32.gmra.mxu1 %vm478_vm1, %v6784_v13  ;;  %v13261_v13 = vld [vmem:[#allocation7_spill] sm:$0xff] }
 0x2c2   : > { %v8320_v23 = vmax.f32 %v2076_v40, 0.0 }
 0x2c3   : > { %v8322_v27 = vmax.f32 %v2077_v15, 0.0  ;;  %v13262_v15 = vmax.f32 %v7385_v24, %v13261_v13 }
 0x2c4   : > { %2366 = vmatmul.f32.gmra.mxu2 %v8320_v23 }
 0x2c5   : > { %2557 = vmatmul.f32.gmra.mxu3 %v8322_v27  ;;  %v1486_v41 = vpop.f32.mrf.mxu0 }
 0x2c6   : > { %v1956_v30 = vmax.f32 %v13258_v21, %v1486_v41  ;;  %v1677_v50 = vpop.f32.mrf.mxu1  ;;  %v6786_v21 = vld [vmem:[%s7051_s19 + $0xe0] sm:$0xff]  ;;  %v8369_v32 = vpop.f32.mrf.mxu3 }
 0x2c7   : > { %v1957_v43 = vmax.f32 %v13259_v10, %v1677_v50 }
 0x2c8   : > { %v2078_v22 = vadd.f32 %v8093_v47, %v1956_v30  ;;  %6299 = vmatmul.msk.f32.gmra.mxu0 %vm478_vm1, %v6785_v25  ;;  %v8362_v30 = vpop.f32.mrf.mxu2 }
 0x2c9   : > { %v2079_v4 = vadd.f32 %v8097_v12, %v1957_v43  ;;  %6358 = vmatmul.msk.f32.gmra.mxu1 %vm478_vm1, %v6785_v25  ;;  %v13265_v25 = vld [vmem:[#allocation13_spill] sm:$0xff] }
 0x2ca   : > { %v8347_v0 = vmax.f32 %v2078_v22, 0.0  ;;  %v13264_v22 = vld [vmem:[#allocation8_spill] sm:$0xff] }
 0x2cb   : > { %v8349_v26 = vmax.f32 %v2079_v4, 0.0  ;;  %v13266_v4 = vmax.f32 %v13264_v22, %v13265_v25 }
 0x2cc   : > { %2369 = vmatmul.f32.gmra.mxu2 %v8347_v0 }
 0x2cd   : > { %2560 = vmatmul.f32.gmra.mxu3 %v8349_v26  ;;  %v1489_v39 = vpop.f32.mrf.mxu0 }
 0x2ce   : > { %v1958_v37 = vmax.f32 %v13260_v51, %v1489_v39  ;;  %v1680_v40 = vpop.f32.mrf.mxu1  ;;  %v13267_v51 = vld [vmem:[#allocation9_spill] sm:$0xff]  ;;  %v8397_v22 = vpop.f32.mrf.mxu3 }
 0x2cf   : > { %v1959_v41 = vmax.f32 %v13262_v15, %v1680_v40 }
 0x2d0   : > { %v2080_v14 = vadd.f32 %v8093_v47, %v1958_v37  ;;  %6300 = vmatmul.msk.f32.gmra.mxu0 %vm478_vm1, %v6786_v21  ;;  %v13268_v37 = vld [vmem:[#allocation10_spill] sm:$0xff]  ;;  %v8393_v19 = vpop.f32.mrf.mxu2 }
 0x2d1   : > { %v2081_v50 = vadd.f32 %v8097_v12, %v1959_v41  ;;  %6359 = vmatmul.msk.f32.gmra.mxu1 %vm478_vm1, %v6786_v21  ;;  %v13269_v40 = vmax.f32 %v13267_v51, %v13268_v37  ;;  %v6787_v41 = vld [vmem:[%s7051_s19 + $0xe8] sm:$0xff]  ;;  %v6404_v21 = vld [vmem:[%s12750_s3 + $0x178] sm:$0xff]  ;;  %13271 = vst [vmem:[#allocation13_spill] sm:$0xff] %v8393_v19 }
 0x2d2   : > { %v8371_v24 = vmax.f32 %v2080_v14, 0.0  ;;  %2735 = vmatpush.msra.mxu0 %v6404_v21  ;;  %13273 = vst [vmem:[#allocation10_spill] sm:$0xff] %v8397_v22  ;;  %v6789_v19 = vld [vmem:[%s7051_s19 + $0xf8] sm:$0xff] }
 0x2d3   : > { %v8373_v10 = vmax.f32 %v2081_v50, 0.0 }
 0x2d4   : > { %2372 = vmatmul.f32.gmra.mxu2 %v8371_v24 }
 0x2d5   : > { %13263 = vst [vmem:[#allocation7_spill] sm:$0xff] %v8373_v10  ;;  %2563 = vmatmul.f32.gmra.mxu3 %v8373_v10  ;;  %v1492_v43 = vpop.f32.mrf.mxu0 }
 0x2d6   : > { %v1960_v34 = vmax.f32 %v13266_v4, %v1492_v43  ;;  %v1683_v39 = vpop.f32.mrf.mxu1  ;;  %v13274_v4 = vld [vmem:[#allocation11_spill] sm:$0xff] }
 0x2d7   : > { %v1961_v13 = vmax.f32 %v13269_v40, %v1683_v39  ;;  %v13277_v40 = vld [vmem:[#allocation12_spill] sm:$0xff] }
 0x2d8   : > { %v2082_v15 = vadd.f32 %v8093_v47, %v1960_v34  ;;  %6301 = vmatmul.msk.f32.gmra.mxu0 %vm478_vm1, %v6787_v41  ;;  %v13275_v34 = vld [vmem:[#allocation17_spill] sm:$0xff] }
 0x2d9   : > { %v2083_v14 = vadd.f32 %v8097_v12, %v1961_v13  ;;  %6360 = vmatmul.msk.f32.gmra.mxu1 %vm478_vm1, %v6787_v41  ;;  %v13276_v39 = vmax.f32 %v13274_v4, %v13275_v34  ;;  %v13278_v13 = vld [vmem:[#allocation14_spill] sm:$0xff]  ;;  %v6450_v4 = vld [vmem:[%s12750_s3 + $0x2e8] sm:$0xff] }
 0x2da   : > { %v8391_v50 = vmax.f32 %v2082_v15, 0.0  ;;  %v13279_v15 = vmax.f32 %v13277_v40, %v13278_v13  ;;  %3337 = vmatpush.msra.mxu3 %v6450_v4  ;;  %v13284_v40 = vld [vmem:[#allocation15_spill] sm:$0xff]  ;;  %v13285_v13 = vld [vmem:[#allocation21_spill] sm:$0xff] }
 0x2db   : > { %v8395_v43 = vmax.f32 %v2083_v14, 0.0  ;;  %v6788_v14 = vld [vmem:[%s7051_s19 + $0xf0] sm:$0xff] }
 0x2dc   : > { %13270 = vst [vmem:[#allocation8_spill] sm:$0xff] %v8391_v50  ;;  %2375 = vmatmul.f32.gmra.mxu2 %v8391_v50 }
 0x2dd   : > { %13272 = vst [vmem:[#allocation9_spill] sm:$0xff] %v8395_v43  ;;  %2566 = vmatmul.f32.gmra.mxu3 %v8395_v43  ;;  %v1495_v25 = vpop.f32.mrf.mxu0  ;;  %v13287_v43 = vld [vmem:[#allocation16_spill] sm:$0xff] }
 0x2de   : > { %v1962_v51 = vmax.f32 %v13276_v39, %v1495_v25  ;;  %v1686_v37 = vpop.f32.mrf.mxu1  ;;  %v8420_v39 = vpop.f32.mrf.mxu2 }
 0x2df   : > { %v1963_v41 = vmax.f32 %v13279_v15, %v1686_v37  ;;  %13282 = vst [vmem:[#allocation12_spill] sm:$0xff] %v8420_v39  ;;  %v8423_v37 = vpop.f32.mrf.mxu3  ;;  %v13286_v15 = vmax.f32 %v13284_v40, %v13285_v13  ;;  %v6419_v40 = vld [vmem:[%s12750_s3 + $0x1f0] sm:$0xff] }
 0x2e0   : > { %v2084_v21 = vadd.f32 %v8093_v47, %v1962_v51  ;;  %6302 = vmatmul.msk.f32.gmra.mxu0 %vm478_vm1, %v6788_v14  ;;  %13283 = vst [vmem:[#allocation14_spill] sm:$0xff] %v8423_v37  ;;  %2925 = vmatpush.msra.mxu1 %v6419_v40  ;;  %v6790_v40 = vld [vmem:[%s7051_s19 + $0x100] sm:$0xff] }
 0x2e1   : > { %v2085_v50 = vadd.f32 %v8097_v12, %v1963_v41  ;;  %6361 = vmatmul.msk.f32.gmra.mxu1 %vm478_vm1, %v6788_v14 }
 0x2e2   : > { %v8415_v25 = vmax.f32 %v2084_v21, 0.0  ;;  %v13288_v21 = vld [vmem:[#allocation18_spill] sm:$0xff] }
 0x2e3   : > { %v8417_v34 = vmax.f32 %v2085_v50, 0.0  ;;  %v13289_v22 = vmax.f32 %v13287_v43, %v13288_v21 }
 0x2e4   : > { %13280 = vst [vmem:[#allocation11_spill] sm:$0xff] %v8415_v25  ;;  %2378 = vmatmul.f32.gmra.mxu2 %v8415_v25  ;;  %v13297_v25 = vld [vmem:[#allocation22_spill] sm:$0xff] }
 0x2e5   : > { %13281 = vst [vmem:[#allocation17_spill] sm:$0xff] %v8417_v34  ;;  %2569 = vmatmul.f32.gmra.mxu3 %v8417_v34  ;;  %v1498_v51 = vpop.f32.mrf.mxu0 }
 0x2e6   : > { %v1964_v41 = vmax.f32 %v13286_v15, %v1498_v51  ;;  %v1689_v14 = vpop.f32.mrf.mxu1  ;;  %v13293_v15 = vld [vmem:[#allocation25_spill] sm:$0xff] }
 0x2e7   : > { %v1965_v4 = vmax.f32 %v13289_v22, %v1689_v14  ;;  %v13292_v22 = vld [vmem:[#allocation19_spill] sm:$0xff]  ;;  %v8453_v39 = vpop.f32.mrf.mxu3 }
 0x2e8   : > { %v2086_v50 = vadd.f32 %v8093_v47, %v1964_v41  ;;  %6303 = vmatmul.msk.f32.gmra.mxu0 %vm478_vm1, %v6789_v19  ;;  %v13294_v41 = vmax.f32 %v13292_v22, %v13293_v15  ;;  %13299 = vst [vmem:[#allocation18_spill] sm:$0xff] %v8453_v39  ;;  %v13302_v15 = vld [vmem:[#allocation23_spill] sm:$0xff] }
 0x2e9   : > { %v2087_v34 = vadd.f32 %v8097_v12, %v1965_v4  ;;  %6362 = vmatmul.msk.f32.gmra.mxu1 %vm478_vm1, %v6789_v19  ;;  %v8448_v19 = vpop.f32.mrf.mxu2  ;;  %v13296_v4 = vld [vmem:[#allocation20_spill] sm:$0xff] }
 0x2ea   : > { %v8439_v51 = vmax.f32 %v2086_v50, 0.0  ;;  %13295 = vst [vmem:[#allocation16_spill] sm:$0xff] %v8448_v19  ;;  %v13298_v37 = vmax.f32 %v13296_v4, %v13297_v25 }
 0x2eb   : > { %v8441_v13 = vmax.f32 %v2087_v34, 0.0 }
 0x2ec   : > { %13290 = vst [vmem:[#allocation15_spill] sm:$0xff] %v8439_v51  ;;  %2381 = vmatmul.f32.gmra.mxu2 %v8439_v51 }
 0x2ed   : > { %13291 = vst [vmem:[#allocation21_spill] sm:$0xff] %v8441_v13  ;;  %2572 = vmatmul.f32.gmra.mxu3 %v8441_v13  ;;  %v1501_v43 = vpop.f32.mrf.mxu0 }
 0x2ee   : > { %v1966_v14 = vmax.f32 %v13294_v41, %v1501_v43  ;;  %v1692_v21 = vpop.f32.mrf.mxu1  ;;  %v6434_v43 = vld [vmem:[%s12750_s3 + $0x268] sm:$0xff]  ;;  %v13303_v41 = vld [vmem:[#allocation29_spill] sm:$0xff] }
 0x2ef   : > { %v1967_v50 = vmax.f32 %v13298_v37, %v1692_v21  ;;  %3148 = vmatpush.msra.mxu2 %v6434_v43 }
 0x2f0   : > { %v2088_v34 = vadd.f32 %v8093_v47, %v1966_v14  ;;  %6304 = vmatmul.msk.f32.gmra.mxu0 %vm478_vm1, %v6790_v40  ;;  %v13304_v14 = vmax.f32 %v13302_v15, %v13303_v41 }
 0x2f1   : > { %v2089_v13 = vadd.f32 %v8097_v12, %v1967_v50  ;;  %6363 = vmatmul.msk.f32.gmra.mxu1 %vm478_vm1, %v6790_v40  ;;  %v13305_v50 = vld [vmem:[#allocation24_spill] sm:$0xff]  ;;  %v13306_v40 = vld [vmem:[#allocation26_spill] sm:$0xff] }
 0x2f2   : > { %v8463_v22 = vmax.f32 %v2088_v34, 0.0  ;;  %v13307_v51 = vmax.f32 %v13305_v50, %v13306_v40  ;;  %v13314_v50 = vld [vmem:[#allocation28_spill] sm:$0xff]  ;;  %v13315_v40 = vld [vmem:[#allocation30_spill] sm:$0xff] }
 0x2f3   : > { %v8465_v25 = vmax.f32 %v2089_v13, 0.0  ;;  %v6791_v13 = vld [vmem:[%s7051_s19 + $0x108] sm:$0xff] }
 0x2f4   : > { %13300 = vst [vmem:[#allocation19_spill] sm:$0xff] %v8463_v22  ;;  %2384 = vmatmul.f32.gmra.mxu2 %v8463_v22 }
 0x2f5   : > { %13301 = vst [vmem:[#allocation25_spill] sm:$0xff] %v8465_v25  ;;  %2575 = vmatmul.f32.gmra.mxu3 %v8465_v25  ;;  %v1504_v37 = vpop.f32.mrf.mxu0 }
 0x2f6   : > { %v1968_v21 = vmax.f32 %v13304_v14, %v1504_v37  ;;  %v1695_v4 = vpop.f32.mrf.mxu1  ;;  %v6403_v37 = vld [vmem:[%s12750_s3 + $0x170] sm:$0xff] }
 0x2f7   : > { %v1969_v39 = vmax.f32 %v13307_v51, %v1695_v4  ;;  %v2337_v19 = vpop.f32.mrf.mxu2  ;;  %2736 = vmatpush.msra.mxu0 %v6403_v37  ;;  %v13312_v14 = vld [vmem:[#allocation33_spill] sm:$0xff] }
 0x2f8   : > { %v2090_v34 = vadd.f32 %v8093_v47, %v1968_v21  ;;  %v2528_v43 = vpop.f32.mrf.mxu3  ;;  %6305 = vmatmul.msk.f32.gmra.mxu0 %vm478_vm1, %v6791_v13 }
 0x2f9   : > { %v2091_v22 = vadd.f32 %v8097_v12, %v1969_v39  ;;  %v8479_v25 = vadd.f32 %v2528_v43, %v2337_v19  ;;  %6364 = vmatmul.msk.f32.gmra.mxu1 %vm478_vm1, %v6791_v13  ;;  %v13311_v39 = vld [vmem:[#allocation27_spill] sm:$0xff]  ;;  %v13316_v43 = vmax.f32 %v13314_v50, %v13315_v40 }
 0x2fa   : > { %v8485_v15 = vmax.f32 %v2090_v34, 0.0  ;;  %v13313_v19 = vmax.f32 %v13311_v39, %v13312_v14  ;;  %v6418_v39 = vld [vmem:[%s12750_s3 + $0x1e8] sm:$0xff] }
 0x2fb   : > { %13308 = vst [vmem:[#allocation20_spill] sm:$0xff] %v8479_v25  ;;  %v8487_v51 = vmax.f32 %v2091_v22, 0.0  ;;  %v6792_v22 = vld [vmem:[%s7051_s19 + $0x110] sm:$0xff]  ;;  %2926 = vmatpush.msra.mxu1 %v6418_v39 }
 0x2fc   : > { %13309 = vst [vmem:[#allocation22_spill] sm:$0xff] %v8485_v15  ;;  %2387 = vmatmul.f32.gmra.mxu2 %v8485_v15 }
 0x2fd   : > { %13310 = vst [vmem:[#allocation23_spill] sm:$0xff] %v8487_v51  ;;  %2578 = vmatmul.f32.gmra.mxu3 %v8487_v51  ;;  %v1507_v41 = vpop.f32.mrf.mxu0 }
 0x2fe   : > { %v1970_v21 = vmax.f32 %v13313_v19, %v1507_v41  ;;  %v1698_v4 = vpop.f32.mrf.mxu1  ;;  %v6449_v41 = vld [vmem:[%s12750_s3 + $0x2e0] sm:$0xff] }
 0x2ff   : > { %v1971_v13 = vmax.f32 %v13316_v43, %v1698_v4  ;;  %v2340_v25 = vpop.f32.mrf.mxu2  ;;  %3338 = vmatpush.msra.mxu3 %v6449_v41  ;;  %v13321_v4 = vld [vmem:[#allocation37_spill] sm:$0xff] }
 0x300   : > { %v2092_v34 = vadd.f32 %v8093_v47, %v1970_v21  ;;  %v2531_v37 = vpop.f32.mrf.mxu3  ;;  %6306 = vmatmul.msk.f32.gmra.mxu0 %vm478_vm1, %v6792_v22  ;;  %v13320_v21 = vld [vmem:[#allocation31_spill] sm:$0xff] }
 0x301   : > { %v2093_v15 = vadd.f32 %v8097_v12, %v1971_v13  ;;  %v8501_v51 = vadd.f32 %v2531_v37, %v2340_v25  ;;  %6365 = vmatmul.msk.f32.gmra.mxu1 %vm478_vm1, %v6792_v22  ;;  %v13322_v50 = vmax.f32 %v13320_v21, %v13321_v4  ;;  %v13323_v13 = vld [vmem:[#allocation32_spill] sm:$0xff]  ;;  %v13324_v37 = vld [vmem:[#allocation34_spill] sm:$0xff] }
 0x302   : > { %v8510_v14 = vmax.f32 %v2092_v34, 0.0  ;;  %v13325_v22 = vmax.f32 %v13323_v13, %v13324_v37 }
 0x303   : > { %13317 = vst [vmem:[#allocation29_spill] sm:$0xff] %v8501_v51  ;;  %v8512_v19 = vmax.f32 %v2093_v15, 0.0  ;;  %v6793_v15 = vld [vmem:[%s7051_s19 + $0x118] sm:$0xff] }
 0x304   : > { %13318 = vst [vmem:[#allocation24_spill] sm:$0xff] %v8510_v14  ;;  %2390 = vmatmul.f32.gmra.mxu2 %v8510_v14 }
 0x305   : > { %13319 = vst [vmem:[#allocation26_spill] sm:$0xff] %v8512_v19  ;;  %2581 = vmatmul.f32.gmra.mxu3 %v8512_v19  ;;  %v1510_v25 = vpop.f32.mrf.mxu0 }
 0x306   : > { %v1972_v40 = vmax.f32 %v13322_v50, %v1510_v25  ;;  %v1701_v43 = vpop.f32.mrf.mxu1  ;;  %v6433_v50 = vld [vmem:[%s12750_s3 + $0x260] sm:$0xff] }
 0x307   : > { %v1973_v51 = vmax.f32 %v13325_v22, %v1701_v43  ;;  %v2343_v34 = vpop.f32.mrf.mxu2  ;;  %3149 = vmatpush.msra.mxu2 %v6433_v50  ;;  %v13332_v22 = vld [vmem:[#allocation36_spill] sm:$0xff] }
 0x308   : > { %v2094_v41 = vadd.f32 %v8093_v47, %v1972_v40  ;;  %v2534_v39 = vpop.f32.mrf.mxu3  ;;  %6307 = vmatmul.msk.f32.gmra.mxu0 %vm478_vm1, %v6793_v15  ;;  %v13329_v40 = vld [vmem:[#allocation35_spill] sm:$0xff] }
 0x309   : > { %v2095_v14 = vadd.f32 %v8097_v12, %v1973_v51  ;;  %v8526_v19 = vadd.f32 %v2534_v39, %v2343_v34  ;;  %6366 = vmatmul.msk.f32.gmra.mxu1 %vm478_vm1, %v6793_v15  ;;  %v13330_v51 = vld [vmem:[#allocation41_spill] sm:$0xff]  ;;  %v13333_v34 = vld [vmem:[#allocation38_spill] sm:$0xff] }
 0x30a   : > { %v8529_v25 = vmax.f32 %v2094_v41, 0.0  ;;  %v13331_v43 = vmax.f32 %v13329_v40, %v13330_v51  ;;  %v13334_v41 = vmax.f32 %v13332_v22, %v13333_v34  ;;  %v13341_v34 = vld [vmem:[#allocation42_spill] sm:$0xff] }
 0x30b   : > { %13326 = vst [vmem:[#allocation27_spill] sm:$0xff] %v8526_v19  ;;  %v8531_v21 = vmax.f32 %v2095_v14, 0.0 }
 0x30c   : > { %13327 = vst [vmem:[#allocation33_spill] sm:$0xff] %v8529_v25  ;;  %2393 = vmatmul.f32.gmra.mxu2 %v8529_v25 }
 0x30d   : > { %13328 = vst [vmem:[#allocation28_spill] sm:$0xff] %v8531_v21  ;;  %2584 = vmatmul.f32.gmra.mxu3 %v8531_v21  ;;  %v1513_v4 = vpop.f32.mrf.mxu0  ;;  %v6794_v21 = vld [vmem:[%s7051_s19 + $0x120] sm:$0xff] }
 0x30e   : > { %v1974_v13 = vmax.f32 %v13331_v43, %v1513_v4  ;;  %v1704_v37 = vpop.f32.mrf.mxu1  ;;  %v6402_v4 = vld [vmem:[%s12750_s3 + $0x168] sm:$0xff] }
 0x30f   : > { %v1975_v14 = vmax.f32 %v13334_v41, %v1704_v37  ;;  %v2346_v39 = vpop.f32.mrf.mxu2  ;;  %2737 = vmatpush.msra.mxu0 %v6402_v4  ;;  %v13337_v43 = vld [vmem:[#allocation39_spill] sm:$0xff] }
 0x310   : > { %v2096_v15 = vadd.f32 %v8093_v47, %v1974_v13  ;;  %v2537_v19 = vpop.f32.mrf.mxu3  ;;  %6308 = vmatmul.msk.f32.gmra.mxu0 %vm478_vm1, %v6794_v21  ;;  %v13338_v13 = vld [vmem:[#allocation45_spill] sm:$0xff] }
 0x311   : > { %v2097_v25 = vadd.f32 %v8097_v12, %v1975_v14  ;;  %v8548_v10 = vadd.f32 %v2537_v19, %v2346_v39  ;;  %6367 = vmatmul.msk.f32.gmra.mxu1 %vm478_vm1, %v6794_v21  ;;  %v13339_v19 = vmax.f32 %v13337_v43, %v13338_v13  ;;  %v13340_v21 = vld [vmem:[#allocation40_spill] sm:$0xff] }
 0x312   : > { %v8554_v50 = vmax.f32 %v2096_v15, 0.0  ;;  %v13342_v41 = vmax.f32 %v13340_v21, %v13341_v34 }
 0x313   : > { %13335 = vst [vmem:[#allocation30_spill] sm:$0xff] %v8548_v10  ;;  %v8556_v40 = vmax.f32 %v2097_v25, 0.0  ;;  %v6795_v25 = vld [vmem:[%s7051_s19 + $0x128] sm:$0xff] }
 0x314   : > { %2396 = vmatmul.f32.gmra.mxu2 %v8554_v50 }
 0x315   : > { %13336 = vst [vmem:[#allocation31_spill] sm:$0xff] %v8556_v40  ;;  %2587 = vmatmul.f32.gmra.mxu3 %v8556_v40  ;;  %v1516_v51 = vpop.f32.mrf.mxu0 }
 0x316   : > { %v1976_v37 = vmax.f32 %v13339_v19, %v1516_v51  ;;  %v1707_v22 = vpop.f32.mrf.mxu1  ;;  %v6448_v51 = vld [vmem:[%s12750_s3 + $0x2d8] sm:$0xff] }
 0x317   : > { %v1977_v14 = vmax.f32 %v13342_v41, %v1707_v22  ;;  %v2349_v39 = vpop.f32.mrf.mxu2  ;;  %3339 = vmatpush.msra.mxu3 %v6448_v51  ;;  %v13347_v22 = vld [vmem:[#allocation49_spill] sm:$0xff] }
 0x318   : > { %v2098_v15 = vadd.f32 %v8093_v47, %v1976_v37  ;;  %v2540_v4 = vpop.f32.mrf.mxu3  ;;  %6309 = vmatmul.msk.f32.gmra.mxu0 %vm478_vm1, %v6795_v25  ;;  %v13346_v37 = vld [vmem:[#allocation43_spill] sm:$0xff] }
 0x319   : > { %v2099_v10 = vadd.f32 %v8097_v12, %v1977_v14  ;;  %v8570_v40 = vadd.f32 %v2540_v4, %v2349_v39  ;;  %6368 = vmatmul.msk.f32.gmra.mxu1 %vm478_vm1, %v6795_v25  ;;  %v13348_v21 = vmax.f32 %v13346_v37, %v13347_v22  ;;  %v13349_v14 = vld [vmem:[#allocation44_spill] sm:$0xff]  ;;  %v13350_v39 = vld [vmem:[#allocation46_spill] sm:$0xff] }
 0x31a   : > { %v8576_v43 = vmax.f32 %v2098_v15, 0.0  ;;  %v13351_v4 = vmax.f32 %v13349_v14, %v13350_v39 }
 0x31b   : > { %13343 = vst [vmem:[#allocation37_spill] sm:$0xff] %v8570_v40  ;;  %v8578_v13 = vmax.f32 %v2099_v10, 0.0  ;;  %v6796_v10 = vld [vmem:[%s7051_s19 + $0x130] sm:$0xff] }
 0x31c   : > { %13344 = vst [vmem:[#allocation32_spill] sm:$0xff] %v8576_v43  ;;  %2399 = vmatmul.f32.gmra.mxu2 %v8576_v43 }
 0x31d   : > { %13345 = vst [vmem:[#allocation34_spill] sm:$0xff] %v8578_v13  ;;  %2590 = vmatmul.f32.gmra.mxu3 %v8578_v13  ;;  %v1519_v19 = vpop.f32.mrf.mxu0 }
 0x31e   : > { %v1978_v34 = vmax.f32 %v13348_v21, %v1519_v19  ;;  %v1710_v41 = vpop.f32.mrf.mxu1  ;;  %v6417_v19 = vld [vmem:[%s12750_s3 + $0x1e0] sm:$0xff] }
 0x31f   : > { %v1979_v25 = vmax.f32 %v13351_v4, %v1710_v41  ;;  %v2352_v40 = vpop.f32.mrf.mxu2  ;;  %2927 = vmatpush.msra.mxu1 %v6417_v19  ;;  %v13356_v41 = vld [vmem:[#allocation53_spill] sm:$0xff]  ;;  %v13358_v4 = vld [vmem:[#allocation48_spill] sm:$0xff] }
 0x320   : > { %v2100_v15 = vadd.f32 %v8093_v47, %v1978_v34  ;;  %v2543_v51 = vpop.f32.mrf.mxu3  ;;  %6310 = vmatmul.msk.f32.gmra.mxu0 %vm478_vm1, %v6796_v10  ;;  %v13355_v34 = vld [vmem:[#allocation47_spill] sm:$0xff] }
 0x321   : > { %v2101_v43 = vadd.f32 %v8097_v12, %v1979_v25  ;;  %v8592_v13 = vadd.f32 %v2543_v51, %v2352_v40  ;;  %6369 = vmatmul.msk.f32.gmra.mxu1 %vm478_vm1, %v6796_v10  ;;  %v13357_v40 = vmax.f32 %v13355_v34, %v13356_v41  ;;  %v13359_v25 = vld [vmem:[#allocation50_spill] sm:$0xff] }
 0x322   : > { %v8598_v37 = vmax.f32 %v2100_v15, 0.0  ;;  %v13360_v51 = vmax.f32 %v13358_v4, %v13359_v25 }
 0x323   : > { %13352 = vst [vmem:[#allocation35_spill] sm:$0xff] %v8592_v13  ;;  %v8600_v22 = vmax.f32 %v2101_v43, 0.0  ;;  %v6797_v43 = vld [vmem:[%s7051_s19 + $0x138] sm:$0xff] }
 0x324   : > { %13353 = vst [vmem:[#allocation41_spill] sm:$0xff] %v8598_v37  ;;  %2402 = vmatmul.f32.gmra.mxu2 %v8598_v37 }
 0x325   : > { %13354 = vst [vmem:[#allocation36_spill] sm:$0xff] %v8600_v22  ;;  %2593 = vmatmul.f32.gmra.mxu3 %v8600_v22  ;;  %v1522_v21 = vpop.f32.mrf.mxu0 }
 0x326   : > { %v1980_v14 = vmax.f32 %v13357_v40, %v1522_v21  ;;  %v1713_v39 = vpop.f32.mrf.mxu1  ;;  %v6432_v21 = vld [vmem:[%s12750_s3 + $0x258] sm:$0xff] }
 0x327   : > { %v1981_v10 = vmax.f32 %v13360_v51, %v1713_v39  ;;  %v2355_v13 = vpop.f32.mrf.mxu2  ;;  %3150 = vmatpush.msra.mxu2 %v6432_v21  ;;  %v13365_v39 = vld [vmem:[#allocation57_spill] sm:$0xff]  ;;  %v13367_v51 = vld [vmem:[#allocation52_spill] sm:$0xff] }
 0x328   : > { %v2102_v15 = vadd.f32 %v8093_v47, %v1980_v14  ;;  %v2546_v19 = vpop.f32.mrf.mxu3  ;;  %6311 = vmatmul.msk.f32.gmra.mxu0 %vm478_vm1, %v6797_v43  ;;  %v13364_v14 = vld [vmem:[#allocation51_spill] sm:$0xff] }
 0x329   : > { %v2103_v37 = vadd.f32 %v8097_v12, %v1981_v10  ;;  %v8614_v22 = vadd.f32 %v2546_v19, %v2355_v13  ;;  %6370 = vmatmul.msk.f32.gmra.mxu1 %vm478_vm1, %v6797_v43  ;;  %v13366_v13 = vmax.f32 %v13364_v14, %v13365_v39  ;;  %v13368_v10 = vld [vmem:[#allocation54_spill] sm:$0xff] }
 0x32a   : > { %v8620_v34 = vmax.f32 %v2102_v15, 0.0  ;;  %v13369_v19 = vmax.f32 %v13367_v51, %v13368_v10 }
 0x32b   : > { %13361 = vst [vmem:[#allocation38_spill] sm:$0xff] %v8614_v22  ;;  %v8622_v41 = vmax.f32 %v2103_v37, 0.0  ;;  %v6798_v37 = vld [vmem:[%s7051_s19 + $0x140] sm:$0xff] }
 0x32c   : > { %13362 = vst [vmem:[#allocation39_spill] sm:$0xff] %v8620_v34  ;;  %2405 = vmatmul.f32.gmra.mxu2 %v8620_v34 }
 0x32d   : > { %13363 = vst [vmem:[#allocation45_spill] sm:$0xff] %v8622_v41  ;;  %2596 = vmatmul.f32.gmra.mxu3 %v8622_v41  ;;  %v1525_v40 = vpop.f32.mrf.mxu0 }
 0x32e   : > { %v1982_v4 = vmax.f32 %v13366_v13, %v1525_v40  ;;  %v1716_v25 = vpop.f32.mrf.mxu1  ;;  %v6401_v40 = vld [vmem:[%s12750_s3 + $0x160] sm:$0xff] }
 0x32f   : > { %v1983_v43 = vmax.f32 %v13369_v19, %v1716_v25  ;;  %v2358_v22 = vpop.f32.mrf.mxu2  ;;  %2738 = vmatpush.msra.mxu0 %v6401_v40  ;;  %v13374_v25 = vld [vmem:[#allocation61_spill] sm:$0xff]  ;;  %v13376_v19 = vld [vmem:[#allocation56_spill] sm:$0xff] }
 0x330   : > { %v2104_v15 = vadd.f32 %v8093_v47, %v1982_v4  ;;  %v2549_v21 = vpop.f32.mrf.mxu3  ;;  %6312 = vmatmul.msk.f32.gmra.mxu0 %vm478_vm1, %v6798_v37  ;;  %v13373_v4 = vld [vmem:[#allocation55_spill] sm:$0xff] }
 0x331   : > { %v2105_v34 = vadd.f32 %v8097_v12, %v1983_v43  ;;  %v8636_v41 = vadd.f32 %v2549_v21, %v2358_v22  ;;  %6371 = vmatmul.msk.f32.gmra.mxu1 %vm478_vm1, %v6798_v37  ;;  %v13375_v22 = vmax.f32 %v13373_v4, %v13374_v25  ;;  %v13377_v43 = vld [vmem:[#allocation58_spill] sm:$0xff] }
 0x332   : > { %v8642_v14 = vmax.f32 %v2104_v15, 0.0  ;;  %v13378_v21 = vmax.f32 %v13376_v19, %v13377_v43 }
 0x333   : > { %13370 = vst [vmem:[#allocation40_spill] sm:$0xff] %v8636_v41  ;;  %v8644_v39 = vmax.f32 %v2105_v34, 0.0  ;;  %v6799_v34 = vld [vmem:[%s7051_s19 + $0x148] sm:$0xff] }
 0x334   : > { %13371 = vst [vmem:[#allocation42_spill] sm:$0xff] %v8642_v14  ;;  %2408 = vmatmul.f32.gmra.mxu2 %v8642_v14 }
 0x335   : > { %13372 = vst [vmem:[#allocation43_spill] sm:$0xff] %v8644_v39  ;;  %2599 = vmatmul.f32.gmra.mxu3 %v8644_v39  ;;  %v1528_v13 = vpop.f32.mrf.mxu0 }
 0x336   : > { %v1984_v51 = vmax.f32 %v13375_v22, %v1528_v13  ;;  %v1719_v10 = vpop.f32.mrf.mxu1  ;;  %v6447_v13 = vld [vmem:[%s12750_s3 + $0x2d0] sm:$0xff] }
 0x337   : > { %v1985_v37 = vmax.f32 %v13378_v21, %v1719_v10  ;;  %v2361_v41 = vpop.f32.mrf.mxu2  ;;  %3340 = vmatpush.msra.mxu3 %v6447_v13  ;;  %v13383_v10 = vld [vmem:[#allocation65_spill] sm:$0xff]  ;;  %v13385_v21 = vld [vmem:[#allocation60_spill] sm:$0xff] }
 0x338   : > { %v2106_v15 = vadd.f32 %v8093_v47, %v1984_v51  ;;  %v2552_v40 = vpop.f32.mrf.mxu3  ;;  %6313 = vmatmul.msk.f32.gmra.mxu0 %vm478_vm1, %v6799_v34  ;;  %v13382_v51 = vld [vmem:[#allocation59_spill] sm:$0xff] }
 0x339   : > { %v2107_v14 = vadd.f32 %v8097_v12, %v1985_v37  ;;  %v8658_v39 = vadd.f32 %v2552_v40, %v2361_v41  ;;  %6372 = vmatmul.msk.f32.gmra.mxu1 %vm478_vm1, %v6799_v34  ;;  %v13384_v41 = vmax.f32 %v13382_v51, %v13383_v10  ;;  %v13386_v37 = vld [vmem:[#allocation62_spill] sm:$0xff] }
 0x33a   : > { %v8664_v4 = vmax.f32 %v2106_v15, 0.0  ;;  %v13387_v40 = vmax.f32 %v13385_v21, %v13386_v37 }
 0x33b   : > { %13379 = vst [vmem:[#allocation49_spill] sm:$0xff] %v8658_v39  ;;  %v8666_v25 = vmax.f32 %v2107_v14, 0.0  ;;  %v6800_v14 = vld [vmem:[%s7051_s19 + $0x150] sm:$0xff] }
 0x33c   : > { %13380 = vst [vmem:[#allocation44_spill] sm:$0xff] %v8664_v4  ;;  %2411 = vmatmul.f32.gmra.mxu2 %v8664_v4 }
 0x33d   : > { %13381 = vst [vmem:[#allocation46_spill] sm:$0xff] %v8666_v25  ;;  %2602 = vmatmul.f32.gmra.mxu3 %v8666_v25  ;;  %v1531_v22 = vpop.f32.mrf.mxu0 }
 0x33e   : > { %v1986_v19 = vmax.f32 %v13384_v41, %v1531_v22  ;;  %v1722_v43 = vpop.f32.mrf.mxu1  ;;  %v6416_v22 = vld [vmem:[%s12750_s3 + $0x1d8] sm:$0xff] }
 0x33f   : > { %v1987_v34 = vmax.f32 %v13387_v40, %v1722_v43  ;;  %v2364_v39 = vpop.f32.mrf.mxu2  ;;  %2928 = vmatpush.msra.mxu1 %v6416_v22  ;;  %v13392_v43 = vld [vmem:[#allocation69_spill] sm:$0xff]  ;;  %v13394_v40 = vld [vmem:[#allocation64_spill] sm:$0xff] }
 0x340   : > { %v2108_v15 = vadd.f32 %v8093_v47, %v1986_v19  ;;  %v2555_v13 = vpop.f32.mrf.mxu3  ;;  %6314 = vmatmul.msk.f32.gmra.mxu0 %vm478_vm1, %v6800_v14  ;;  %v13391_v19 = vld [vmem:[#allocation63_spill] sm:$0xff] }
 0x341   : > { %v2109_v4 = vadd.f32 %v8097_v12, %v1987_v34  ;;  %v8680_v25 = vadd.f32 %v2555_v13, %v2364_v39  ;;  %6373 = vmatmul.msk.f32.gmra.mxu1 %vm478_vm1, %v6800_v14  ;;  %v13393_v39 = vmax.f32 %v13391_v19, %v13392_v43  ;;  %v13395_v34 = vld [vmem:[#allocation66_spill] sm:$0xff] }
 0x342   : > { %v8686_v51 = vmax.f32 %v2108_v15, 0.0  ;;  %v13396_v13 = vmax.f32 %v13394_v40, %v13395_v34 }
 0x343   : > { %13388 = vst [vmem:[#allocation47_spill] sm:$0xff] %v8680_v25  ;;  %v8688_v10 = vmax.f32 %v2109_v4, 0.0  ;;  %v6801_v4 = vld [vmem:[%s7051_s19 + $0x158] sm:$0xff] }
 0x344   : > { %13389 = vst [vmem:[#allocation53_spill] sm:$0xff] %v8686_v51  ;;  %2414 = vmatmul.f32.gmra.mxu2 %v8686_v51 }
 0x345   : > { %13390 = vst [vmem:[#allocation48_spill] sm:$0xff] %v8688_v10  ;;  %2605 = vmatmul.f32.gmra.mxu3 %v8688_v10  ;;  %v1534_v41 = vpop.f32.mrf.mxu0 }
 0x346   : > { %v1988_v21 = vmax.f32 %v13393_v39, %v1534_v41  ;;  %v1725_v37 = vpop.f32.mrf.mxu1  ;;  %v6431_v41 = vld [vmem:[%s12750_s3 + $0x250] sm:$0xff] }
 0x347   : > { %v1989_v14 = vmax.f32 %v13396_v13, %v1725_v37  ;;  %v2367_v25 = vpop.f32.mrf.mxu2  ;;  %3151 = vmatpush.msra.mxu2 %v6431_v41  ;;  %v13401_v37 = vld [vmem:[#allocation73_spill] sm:$0xff]  ;;  %v13403_v13 = vld [vmem:[#allocation68_spill] sm:$0xff] }
 0x348   : > { %v2110_v15 = vadd.f32 %v8093_v47, %v1988_v21  ;;  %v2558_v22 = vpop.f32.mrf.mxu3  ;;  %6315 = vmatmul.msk.f32.gmra.mxu0 %vm478_vm1, %v6801_v4  ;;  %v13400_v21 = vld [vmem:[#allocation67_spill] sm:$0xff] }
 0x349   : > { %v2111_v51 = vadd.f32 %v8097_v12, %v1989_v14  ;;  %v8702_v10 = vadd.f32 %v2558_v22, %v2367_v25  ;;  %6374 = vmatmul.msk.f32.gmra.mxu1 %vm478_vm1, %v6801_v4  ;;  %v13402_v25 = vmax.f32 %v13400_v21, %v13401_v37  ;;  %v13404_v14 = vld [vmem:[#allocation70_spill] sm:$0xff] }
 0x34a   : > { %v8708_v19 = vmax.f32 %v2110_v15, 0.0  ;;  %v13405_v22 = vmax.f32 %v13403_v13, %v13404_v14 }
 0x34b   : > { %13397 = vst [vmem:[#allocation50_spill] sm:$0xff] %v8702_v10  ;;  %v8710_v43 = vmax.f32 %v2111_v51, 0.0  ;;  %v6802_v51 = vld [vmem:[%s7051_s19 + $0x160] sm:$0xff] }
 0x34c   : > { %13398 = vst [vmem:[#allocation51_spill] sm:$0xff] %v8708_v19  ;;  %2417 = vmatmul.f32.gmra.mxu2 %v8708_v19 }
 0x34d   : > { %13399 = vst [vmem:[#allocation57_spill] sm:$0xff] %v8710_v43  ;;  %2608 = vmatmul.f32.gmra.mxu3 %v8710_v43  ;;  %v1537_v39 = vpop.f32.mrf.mxu0 }
 0x34e   : > { %v1990_v40 = vmax.f32 %v13402_v25, %v1537_v39  ;;  %v1728_v34 = vpop.f32.mrf.mxu1  ;;  %v6400_v39 = vld [vmem:[%s12750_s3 + $0x158] sm:$0xff] }
 0x34f   : > { %v1991_v4 = vmax.f32 %v13405_v22, %v1728_v34  ;;  %v2370_v10 = vpop.f32.mrf.mxu2  ;;  %2739 = vmatpush.msra.mxu0 %v6400_v39  ;;  %v13410_v34 = vld [vmem:[#allocation77_spill] sm:$0xff]  ;;  %v13412_v22 = vld [vmem:[#allocation72_spill] sm:$0xff] }
 0x350   : > { %v2112_v15 = vadd.f32 %v8093_v47, %v1990_v40  ;;  %v2561_v41 = vpop.f32.mrf.mxu3  ;;  %6316 = vmatmul.msk.f32.gmra.mxu0 %vm478_vm1, %v6802_v51  ;;  %v13409_v40 = vld [vmem:[#allocation71_spill] sm:$0xff] }
 0x351   : > { %v2113_v19 = vadd.f32 %v8097_v12, %v1991_v4  ;;  %v8724_v43 = vadd.f32 %v2561_v41, %v2370_v10  ;;  %6375 = vmatmul.msk.f32.gmra.mxu1 %vm478_vm1, %v6802_v51  ;;  %v13411_v10 = vmax.f32 %v13409_v40, %v13410_v34  ;;  %v13413_v4 = vld [vmem:[#allocation74_spill] sm:$0xff]  ;;  %v6415_v40 = vld [vmem:[%s12750_s3 + $0x1d0] sm:$0xff] }
 0x352   : > { %v8730_v21 = vmax.f32 %v2112_v15, 0.0  ;;  %v13414_v41 = vmax.f32 %v13412_v22, %v13413_v4  ;;  %2929 = vmatpush.msra.mxu1 %v6415_v40 }
 0x353   : > { %13406 = vst [vmem:[#allocation52_spill] sm:$0xff] %v8724_v43  ;;  %v8732_v37 = vmax.f32 %v2113_v19, 0.0  ;;  %v6803_v19 = vld [vmem:[%s7051_s19 + $0x168] sm:$0xff] }
 0x354   : > { %13407 = vst [vmem:[#allocation54_spill] sm:$0xff] %v8730_v21  ;;  %2420 = vmatmul.f32.gmra.mxu2 %v8730_v21 }
 0x355   : > { %13408 = vst [vmem:[#allocation55_spill] sm:$0xff] %v8732_v37  ;;  %2611 = vmatmul.f32.gmra.mxu3 %v8732_v37  ;;  %v1540_v25 = vpop.f32.mrf.mxu0 }
 0x356   : > { %v1992_v13 = vmax.f32 %v13411_v10, %v1540_v25  ;;  %v1731_v14 = vpop.f32.mrf.mxu1  ;;  %v6446_v25 = vld [vmem:[%s12750_s3 + $0x2c8] sm:$0xff] }
 0x357   : > { %v1993_v51 = vmax.f32 %v13414_v41, %v1731_v14  ;;  %v2373_v43 = vpop.f32.mrf.mxu2  ;;  %3341 = vmatpush.msra.mxu3 %v6446_v25  ;;  %v13419_v14 = vld [vmem:[#allocation81_spill] sm:$0xff] }
 0x358   : > { %v2114_v15 = vadd.f32 %v8093_v47, %v1992_v13  ;;  %v2564_v39 = vpop.f32.mrf.mxu3  ;;  %6317 = vmatmul.msk.f32.gmra.mxu0 %vm478_vm1, %v6803_v19  ;;  %v13418_v13 = vld [vmem:[#allocation75_spill] sm:$0xff] }
 0x359   : > { %v2115_v21 = vadd.f32 %v8097_v12, %v1993_v51  ;;  %v8746_v37 = vadd.f32 %v2564_v39, %v2373_v43  ;;  %6376 = vmatmul.msk.f32.gmra.mxu1 %vm478_vm1, %v6803_v19  ;;  %v13420_v22 = vmax.f32 %v13418_v13, %v13419_v14  ;;  %v13421_v51 = vld [vmem:[#allocation76_spill] sm:$0xff]  ;;  %v13422_v39 = vld [vmem:[#allocation78_spill] sm:$0xff] }
 0x35a   : > { %v8755_v34 = vmax.f32 %v2114_v15, 0.0  ;;  %v13423_v19 = vmax.f32 %v13421_v51, %v13422_v39 }
 0x35b   : > { %13415 = vst [vmem:[#allocation61_spill] sm:$0xff] %v8746_v37  ;;  %v8757_v10 = vmax.f32 %v2115_v21, 0.0  ;;  %v6804_v21 = vld [vmem:[%s7051_s19 + $0x170] sm:$0xff] }
 0x35c   : > { %13416 = vst [vmem:[#allocation56_spill] sm:$0xff] %v8755_v34  ;;  %2423 = vmatmul.f32.gmra.mxu2 %v8755_v34 }
 0x35d   : > { %13417 = vst [vmem:[#allocation58_spill] sm:$0xff] %v8757_v10  ;;  %2614 = vmatmul.f32.gmra.mxu3 %v8757_v10  ;;  %v1543_v43 = vpop.f32.mrf.mxu0 }
 0x35e   : > { %v1994_v4 = vmax.f32 %v13420_v22, %v1543_v43  ;;  %v1734_v41 = vpop.f32.mrf.mxu1  ;;  %v6430_v43 = vld [vmem:[%s12750_s3 + $0x248] sm:$0xff] }
 0x35f   : > { %v1995_v37 = vmax.f32 %v13423_v19, %v1734_v41  ;;  %v2376_v15 = vpop.f32.mrf.mxu2  ;;  %3152 = vmatpush.msra.mxu2 %v6430_v43  ;;  %v13430_v19 = vld [vmem:[#allocation80_spill] sm:$0xff] }
 0x360   : > { %v2116_v25 = vadd.f32 %v8093_v47, %v1994_v4  ;;  %v2567_v40 = vpop.f32.mrf.mxu3  ;;  %6318 = vmatmul.msk.f32.gmra.mxu0 %vm478_vm1, %v6804_v21  ;;  %v13428_v4 = vld [vmem:[#allocation85_spill] sm:$0xff] }
 0x361   : > { %v2117_v34 = vadd.f32 %v8097_v12, %v1995_v37  ;;  %v8771_v10 = vadd.f32 %v2567_v40, %v2376_v15  ;;  %6377 = vmatmul.msk.f32.gmra.mxu1 %vm478_vm1, %v6804_v21  ;;  %v13427_v37 = vld [vmem:[#allocation79_spill] sm:$0xff]  ;;  %v13431_v15 = vld [vmem:[#allocation82_spill] sm:$0xff] }
 0x362   : > { %v8777_v13 = vmax.f32 %v2116_v25, 0.0  ;;  %v13429_v41 = vmax.f32 %v13427_v37, %v13428_v4  ;;  %v13432_v40 = vmax.f32 %v13430_v19, %v13431_v15 }
 0x363   : > { %13424 = vst [vmem:[#allocation59_spill] sm:$0xff] %v8771_v10  ;;  %v8779_v14 = vmax.f32 %v2117_v34, 0.0  ;;  %v6805_v34 = vld [vmem:[%s7051_s19 + $0x178] sm:$0xff] }
 0x364   : > { %13425 = vst [vmem:[#allocation65_spill] sm:$0xff] %v8777_v13  ;;  %2426 = vmatmul.f32.gmra.mxu2 %v8777_v13 }
 0x365   : > { %13426 = vst [vmem:[#allocation60_spill] sm:$0xff] %v8779_v14  ;;  %2617 = vmatmul.f32.gmra.mxu3 %v8779_v14  ;;  %v1546_v22 = vpop.f32.mrf.mxu0 }
 0x366   : > { %v1996_v51 = vmax.f32 %v13429_v41, %v1546_v22  ;;  %v1737_v39 = vpop.f32.mrf.mxu1  ;;  %v6399_v22 = vld [vmem:[%s12750_s3 + $0x150] sm:$0xff] }
 0x367   : > { %v1997_v21 = vmax.f32 %v13432_v40, %v1737_v39  ;;  %v2379_v10 = vpop.f32.mrf.mxu2  ;;  %2740 = vmatpush.msra.mxu0 %v6399_v22  ;;  %v13437_v39 = vld [vmem:[#allocation89_spill] sm:$0xff]  ;;  %v13439_v40 = vld [vmem:[#allocation84_spill] sm:$0xff] }
 0x368   : > { %v2118_v25 = vadd.f32 %v8093_v47, %v1996_v51  ;;  %v2570_v43 = vpop.f32.mrf.mxu3  ;;  %6319 = vmatmul.msk.f32.gmra.mxu0 %vm478_vm1, %v6805_v34  ;;  %v13436_v51 = vld [vmem:[#allocation83_spill] sm:$0xff] }
 0x369   : > { %v2119_v13 = vadd.f32 %v8097_v12, %v1997_v21  ;;  %v8793_v14 = vadd.f32 %v2570_v43, %v2379_v10  ;;  %6378 = vmatmul.msk.f32.gmra.mxu1 %vm478_vm1, %v6805_v34  ;;  %v13438_v10 = vmax.f32 %v13436_v51, %v13437_v39  ;;  %v13440_v21 = vld [vmem:[#allocation86_spill] sm:$0xff] }
 0x36a   : > { %v8799_v37 = vmax.f32 %v2118_v25, 0.0  ;;  %v13441_v43 = vmax.f32 %v13439_v40, %v13440_v21 }
 0x36b   : > { %13433 = vst [vmem:[#allocation62_spill] sm:$0xff] %v8793_v14  ;;  %v8801_v4 = vmax.f32 %v2119_v13, 0.0  ;;  %v6806_v13 = vld [vmem:[%s7051_s19 + $0x180] sm:$0xff] }
 0x36c   : > { %13434 = vst [vmem:[#allocation63_spill] sm:$0xff] %v8799_v37  ;;  %2429 = vmatmul.f32.gmra.mxu2 %v8799_v37 }
 0x36d   : > { %13435 = vst [vmem:[#allocation69_spill] sm:$0xff] %v8801_v4  ;;  %2620 = vmatmul.f32.gmra.mxu3 %v8801_v4  ;;  %v1549_v41 = vpop.f32.mrf.mxu0 }
 0x36e   : > { %v1998_v19 = vmax.f32 %v13438_v10, %v1549_v41  ;;  %v1740_v15 = vpop.f32.mrf.mxu1  ;;  %v6445_v41 = vld [vmem:[%s12750_s3 + $0x2c0] sm:$0xff] }
 0x36f   : > { %v1999_v34 = vmax.f32 %v13441_v43, %v1740_v15  ;;  %v2382_v14 = vpop.f32.mrf.mxu2  ;;  %3342 = vmatpush.msra.mxu3 %v6445_v41  ;;  %v13446_v15 = vld [vmem:[#allocation93_spill] sm:$0xff]  ;;  %v13448_v43 = vld [vmem:[#allocation88_spill] sm:$0xff] }
 0x370   : > { %v2120_v25 = vadd.f32 %v8093_v47, %v1998_v19  ;;  %v2573_v22 = vpop.f32.mrf.mxu3  ;;  %6320 = vmatmul.msk.f32.gmra.mxu0 %vm478_vm1, %v6806_v13  ;;  %v13445_v19 = vld [vmem:[#allocation87_spill] sm:$0xff] }
 0x371   : > { %v2121_v37 = vadd.f32 %v8097_v12, %v1999_v34  ;;  %v8815_v4 = vadd.f32 %v2573_v22, %v2382_v14  ;;  %6379 = vmatmul.msk.f32.gmra.mxu1 %vm478_vm1, %v6806_v13  ;;  %v13447_v14 = vmax.f32 %v13445_v19, %v13446_v15  ;;  %v13449_v34 = vld [vmem:[#allocation90_spill] sm:$0xff] }
 0x372   : > { %v8821_v51 = vmax.f32 %v2120_v25, 0.0  ;;  %v13450_v22 = vmax.f32 %v13448_v43, %v13449_v34  ;;  %v13456_v43 = vld [vmem:[#allocation117_spill] sm:$0xff] }
 0x373   : > { %13442 = vst [vmem:[#allocation64_spill] sm:$0xff] %v8815_v4  ;;  %v8823_v39 = vmax.f32 %v2121_v37, 0.0  ;;  %v6807_v37 = vld [vmem:[%s7051_s19 + $0x188] sm:$0xff] }
 0x374   : > { %13443 = vst [vmem:[#allocation66_spill] sm:$0xff] %v8821_v51  ;;  %2432 = vmatmul.f32.gmra.mxu2 %v8821_v51 }
 0x375   : > { %13444 = vst [vmem:[#allocation67_spill] sm:$0xff] %v8823_v39  ;;  %2623 = vmatmul.f32.gmra.mxu3 %v8823_v39  ;;  %v1552_v10 = vpop.f32.mrf.mxu0 }
 0x376   : > { %v2000_v40 = vmax.f32 %v13447_v14, %v1552_v10  ;;  %v1743_v21 = vpop.f32.mrf.mxu1  ;;  %v6414_v10 = vld [vmem:[%s12750_s3 + $0x1c8] sm:$0xff] }
 0x377   : > { %v2001_v13 = vmax.f32 %v13450_v22, %v1743_v21  ;;  %v2385_v4 = vpop.f32.mrf.mxu2  ;;  %2930 = vmatpush.msra.mxu1 %v6414_v10  ;;  %v13454_v14 = vld [vmem:[#allocation116_spill] sm:$0xff] }
 0x378   : > { %v2122_v25 = vadd.f32 %v8093_v47, %v2000_v40  ;;  %v2576_v41 = vpop.f32.mrf.mxu3  ;;  %6321 = vmatmul.msk.f32.gmra.mxu0 %vm478_vm1, %v6807_v37  ;;  %v13455_v40 = vld [vmem:[#allocation91_spill] sm:$0xff] }
 0x379   : > { %v2123_v51 = vadd.f32 %v8097_v12, %v2001_v13  ;;  %v8837_v39 = vadd.f32 %v2576_v41, %v2385_v4  ;;  %6380 = vmatmul.msk.f32.gmra.mxu1 %vm478_vm1, %v6807_v37  ;;  %v1886_v21 = vmax.f32 %v13455_v40, %v13454_v14  ;;  %v13457_v4 = vld [vmem:[#allocation92_spill] sm:$0xff] }
 0x37a   : > { %v8843_v19 = vmax.f32 %v2122_v25, 0.0  ;;  %v1887_v34 = vmax.f32 %v13457_v4, %v13456_v43 }
 0x37b   : > { %13451 = vst [vmem:[#allocation73_spill] sm:$0xff] %v8837_v39  ;;  %v8845_v15 = vmax.f32 %v2123_v51, 0.0  ;;  %v6808_v51 = vld [vmem:[%s7051_s19 + $0x190] sm:$0xff] }
 0x37c   : > { %13452 = vst [vmem:[#allocation68_spill] sm:$0xff] %v8843_v19  ;;  %2435 = vmatmul.f32.gmra.mxu2 %v8843_v19 }
 0x37d   : > { %13453 = vst [vmem:[#allocation70_spill] sm:$0xff] %v8845_v15  ;;  %2626 = vmatmul.f32.gmra.mxu3 %v8845_v15  ;;  %v1555_v22 = vpop.f32.mrf.mxu0 }
 0x37e   : > { %v2002_v13 = vmax.f32 %v1886_v21, %v1555_v22  ;;  %v1746_v41 = vpop.f32.mrf.mxu1  ;;  %v6429_v21 = vld [vmem:[%s12750_s3 + $0x240] sm:$0xff] }
 0x37f   : > { %v2003_v37 = vmax.f32 %v1887_v34, %v1746_v41  ;;  %v2388_v39 = vpop.f32.mrf.mxu2  ;;  %3153 = vmatpush.msra.mxu2 %v6429_v21  ;;  %v13461_v34 = vld [vmem:[#allocation120_spill] sm:$0xff]  ;;  %v13462_v22 = vld [vmem:[#allocation94_spill] sm:$0xff]  ;;  %v13463_v41 = vld [vmem:[#allocation121_spill] sm:$0xff] }
 0x380   : > { %v2124_v25 = vadd.f32 %v8093_v47, %v2002_v13  ;;  %v2579_v10 = vpop.f32.mrf.mxu3  ;;  %6322 = vmatmul.msk.f32.gmra.mxu0 %vm478_vm1, %v6808_v51  ;;  %v1888_v13 = vmax.f32 %v13462_v22, %v13461_v34 }
 0x381   : > { %v2125_v14 = vadd.f32 %v8097_v12, %v2003_v37  ;;  %v8857_v40 = vadd.f32 %v2579_v10, %v2388_v39  ;;  %6381 = vmatmul.msk.f32.gmra.mxu1 %vm478_vm1, %v6808_v51  ;;  %v13464_v39 = vld [vmem:[#allocation95_spill] sm:$0xff] }
 0x382   : > { %v8863_v43 = vmax.f32 %v2124_v25, 0.0  ;;  %v1889_v37 = vmax.f32 %v13464_v39, %v13463_v41  ;;  %v6398_v41 = vld [vmem:[%s12750_s3 + $0x148] sm:$0xff] }
 0x383   : > { %13458 = vst [vmem:[#allocation71_spill] sm:$0xff] %v8857_v40  ;;  %v8865_v4 = vmax.f32 %v2125_v14, 0.0  ;;  %v6809_v14 = vld [vmem:[%s7051_s19 + $0x198] sm:$0xff]  ;;  %2741 = vmatpush.msra.mxu0 %v6398_v41  ;;  %v13468_v39 = vld [vmem:[#allocation124_spill] sm:$0xff]  ;;  %v6413_v41 = vld [vmem:[%s12750_s3 + $0x1c0] sm:$0xff] }
 0x384   : > { %13459 = vst [vmem:[#allocation77_spill] sm:$0xff] %v8863_v43  ;;  %2438 = vmatmul.f32.gmra.mxu2 %v8863_v43  ;;  %2931 = vmatpush.msra.mxu1 %v6413_v41 }
 0x385   : > { %13460 = vst [vmem:[#allocation72_spill] sm:$0xff] %v8865_v4  ;;  %2629 = vmatmul.f32.gmra.mxu3 %v8865_v4  ;;  %v1558_v10 = vpop.f32.mrf.mxu0 }
 0x386   : > { %v2004_v51 = vmax.f32 %v1888_v13, %v1558_v10  ;;  %v1749_v40 = vpop.f32.mrf.mxu1 }
 0x387   : > { %v2005_v15 = vmax.f32 %v1889_v37, %v1749_v40  ;;  %v2391_v19 = vpop.f32.mrf.mxu2  ;;  %v13469_v37 = vld [vmem:[#allocation96_spill] sm:$0xff] }
 0x388   : > { %v2126_v25 = vadd.f32 %v8093_v47, %v2004_v51  ;;  %v2582_v21 = vpop.f32.mrf.mxu3  ;;  %6323 = vmatmul.msk.f32.gmra.mxu0 %vm478_vm1, %v6809_v14  ;;  %v1890_v10 = vmax.f32 %v13469_v37, %v13468_v39 }
 0x389   : > { %v2127_v34 = vadd.f32 %v8097_v12, %v2005_v15  ;;  %v8877_v22 = vadd.f32 %v2582_v21, %v2391_v19  ;;  %6382 = vmatmul.msk.f32.gmra.mxu1 %vm478_vm1, %v6809_v14  ;;  %v13470_v15 = vld [vmem:[#allocation126_spill] sm:$0xff]  ;;  %v13471_v19 = vld [vmem:[#allocation97_spill] sm:$0xff] }
 0x38a   : > { %v8883_v13 = vmax.f32 %v2126_v25, 0.0  ;;  %v1891_v51 = vmax.f32 %v13471_v19, %v13470_v15  ;;  %v6396_v19 = vld [vmem:[%s12750_s3 + $0x138] sm:$0xff] }
 0x38b   : > { %13465 = vst [vmem:[#allocation74_spill] sm:$0xff] %v8877_v22  ;;  %v8885_v40 = vmax.f32 %v2127_v34, 0.0  ;;  %v6397_v34 = vld [vmem:[%s12750_s3 + $0x140] sm:$0xff] }
 0x38c   : > { %13466 = vst [vmem:[#allocation75_spill] sm:$0xff] %v8883_v13  ;;  %2441 = vmatmul.f32.gmra.mxu2 %v8883_v13  ;;  %v6810_v13 = vld [vmem:[%s7051_s19 + $0x1a0] sm:$0xff]  ;;  %2742 = vmatpush.msra.mxu0 %v6397_v34 }
 0x38d   : > { %13467 = vst [vmem:[#allocation81_spill] sm:$0xff] %v8885_v40  ;;  %2632 = vmatmul.f32.gmra.mxu3 %v8885_v40  ;;  %v1561_v21 = vpop.f32.mrf.mxu0  ;;  %v13476_v34 = vld [vmem:[#allocation98_spill] sm:$0xff] }
 0x38e   : > { %v2006_v14 = vmax.f32 %v1890_v10, %v1561_v21  ;;  %v1752_v22 = vpop.f32.mrf.mxu1  ;;  %2743 = vmatpush.msra.mxu0 %v6396_v19  ;;  %v6410_v19 = vld [vmem:[%s12750_s3 + $0x1a8] sm:$0xff] }
 0x38f   : > { %v2007_v4 = vmax.f32 %v1891_v51, %v1752_v22  ;;  %v2394_v25 = vpop.f32.mrf.mxu2  ;;  %v6444_v22 = vld [vmem:[%s12750_s3 + $0x2b8] sm:$0xff] }
 0x390   : > { %v2128_v39 = vadd.f32 %v8093_v47, %v2006_v14  ;;  %v2585_v37 = vpop.f32.mrf.mxu3  ;;  %6324 = vmatmul.msk.f32.gmra.mxu0 %vm478_vm1, %v6810_v13  ;;  %v6412_v51 = vld [vmem:[%s12750_s3 + $0x1b8] sm:$0xff]  ;;  %3343 = vmatpush.msra.mxu3 %v6444_v22 }
 0x391   : > { %v2129_v10 = vadd.f32 %v8097_v12, %v2007_v4  ;;  %v8903_v15 = vadd.f32 %v2585_v37, %v2394_v25  ;;  %6383 = vmatmul.msk.f32.gmra.mxu1 %vm478_vm1, %v6810_v13  ;;  %v6395_v4 = vld [vmem:[%s12750_s3 + $0x130] sm:$0xff]  ;;  %v13475_v25 = vld [vmem:[#allocation130_spill] sm:$0xff]  ;;  %v13478_v37 = vld [vmem:[#allocation99_spill] sm:$0xff] }
 0x392   : > { %v8915_v21 = vmax.f32 %v2128_v39, 0.0  ;;  %2932 = vmatpush.msra.mxu1 %v6412_v51  ;;  %v6411_v13 = vld [vmem:[%s12750_s3 + $0x1b0] sm:$0xff]  ;;  %v1892_v41 = vmax.f32 %v13476_v34, %v13475_v25  ;;  %v13477_v39 = vld [vmem:[#allocation131_spill] sm:$0xff]  ;;  %2744 = vmatpush.msra.mxu0 %v6395_v4 }
 0x393   : > { %13472 = vst [vmem:[#allocation76_spill] sm:$0xff] %v8903_v15  ;;  %v8923_v14 = vmax.f32 %v2129_v10, 0.0  ;;  %v1893_v22 = vmax.f32 %v13478_v37, %v13477_v39  ;;  %v6394_v10 = vld [vmem:[%s12750_s3 + $0x128] sm:$0xff]  ;;  %v6393_v39 = vld [vmem:[%s12750_s3 + $0x120] sm:$0xff] }
 0x394   : > { %13473 = vst [vmem:[#allocation78_spill] sm:$0xff] %v8915_v21  ;;  %2444 = vmatmul.f32.gmra.mxu2 %v8915_v21  ;;  %2933 = vmatpush.msra.mxu1 %v6411_v13  ;;  %v6409_v4 = vld [vmem:[%s12750_s3 + $0x1a0] sm:$0xff]  ;;  %v6811_v21 = vld [vmem:[%s7051_s19 + $0x1a8] sm:$0xff] }
 0x395   : > { %13474 = vst [vmem:[#allocation79_spill] sm:$0xff] %v8923_v14  ;;  %2635 = vmatmul.f32.gmra.mxu3 %v8923_v14  ;;  %v1564_v51 = vpop.f32.mrf.mxu0  ;;  %2745 = vmatpush.msra.mxu0 %v6394_v10  ;;  %v6408_v10 = vld [vmem:[%s12750_s3 + $0x198] sm:$0xff] }
 0x396   : > { %v2008_v25 = vmax.f32 %v1892_v41, %v1564_v51  ;;  %v1755_v34 = vpop.f32.mrf.mxu1  ;;  %2934 = vmatpush.msra.mxu1 %v6410_v19  ;;  %v6392_v51 = vld [vmem:[%s12750_s3 + $0x118] sm:$0xff] }
 0x397   : > { %v2009_v13 = vmax.f32 %v1893_v22, %v1755_v34  ;;  %v2397_v15 = vpop.f32.mrf.mxu2  ;;  %2746 = vmatpush.msra.mxu0 %v6393_v39  ;;  %v13483_v34 = vld [vmem:[#allocation100_spill] sm:$0xff]  ;;  %v13484_v39 = vld [vmem:[#allocation135_spill] sm:$0xff] }
 0x398   : > { %v2130_v37 = vadd.f32 %v8093_v47, %v2008_v25  ;;  %v2588_v14 = vpop.f32.mrf.mxu3  ;;  %6325 = vmatmul.msk.f32.gmra.mxu0 %vm478_vm1, %v6811_v21  ;;  %2935 = vmatpush.msra.mxu1 %v6409_v4  ;;  %v6391_v25 = vld [vmem:[%s12750_s3 + $0x110] sm:$0xff] }
 0x399   : > { %v2131_v41 = vadd.f32 %v8097_v12, %v2009_v13  ;;  %v8947_v22 = vadd.f32 %v2588_v14, %v2397_v15  ;;  %6384 = vmatmul.msk.f32.gmra.mxu1 %vm478_vm1, %v6811_v21  ;;  %v6407_v15 = vld [vmem:[%s12750_s3 + $0x190] sm:$0xff]  ;;  %2747 = vmatpush.msra.mxu0 %v6392_v51  ;;  %v13482_v14 = vld [vmem:[#allocation134_spill] sm:$0xff]  ;;  %v6406_v51 = vld [vmem:[%s12750_s3 + $0x188] sm:$0xff] }
 0x39a   : > { %v8956_v19 = vmax.f32 %v2130_v37, 0.0  ;;  %2936 = vmatpush.msra.mxu1 %v6408_v10  ;;  %v1894_v13 = vmax.f32 %v13483_v34, %v13482_v14  ;;  %v13485_v4 = vld [vmem:[#allocation101_spill] sm:$0xff] }
 0x39b   : > { %13479 = vst [vmem:[#allocation85_spill] sm:$0xff] %v8947_v22  ;;  %v8964_v21 = vmax.f32 %v2131_v41, 0.0  ;;  %v1895_v37 = vmax.f32 %v13485_v4, %v13484_v39  ;;  %2748 = vmatpush.msra.mxu0 %v6391_v25  ;;  %v6390_v41 = vld [vmem:[%s12750_s3 + $0x108] sm:$0xff]  ;;  %v6389_v39 = vld [vmem:[%s12750_s3 + $0x100] sm:$0xff] }
 0x39c   : > { %13480 = vst [vmem:[#allocation80_spill] sm:$0xff] %v8956_v19  ;;  %2447 = vmatmul.f32.gmra.mxu2 %v8956_v19  ;;  %2937 = vmatpush.msra.mxu1 %v6407_v15  ;;  %v6405_v25 = vld [vmem:[%s12750_s3 + $0x180] sm:$0xff]  ;;  %v6812_v19 = vld [vmem:[%s7051_s19 + $0x1b0] sm:$0xff] }
 0x39d   : > { %13481 = vst [vmem:[#allocation82_spill] sm:$0xff] %v8964_v21  ;;  %2638 = vmatmul.f32.gmra.mxu3 %v8964_v21  ;;  %v1567_v10 = vpop.f32.mrf.mxu0  ;;  %2749 = vmatpush.msra.mxu0 %v6390_v41 }
 0x39e   : > { %v2010_v14 = vmax.f32 %v1894_v13, %v1567_v10  ;;  %v1758_v34 = vpop.f32.mrf.mxu1  ;;  %2938 = vmatpush.msra.mxu1 %v6406_v51  ;;  %v6428_v10 = vld [vmem:[%s12750_s3 + $0x238] sm:$0xff] }
 0x39f   : > { %v2011_v15 = vmax.f32 %v1895_v37, %v1758_v34  ;;  %v2400_v22 = vpop.f32.mrf.mxu2  ;;  %2750 = vmatpush.msra.mxu0 %v6389_v39  ;;  %3154 = vmatpush.msra.mxu2 %v6428_v10  ;;  %v13490_v34 = vld [vmem:[#allocation102_spill] sm:$0xff] }
 0x3a0   : > { %v2132_v4 = vadd.f32 %v8093_v47, %v2010_v14  ;;  %v2591_v21 = vpop.f32.mrf.mxu3  ;;  %6326 = vmatmul.msk.f32.gmra.mxu0 %vm478_vm1, %v6812_v19  ;;  %2939 = vmatpush.msra.mxu1 %v6405_v25  ;;  %v13489_v14 = vld [vmem:[#allocation138_spill] sm:$0xff] }
 0x3a1   : > { %v2133_v13 = vadd.f32 %v8097_v12, %v2011_v15  ;;  %v8988_v37 = vadd.f32 %v2591_v21, %v2400_v22  ;;  %6385 = vmatmul.msk.f32.gmra.mxu1 %vm478_vm1, %v6812_v19  ;;  %v1896_v25 = vmax.f32 %v13490_v34, %v13489_v14  ;;  %v13491_v22 = vld [vmem:[#allocation139_spill] sm:$0xff] }
 0x3a2   : > { %v8994_v41 = vmax.f32 %v2132_v4, 0.0  ;;  %v13492_v21 = vld [vmem:[#allocation103_spill] sm:$0xff] }
 0x3a3   : > { %13486 = vst [vmem:[#allocation83_spill] sm:$0xff] %v8988_v37  ;;  %v8996_v51 = vmax.f32 %v2133_v13, 0.0  ;;  %v1897_v15 = vmax.f32 %v13492_v21, %v13491_v22  ;;  %v6813_v13 = vld [vmem:[%s7051_s19 + $0x1b8] sm:$0xff] }
 0x3a4   : > { %13487 = vst [vmem:[#allocation89_spill] sm:$0xff] %v8994_v41  ;;  %2450 = vmatmul.f32.gmra.mxu2 %v8994_v41 }
 0x3a5   : > { %13488 = vst [vmem:[#allocation84_spill] sm:$0xff] %v8996_v51  ;;  %2641 = vmatmul.f32.gmra.mxu3 %v8996_v51  ;;  %v1570_v19 = vpop.f32.mrf.mxu0 }
 0x3a6   : > { %v2012_v37 = vmax.f32 %v1896_v25, %v1570_v19  ;;  %v1761_v40 = vpop.f32.mrf.mxu1  ;;  %v13496_v25 = vld [vmem:[#allocation142_spill] sm:$0xff]  ;;  %v13499_v19 = vld [vmem:[#allocation105_spill] sm:$0xff] }
 0x3a7   : > { %v2013_v43 = vmax.f32 %v1897_v15, %v1761_v40  ;;  %v2403_v39 = vpop.f32.mrf.mxu2  ;;  %v13497_v40 = vld [vmem:[#allocation104_spill] sm:$0xff] }
 0x3a8   : > { %v2134_v4 = vadd.f32 %v8093_v47, %v2012_v37  ;;  %v2594_v10 = vpop.f32.mrf.mxu3  ;;  %6327 = vmatmul.msk.f32.gmra.mxu0 %vm478_vm1, %v6813_v13  ;;  %v1898_v15 = vmax.f32 %v13497_v40, %v13496_v25  ;;  %v13498_v37 = vld [vmem:[#allocation144_spill] sm:$0xff]  ;;  %v6814_v40 = vld [vmem:[%s7051_s19 + $0x1c0] sm:$0xff] }
 0x3a9   : > { %v2135_v14 = vadd.f32 %v8097_v12, %v2013_v43  ;;  %v9008_v34 = vadd.f32 %v2594_v10, %v2403_v39  ;;  %6386 = vmatmul.msk.f32.gmra.mxu1 %vm478_vm1, %v6813_v13  ;;  %v1899_v51 = vmax.f32 %v13499_v19, %v13498_v37  ;;  %v6443_v39 = vld [vmem:[%s12750_s3 + $0x2b0] sm:$0xff] }
 0x3aa   : > { %v9011_v22 = vmax.f32 %v2134_v4, 0.0  ;;  %3344 = vmatpush.msra.mxu3 %v6443_v39 }
 0x3ab   : > { %13493 = vst [vmem:[#allocation86_spill] sm:$0xff] %v9008_v34  ;;  %v9013_v21 = vmax.f32 %v2135_v14, 0.0 }
 0x3ac   : > { %13494 = vst [vmem:[#allocation87_spill] sm:$0xff] %v9011_v22  ;;  %2453 = vmatmul.f32.gmra.mxu2 %v9011_v22 }
 0x3ad   : > { %13495 = vst [vmem:[#allocation93_spill] sm:$0xff] %v9013_v21  ;;  %2644 = vmatmul.f32.gmra.mxu3 %v9013_v21  ;;  %v1573_v43 = vpop.f32.mrf.mxu0 }
 0x3ae   : > { %v2014_v10 = vmax.f32 %v1898_v15, %v1573_v43  ;;  %v1764_v4 = vpop.f32.mrf.mxu1  ;;  %v13503_v43 = vld [vmem:[#allocation148_spill] sm:$0xff] }
 0x3af   : > { %v2015_v13 = vmax.f32 %v1899_v51, %v1764_v4  ;;  %v2406_v14 = vpop.f32.mrf.mxu2  ;;  %v13504_v51 = vld [vmem:[#allocation106_spill] sm:$0xff]  ;;  %v13506_v4 = vld [vmem:[#allocation107_spill] sm:$0xff] }
 0x3b0   : > { %v2136_v34 = vadd.f32 %v8093_v47, %v2014_v10  ;;  %v2597_v25 = vpop.f32.mrf.mxu3  ;;  %6328 = vmatmul.msk.f32.gmra.mxu0 %vm478_vm1, %v6814_v40  ;;  %v1900_v39 = vmax.f32 %v13504_v51, %v13503_v43  ;;  %v13505_v10 = vld [vmem:[#allocation149_spill] sm:$0xff] }
 0x3b1   : > { %v2137_v37 = vadd.f32 %v8097_v12, %v2015_v13  ;;  %v9028_v19 = vadd.f32 %v2597_v25, %v2406_v14  ;;  %6387 = vmatmul.msk.f32.gmra.mxu1 %vm478_vm1, %v6814_v40  ;;  %v1901_v22 = vmax.f32 %v13506_v4, %v13505_v10  ;;  %v6427_v10 = vld [vmem:[%s12750_s3 + $0x230] sm:$0xff] }
 0x3b2   : > { %v9031_v21 = vmax.f32 %v2136_v34, 0.0  ;;  %3155 = vmatpush.msra.mxu2 %v6427_v10  ;;  %v13511_v4 = vld [vmem:[#allocation108_spill] sm:$0xff] }
 0x3b3   : > { %13500 = vst [vmem:[#allocation88_spill] sm:$0xff] %v9028_v19  ;;  %v9033_v15 = vmax.f32 %v2137_v37, 0.0  ;;  %v6815_v37 = vld [vmem:[%s7051_s19 + $0x1c8] sm:$0xff] }
 0x3b4   : > { %13501 = vst [vmem:[#allocation90_spill] sm:$0xff] %v9031_v21  ;;  %2456 = vmatmul.f32.gmra.mxu2 %v9031_v21 }
 0x3b5   : > { %13502 = vst [vmem:[#allocation116_spill] sm:$0xff] %v9033_v15  ;;  %2647 = vmatmul.f32.gmra.mxu3 %v9033_v15  ;;  %v1576_v13 = vpop.f32.mrf.mxu0 }
 0x3b6   : > { %v2016_v41 = vmax.f32 %v1900_v39, %v1576_v13  ;;  %v1767_v14 = vpop.f32.mrf.mxu1 }
 0x3b7   : > { %v2017_v25 = vmax.f32 %v1901_v22, %v1767_v14  ;;  %v2409_v19 = vpop.f32.mrf.mxu2  ;;  %v13512_v14 = vld [vmem:[#allocation153_spill] sm:$0xff] }
 0x3b8   : > { %v2138_v34 = vadd.f32 %v8093_v47, %v2016_v41  ;;  %v2600_v40 = vpop.f32.mrf.mxu3  ;;  %6329 = vmatmul.msk.f32.gmra.mxu0 %vm478_vm1, %v6815_v37  ;;  %v13510_v41 = vld [vmem:[#allocation152_spill] sm:$0xff] }
 0x3b9   : > { %v2139_v43 = vadd.f32 %v8097_v12, %v2017_v25  ;;  %v9045_v51 = vadd.f32 %v2600_v40, %v2409_v19  ;;  %6388 = vmatmul.msk.f32.gmra.mxu1 %vm478_vm1, %v6815_v37  ;;  %v1902_v13 = vmax.f32 %v13511_v4, %v13510_v41  ;;  %v13513_v25 = vld [vmem:[#allocation109_spill] sm:$0xff] }
 0x3ba   : > { %v9051_v39 = vmax.f32 %v2138_v34, 0.0  ;;  %v1903_v19 = vmax.f32 %v13513_v25, %v13512_v14  ;;  %v13517_v25 = vld [vmem:[#allocation156_spill] sm:$0xff] }
 0x3bb   : > { %13507 = vst [vmem:[#allocation91_spill] sm:$0xff] %v9045_v51  ;;  %v9053_v22 = vmax.f32 %v2139_v43, 0.0 }
 0x3bc   : > { %13508 = vst [vmem:[#allocation117_spill] sm:$0xff] %v9051_v39  ;;  %2459 = vmatmul.f32.gmra.mxu2 %v9051_v39 }
 0x3bd   : > { %13509 = vst [vmem:[#allocation92_spill] sm:$0xff] %v9053_v22  ;;  %2650 = vmatmul.f32.gmra.mxu3 %v9053_v22  ;;  %v1579_v40 = vpop.f32.mrf.mxu0 }
 0x3be   : > { %v2018_v37 = vmax.f32 %v1902_v13, %v1579_v40  ;;  %v1770_v51 = vpop.f32.mrf.mxu1  ;;  %v13518_v13 = vld [vmem:[#allocation110_spill] sm:$0xff] }
 0x3bf   : > { %v2019_v15 = vmax.f32 %v1903_v19, %v1770_v51  ;;  %v2412_v21 = vpop.f32.mrf.mxu2  ;;  %v1904_v40 = vmax.f32 %v13518_v13, %v13517_v25  ;;  %v13519_v51 = vld [vmem:[#allocation157_spill] sm:$0xff]  ;;  %v13520_v19 = vld [vmem:[#allocation111_spill] sm:$0xff] }
 0x3c0   : > { %v2140_v34 = vadd.f32 %v8093_v47, %v2018_v37  ;;  %v2603_v10 = vpop.f32.mrf.mxu3  ;;  %2751 = vmatmul.f32.vlgmr.msra.gmra.mxu0 %v8112_v52  ;;  %v1905_v37 = vmax.f32 %v13520_v19, %v13519_v51  ;;  %v6442_v13 = vld [vmem:[%s12750_s3 + $0x2a8] sm:$0xff] }
 0x3c1   : > { %v2141_v43 = vadd.f32 %v8097_v12, %v2019_v15  ;;  %v9064_v41 = vadd.f32 %v2603_v10, %v2412_v21  ;;  %2940 = vmatmul.f32.vlgmr.msra.gmra.mxu1 %v8114_v28  ;;  %3345 = vmatpush.msra.mxu3 %v6442_v13  ;;  %v13524_v19 = vld [vmem:[#allocation112_spill] sm:$0xff] }
 0x3c2   : > { %v9067_v4 = vmax.f32 %v2140_v34, 0.0 }
 0x3c3   : > { %13514 = vst [vmem:[#allocation120_spill] sm:$0xff] %v9064_v41  ;;  %v9069_v14 = vmax.f32 %v2141_v43, 0.0 }
 0x3c4   : > { %13515 = vst [vmem:[#allocation94_spill] sm:$0xff] %v9067_v4  ;;  %2462 = vmatmul.f32.gmra.mxu2 %v9067_v4 }
 0x3c5   : > { %13516 = vst [vmem:[#allocation121_spill] sm:$0xff] %v9069_v14  ;;  %2653 = vmatmul.f32.gmra.mxu3 %v9069_v14  ;;  %v1582_v22 = vpop.f32.mrf.mxu0 }
 0x3c6   : > { %v2020_v15 = vmax.f32 %v1904_v40, %v1582_v22  ;;  %v1773_v21 = vpop.f32.mrf.mxu1  ;;  %v13523_v40 = vld [vmem:[#allocation160_spill] sm:$0xff] }
 0x3c7   : > { %v2021_v10 = vmax.f32 %v1905_v37, %v1773_v21  ;;  %v2415_v41 = vpop.f32.mrf.mxu2  ;;  %v1906_v37 = vmax.f32 %v13524_v19, %v13523_v40  ;;  %v13526_v21 = vld [vmem:[#allocation113_spill] sm:$0xff] }
 0x3c8   : > { %v2142_v34 = vadd.f32 %v8093_v47, %v2020_v15  ;;  %v2606_v39 = vpop.f32.mrf.mxu3  ;;  %2754 = vmatmul.f32.gmra.mxu0 %v8133_v48  ;;  %v13525_v15 = vld [vmem:[#allocation161_spill] sm:$0xff] }
 0x3c9   : > { %v2143_v43 = vadd.f32 %v8097_v12, %v2021_v10  ;;  %v9080_v25 = vadd.f32 %v2606_v39, %v2415_v41  ;;  %2943 = vmatmul.f32.gmra.mxu1 %v8135_v59  ;;  %v1907_v39 = vmax.f32 %v13526_v21, %v13525_v15 }
 0x3ca   : > { %v9086_v51 = vmax.f32 %v2142_v34, 0.0 }
 0x3cb   : > { %13521 = vst [vmem:[#allocation95_spill] sm:$0xff] %v9080_v25  ;;  %v9088_v22 = vmax.f32 %v2143_v43, 0.0 }
 0x3cc   : > { %2465 = vmatmul.f32.gmra.mxu2 %v9086_v51 }
 0x3cd   : > { %13522 = vst [vmem:[#allocation124_spill] sm:$0xff] %v9088_v22  ;;  %2656 = vmatmul.f32.gmra.mxu3 %v9088_v22  ;;  %v1585_v41 = vpop.f32.mrf.mxu0  ;;  %v13642_v22 = vld [vmem:[#allocation48_spill] sm:$0xff] }
 0x3ce   : > { %v2022_v10 = vmax.f32 %v1906_v37, %v1585_v41  ;;  %v1776_v25 = vpop.f32.mrf.mxu1  ;;  %v13530_v37 = vld [vmem:[#allocation114_spill] sm:$0xff] }
 0x3cf   : > { %v2023_v14 = vmax.f32 %v1907_v39, %v1776_v25  ;;  %v2418_v4 = vpop.f32.mrf.mxu2  ;;  %v1908_v21 = vmax.f32 %v13530_v37, %v8121_v5  ;;  %v13531_v25 = vld [vmem:[#allocation115_spill] sm:$0xff] }
 0x3d0   : > { %v2144_v34 = vadd.f32 %v8093_v47, %v2022_v10  ;;  %v2609_v13 = vpop.f32.mrf.mxu3  ;;  %2757 = vmatmul.f32.gmra.mxu0 %v8154_v55  ;;  %v1909_v39 = vmax.f32 %v13531_v25, %v8126_v54  ;;  %v6426_v54 = vld [vmem:[%s12750_s3 + $0x228] sm:$0xff]  ;;  %v13535_v25 = vld [vmem:[#allocation118_spill] sm:$0xff] }
 0x3d1   : > { %v2145_v43 = vadd.f32 %v8097_v12, %v2023_v14  ;;  %v9099_v40 = vadd.f32 %v2609_v13, %v2418_v4  ;;  %2946 = vmatmul.f32.gmra.mxu1 %v8156_v2  ;;  %3156 = vmatpush.msra.mxu2 %v6426_v54 }
 0x3d2   : > { %v9102_v19 = vmax.f32 %v2144_v34, 0.0 }
 0x3d3   : > { %13527 = vst [vmem:[#allocation96_spill] sm:$0xff] %v9099_v40  ;;  %v9104_v15 = vmax.f32 %v2145_v43, 0.0 }
 0x3d4   : > { %13528 = vst [vmem:[#allocation126_spill] sm:$0xff] %v9102_v19  ;;  %2468 = vmatmul.f32.gmra.mxu2 %v9102_v19 }
 0x3d5   : > { %13529 = vst [vmem:[#allocation97_spill] sm:$0xff] %v9104_v15  ;;  %2659 = vmatmul.f32.gmra.mxu3 %v9104_v15  ;;  %v1588_v41 = vpop.f32.mrf.mxu0  ;;  %v13636_v15 = vld [vmem:[#allocation44_spill] sm:$0xff] }
 0x3d6   : > { %v2024_v14 = vmax.f32 %v1908_v21, %v1588_v41  ;;  %v1779_v4 = vpop.f32.mrf.mxu1  ;;  %v13536_v41 = vld [vmem:[#allocation119_spill] sm:$0xff] }
 0x3d7   : > { %v2025_v10 = vmax.f32 %v1909_v39, %v1779_v4  ;;  %v2421_v13 = vpop.f32.mrf.mxu2  ;;  %v1910_v39 = vmax.f32 %v13535_v25, %v8148_v36 }
 0x3d8   : > { %v2146_v34 = vadd.f32 %v8093_v47, %v2024_v14  ;;  %v2612_v40 = vpop.f32.mrf.mxu3  ;;  %2760 = vmatmul.f32.gmra.mxu0 %v8171_v44 }
 0x3d9   : > { %v2147_v43 = vadd.f32 %v8097_v12, %v2025_v10  ;;  %v9115_v5 = vadd.f32 %v2612_v40, %v2421_v13  ;;  %2949 = vmatmul.f32.gmra.mxu1 %v8175_v63  ;;  %v1911_v40 = vmax.f32 %v13536_v41, %v8152_v3 }
 0x3da   : > { %v9121_v37 = vmax.f32 %v2146_v34, 0.0 }
 0x3db   : > { %13532 = vst [vmem:[#allocation130_spill] sm:$0xff] %v9115_v5  ;;  %v9123_v21 = vmax.f32 %v2147_v43, 0.0 }
 0x3dc   : > { %13533 = vst [vmem:[#allocation98_spill] sm:$0xff] %v9121_v37  ;;  %2471 = vmatmul.f32.gmra.mxu2 %v9121_v37 }
 0x3dd   : > { %13534 = vst [vmem:[#allocation131_spill] sm:$0xff] %v9123_v21  ;;  %2662 = vmatmul.f32.gmra.mxu3 %v9123_v21  ;;  %v1591_v14 = vpop.f32.mrf.mxu0  ;;  %v13631_v21 = vld [vmem:[#allocation42_spill] sm:$0xff] }
 0x3de   : > { %v2026_v4 = vmax.f32 %v1910_v39, %v1591_v14  ;;  %v1782_v10 = vpop.f32.mrf.mxu1  ;;  %v13540_v39 = vld [vmem:[#allocation122_spill] sm:$0xff] }
 0x3df   : > { %v2027_v13 = vmax.f32 %v1911_v40, %v1782_v10  ;;  %v2424_v5 = vpop.f32.mrf.mxu2  ;;  %v1912_v41 = vmax.f32 %v13540_v39, %v8173_v46  ;;  %v13541_v40 = vld [vmem:[#allocation123_spill] sm:$0xff] }
 0x3e0   : > { %v2148_v34 = vadd.f32 %v8093_v47, %v2026_v4  ;;  %v2615_v54 = vpop.f32.mrf.mxu3  ;;  %2763 = vmatmul.f32.gmra.mxu0 %v8192_v53  ;;  %v1913_v14 = vmax.f32 %v13541_v40, %v8177_v9  ;;  %v6441_v9 = vld [vmem:[%s12750_s3 + $0x2a0] sm:$0xff]  ;;  %v13545_v40 = vld [vmem:[#allocation125_spill] sm:$0xff] }
 0x3e1   : > { %v2149_v43 = vadd.f32 %v8097_v12, %v2027_v13  ;;  %v9134_v36 = vadd.f32 %v2615_v54, %v2424_v5  ;;  %2952 = vmatmul.f32.gmra.mxu1 %v8194_v62  ;;  %3346 = vmatpush.msra.mxu3 %v6441_v9 }
 0x3e2   : > { %v9137_v25 = vmax.f32 %v2148_v34, 0.0 }
 0x3e3   : > { %13537 = vst [vmem:[#allocation99_spill] sm:$0xff] %v9134_v36  ;;  %v9139_v3 = vmax.f32 %v2149_v43, 0.0 }
 0x3e4   : > { %13538 = vst [vmem:[#allocation134_spill] sm:$0xff] %v9137_v25  ;;  %2474 = vmatmul.f32.gmra.mxu2 %v9137_v25  ;;  %v13630_v25 = vld [vmem:[#allocation45_spill] sm:$0xff] }
 0x3e5   : > { %13539 = vst [vmem:[#allocation100_spill] sm:$0xff] %v9139_v3  ;;  %2665 = vmatmul.f32.gmra.mxu3 %v9139_v3  ;;  %v1594_v4 = vpop.f32.mrf.mxu0 }
 0x3e6   : > { %v2028_v10 = vmax.f32 %v1912_v41, %v1594_v4  ;;  %v1785_v5 = vpop.f32.mrf.mxu1  ;;  %v13546_v4 = vld [vmem:[#allocation127_spill] sm:$0xff] }
 0x3e7   : > { %v2029_v13 = vmax.f32 %v1913_v14, %v1785_v5  ;;  %v2427_v54 = vpop.f32.mrf.mxu2  ;;  %v1914_v14 = vmax.f32 %v13545_v40, %v8197_v6 }
 0x3e8   : > { %v2150_v34 = vadd.f32 %v8093_v47, %v2028_v10  ;;  %v2618_v36 = vpop.f32.mrf.mxu3  ;;  %2766 = vmatmul.f32.gmra.mxu0 %v8213_v61 }
 0x3e9   : > { %v2151_v43 = vadd.f32 %v8097_v12, %v2029_v13  ;;  %v9150_v46 = vadd.f32 %v2618_v36, %v2427_v54  ;;  %2955 = vmatmul.f32.gmra.mxu1 %v8215_v60  ;;  %v1915_v36 = vmax.f32 %v13546_v4, %v8200_v11 }
 0x3ea   : > { %v9156_v39 = vmax.f32 %v2150_v34, 0.0 }
 0x3eb   : > { %13542 = vst [vmem:[#allocation135_spill] sm:$0xff] %v9150_v46  ;;  %v9158_v41 = vmax.f32 %v2151_v43, 0.0 }
 0x3ec   : > { %13543 = vst [vmem:[#allocation101_spill] sm:$0xff] %v9156_v39  ;;  %2477 = vmatmul.f32.gmra.mxu2 %v9156_v39  ;;  %v13627_v39 = vld [vmem:[#allocation36_spill] sm:$0xff] }
 0x3ed   : > { %13544 = vst [vmem:[#allocation138_spill] sm:$0xff] %v9158_v41  ;;  %2668 = vmatmul.f32.gmra.mxu3 %v9158_v41  ;;  %v1597_v10 = vpop.f32.mrf.mxu0 }
 0x3ee   : > { %v2030_v5 = vmax.f32 %v1914_v14, %v1597_v10  ;;  %v1788_v13 = vpop.f32.mrf.mxu1  ;;  %v13550_v14 = vld [vmem:[#allocation128_spill] sm:$0xff] }
 0x3ef   : > { %v2031_v54 = vmax.f32 %v1915_v36, %v1788_v13  ;;  %v2430_v46 = vpop.f32.mrf.mxu2  ;;  %v1916_v4 = vmax.f32 %v13550_v14, %v8222_v17  ;;  %v13551_v36 = vld [vmem:[#allocation129_spill] sm:$0xff] }
 0x3f0   : > { %v2152_v34 = vadd.f32 %v8093_v47, %v2030_v5  ;;  %v2621_v9 = vpop.f32.mrf.mxu3  ;;  %2769 = vmatmul.f32.gmra.mxu0 %v8234_v20  ;;  %v1917_v10 = vmax.f32 %v13551_v36, %v8227_v16 }
 0x3f1   : > { %v2153_v43 = vadd.f32 %v8097_v12, %v2031_v54  ;;  %v9169_v6 = vadd.f32 %v2621_v9, %v2430_v46  ;;  %2958 = vmatmul.f32.gmra.mxu1 %v8236_v31  ;;  %v6425_v46 = vld [vmem:[%s12750_s3 + $0x220] sm:$0xff] }
 0x3f2   : > { %v9172_v40 = vmax.f32 %v2152_v34, 0.0  ;;  %3157 = vmatpush.msra.mxu2 %v6425_v46 }
 0x3f3   : > { %13547 = vst [vmem:[#allocation102_spill] sm:$0xff] %v9169_v6  ;;  %v9174_v11 = vmax.f32 %v2153_v43, 0.0 }
 0x3f4   : > { %13548 = vst [vmem:[#allocation139_spill] sm:$0xff] %v9172_v40  ;;  %2480 = vmatmul.f32.gmra.mxu2 %v9172_v40  ;;  %v13624_v40 = vld [vmem:[#allocation34_spill] sm:$0xff] }
 0x3f5   : > { %13549 = vst [vmem:[#allocation103_spill] sm:$0xff] %v9174_v11  ;;  %2671 = vmatmul.f32.gmra.mxu3 %v9174_v11  ;;  %v1600_v5 = vpop.f32.mrf.mxu0 }
 0x3f6   : > { %v2032_v13 = vmax.f32 %v1916_v4, %v1600_v5  ;;  %v1791_v54 = vpop.f32.mrf.mxu1  ;;  %v13555_v4 = vld [vmem:[#allocation132_spill] sm:$0xff] }
 0x3f7   : > { %v2033_v34 = vmax.f32 %v1917_v10, %v1791_v54  ;;  %v2433_v9 = vpop.f32.mrf.mxu2  ;;  %v1918_v5 = vmax.f32 %v13555_v4, %v8249_v18  ;;  %v13556_v10 = vld [vmem:[#allocation133_spill] sm:$0xff] }
 0x3f8   : > { %v2154_v43 = vadd.f32 %v8093_v47, %v2032_v13  ;;  %v2624_v17 = vpop.f32.mrf.mxu3  ;;  %2772 = vmatmul.f32.gmra.mxu0 %v8258_v29  ;;  %v1919_v46 = vmax.f32 %v13556_v10, %v8256_v38  ;;  %v6440_v38 = vld [vmem:[%s12750_s3 + $0x298] sm:$0xff]  ;;  %v13560_v10 = vld [vmem:[#allocation136_spill] sm:$0xff] }
 0x3f9   : > { %v2155_v14 = vadd.f32 %v8097_v12, %v2033_v34  ;;  %v9188_v16 = vadd.f32 %v2624_v17, %v2433_v9  ;;  %2961 = vmatmul.f32.gmra.mxu1 %v8260_v33  ;;  %3347 = vmatpush.msra.mxu3 %v6440_v38 }
 0x3fa   : > { %v9191_v36 = vmax.f32 %v2154_v43, 0.0 }
 0x3fb   : > { %13552 = vst [vmem:[#allocation142_spill] sm:$0xff] %v9188_v16  ;;  %v9193_v6 = vmax.f32 %v2155_v14, 0.0 }
 0x3fc   : > { %13553 = vst [vmem:[#allocation104_spill] sm:$0xff] %v9191_v36  ;;  %2483 = vmatmul.f32.gmra.mxu2 %v9191_v36  ;;  %v13621_v36 = vld [vmem:[#allocation31_spill] sm:$0xff] }
 0x3fd   : > { %13554 = vst [vmem:[#allocation144_spill] sm:$0xff] %v9193_v6  ;;  %2674 = vmatmul.f32.gmra.mxu3 %v9193_v6  ;;  %v1603_v13 = vpop.f32.mrf.mxu0  ;;  %v13619_v6 = vld [vmem:[#allocation28_spill] sm:$0xff] }
 0x3fe   : > { %v2034_v54 = vmax.f32 %v1918_v5, %v1603_v13  ;;  %v1794_v34 = vpop.f32.mrf.mxu1  ;;  %v13561_v13 = vld [vmem:[#allocation137_spill] sm:$0xff] }
 0x3ff   : > { %v2035_v9 = vmax.f32 %v1919_v46, %v1794_v34  ;;  %v2436_v17 = vpop.f32.mrf.mxu2  ;;  %v1920_v46 = vmax.f32 %v13560_v10, %v8277_v57 }
 0x400   : > { %v2156_v43 = vadd.f32 %v8093_v47, %v2034_v54  ;;  %v2627_v16 = vpop.f32.mrf.mxu3  ;;  %2775 = vmatmul.f32.gmra.mxu0 %v8275_v45 }
 0x401   : > { %v2157_v14 = vadd.f32 %v8097_v12, %v2035_v9  ;;  %v9204_v18 = vadd.f32 %v2627_v16, %v2436_v17  ;;  %2964 = vmatmul.f32.gmra.mxu1 %v8279_v35  ;;  %v1921_v16 = vmax.f32 %v13561_v13, %v8281_v58 }
 0x402   : > { %v9210_v4 = vmax.f32 %v2156_v43, 0.0 }
 0x403   : > { %13557 = vst [vmem:[#allocation105_spill] sm:$0xff] %v9204_v18  ;;  %v9212_v5 = vmax.f32 %v2157_v14, 0.0 }
 0x404   : > { %13558 = vst [vmem:[#allocation148_spill] sm:$0xff] %v9210_v4  ;;  %2486 = vmatmul.f32.gmra.mxu2 %v9210_v4 }
 0x405   : > { %13559 = vst [vmem:[#allocation106_spill] sm:$0xff] %v9212_v5  ;;  %2677 = vmatmul.f32.gmra.mxu3 %v9212_v5  ;;  %v1606_v54 = vpop.f32.mrf.mxu0 }
 0x406   : > { %v2036_v34 = vmax.f32 %v1920_v46, %v1606_v54  ;;  %v1797_v9 = vpop.f32.mrf.mxu1  ;;  %v13565_v46 = vld [vmem:[#allocation140_spill] sm:$0xff] }
 0x407   : > { %v2037_v17 = vmax.f32 %v1921_v16, %v1797_v9  ;;  %v2439_v18 = vpop.f32.mrf.mxu2  ;;  %v1922_v13 = vmax.f32 %v13565_v46, %v8304_v49  ;;  %v13566_v16 = vld [vmem:[#allocation141_spill] sm:$0xff] }
 0x408   : > { %v2158_v43 = vadd.f32 %v8093_v47, %v2036_v34  ;;  %v2630_v38 = vpop.f32.mrf.mxu3  ;;  %2778 = vmatmul.f32.gmra.mxu0 %v8299_v56  ;;  %v1923_v54 = vmax.f32 %v13566_v16, %v8307_v1  ;;  %v6424_v1 = vld [vmem:[%s12750_s3 + $0x218] sm:$0xff]  ;;  %v13570_v16 = vld [vmem:[#allocation143_spill] sm:$0xff] }
 0x409   : > { %v2159_v14 = vadd.f32 %v8097_v12, %v2037_v17  ;;  %v9223_v57 = vadd.f32 %v2630_v38, %v2439_v18  ;;  %2967 = vmatmul.f32.gmra.mxu1 %v8301_v42  ;;  %3158 = vmatpush.msra.mxu2 %v6424_v1 }
 0x40a   : > { %v9226_v10 = vmax.f32 %v2158_v43, 0.0 }
 0x40b   : > { %13562 = vst [vmem:[#allocation149_spill] sm:$0xff] %v9223_v57  ;;  %v9228_v58 = vmax.f32 %v2159_v14, 0.0 }
 0x40c   : > { %13563 = vst [vmem:[#allocation107_spill] sm:$0xff] %v9226_v10  ;;  %2489 = vmatmul.f32.gmra.mxu2 %v9226_v10 }
 0x40d   : > { %13564 = vst [vmem:[#allocation152_spill] sm:$0xff] %v9228_v58  ;;  %2680 = vmatmul.f32.gmra.mxu3 %v9228_v58  ;;  %v1609_v34 = vpop.f32.mrf.mxu0  ;;  %v13585_v58 = vld [vmem:[#allocation8_spill] sm:$0xff] }
 0x40e   : > { %v2038_v9 = vmax.f32 %v1922_v13, %v1609_v34  ;;  %v1800_v18 = vpop.f32.mrf.mxu1  ;;  %v13571_v34 = vld [vmem:[#allocation145_spill] sm:$0xff] }
 0x40f   : > { %v2039_v17 = vmax.f32 %v1923_v54, %v1800_v18  ;;  %v2442_v38 = vpop.f32.mrf.mxu2  ;;  %v1924_v54 = vmax.f32 %v13570_v16, %v8332_v8 }
 0x410   : > { %v2160_v43 = vadd.f32 %v8093_v47, %v2038_v9  ;;  %v2633_v57 = vpop.f32.mrf.mxu3  ;;  %2781 = vmatmul.f32.gmra.mxu0 %v8320_v23 }
 0x411   : > { %v2161_v14 = vadd.f32 %v8097_v12, %v2039_v17  ;;  %v9239_v49 = vadd.f32 %v2633_v57, %v2442_v38  ;;  %2970 = vmatmul.f32.gmra.mxu1 %v8322_v27  ;;  %v1925_v57 = vmax.f32 %v13571_v34, %v8337_v7 }
 0x412   : > { %v9245_v46 = vmax.f32 %v2160_v43, 0.0 }
 0x413   : > { %13567 = vst [vmem:[#allocation108_spill] sm:$0xff] %v9239_v49  ;;  %v9247_v13 = vmax.f32 %v2161_v14, 0.0 }
 0x414   : > { %13568 = vst [vmem:[#allocation153_spill] sm:$0xff] %v9245_v46  ;;  %2492 = vmatmul.f32.gmra.mxu2 %v9245_v46 }
 0x415   : > { %13569 = vst [vmem:[#allocation109_spill] sm:$0xff] %v9247_v13  ;;  %2683 = vmatmul.f32.gmra.mxu3 %v9247_v13  ;;  %v1612_v9 = vpop.f32.mrf.mxu0 }
 0x416   : > { %v2040_v18 = vmax.f32 %v1924_v54, %v1612_v9  ;;  %v1803_v17 = vpop.f32.mrf.mxu1  ;;  %v13575_v54 = vld [vmem:[#allocation146_spill] sm:$0xff] }
 0x417   : > { %v2041_v38 = vmax.f32 %v1925_v57, %v1803_v17  ;;  %v2445_v49 = vpop.f32.mrf.mxu2  ;;  %v1926_v34 = vmax.f32 %v13575_v54, %v8362_v30  ;;  %v13576_v57 = vld [vmem:[#allocation147_spill] sm:$0xff]  ;;  %v6439_v30 = vld [vmem:[%s12750_s3 + $0x290] sm:$0xff] }
 0x418   : > { %v2162_v43 = vadd.f32 %v8093_v47, %v2040_v18  ;;  %v2636_v1 = vpop.f32.mrf.mxu3  ;;  %2784 = vmatmul.f32.gmra.mxu0 %v8347_v0  ;;  %v1927_v9 = vmax.f32 %v13576_v57, %v8369_v32  ;;  %v13578_v57 = vld [vmem:[#allocation7_spill] sm:$0xff]  ;;  %3348 = vmatpush.msra.mxu3 %v6439_v30  ;;  %v13582_v30 = vld [vmem:[#allocation150_spill] sm:$0xff] }
 0x419   : > { %v2163_v14 = vadd.f32 %v8097_v12, %v2041_v38  ;;  %v9258_v8 = vadd.f32 %v2636_v1, %v2445_v49  ;;  %2973 = vmatmul.f32.gmra.mxu1 %v8349_v26 }
 0x41a   : > { %v9261_v16 = vmax.f32 %v2162_v43, 0.0  ;;  %v6423_v43 = vld [vmem:[%s12750_s3 + $0x210] sm:$0xff] }
 0x41b   : > { %13572 = vst [vmem:[#allocation156_spill] sm:$0xff] %v9258_v8  ;;  %v9263_v7 = vmax.f32 %v2163_v14, 0.0  ;;  %3159 = vmatpush.msra.mxu2 %v6423_v43  ;;  %v13581_v43 = vld [vmem:[#allocation13_spill] sm:$0xff] }
 0x41c   : > { %13573 = vst [vmem:[#allocation110_spill] sm:$0xff] %v9261_v16  ;;  %2495 = vmatmul.f32.gmra.mxu2 %v9261_v16 }
 0x41d   : > { %13574 = vst [vmem:[#allocation157_spill] sm:$0xff] %v9263_v7  ;;  %2686 = vmatmul.f32.gmra.mxu3 %v9263_v7  ;;  %v1615_v18 = vpop.f32.mrf.mxu0 }
 0x41e   : > { %v2042_v17 = vmax.f32 %v1926_v34, %v1615_v18  ;;  %v1806_v49 = vpop.f32.mrf.mxu1  ;;  %v6438_v18 = vld [vmem:[%s12750_s3 + $0x288] sm:$0xff] }
 0x41f   : > { %v2043_v38 = vmax.f32 %v1927_v9, %v1806_v49  ;;  %v2448_v1 = vpop.f32.mrf.mxu2  ;;  %v6422_v9 = vld [vmem:[%s12750_s3 + $0x208] sm:$0xff]  ;;  %v6421_v49 = vld [vmem:[%s12750_s3 + $0x200] sm:$0xff]  ;;  %3349 = vmatpush.msra.mxu3 %v6438_v18 }
 0x420   : > { %v2164_v14 = vadd.f32 %v8093_v47, %v2042_v17  ;;  %v2639_v54 = vpop.f32.mrf.mxu3  ;;  %2787 = vmatmul.f32.gmra.mxu0 %v8371_v24  ;;  %3160 = vmatpush.msra.mxu2 %v6422_v9 }
 0x421   : > { %v2165_v32 = vadd.f32 %v8097_v12, %v2043_v38  ;;  %v9280_v34 = vadd.f32 %v2639_v54, %v2448_v1  ;;  %2976 = vmatmul.f32.gmra.mxu1 %v13578_v57  ;;  %v6437_v1 = vld [vmem:[%s12750_s3 + $0x280] sm:$0xff]  ;;  %v1928_v54 = vmax.f32 %v13582_v30, %v13581_v43 }
 0x422   : > { %v9289_v17 = vmax.f32 %v2164_v14, 0.0  ;;  %v13584_v14 = vld [vmem:[#allocation151_spill] sm:$0xff]  ;;  %3161 = vmatpush.msra.mxu2 %v6421_v49  ;;  %3350 = vmatpush.msra.mxu3 %v6437_v1  ;;  %v13590_v49 = vld [vmem:[#allocation12_spill] sm:$0xff] }
 0x423   : > { %13577 = vst [vmem:[#allocation111_spill] sm:$0xff] %v9280_v34  ;;  %v9294_v38 = vmax.f32 %v2165_v32, 0.0  ;;  %v13583_v34 = vld [vmem:[#allocation10_spill] sm:$0xff] }
 0x424   : > { %13579 = vst [vmem:[#allocation160_spill] sm:$0xff] %v9289_v17  ;;  %2498 = vmatmul.f32.gmra.mxu2 %v9289_v17  ;;  %v1929_v8 = vmax.f32 %v13584_v14, %v13583_v34  ;;  %v13587_v17 = vld [vmem:[#allocation9_spill] sm:$0xff] }
 0x425   : > { %13580 = vst [vmem:[#allocation112_spill] sm:$0xff] %v9294_v38  ;;  %2689 = vmatmul.f32.gmra.mxu3 %v9294_v38  ;;  %v1618_v9 = vpop.f32.mrf.mxu0 }
 0x426   : > { %v2044_v7 = vmax.f32 %v1928_v54, %v1618_v9  ;;  %v1809_v32 = vpop.f32.mrf.mxu1  ;;  %v13591_v54 = vld [vmem:[#allocation154_spill] sm:$0xff] }
 0x427   : > { %v2045_v18 = vmax.f32 %v1929_v8, %v1809_v32  ;;  %v2451_v16 = vpop.f32.mrf.mxu2  ;;  %v1930_v1 = vmax.f32 %v13591_v54, %v13590_v49  ;;  %v13592_v8 = vld [vmem:[#allocation14_spill] sm:$0xff]  ;;  %v13596_v54 = vld [vmem:[#allocation17_spill] sm:$0xff] }
 0x428   : > { %v2166_v13 = vadd.f32 %v8093_v47, %v2044_v7  ;;  %v2642_v46 = vpop.f32.mrf.mxu3  ;;  %2790 = vmatmul.f32.gmra.mxu0 %v13585_v58  ;;  %v13593_v7 = vld [vmem:[#allocation155_spill] sm:$0xff] }
 0x429   : > { %v2167_v43 = vadd.f32 %v8097_v12, %v2045_v18  ;;  %v9308_v30 = vadd.f32 %v2642_v46, %v2451_v16  ;;  %2979 = vmatmul.f32.gmra.mxu1 %v13587_v17  ;;  %v1931_v9 = vmax.f32 %v13593_v7, %v13592_v8  ;;  %v13599_v7 = vld [vmem:[#allocation16_spill] sm:$0xff] }
 0x42a   : > { %v9311_v34 = vmax.f32 %v2166_v13, 0.0 }
 0x42b   : > { %13586 = vst [vmem:[#allocation161_spill] sm:$0xff] %v9308_v30  ;;  %v9313_v14 = vmax.f32 %v2167_v43, 0.0  ;;  %v13594_v43 = vld [vmem:[#allocation11_spill] sm:$0xff] }
 0x42c   : > { %13588 = vst [vmem:[#allocation113_spill] sm:$0xff] %v9311_v34  ;;  %2501 = vmatmul.f32.gmra.mxu2 %v9311_v34 }
 0x42d   : > { %13589 = vst [vmem:[#allocation114_spill] sm:$0xff] %v9313_v14  ;;  %2692 = vmatmul.f32.gmra.mxu3 %v9313_v14  ;;  %v1621_v32 = vpop.f32.mrf.mxu0 }
 0x42e   : > { %v2046_v18 = vmax.f32 %v1930_v1, %v1621_v32  ;;  %v1812_v46 = vpop.f32.mrf.mxu1  ;;  %v13600_v1 = vld [vmem:[#allocation158_spill] sm:$0xff] }
 0x42f   : > { %v2047_v16 = vmax.f32 %v1931_v9, %v1812_v46  ;;  %v2454_v30 = vpop.f32.mrf.mxu2  ;;  %v1932_v32 = vmax.f32 %v13600_v1, %v13599_v7  ;;  %v13601_v9 = vld [vmem:[#allocation18_spill] sm:$0xff]  ;;  %v13605_v1 = vld [vmem:[#allocation21_spill] sm:$0xff] }
 0x430   : > { %v2168_v13 = vadd.f32 %v8093_v47, %v2046_v18  ;;  %v2645_v38 = vpop.f32.mrf.mxu3  ;;  %2793 = vmatmul.f32.gmra.mxu0 %v13594_v43  ;;  %v13602_v18 = vld [vmem:[#allocation159_spill] sm:$0xff] }
 0x431   : > { %v2169_v10 = vadd.f32 %v8097_v12, %v2047_v16  ;;  %v9324_v49 = vadd.f32 %v2645_v38, %v2454_v30  ;;  %2982 = vmatmul.f32.gmra.mxu1 %v13596_v54  ;;  %v1933_v46 = vmax.f32 %v13602_v18, %v13601_v9 }
 0x432   : > { %v9327_v34 = vmax.f32 %v2168_v13, 0.0 }
 0x433   : > { %13595 = vst [vmem:[#allocation115_spill] sm:$0xff] %v9324_v49  ;;  %v9329_v8 = vmax.f32 %v2169_v10, 0.0  ;;  %v13603_v10 = vld [vmem:[#allocation15_spill] sm:$0xff] }
 0x434   : > { %13597 = vst [vmem:[#allocation118_spill] sm:$0xff] %v9327_v34  ;;  %2504 = vmatmul.f32.gmra.mxu2 %v9327_v34 }
 0x435   : > { %13598 = vst [vmem:[#allocation119_spill] sm:$0xff] %v9329_v8  ;;  %2695 = vmatmul.f32.gmra.mxu3 %v9329_v8  ;;  %v1624_v14 = vpop.f32.mrf.mxu0 }
 0x436   : > { %v2048_v16 = vmax.f32 %v1932_v32, %v1624_v14  ;;  %v1815_v38 = vpop.f32.mrf.mxu1 }
 0x437   : > { %v2049_v30 = vmax.f32 %v1933_v46, %v1815_v38  ;;  %v2457_v49 = vpop.f32.mrf.mxu2  ;;  %v13608_v46 = vld [vmem:[#allocation19_spill] sm:$0xff] }
 0x438   : > { %v2170_v13 = vadd.f32 %v8093_v47, %v2048_v16  ;;  %v2648_v5 = vpop.f32.mrf.mxu3  ;;  %2796 = vmatmul.f32.gmra.mxu0 %v13603_v10 }
 0x439   : > { %v2171_v4 = vadd.f32 %v8097_v12, %v2049_v30  ;;  %v9340_v7 = vadd.f32 %v2648_v5, %v2457_v49  ;;  %2985 = vmatmul.f32.gmra.mxu1 %v13605_v1  ;;  %v13610_v5 = vld [vmem:[#allocation25_spill] sm:$0xff]  ;;  %v13611_v30 = vld [vmem:[#allocation22_spill] sm:$0xff] }
 0x43a   : > { %v9343_v34 = vmax.f32 %v2170_v13, 0.0 }
 0x43b   : > { %13604 = vst [vmem:[#allocation122_spill] sm:$0xff] %v9340_v7  ;;  %v9345_v9 = vmax.f32 %v2171_v4, 0.0  ;;  %v13613_v7 = vld [vmem:[#allocation23_spill] sm:$0xff] }
 0x43c   : > { %13606 = vst [vmem:[#allocation123_spill] sm:$0xff] %v9343_v34  ;;  %2507 = vmatmul.f32.gmra.mxu2 %v9343_v34  ;;  %v13616_v34 = vld [vmem:[#allocation26_spill] sm:$0xff] }
 0x43d   : > { %13607 = vst [vmem:[#allocation125_spill] sm:$0xff] %v9345_v9  ;;  %2698 = vmatmul.f32.gmra.mxu3 %v9345_v9  ;;  %v9349_v14 = vpop.f32.mrf.mxu0 }
 0x43e   : > { %v9351_v47 = vpop.f32.mrf.mxu1 }
 0x43f   : > { %v2460_v32 = vpop.f32.mrf.mxu2 }
 0x440   : > { %v2651_v18 = vpop.f32.mrf.mxu3  ;;  %2799 = vmatmul.f32.gmra.mxu0 %v13608_v46 }
 0x441   : > { %v9354_v12 = vadd.f32 %v2651_v18, %v2460_v32  ;;  %2988 = vmatmul.f32.gmra.mxu1 %v13610_v5 }
 0x443   : > { %13609 = vst [vmem:[#allocation127_spill] sm:$0xff] %v9354_v12  ;;  %v13614_v12 = vld [vmem:[#allocation24_spill] sm:$0xff] }
 0x444   : > { %3162 = vmatmul.f32.vlgmr.msra.gmra.mxu2 %v8112_v52 }
 0x445   : > { %3351 = vmatmul.f32.vlgmr.msra.gmra.mxu3 %v8114_v28  ;;  %v9359_v4 = vpop.f32.mrf.mxu0 }
 0x446   : > { %v9361_v49 = vpop.f32.mrf.mxu1 }
 0x447   : > { %v2463_v16 = vpop.f32.mrf.mxu2 }
 0x448   : > { %v2654_v38 = vpop.f32.mrf.mxu3  ;;  %2802 = vmatmul.f32.gmra.mxu0 %v13611_v30 }
 0x449   : > { %v9364_v13 = vadd.f32 %v2654_v38, %v2463_v16  ;;  %2991 = vmatmul.f32.gmra.mxu1 %v13613_v7 }
 0x44b   : > { %13612 = vst [vmem:[#allocation128_spill] sm:$0xff] %v9364_v13  ;;  %v13617_v13 = vld [vmem:[#allocation33_spill] sm:$0xff] }
 0x44c   : > { %3164 = vmatmul.f32.gmra.mxu2 %v8133_v48 }
 0x44d   : > { %3353 = vmatmul.f32.gmra.mxu3 %v8135_v59  ;;  %v9369_v32 = vpop.f32.mrf.mxu0 }
 0x44e   : > { %v9371_v52 = vpop.f32.mrf.mxu1 }
 0x44f   : > { %v2466_v28 = vpop.f32.mrf.mxu2 }
 0x450   : > { %v2657_v18 = vpop.f32.mrf.mxu3  ;;  %2805 = vmatmul.f32.gmra.mxu0 %v13614_v12 }
 0x451   : > { %v9374_v9 = vadd.f32 %v2657_v18, %v2466_v28  ;;  %2994 = vmatmul.f32.gmra.mxu1 %v13616_v34 }
 0x453   : > { %13615 = vst [vmem:[#allocation129_spill] sm:$0xff] %v9374_v9 }
 0x454   : > { %3166 = vmatmul.f32.gmra.mxu2 %v8154_v55 }
 0x455   : > { %3355 = vmatmul.f32.gmra.mxu3 %v8156_v2  ;;  %v9379_v16 = vpop.f32.mrf.mxu0 }
 0x456   : > { %v9381_v48 = vpop.f32.mrf.mxu1 }
 0x457   : > { %v2469_v59 = vpop.f32.mrf.mxu2 }
 0x458   : > { %v2660_v38 = vpop.f32.mrf.mxu3  ;;  %2808 = vmatmul.f32.gmra.mxu0 %v13617_v13 }
 0x459   : > { %v9384_v8 = vadd.f32 %v2660_v38, %v2469_v59  ;;  %2997 = vmatmul.f32.gmra.mxu1 %v13619_v6 }
 0x45b   : > { %13618 = vst [vmem:[#allocation132_spill] sm:$0xff] %v9384_v8  ;;  %v13622_v8 = vld [vmem:[#allocation32_spill] sm:$0xff] }
 0x45c   : > { %3169 = vmatmul.f32.gmra.mxu2 %v8171_v44 }
 0x45d   : > { %3358 = vmatmul.f32.gmra.mxu3 %v8175_v63  ;;  %v9389_v28 = vpop.f32.mrf.mxu0 }
 0x45e   : > { %v9391_v55 = vpop.f32.mrf.mxu1 }
 0x45f   : > { %v2472_v2 = vpop.f32.mrf.mxu2 }
 0x460   : > { %v2663_v18 = vpop.f32.mrf.mxu3  ;;  %2811 = vmatmul.f32.gmra.mxu0 %v8554_v50 }
 0x461   : > { %v9394_v9 = vadd.f32 %v2663_v18, %v2472_v2  ;;  %3000 = vmatmul.f32.gmra.mxu1 %v13621_v36 }
 0x463   : > { %13620 = vst [vmem:[#allocation133_spill] sm:$0xff] %v9394_v9  ;;  %v13625_v9 = vld [vmem:[#allocation41_spill] sm:$0xff] }
 0x464   : > { %3172 = vmatmul.f32.gmra.mxu2 %v8192_v53 }
 0x465   : > { %3361 = vmatmul.f32.gmra.mxu3 %v8194_v62  ;;  %v9399_v59 = vpop.f32.mrf.mxu0 }
 0x466   : > { %v9401_v44 = vpop.f32.mrf.mxu1 }
 0x467   : > { %v2475_v63 = vpop.f32.mrf.mxu2 }
 0x468   : > { %v2666_v38 = vpop.f32.mrf.mxu3  ;;  %2814 = vmatmul.f32.gmra.mxu0 %v13622_v8 }
 0x469   : > { %v9404_v11 = vadd.f32 %v2666_v38, %v2475_v63  ;;  %3003 = vmatmul.f32.gmra.mxu1 %v13624_v40 }
 0x46b   : > { %13623 = vst [vmem:[#allocation136_spill] sm:$0xff] %v9404_v11  ;;  %v13628_v11 = vld [vmem:[#allocation39_spill] sm:$0xff] }
 0x46c   : > { %3175 = vmatmul.f32.gmra.mxu2 %v8213_v61 }
 0x46d   : > { %3364 = vmatmul.f32.gmra.mxu3 %v8215_v60  ;;  %v9409_v2 = vpop.f32.mrf.mxu0 }
 0x46e   : > { %v9411_v53 = vpop.f32.mrf.mxu1 }
 0x46f   : > { %v2478_v62 = vpop.f32.mrf.mxu2 }
 0x470   : > { %v2669_v18 = vpop.f32.mrf.mxu3  ;;  %2817 = vmatmul.f32.gmra.mxu0 %v13625_v9 }
 0x471   : > { %v9414_v41 = vadd.f32 %v2669_v18, %v2478_v62  ;;  %3006 = vmatmul.f32.gmra.mxu1 %v13627_v39  ;;  %v6644_v62 = vld [vmem:[%s12752_s5 + $0xf8] sm:$0xff] }
 0x472   : > { %4461 = vmatpush.msrb.mxu3 %v6644_v62 }
 0x473   : > { %13626 = vst [vmem:[#allocation137_spill] sm:$0xff] %v9414_v41 }
 0x474   : > { %3178 = vmatmul.f32.gmra.mxu2 %v8234_v20 }
 0x475   : > { %3367 = vmatmul.f32.gmra.mxu3 %v8236_v31  ;;  %v9419_v63 = vpop.f32.mrf.mxu0 }
 0x476   : > { %v9421_v61 = vpop.f32.mrf.mxu1 }
 0x477   : > { %v2481_v60 = vpop.f32.mrf.mxu2 }
 0x478   : > { %v2672_v38 = vpop.f32.mrf.mxu3  ;;  %2820 = vmatmul.f32.gmra.mxu0 %v13628_v11 }
 0x479   : > { %v9424_v3 = vadd.f32 %v2672_v38, %v2481_v60  ;;  %3009 = vmatmul.f32.gmra.mxu1 %v13630_v25  ;;  %v13633_v38 = vld [vmem:[#allocation43_spill] sm:$0xff] }
 0x47b   : > { %13629 = vst [vmem:[#allocation140_spill] sm:$0xff] %v9424_v3  ;;  %v6580_v3 = vld [vmem:[%s12752_s5 + $0xb8] sm:$0xff] }
 0x47c   : > { %3181 = vmatmul.f32.gmra.mxu2 %v8258_v29 }
 0x47d   : > { %3370 = vmatmul.f32.gmra.mxu3 %v8260_v33  ;;  %v9432_v20 = vpop.f32.mrf.mxu0  ;;  %4305 = vmatpush.msrb.mxu2 %v6580_v3 }
 0x47e   : > { %v9434_v31 = vpop.f32.mrf.mxu1 }
 0x47f   : > { %v2484_v18 = vpop.f32.mrf.mxu2 }
 0x480   : > { %v2675_v41 = vpop.f32.mrf.mxu3  ;;  %2823 = vmatmul.f32.gmra.mxu0 %v13631_v21 }
 0x481   : > { %v9437_v60 = vadd.f32 %v2675_v41, %v2484_v18  ;;  %3012 = vmatmul.f32.gmra.mxu1 %v13633_v38  ;;  %v13638_v18 = vld [vmem:[#allocation46_spill] sm:$0xff] }
 0x483   : > { %13632 = vst [vmem:[#allocation141_spill] sm:$0xff] %v9437_v60 }
 0x484   : > { %3184 = vmatmul.f32.gmra.mxu2 %v8275_v45 }
 0x485   : > { %3373 = vmatmul.f32.gmra.mxu3 %v8279_v35  ;;  %v9442_v62 = vpop.f32.mrf.mxu0 }
 0x486   : > { %13634 = vst [vmem:[#allocation143_spill] sm:$0xff] %v9442_v62  ;;  %v9444_v29 = vpop.f32.mrf.mxu1  ;;  %v13640_v62 = vld [vmem:[#allocation53_spill] sm:$0xff] }
 0x487   : > { %13635 = vst [vmem:[#allocation145_spill] sm:$0xff] %v9444_v29  ;;  %v2487_v33 = vpop.f32.mrf.mxu2 }
 0x488   : > { %v2678_v37 = vpop.f32.mrf.mxu3  ;;  %2826 = vmatmul.f32.gmra.mxu0 %v13636_v15 }
 0x489   : > { %v9450_v41 = vadd.f32 %v2678_v37, %v2487_v33  ;;  %3015 = vmatmul.f32.gmra.mxu1 %v13638_v18  ;;  %v13645_v33 = vld [vmem:[#allocation51_spill] sm:$0xff] }
 0x48b   : > { %13637 = vst [vmem:[#allocation146_spill] sm:$0xff] %v9450_v41 }
 0x48c   : > { %3187 = vmatmul.f32.gmra.mxu2 %v8299_v56 }
 0x48d   : > { %3376 = vmatmul.f32.gmra.mxu3 %v8301_v42  ;;  %v9455_v45 = vpop.f32.mrf.mxu0 }
 0x48e   : > { %v9457_v35 = vpop.f32.mrf.mxu1 }
 0x48f   : > { %13639 = vst [vmem:[#allocation147_spill] sm:$0xff] %v9457_v35  ;;  %v2490_v60 = vpop.f32.mrf.mxu2  ;;  %v13647_v35 = vld [vmem:[#allocation57_spill] sm:$0xff] }
 0x490   : > { %v2681_v29 = vpop.f32.mrf.mxu3  ;;  %2829 = vmatmul.f32.gmra.mxu0 %v13640_v62 }
 0x491   : > { %v9460_v19 = vadd.f32 %v2681_v29, %v2490_v60  ;;  %3018 = vmatmul.f32.gmra.mxu1 %v13642_v22  ;;  %v6516_v60 = vld [vmem:[%s12752_s5 + $0x78] sm:$0xff] }
 0x492   : > { %4149 = vmatpush.msrb.mxu1 %v6516_v60 }
 0x493   : > { %13641 = vst [vmem:[#allocation7_spill] sm:$0xff] %v9460_v19 }
 0x494   : > { %3190 = vmatmul.f32.gmra.mxu2 %v8320_v23 }
 0x495   : > { %3379 = vmatmul.f32.gmra.mxu3 %v8322_v27  ;;  %v9465_v37 = vpop.f32.mrf.mxu0 }
 0x496   : > { %13643 = vst [vmem:[#allocation13_spill] sm:$0xff] %v9465_v37  ;;  %v9467_v56 = vpop.f32.mrf.mxu1  ;;  %v13657_v37 = vld [vmem:[#allocation58_spill] sm:$0xff] }
 0x497   : > { %13644 = vst [vmem:[#allocation150_spill] sm:$0xff] %v9467_v56  ;;  %v2493_v42 = vpop.f32.mrf.mxu2  ;;  %v13650_v56 = vld [vmem:[#allocation54_spill] sm:$0xff] }
 0x498   : > { %v2684_v3 = vpop.f32.mrf.mxu3  ;;  %2832 = vmatmul.f32.gmra.mxu0 %v13645_v33 }
 0x499   : > { %v9470_v41 = vadd.f32 %v2684_v3, %v2493_v42  ;;  %3021 = vmatmul.f32.gmra.mxu1 %v13647_v35  ;;  %v13652_v3 = vld [vmem:[#allocation55_spill] sm:$0xff] }
 0x49b   : > { %13646 = vst [vmem:[#allocation10_spill] sm:$0xff] %v9470_v41 }
 0x49c   : > { %3193 = vmatmul.f32.gmra.mxu2 %v8347_v0 }
 0x49d   : > { %3382 = vmatmul.f32.gmra.mxu3 %v8349_v26  ;;  %v9478_v23 = vpop.f32.mrf.mxu0 }
 0x49e   : > { %13648 = vst [vmem:[#allocation151_spill] sm:$0xff] %v9478_v23  ;;  %v9480_v27 = vpop.f32.mrf.mxu1  ;;  %v13655_v23 = vld [vmem:[#allocation56_spill] sm:$0xff] }
 0x49f   : > { %13649 = vst [vmem:[#allocation8_spill] sm:$0xff] %v9480_v27  ;;  %v2496_v29 = vpop.f32.mrf.mxu2 }
 0x4a0   : > { %v2687_v19 = vpop.f32.mrf.mxu3  ;;  %2835 = vmatmul.f32.gmra.mxu0 %v13650_v56 }
 0x4a1   : > { %v9483_v42 = vadd.f32 %v2687_v19, %v2496_v29  ;;  %3024 = vmatmul.f32.gmra.mxu1 %v13652_v3  ;;  %v3815_v19 = vld [vmem:[%s12752_s5 + $0x38] sm:$0xff] }
 0x4a2   : > { %3993 = vmatpush.msrb.mxu0 %v3815_v19  ;;  %v6643_v19 = vld [vmem:[%s12752_s5 + $0xf0] sm:$0xff] }
 0x4a3   : > { %13651 = vst [vmem:[#allocation9_spill] sm:$0xff] %v9483_v42  ;;  %4462 = vmatpush.msrb.mxu3 %v6643_v19 }
 0x4a4   : > { %3196 = vmatmul.f32.gmra.mxu2 %v8371_v24 }
 0x4a5   : > { %3385 = vmatmul.f32.gmra.mxu3 %v13578_v57  ;;  %v9488_v60 = vpop.f32.mrf.mxu0 }
 0x4a6   : > { %13653 = vst [vmem:[#allocation12_spill] sm:$0xff] %v9488_v60  ;;  %v9490_v0 = vpop.f32.mrf.mxu1  ;;  %v13672_v60 = vld [vmem:[#allocation67_spill] sm:$0xff] }
 0x4a7   : > { %13654 = vst [vmem:[#allocation154_spill] sm:$0xff] %v9490_v0  ;;  %v2499_v26 = vpop.f32.mrf.mxu2  ;;  %v13660_v0 = vld [vmem:[#allocation65_spill] sm:$0xff] }
 0x4a8   : > { %v2690_v41 = vpop.f32.mrf.mxu3  ;;  %2838 = vmatmul.f32.gmra.mxu0 %v13655_v23 }
 0x4a9   : > { %v9493_v27 = vadd.f32 %v2690_v41, %v2499_v26  ;;  %3027 = vmatmul.f32.gmra.mxu1 %v13657_v37  ;;  %v13662_v26 = vld [vmem:[#allocation60_spill] sm:$0xff] }
 0x4ab   : > { %13656 = vst [vmem:[#allocation14_spill] sm:$0xff] %v9493_v27 }
 0x4ac   : > { %3199 = vmatmul.f32.gmra.mxu2 %v13585_v58 }
 0x4ad   : > { %3388 = vmatmul.f32.gmra.mxu3 %v13587_v17  ;;  %v9501_v24 = vpop.f32.mrf.mxu0 }
 0x4ae   : > { %13658 = vst [vmem:[#allocation155_spill] sm:$0xff] %v9501_v24  ;;  %v9503_v57 = vpop.f32.mrf.mxu1  ;;  %v13665_v24 = vld [vmem:[#allocation63_spill] sm:$0xff] }
 0x4af   : > { %13659 = vst [vmem:[#allocation11_spill] sm:$0xff] %v9503_v57  ;;  %v2502_v29 = vpop.f32.mrf.mxu2 }
 0x4b0   : > { %v2693_v42 = vpop.f32.mrf.mxu3  ;;  %2841 = vmatmul.f32.gmra.mxu0 %v13660_v0 }
 0x4b1   : > { %v9506_v41 = vadd.f32 %v2693_v42, %v2502_v29  ;;  %3030 = vmatmul.f32.gmra.mxu1 %v13662_v26  ;;  %v13667_v29 = vld [vmem:[#allocation69_spill] sm:$0xff] }
 0x4b3   : > { %13661 = vst [vmem:[#allocation17_spill] sm:$0xff] %v9506_v41 }
 0x4b4   : > { %3202 = vmatmul.f32.gmra.mxu2 %v13594_v43 }
 0x4b5   : > { %3391 = vmatmul.f32.gmra.mxu3 %v13596_v54  ;;  %v9514_v58 = vpop.f32.mrf.mxu0 }
 0x4b6   : > { %13663 = vst [vmem:[#allocation16_spill] sm:$0xff] %v9514_v58  ;;  %v9516_v17 = vpop.f32.mrf.mxu1  ;;  %v13670_v58 = vld [vmem:[#allocation66_spill] sm:$0xff] }
 0x4b7   : > { %13664 = vst [vmem:[#allocation158_spill] sm:$0xff] %v9516_v17  ;;  %v2505_v27 = vpop.f32.mrf.mxu2 }
 0x4b8   : > { %v2696_v57 = vpop.f32.mrf.mxu3  ;;  %2844 = vmatmul.f32.gmra.mxu0 %v13665_v24 }
 0x4b9   : > { %v9519_v42 = vadd.f32 %v2696_v57, %v2505_v27  ;;  %3033 = vmatmul.f32.gmra.mxu1 %v13667_v29  ;;  %v6579_v57 = vld [vmem:[%s12752_s5 + $0xb0] sm:$0xff] }
 0x4ba   : > { %4306 = vmatpush.msrb.mxu2 %v6579_v57 }
 0x4bb   : > { %13666 = vst [vmem:[#allocation18_spill] sm:$0xff] %v9519_v42 }
 0x4bc   : > { %3205 = vmatmul.f32.gmra.mxu2 %v13603_v10 }
 0x4bd   : > { %3394 = vmatmul.f32.gmra.mxu3 %v13605_v1  ;;  %v9524_v19 = vpop.f32.mrf.mxu0 }
 0x4be   : > { %13668 = vst [vmem:[#allocation159_spill] sm:$0xff] %v9524_v19  ;;  %v9526_v43 = vpop.f32.mrf.mxu1 }
 0x4bf   : > { %13669 = vst [vmem:[#allocation15_spill] sm:$0xff] %v9526_v43  ;;  %v2508_v54 = vpop.f32.mrf.mxu2  ;;  %v13675_v43 = vld [vmem:[#allocation68_spill] sm:$0xff] }
 0x4c0   : > { %v2699_v41 = vpop.f32.mrf.mxu3  ;;  %2847 = vmatmul.f32.gmra.mxu0 %v13670_v58 }
 0x4c1   : > { %v9529_v17 = vadd.f32 %v2699_v41, %v2508_v54  ;;  %3036 = vmatmul.f32.gmra.mxu1 %v13672_v60  ;;  %v13676_v41 = vld [vmem:[#allocation70_spill] sm:$0xff] }
 0x4c3   : > { %13671 = vst [vmem:[#allocation21_spill] sm:$0xff] %v9529_v17  ;;  %v13679_v17 = vld [vmem:[#allocation77_spill] sm:$0xff] }
 0x4c4   : > { %3208 = vmatmul.f32.gmra.mxu2 %v13608_v46 }
 0x4c5   : > { %3397 = vmatmul.f32.gmra.mxu3 %v13610_v5  ;;  %v9534_v27 = vpop.f32.mrf.mxu0 }
 0x4c6   : > { %13673 = vst [vmem:[#allocation19_spill] sm:$0xff] %v9534_v27  ;;  %v9536_v10 = vpop.f32.mrf.mxu1 }
 0x4c7   : > { %13674 = vst [vmem:[#allocation25_spill] sm:$0xff] %v9536_v10  ;;  %v3163_v1 = vpop.f32.mrf.mxu2  ;;  %v13680_v10 = vld [vmem:[#allocation72_spill] sm:$0xff] }
 0x4c8   : > { %v3352_v42 = vpop.f32.mrf.mxu3  ;;  %2850 = vmatmul.f32.gmra.mxu0 %v13675_v43 }
 0x4c9   : > { %3039 = vmatmul.f32.gmra.mxu1 %v13676_v41 }
 0x4cc   : > { %3211 = vmatmul.f32.gmra.mxu2 %v13611_v30 }
 0x4cd   : > { %3400 = vmatmul.f32.gmra.mxu3 %v13613_v7  ;;  %v9545_v46 = vpop.f32.mrf.mxu0  ;;  %v6515_v7 = vld [vmem:[%s12752_s5 + $0x70] sm:$0xff] }
 0x4ce   : > { %13677 = vst [vmem:[#allocation22_spill] sm:$0xff] %v9545_v46  ;;  %v9547_v5 = vpop.f32.mrf.mxu1  ;;  %4150 = vmatpush.msrb.mxu1 %v6515_v7 }
 0x4cf   : > { %13678 = vst [vmem:[#allocation23_spill] sm:$0xff] %v9547_v5  ;;  %v3165_v54 = vpop.f32.mrf.mxu2 }
 0x4d0   : > { %v3354_v1 = vpop.f32.mrf.mxu3  ;;  %2853 = vmatmul.f32.gmra.mxu0 %v13679_v17  ;;  %v13683_v54 = vld [vmem:[#allocation75_spill] sm:$0xff] }
 0x4d1   : > { %3042 = vmatmul.f32.gmra.mxu1 %v13680_v10  ;;  %v2942_v1 = vadd.f32 %v9351_v47, %v9349_v14  ;;  %v13686_v10 = vld [vmem:[#allocation27_spill] sm:$0xff]  ;;  %v13688_v14 = vld [vmem:[#allocation78_spill] sm:$0xff]  ;;  %v2945_v47 = vadd.f32 %v9361_v49, %v9359_v4  ;;  %v3814_v4 = vld [vmem:[%s12752_s5 + $0x30] sm:$0xff] }
 0x4d2   : > { %3994 = vmatpush.msrb.mxu0 %v3814_v4 }
 0x4d4   : > { %3214 = vmatmul.f32.gmra.mxu2 %v13614_v12  ;;  %v13684_v12 = vld [vmem:[#allocation81_spill] sm:$0xff] }
 0x4d5   : > { %3403 = vmatmul.f32.gmra.mxu3 %v13616_v34  ;;  %v9553_v42 = vpop.f32.mrf.mxu0 }
 0x4d6   : > { %13681 = vst [vmem:[#allocation24_spill] sm:$0xff] %v9553_v42  ;;  %v9555_v57 = vpop.f32.mrf.mxu1  ;;  %v13685_v42 = vld [vmem:[#allocation20_spill] sm:$0xff] }
 0x4d7   : > { %13682 = vst [vmem:[#allocation26_spill] sm:$0xff] %v9555_v57  ;;  %v3167_v30 = vpop.f32.mrf.mxu2 }
 0x4d8   : > { %v3356_v5 = vpop.f32.mrf.mxu3  ;;  %2856 = vmatmul.f32.gmra.mxu0 %v13683_v54 }
 0x4d9   : > { %v3357_v46 = vadd.f32 %v3356_v5, %v3167_v30  ;;  %3045 = vmatmul.f32.gmra.mxu1 %v13684_v12 }
 0x4db   : > { %v3524_v34 = vadd.f32 %v3357_v46, %v2942_v1  ;;  %v13692_v1 = vld [vmem:[#allocation30_spill] sm:$0xff] }
 0x4dc   : > { %3217 = vmatmul.f32.gmra.mxu2 %v13617_v13  ;;  %v13689_v13 = vld [vmem:[#allocation79_spill] sm:$0xff] }
 0x4dd   : > { %v3580_v57 = vmax.f32 %v13685_v42, %v3524_v34  ;;  %3406 = vmatmul.f32.gmra.mxu3 %v13619_v6  ;;  %v9567_v27 = vpop.f32.mrf.mxu0  ;;  %v13690_v6 = vld [vmem:[#allocation29_spill] sm:$0xff] }
 0x4de   : > { %v9569_v19 = vpop.f32.mrf.mxu1 }
 0x4df   : > { %v9572_v54 = vmax.f32 %v3580_v57, %v13686_v10  ;;  %v3170_v7 = vpop.f32.mrf.mxu2 }
 0x4e0   : > { %v3359_v17 = vpop.f32.mrf.mxu3  ;;  %2859 = vmatmul.f32.gmra.mxu0 %v13688_v14 }
 0x4e1   : > { %13687 = vst [vmem:[#allocation33_spill] sm:$0xff] %v9572_v54  ;;  %v3360_v46 = vadd.f32 %v3359_v17, %v3170_v7  ;;  %3048 = vmatmul.f32.gmra.mxu1 %v13689_v13  ;;  %v13694_v17 = vld [vmem:[#allocation80_spill] sm:$0xff] }
 0x4e3   : > { %v3525_v5 = vadd.f32 %v3360_v46, %v2945_v47 }
 0x4e4   : > { %3220 = vmatmul.f32.gmra.mxu2 %v8554_v50  ;;  %v2948_v50 = vadd.f32 %v9371_v52, %v9369_v32  ;;  %v6642_v32 = vld [vmem:[%s12752_s5 + $0xe8] sm:$0xff] }
 0x4e5   : > { %v3581_v42 = vmax.f32 %v13690_v6, %v3525_v5  ;;  %3409 = vmatmul.f32.gmra.mxu3 %v13621_v36  ;;  %v9581_v30 = vpop.f32.mrf.mxu0  ;;  %v13695_v36 = vld [vmem:[#allocation82_spill] sm:$0xff] }
 0x4e6   : > { %v9583_v57 = vpop.f32.mrf.mxu1  ;;  %4463 = vmatpush.msrb.mxu3 %v6642_v32 }
 0x4e7   : > { %13691 = vst [vmem:[#allocation28_spill] sm:$0xff] %v9583_v57  ;;  %v9586_v34 = vmax.f32 %v3581_v42, %v13692_v1  ;;  %v3173_v54 = vpop.f32.mrf.mxu2  ;;  %v13696_v42 = vld [vmem:[#allocation37_spill] sm:$0xff] }
 0x4e8   : > { %v3362_v49 = vpop.f32.mrf.mxu3  ;;  %2862 = vmatmul.f32.gmra.mxu0 %v13694_v17 }
 0x4e9   : > { %13693 = vst [vmem:[#allocation31_spill] sm:$0xff] %v9586_v34  ;;  %v3363_v7 = vadd.f32 %v3362_v49, %v3173_v54  ;;  %3051 = vmatmul.f32.gmra.mxu1 %v13695_v36  ;;  %v13698_v54 = vld [vmem:[#allocation89_spill] sm:$0xff] }
 0x4eb   : > { %v3526_v47 = vadd.f32 %v3363_v7, %v2948_v50 }
 0x4ec   : > { %3223 = vmatmul.f32.gmra.mxu2 %v13622_v8  ;;  %v2951_v8 = vadd.f32 %v9381_v48, %v9379_v16  ;;  %v13702_v16 = vld [vmem:[#allocation87_spill] sm:$0xff]  ;;  %v2954_v48 = vadd.f32 %v9391_v55, %v9389_v28 }
 0x4ed   : > { %v3582_v46 = vmax.f32 %v13686_v10, %v3526_v47  ;;  %3412 = vmatmul.f32.gmra.mxu3 %v13624_v40  ;;  %v9598_v5 = vpop.f32.mrf.mxu0  ;;  %v13699_v10 = vld [vmem:[#allocation84_spill] sm:$0xff]  ;;  %v13700_v47 = vld [vmem:[#allocation35_spill] sm:$0xff] }
 0x4ee   : > { %v9600_v6 = vpop.f32.mrf.mxu1  ;;  %v6578_v28 = vld [vmem:[%s12752_s5 + $0xa8] sm:$0xff] }
 0x4ef   : > { %v9603_v34 = vmax.f32 %v3582_v46, %v13696_v42  ;;  %v3176_v57 = vpop.f32.mrf.mxu2  ;;  %4307 = vmatpush.msrb.mxu2 %v6578_v28 }
 0x4f0   : > { %v3365_v52 = vpop.f32.mrf.mxu3  ;;  %2865 = vmatmul.f32.gmra.mxu0 %v13698_v54 }
 0x4f1   : > { %13697 = vst [vmem:[#allocation32_spill] sm:$0xff] %v9603_v34  ;;  %v3366_v40 = vadd.f32 %v3365_v52, %v3176_v57  ;;  %3054 = vmatmul.f32.gmra.mxu1 %v13699_v10 }
 0x4f3   : > { %v3527_v4 = vadd.f32 %v3366_v40, %v2951_v8  ;;  %v13704_v40 = vld [vmem:[#allocation38_spill] sm:$0xff] }
 0x4f4   : > { %3226 = vmatmul.f32.gmra.mxu2 %v13625_v9  ;;  %v13703_v9 = vld [vmem:[#allocation93_spill] sm:$0xff] }
 0x4f5   : > { %v3583_v49 = vmax.f32 %v13692_v1, %v3527_v4  ;;  %3415 = vmatmul.f32.gmra.mxu3 %v13627_v39  ;;  %v9615_v50 = vpop.f32.mrf.mxu0 }
 0x4f6   : > { %v9617_v7 = vpop.f32.mrf.mxu1 }
 0x4f7   : > { %v9620_v46 = vmax.f32 %v3583_v49, %v13700_v47  ;;  %v3179_v32 = vpop.f32.mrf.mxu2 }
 0x4f8   : > { %v3368_v34 = vpop.f32.mrf.mxu3  ;;  %2868 = vmatmul.f32.gmra.mxu0 %v13702_v16 }
 0x4f9   : > { %13701 = vst [vmem:[#allocation34_spill] sm:$0xff] %v9620_v46  ;;  %v3369_v57 = vadd.f32 %v3368_v34, %v3179_v32  ;;  %3057 = vmatmul.f32.gmra.mxu1 %v13703_v9  ;;  %v13706_v34 = vld [vmem:[#allocation90_spill] sm:$0xff] }
 0x4fb   : > { %v3528_v1 = vadd.f32 %v3369_v57, %v2954_v48 }
 0x4fc   : > { %3229 = vmatmul.f32.gmra.mxu2 %v13628_v11  ;;  %v2957_v11 = vadd.f32 %v9401_v44, %v9399_v59  ;;  %v13710_v59 = vld [vmem:[#allocation117_spill] sm:$0xff]  ;;  %v2960_v44 = vadd.f32 %v9411_v53, %v9409_v2  ;;  %v6514_v2 = vld [vmem:[%s12752_s5 + $0x68] sm:$0xff] }
 0x4fd   : > { %v3584_v39 = vmax.f32 %v13696_v42, %v3528_v1  ;;  %3418 = vmatmul.f32.gmra.mxu3 %v13630_v25  ;;  %v9629_v52 = vpop.f32.mrf.mxu0  ;;  %v13707_v42 = vld [vmem:[#allocation116_spill] sm:$0xff]  ;;  %4151 = vmatpush.msrb.mxu1 %v6514_v2 }
 0x4fe   : > { %v9631_v8 = vpop.f32.mrf.mxu1 }
 0x4ff   : > { %v9634_v4 = vmax.f32 %v3584_v39, %v13704_v40  ;;  %v3182_v49 = vpop.f32.mrf.mxu2  ;;  %v13708_v39 = vld [vmem:[#allocation40_spill] sm:$0xff] }
 0x500   : > { %v3371_v55 = vpop.f32.mrf.mxu3  ;;  %2871 = vmatmul.f32.gmra.mxu0 %v13706_v34 }
 0x501   : > { %13705 = vst [vmem:[#allocation41_spill] sm:$0xff] %v9634_v4  ;;  %v3372_v25 = vadd.f32 %v3371_v55, %v3182_v49  ;;  %3060 = vmatmul.f32.gmra.mxu1 %v13707_v42 }
 0x503   : > { %v3529_v32 = vadd.f32 %v3372_v25, %v2957_v11  ;;  %v13712_v25 = vld [vmem:[#allocation49_spill] sm:$0xff] }
 0x504   : > { %3232 = vmatmul.f32.gmra.mxu2 %v13631_v21  ;;  %v13711_v21 = vld [vmem:[#allocation92_spill] sm:$0xff] }
 0x505   : > { %v3585_v48 = vmax.f32 %v13700_v47, %v3529_v32  ;;  %3421 = vmatmul.f32.gmra.mxu3 %v13633_v38  ;;  %v9646_v57 = vpop.f32.mrf.mxu0 }
 0x506   : > { %v9648_v1 = vpop.f32.mrf.mxu1 }
 0x507   : > { %v9651_v4 = vmax.f32 %v3585_v48, %v13708_v39  ;;  %v3185_v28 = vpop.f32.mrf.mxu2 }
 0x508   : > { %v3374_v46 = vpop.f32.mrf.mxu3  ;;  %2874 = vmatmul.f32.gmra.mxu0 %v13710_v59 }
 0x509   : > { %13709 = vst [vmem:[#allocation36_spill] sm:$0xff] %v9651_v4  ;;  %v3375_v49 = vadd.f32 %v3374_v46, %v3185_v28  ;;  %3063 = vmatmul.f32.gmra.mxu1 %v13711_v21  ;;  %v13714_v46 = vld [vmem:[#allocation94_spill] sm:$0xff] }
 0x50b   : > { %v3530_v47 = vadd.f32 %v3375_v49, %v2960_v44 }
 0x50c   : > { %3235 = vmatmul.f32.gmra.mxu2 %v13636_v15  ;;  %v2963_v15 = vadd.f32 %v9421_v61, %v9419_v63  ;;  %v2966_v63 = vadd.f32 %v9434_v31, %v9432_v20  ;;  %v3813_v20 = vld [vmem:[%s12752_s5 + $0x28] sm:$0xff] }
 0x50d   : > { %v3586_v38 = vmax.f32 %v13704_v40, %v3530_v47  ;;  %3424 = vmatmul.f32.gmra.mxu3 %v13638_v18  ;;  %v9660_v55 = vpop.f32.mrf.mxu0  ;;  %v13715_v40 = vld [vmem:[#allocation121_spill] sm:$0xff]  ;;  %3995 = vmatpush.msrb.mxu0 %v3813_v20 }
 0x50e   : > { %v9662_v11 = vpop.f32.mrf.mxu1 }
 0x50f   : > { %v9665_v32 = vmax.f32 %v3586_v38, %v13712_v25  ;;  %v3188_v48 = vpop.f32.mrf.mxu2  ;;  %v13716_v38 = vld [vmem:[#allocation47_spill] sm:$0xff] }
 0x510   : > { %v3377_v53 = vpop.f32.mrf.mxu3  ;;  %2877 = vmatmul.f32.gmra.mxu0 %v13714_v46 }
 0x511   : > { %13713 = vst [vmem:[#allocation39_spill] sm:$0xff] %v9665_v32  ;;  %v3378_v18 = vadd.f32 %v3377_v53, %v3188_v48  ;;  %3066 = vmatmul.f32.gmra.mxu1 %v13715_v40 }
 0x513   : > { %v3531_v28 = vadd.f32 %v3378_v18, %v2963_v15  ;;  %v13720_v15 = vld [vmem:[#allocation50_spill] sm:$0xff] }
 0x514   : > { %3238 = vmatmul.f32.gmra.mxu2 %v13640_v62  ;;  %v13718_v62 = vld [vmem:[#allocation124_spill] sm:$0xff] }
 0x515   : > { %v3587_v44 = vmax.f32 %v13708_v39, %v3531_v28  ;;  %3427 = vmatmul.f32.gmra.mxu3 %v13642_v22  ;;  %v9677_v49 = vpop.f32.mrf.mxu0 }
 0x516   : > { %v9679_v47 = vpop.f32.mrf.mxu1 }
 0x517   : > { %v9682_v32 = vmax.f32 %v3587_v44, %v13716_v38  ;;  %v3191_v2 = vpop.f32.mrf.mxu2  ;;  %v13724_v44 = vld [vmem:[#allocation145_spill] sm:$0xff] }
 0x518   : > { %v3380_v4 = vpop.f32.mrf.mxu3  ;;  %2880 = vmatmul.f32.gmra.mxu0 %v9086_v51 }
 0x519   : > { %13717 = vst [vmem:[#allocation45_spill] sm:$0xff] %v9682_v32  ;;  %v3381_v61 = vadd.f32 %v3380_v4, %v3191_v2  ;;  %3069 = vmatmul.f32.gmra.mxu1 %v13718_v62  ;;  %v13722_v4 = vld [vmem:[#allocation126_spill] sm:$0xff] }
 0x51b   : > { %v3532_v39 = vadd.f32 %v3381_v61, %v2966_v63 }
 0x51c   : > { %3241 = vmatmul.f32.gmra.mxu2 %v13645_v33  ;;  %v13723_v33 = vld [vmem:[#allocation143_spill] sm:$0xff] }
 0x51d   : > { %v3588_v22 = vmax.f32 %v13712_v25, %v3532_v39  ;;  %3430 = vmatmul.f32.gmra.mxu3 %v13647_v35  ;;  %v9691_v48 = vpop.f32.mrf.mxu0  ;;  %v2969_v25 = vadd.f32 %v13724_v44, %v13723_v33  ;;  %v13725_v35 = vld [vmem:[#allocation97_spill] sm:$0xff]  ;;  %v13731_v33 = vld [vmem:[#allocation131_spill] sm:$0xff] }
 0x51e   : > { %v9693_v53 = vpop.f32.mrf.mxu1 }
 0x51f   : > { %13719 = vst [vmem:[#allocation42_spill] sm:$0xff] %v9693_v53  ;;  %v9696_v18 = vmax.f32 %v3588_v22, %v13720_v15  ;;  %v3194_v28 = vpop.f32.mrf.mxu2 }
 0x520   : > { %v3383_v31 = vpop.f32.mrf.mxu3  ;;  %2883 = vmatmul.f32.gmra.mxu0 %v13722_v4 }
 0x521   : > { %13721 = vst [vmem:[#allocation43_spill] sm:$0xff] %v9696_v18  ;;  %v3384_v2 = vadd.f32 %v3383_v31, %v3194_v28  ;;  %3072 = vmatmul.f32.gmra.mxu1 %v13725_v35  ;;  %v13727_v18 = vld [vmem:[#allocation52_spill] sm:$0xff]  ;;  %v6641_v28 = vld [vmem:[%s12752_s5 + $0xe0] sm:$0xff] }
 0x522   : > { %v13729_v31 = vld [vmem:[#allocation98_spill] sm:$0xff]  ;;  %4464 = vmatpush.msrb.mxu3 %v6641_v28 }
 0x523   : > { %v3533_v63 = vadd.f32 %v3384_v2, %v2969_v25 }
 0x524   : > { %3244 = vmatmul.f32.gmra.mxu2 %v13650_v56  ;;  %v13730_v56 = vld [vmem:[#allocation147_spill] sm:$0xff] }
 0x525   : > { %v3589_v61 = vmax.f32 %v13716_v38, %v3533_v63  ;;  %3433 = vmatmul.f32.gmra.mxu3 %v13652_v3  ;;  %v9708_v39 = vpop.f32.mrf.mxu0  ;;  %v2972_v38 = vadd.f32 %v13730_v56, %v9455_v45  ;;  %v13736_v45 = vld [vmem:[#allocation134_spill] sm:$0xff] }
 0x526   : > { %v9710_v22 = vpop.f32.mrf.mxu1 }
 0x527   : > { %13726 = vst [vmem:[#allocation44_spill] sm:$0xff] %v9710_v22  ;;  %v9713_v32 = vmax.f32 %v3589_v61, %v13727_v18  ;;  %v3197_v53 = vpop.f32.mrf.mxu2  ;;  %v13734_v61 = vld [vmem:[#allocation61_spill] sm:$0xff] }
 0x528   : > { %v3386_v20 = vpop.f32.mrf.mxu3  ;;  %2886 = vmatmul.f32.gmra.mxu0 %v13729_v31 }
 0x529   : > { %13728 = vst [vmem:[#allocation46_spill] sm:$0xff] %v9713_v32  ;;  %v3387_v3 = vadd.f32 %v3386_v20, %v3197_v53  ;;  %3075 = vmatmul.f32.gmra.mxu1 %v13731_v33  ;;  %v13737_v53 = vld [vmem:[#allocation13_spill] sm:$0xff]  ;;  %v13738_v20 = vld [vmem:[#allocation150_spill] sm:$0xff] }
 0x52a   : > { %v2975_v56 = vadd.f32 %v13738_v20, %v13737_v53  ;;  %v13744_v53 = vld [vmem:[#allocation101_spill] sm:$0xff] }
 0x52b   : > { %v3534_v44 = vadd.f32 %v3387_v3, %v2972_v38 }
 0x52c   : > { %3247 = vmatmul.f32.gmra.mxu2 %v13655_v23  ;;  %v13739_v23 = vld [vmem:[#allocation100_spill] sm:$0xff] }
 0x52d   : > { %v3590_v25 = vmax.f32 %v13720_v15, %v3534_v44  ;;  %3436 = vmatmul.f32.gmra.mxu3 %v13657_v37  ;;  %v9725_v2 = vpop.f32.mrf.mxu0 }
 0x52e   : > { %13732 = vst [vmem:[#allocation53_spill] sm:$0xff] %v9725_v2  ;;  %v9727_v63 = vpop.f32.mrf.mxu1 }
 0x52f   : > { %13733 = vst [vmem:[#allocation48_spill] sm:$0xff] %v9727_v63  ;;  %v9730_v32 = vmax.f32 %v3590_v25, %v13734_v61  ;;  %v3200_v28 = vpop.f32.mrf.mxu2  ;;  %v13742_v25 = vld [vmem:[#allocation59_spill] sm:$0xff] }
 0x530   : > { %v3389_v22 = vpop.f32.mrf.mxu3  ;;  %2889 = vmatmul.f32.gmra.mxu0 %v13736_v45 }
 0x531   : > { %13735 = vst [vmem:[#allocation51_spill] sm:$0xff] %v9730_v32  ;;  %v3390_v38 = vadd.f32 %v3389_v22, %v3200_v28  ;;  %3078 = vmatmul.f32.gmra.mxu1 %v13739_v23  ;;  %v6577_v22 = vld [vmem:[%s12752_s5 + $0xa0] sm:$0xff] }
 0x532   : > { %4308 = vmatpush.msrb.mxu2 %v6577_v22 }
 0x533   : > { %v3535_v15 = vadd.f32 %v3390_v38, %v2975_v56  ;;  %v13747_v56 = vld [vmem:[#allocation138_spill] sm:$0xff] }
 0x534   : > { %3250 = vmatmul.f32.gmra.mxu2 %v13660_v0  ;;  %v13745_v0 = vld [vmem:[#allocation151_spill] sm:$0xff] }
 0x535   : > { %v3591_v37 = vmax.f32 %v13727_v18, %v3535_v15  ;;  %3439 = vmatmul.f32.gmra.mxu3 %v13662_v26  ;;  %v9739_v3 = vpop.f32.mrf.mxu0  ;;  %v13746_v18 = vld [vmem:[#allocation8_spill] sm:$0xff] }
 0x536   : > { %13740 = vst [vmem:[#allocation57_spill] sm:$0xff] %v9739_v3  ;;  %v9741_v44 = vpop.f32.mrf.mxu1  ;;  %v2978_v20 = vadd.f32 %v13746_v18, %v13745_v0  ;;  %v13752_v0 = vld [vmem:[#allocation139_spill] sm:$0xff] }
 0x537   : > { %13741 = vst [vmem:[#allocation54_spill] sm:$0xff] %v9741_v44  ;;  %v9744_v32 = vmax.f32 %v3591_v37, %v13742_v25  ;;  %v3203_v63 = vpop.f32.mrf.mxu2  ;;  %v13750_v44 = vld [vmem:[#allocation62_spill] sm:$0xff] }
 0x538   : > { %v3392_v28 = vpop.f32.mrf.mxu3  ;;  %2892 = vmatmul.f32.gmra.mxu0 %v13744_v53 }
 0x539   : > { %13743 = vst [vmem:[#allocation55_spill] sm:$0xff] %v9744_v32  ;;  %v3393_v26 = vadd.f32 %v3392_v28, %v3203_v63  ;;  %3081 = vmatmul.f32.gmra.mxu1 %v13747_v56  ;;  %v13753_v63 = vld [vmem:[#allocation12_spill] sm:$0xff]  ;;  %v13754_v28 = vld [vmem:[#allocation154_spill] sm:$0xff] }
 0x53a   : > { %v2981_v18 = vadd.f32 %v13754_v28, %v13753_v63  ;;  %v13760_v63 = vld [vmem:[#allocation104_spill] sm:$0xff] }
 0x53b   : > { %v3536_v38 = vadd.f32 %v3393_v26, %v2978_v20 }
 0x53c   : > { %3253 = vmatmul.f32.gmra.mxu2 %v13665_v24  ;;  %v13755_v24 = vld [vmem:[#allocation103_spill] sm:$0xff] }
 0x53d   : > { %v3592_v15 = vmax.f32 %v13734_v61, %v3536_v38  ;;  %3442 = vmatmul.f32.gmra.mxu3 %v13667_v29  ;;  %v9756_v37 = vpop.f32.mrf.mxu0 }
 0x53e   : > { %13748 = vst [vmem:[#allocation56_spill] sm:$0xff] %v9756_v37  ;;  %v9758_v32 = vpop.f32.mrf.mxu1 }
 0x53f   : > { %13749 = vst [vmem:[#allocation58_spill] sm:$0xff] %v9758_v32  ;;  %v9761_v3 = vmax.f32 %v3592_v15, %v13750_v44  ;;  %v3206_v22 = vpop.f32.mrf.mxu2  ;;  %v13758_v15 = vld [vmem:[#allocation64_spill] sm:$0xff] }
 0x540   : > { %v3395_v2 = vpop.f32.mrf.mxu3  ;;  %2895 = vmatmul.f32.gmra.mxu0 %v13752_v0 }
 0x541   : > { %13751 = vst [vmem:[#allocation65_spill] sm:$0xff] %v9761_v3  ;;  %v3396_v20 = vadd.f32 %v3395_v2, %v3206_v22  ;;  %3084 = vmatmul.f32.gmra.mxu1 %v13755_v24  ;;  %v13761_v2 = vld [vmem:[#allocation155_spill] sm:$0xff] }
 0x542   : > { %v13762_v22 = vld [vmem:[#allocation11_spill] sm:$0xff] }
 0x543   : > { %v3537_v61 = vadd.f32 %v3396_v20, %v2981_v18  ;;  %v2984_v28 = vadd.f32 %v13762_v22, %v13761_v2  ;;  %v13768_v2 = vld [vmem:[#allocation148_spill] sm:$0xff] }
 0x544   : > { %3256 = vmatmul.f32.gmra.mxu2 %v13670_v58  ;;  %v13763_v58 = vld [vmem:[#allocation144_spill] sm:$0xff] }
 0x545   : > { %v3593_v29 = vmax.f32 %v13742_v25, %v3537_v61  ;;  %3445 = vmatmul.f32.gmra.mxu3 %v13672_v60  ;;  %v9770_v26 = vpop.f32.mrf.mxu0 }
 0x546   : > { %13756 = vst [vmem:[#allocation60_spill] sm:$0xff] %v9770_v26  ;;  %v9772_v38 = vpop.f32.mrf.mxu1  ;;  %v13776_v26 = vld [vmem:[#allocation71_spill] sm:$0xff] }
 0x547   : > { %13757 = vst [vmem:[#allocation63_spill] sm:$0xff] %v9772_v38  ;;  %v9775_v3 = vmax.f32 %v3593_v29, %v13758_v15  ;;  %v3209_v32 = vpop.f32.mrf.mxu2  ;;  %v13766_v29 = vld [vmem:[#allocation73_spill] sm:$0xff] }
 0x548   : > { %v3398_v37 = vpop.f32.mrf.mxu3  ;;  %2898 = vmatmul.f32.gmra.mxu0 %v13760_v63 }
 0x549   : > { %13759 = vst [vmem:[#allocation69_spill] sm:$0xff] %v9775_v3  ;;  %v3399_v18 = vadd.f32 %v3398_v37, %v3209_v32  ;;  %3087 = vmatmul.f32.gmra.mxu1 %v13763_v58  ;;  %v6513_v32 = vld [vmem:[%s12752_s5 + $0x60] sm:$0xff] }
 0x54a   : > { %4152 = vmatpush.msrb.mxu1 %v6513_v32 }
 0x54b   : > { %v3538_v25 = vadd.f32 %v3399_v18, %v2984_v28  ;;  %v13771_v28 = vld [vmem:[#allocation106_spill] sm:$0xff] }
 0x54c   : > { %3259 = vmatmul.f32.gmra.mxu2 %v13675_v43  ;;  %v13769_v43 = vld [vmem:[#allocation16_spill] sm:$0xff] }
 0x54d   : > { %v3594_v60 = vmax.f32 %v13750_v44, %v3538_v25  ;;  %3448 = vmatmul.f32.gmra.mxu3 %v13676_v41  ;;  %v9784_v20 = vpop.f32.mrf.mxu0  ;;  %v13770_v44 = vld [vmem:[#allocation158_spill] sm:$0xff]  ;;  %v13772_v25 = vld [vmem:[#allocation77_spill] sm:$0xff] }
 0x54e   : > { %13764 = vst [vmem:[#allocation66_spill] sm:$0xff] %v9784_v20  ;;  %v9786_v61 = vpop.f32.mrf.mxu1  ;;  %v2987_v22 = vadd.f32 %v13770_v44, %v13769_v43  ;;  %v13778_v43 = vld [vmem:[#allocation107_spill] sm:$0xff] }
 0x54f   : > { %13765 = vst [vmem:[#allocation67_spill] sm:$0xff] %v9786_v61  ;;  %v9789_v3 = vmax.f32 %v3594_v60, %v13766_v29  ;;  %v3212_v38 = vpop.f32.mrf.mxu2 }
 0x550   : > { %v3401_v37 = vpop.f32.mrf.mxu3  ;;  %2901 = vmatmul.f32.gmra.mxu0 %v13768_v2 }
 0x551   : > { %13767 = vst [vmem:[#allocation68_spill] sm:$0xff] %v9789_v3  ;;  %v3402_v41 = vadd.f32 %v3401_v37, %v3212_v38  ;;  %3090 = vmatmul.f32.gmra.mxu1 %v13771_v28  ;;  %v13773_v3 = vld [vmem:[#allocation72_spill] sm:$0xff]  ;;  %v13779_v38 = vld [vmem:[#allocation159_spill] sm:$0xff] }
 0x552   : > { %v13780_v37 = vld [vmem:[#allocation15_spill] sm:$0xff] }
 0x553   : > { %v3539_v18 = vadd.f32 %v3402_v41, %v2987_v22  ;;  %v2990_v44 = vadd.f32 %v13780_v37, %v13779_v38  ;;  %v13781_v41 = vld [vmem:[#allocation152_spill] sm:$0xff]  ;;  %v13787_v38 = vld [vmem:[#allocation153_spill] sm:$0xff]  ;;  %v13788_v37 = vld [vmem:[#allocation19_spill] sm:$0xff] }
 0x554   : > { %3262 = vmatmul.f32.gmra.mxu2 %v13772_v25 }
 0x555   : > { %v3595_v60 = vmax.f32 %v13758_v15, %v3539_v18  ;;  %3451 = vmatmul.f32.gmra.mxu3 %v13773_v3  ;;  %v9801_v61 = vpop.f32.mrf.mxu0  ;;  %v13782_v18 = vld [vmem:[#allocation75_spill] sm:$0xff] }
 0x556   : > { %13774 = vst [vmem:[#allocation70_spill] sm:$0xff] %v9801_v61  ;;  %v9803_v20 = vpop.f32.mrf.mxu1 }
 0x557   : > { %13775 = vst [vmem:[#allocation81_spill] sm:$0xff] %v9803_v20  ;;  %v9806_v2 = vmax.f32 %v3595_v60, %v13776_v26  ;;  %v3215_v32 = vpop.f32.mrf.mxu2 }
 0x558   : > { %v3404_v58 = vpop.f32.mrf.mxu3  ;;  %2904 = vmatmul.f32.gmra.mxu0 %v13778_v43 }
 0x559   : > { %13777 = vst [vmem:[#allocation20_spill] sm:$0xff] %v9806_v2  ;;  %v3405_v22 = vadd.f32 %v3404_v58, %v3215_v32  ;;  %3093 = vmatmul.f32.gmra.mxu1 %v13781_v41  ;;  %v13785_v2 = vld [vmem:[#allocation74_spill] sm:$0xff] }
 0x55a   : > { %v3812_v58 = vld [vmem:[%s12752_s5 + $0x20] sm:$0xff] }
 0x55b   : > { %v3540_v15 = vadd.f32 %v3405_v22, %v2990_v44  ;;  %v13789_v44 = vld [vmem:[#allocation25_spill] sm:$0xff]  ;;  %3996 = vmatpush.msrb.mxu0 %v3812_v58 }
 0x55c   : > { %3265 = vmatmul.f32.gmra.mxu2 %v13782_v18 }
 0x55d   : > { %v3596_v3 = vmax.f32 %v13766_v29, %v3540_v15  ;;  %3454 = vmatmul.f32.gmra.mxu3 %v13684_v12  ;;  %v9815_v25 = vpop.f32.mrf.mxu0  ;;  %v2993_v29 = vadd.f32 %v13789_v44, %v13788_v37  ;;  %v13790_v12 = vld [vmem:[#allocation109_spill] sm:$0xff] }
 0x55e   : > { %13783 = vst [vmem:[#allocation27_spill] sm:$0xff] %v9815_v25  ;;  %v9817_v60 = vpop.f32.mrf.mxu1  ;;  %v13798_v44 = vld [vmem:[#allocation157_spill] sm:$0xff] }
 0x55f   : > { %13784 = vst [vmem:[#allocation78_spill] sm:$0xff] %v9817_v60  ;;  %v9820_v20 = vmax.f32 %v3596_v3, %v13785_v2  ;;  %v3218_v61 = vpop.f32.mrf.mxu2  ;;  %v13793_v60 = vld [vmem:[#allocation76_spill] sm:$0xff] }
 0x560   : > { %v3407_v32 = vpop.f32.mrf.mxu3  ;;  %2907 = vmatmul.f32.gmra.mxu0 %v13787_v38 }
 0x561   : > { %13786 = vst [vmem:[#allocation79_spill] sm:$0xff] %v9820_v20  ;;  %v3408_v22 = vadd.f32 %v3407_v32, %v3218_v61  ;;  %3096 = vmatmul.f32.gmra.mxu1 %v13790_v12  ;;  %v6640_v61 = vld [vmem:[%s12752_s5 + $0xd8] sm:$0xff] }
 0x562   : > { %v13795_v32 = vld [vmem:[#allocation110_spill] sm:$0xff]  ;;  %4465 = vmatpush.msrb.mxu3 %v6640_v61 }
 0x563   : > { %v3541_v15 = vadd.f32 %v3408_v22, %v2993_v29  ;;  %v3811_v29 = vld [vmem:[%s12752_s5 + $0x18] sm:$0xff] }
 0x564   : > { %3268 = vmatmul.f32.gmra.mxu2 %v13688_v14  ;;  %v13796_v14 = vld [vmem:[#allocation22_spill] sm:$0xff]  ;;  %3997 = vmatpush.msrb.mxu0 %v3811_v29 }
 0x565   : > { %v3597_v18 = vmax.f32 %v13776_v26, %v3541_v15  ;;  %3457 = vmatmul.f32.gmra.mxu3 %v13689_v13  ;;  %v9832_v3 = vpop.f32.mrf.mxu0  ;;  %v13797_v26 = vld [vmem:[#allocation23_spill] sm:$0xff]  ;;  %v6512_v22 = vld [vmem:[%s12752_s5 + $0x58] sm:$0xff] }
 0x566   : > { %13791 = vst [vmem:[#allocation29_spill] sm:$0xff] %v9832_v3  ;;  %v9834_v20 = vpop.f32.mrf.mxu1  ;;  %v2996_v37 = vadd.f32 %v13797_v26, %v13796_v14  ;;  %4153 = vmatpush.msrb.mxu1 %v6512_v22  ;;  %v3809_v14 = vld [vmem:[%s12752_s5 + $0x8] sm:$0xff]  ;;  %v3808_v29 = vld [vmem:[%s12752_s5] sm:$0xff] }
 0x567   : > { %13792 = vst [vmem:[#allocation30_spill] sm:$0xff] %v9834_v20  ;;  %v9837_v25 = vmax.f32 %v3597_v18, %v13793_v60  ;;  %v3221_v38 = vpop.f32.mrf.mxu2  ;;  %v3810_v18 = vld [vmem:[%s12752_s5 + $0x10] sm:$0xff]  ;;  %v6510_v26 = vld [vmem:[%s12752_s5 + $0x48] sm:$0xff]  ;;  %v6509_v22 = vld [vmem:[%s12752_s5 + $0x40] sm:$0xff] }
 0x568   : > { %v3410_v58 = vpop.f32.mrf.mxu3  ;;  %2910 = vmatmul.f32.gmra.mxu0 %v13795_v32 }
 0x569   : > { %13794 = vst [vmem:[#allocation80_spill] sm:$0xff] %v9837_v25  ;;  %v3411_v13 = vadd.f32 %v3410_v58, %v3221_v38  ;;  %3099 = vmatmul.f32.gmra.mxu1 %v13798_v44  ;;  %v6511_v38 = vld [vmem:[%s12752_s5 + $0x50] sm:$0xff]  ;;  %3998 = vmatpush.msrb.mxu0 %v3810_v18 }
 0x56a   : > { %4154 = vmatpush.msrb.mxu1 %v6511_v38  ;;  %v13803_v18 = vld [vmem:[#allocation160_spill] sm:$0xff] }
 0x56b   : > { %v3542_v15 = vadd.f32 %v3411_v13, %v2996_v37  ;;  %3999 = vmatpush.msrb.mxu0 %v3809_v14  ;;  %v13804_v38 = vld [vmem:[#allocation24_spill] sm:$0xff] }
 0x56c   : > { %3271 = vmatmul.f32.gmra.mxu2 %v13694_v17  ;;  %v13801_v17 = vld [vmem:[#allocation85_spill] sm:$0xff]  ;;  %4155 = vmatpush.msrb.mxu1 %v6510_v26 }
 0x56d   : > { %v3598_v61 = vmax.f32 %v13785_v2, %v3542_v15  ;;  %3460 = vmatmul.f32.gmra.mxu3 %v13695_v36  ;;  %v9861_v58 = vpop.f32.mrf.mxu0  ;;  %v6576_v36 = vld [vmem:[%s12752_s5 + $0x98] sm:$0xff]  ;;  %4000 = vmatpush.msrb.mxu0 %v3808_v29  ;;  %v3002_v29 = vadd.f32 %v9569_v19, %v9567_v27  ;;  %v13814_v27 = vld [vmem:[#allocation28_spill] sm:$0xff] }
 0x56e   : > { %13799 = vst [vmem:[#allocation82_spill] sm:$0xff] %v9861_v58  ;;  %v9869_v37 = vpop.f32.mrf.mxu1  ;;  %4309 = vmatpush.msrb.mxu2 %v6576_v36  ;;  %4156 = vmatpush.msrb.mxu1 %v6509_v22  ;;  %v13807_v36 = vld [vmem:[#allocation83_spill] sm:$0xff]  ;;  %v13813_v19 = vld [vmem:[#allocation118_spill] sm:$0xff] }
 0x56f   : > { %13800 = vst [vmem:[#allocation37_spill] sm:$0xff] %v9869_v37  ;;  %v9872_v13 = vmax.f32 %v3598_v61, %v13801_v17  ;;  %v3224_v2 = vpop.f32.mrf.mxu2  ;;  %v13805_v61 = vld [vmem:[#allocation26_spill] sm:$0xff] }
 0x570   : > { %v3413_v15 = vpop.f32.mrf.mxu3  ;;  %2913 = vmatmul.f32.gmra.mxu0 %v13803_v18  ;;  %v2999_v14 = vadd.f32 %v13805_v61, %v13804_v38  ;;  %v13811_v61 = vld [vmem:[#allocation86_spill] sm:$0xff] }
 0x571   : > { %13802 = vst [vmem:[#allocation89_spill] sm:$0xff] %v9872_v13  ;;  %v3414_v26 = vadd.f32 %v3413_v15, %v3224_v2  ;;  %v13806_v13 = vld [vmem:[#allocation112_spill] sm:$0xff]  ;;  %v13809_v15 = vld [vmem:[#allocation113_spill] sm:$0xff] }
 0x572   : > { %3102 = vmatmul.f32.gmra.mxu1 %v13806_v13 }
 0x573   : > { %v3543_v25 = vadd.f32 %v3414_v26, %v2999_v14 }
 0x574   : > { %3274 = vmatmul.f32.gmra.mxu2 %v13698_v54  ;;  %v13810_v54 = vld [vmem:[#allocation114_spill] sm:$0xff] }
 0x575   : > { %v3599_v37 = vmax.f32 %v13793_v60, %v3543_v25  ;;  %3463 = vmatmul.f32.gmra.mxu3 %v13699_v10  ;;  %v9890_v58 = vpop.f32.mrf.mxu0 }
 0x576   : > { %v9892_v20 = vpop.f32.mrf.mxu1 }
 0x577   : > { %v9895_v3 = vmax.f32 %v3599_v37, %v13807_v36  ;;  %v3227_v38 = vpop.f32.mrf.mxu2 }
 0x578   : > { %v3416_v2 = vpop.f32.mrf.mxu3  ;;  %2916 = vmatmul.f32.gmra.mxu0 %v13809_v15 }
 0x579   : > { %13808 = vst [vmem:[#allocation84_spill] sm:$0xff] %v9895_v3  ;;  %v3417_v22 = vadd.f32 %v3416_v2, %v3227_v38  ;;  %v3005_v38 = vadd.f32 %v13814_v27, %v9581_v30  ;;  %v13817_v30 = vld [vmem:[#allocation88_spill] sm:$0xff]  ;;  %v13819_v27 = vld [vmem:[#allocation123_spill] sm:$0xff] }
 0x57a   : > { %3105 = vmatmul.f32.gmra.mxu1 %v13810_v54 }
 0x57b   : > { %v3544_v25 = vadd.f32 %v3417_v22, %v3002_v29  ;;  %v9923_v22 = vld [vmem:[%s12751_s4] ss:$0 sm:$0xff] }
 0x57c   : > { %3277 = vmatmul.f32.gmra.mxu2 %v13702_v16  ;;  %v13815_v16 = vld [vmem:[#allocation119_spill] sm:$0xff] }
 0x57d   : > { %v3600_v10 = vmax.f32 %v13801_v17, %v3544_v25  ;;  %3466 = vmatmul.f32.gmra.mxu3 %v13703_v9  ;;  %v9904_v60 = vpop.f32.mrf.mxu0 }
 0x57e   : > { %v9906_v37 = vpop.f32.mrf.mxu1 }
 0x57f   : > { %v9909_v14 = vmax.f32 %v3600_v10, %v13811_v61  ;;  %v3230_v26 = vpop.f32.mrf.mxu2 }
 0x580   : > { %v3419_v3 = vpop.f32.mrf.mxu3  ;;  %2919 = vmatmul.f32.gmra.mxu0 %v13813_v19 }
 0x581   : > { %13812 = vst [vmem:[#allocation35_spill] sm:$0xff] %v9909_v14  ;;  %v3420_v2 = vadd.f32 %v3419_v3, %v3230_v26 }
 0x582   : > { %3108 = vmatmul.f32.gmra.mxu1 %v13815_v16 }
 0x583   : > { %v3545_v17 = vadd.f32 %v3420_v2, %v3005_v38  ;;  %v13821_v38 = vld [vmem:[#allocation33_spill] sm:$0xff] }
 0x584   : > { %3280 = vmatmul.f32.gmra.mxu2 %v13706_v34  ;;  %v3008_v34 = vadd.f32 %v9600_v6, %v9598_v5  ;;  %v3696_v2 = vadd.f32 %v9923_v22, %v13821_v38  ;;  %v13822_v5 = vld [vmem:[#allocation91_spill] sm:$0xff] }
 0x585   : > { %v3601_v9 = vmax.f32 %v13807_v36, %v3545_v17  ;;  %3469 = vmatmul.f32.gmra.mxu3 %v13707_v42  ;;  %v9918_v29 = vpop.f32.mrf.mxu0  ;;  %v13820_v36 = vld [vmem:[#allocation125_spill] sm:$0xff] }
 0x586   : > { %v9925_v25 = vpop.f32.mrf.mxu1 }
 0x587   : > { %13816 = vst [vmem:[#allocation87_spill] sm:$0xff] %v9925_v25  ;;  %v9928_v3 = vmax.f32 %v3601_v9, %v13817_v30  ;;  %v3233_v10 = vpop.f32.mrf.mxu2 }
 0x588   : > { %v3422_v26 = vpop.f32.mrf.mxu3  ;;  %2921 = vmatmul.f32.gmra.mxu0 %v13819_v27 }
 0x589   : > { %13818 = vst [vmem:[#allocation93_spill] sm:$0xff] %v9928_v3  ;;  %v3423_v42 = vadd.f32 %v3422_v26, %v3233_v10  ;;  %v9941_v3 = vmax.f32 %v3696_v2, 0.0 }
 0x58a   : > { %3110 = vmatmul.f32.gmra.mxu1 %v13820_v36 }
 0x58b   : > { %v3546_v17 = vadd.f32 %v3423_v42, %v3008_v34 }
 0x58c   : > { %3283 = vmatmul.f32.gmra.mxu2 %v13710_v59  ;;  %v3011_v59 = vadd.f32 %v9617_v7, %v9615_v50  ;;  %v13824_v50 = vld [vmem:[#allocation120_spill] sm:$0xff] }
 0x58d   : > { %v3602_v14 = vmax.f32 %v13811_v61, %v3546_v17  ;;  %3472 = vmatmul.f32.gmra.mxu3 %v13711_v21  ;;  %v9939_v9 = vpop.f32.mrf.mxu0  ;;  %v13823_v21 = vld [vmem:[#allocation31_spill] sm:$0xff] }
 0x58e   : > { %v9943_v25 = vpop.f32.mrf.mxu1  ;;  %v3697_v34 = vadd.f32 %v9923_v22, %v13823_v21 }
 0x58f   : > { %v9946_v6 = vmax.f32 %v3602_v14, %v13822_v5  ;;  %v3236_v10 = vpop.f32.mrf.mxu2 }
 0x590   : > { %v3425_v26 = vpop.f32.mrf.mxu3  ;;  %6453 = vmatmul.msk.f32.vlgmr.msrb.gmra.mxu0 %vm3816_vm2, %v9941_v3  ;;  %v9963_v17 = vmax.f32 %v3697_v34, 0.0 }
 0x591   : > { %v3426_v61 = vadd.f32 %v3425_v26, %v3236_v10 }
 0x592   : > { %6517 = vmatmul.msk.f32.vlgmr.msrb.gmra.mxu1 %vm3816_vm2, %v9941_v3 }
 0x593   : > { %v3547_v42 = vadd.f32 %v3426_v61, %v3011_v59 }
 0x594   : > { %3286 = vmatmul.f32.gmra.mxu2 %v13714_v46  ;;  %v3014_v46 = vadd.f32 %v9631_v8, %v9629_v52  ;;  %v13826_v52 = vld [vmem:[#allocation95_spill] sm:$0xff] }
 0x595   : > { %v3603_v14 = vmax.f32 %v13817_v30, %v3547_v42  ;;  %3475 = vmatmul.f32.gmra.mxu3 %v13715_v40  ;;  %v9959_v38 = vpop.f32.mrf.mxu0  ;;  %v13825_v40 = vld [vmem:[#allocation32_spill] sm:$0xff] }
 0x596   : > { %v9961_v2 = vpop.f32.mrf.mxu1  ;;  %v3698_v59 = vadd.f32 %v9923_v22, %v13825_v40 }
 0x597   : > { %v9966_v7 = vmax.f32 %v3603_v14, %v13824_v50  ;;  %v3239_v10 = vpop.f32.mrf.mxu2 }
 0x598   : > { %v3428_v26 = vpop.f32.mrf.mxu3  ;;  %6454 = vmatmul.msk.f32.gmra.mxu0 %vm3816_vm2, %v9963_v17  ;;  %v9983_v14 = vmax.f32 %v3698_v59, 0.0 }
 0x599   : > { %v3429_v30 = vadd.f32 %v3428_v26, %v3239_v10  ;;  %v6639_v26 = vld [vmem:[%s12752_s5 + $0xd0] sm:$0xff] }
 0x59a   : > { %6518 = vmatmul.msk.f32.gmra.mxu1 %vm3816_vm2, %v9963_v17  ;;  %4466 = vmatpush.msrb.mxu3 %v6639_v26 }
 0x59b   : > { %v3548_v61 = vadd.f32 %v3429_v30, %v3014_v46 }
 0x59c   : > { %3289 = vmatmul.f32.gmra.mxu2 %v9086_v51  ;;  %v3017_v51 = vadd.f32 %v9648_v1, %v9646_v57  ;;  %v13828_v57 = vld [vmem:[#allocation96_spill] sm:$0xff] }
 0x59d   : > { %v3604_v21 = vmax.f32 %v13822_v5, %v3548_v61  ;;  %3478 = vmatmul.f32.gmra.mxu3 %v13718_v62  ;;  %v9979_v34 = vpop.f32.mrf.mxu0  ;;  %v13827_v5 = vld [vmem:[#allocation34_spill] sm:$0xff] }
 0x59e   : > { %v9981_v42 = vpop.f32.mrf.mxu1  ;;  %v3699_v30 = vadd.f32 %v9923_v22, %v13827_v5 }
 0x59f   : > { %v9986_v8 = vmax.f32 %v3604_v21, %v13826_v52  ;;  %v3242_v10 = vpop.f32.mrf.mxu2 }
 0x5a0   : > { %v3431_v46 = vpop.f32.mrf.mxu3  ;;  %6455 = vmatmul.msk.f32.gmra.mxu0 %vm3816_vm2, %v9983_v14  ;;  %v10006_v26 = vmax.f32 %v3699_v30, 0.0 }
 0x5a1   : > { %v3432_v62 = vadd.f32 %v3431_v46, %v3242_v10 }
 0x5a2   : > { %6519 = vmatmul.msk.f32.gmra.mxu1 %vm3816_vm2, %v9983_v14 }
 0x5a3   : > { %v3549_v40 = vadd.f32 %v3432_v62, %v3017_v51 }
 0x5a4   : > { %3292 = vmatmul.f32.gmra.mxu2 %v13722_v4  ;;  %v3020_v4 = vadd.f32 %v9662_v11, %v9660_v55  ;;  %v13830_v55 = vld [vmem:[#allocation130_spill] sm:$0xff] }
 0x5a5   : > { %v3605_v59 = vmax.f32 %v13824_v50, %v3549_v40  ;;  %3481 = vmatmul.f32.gmra.mxu3 %v13725_v35  ;;  %v10002_v61 = vpop.f32.mrf.mxu0  ;;  %v13829_v35 = vld [vmem:[#allocation41_spill] sm:$0xff] }
 0x5a6   : > { %v10004_v21 = vpop.f32.mrf.mxu1  ;;  %v3700_v51 = vadd.f32 %v9923_v22, %v13829_v35 }
 0x5a7   : > { %v10009_v1 = vmax.f32 %v3605_v59, %v13828_v57  ;;  %v3245_v10 = vpop.f32.mrf.mxu2 }
 0x5a8   : > { %v3434_v46 = vpop.f32.mrf.mxu3  ;;  %6456 = vmatmul.msk.f32.gmra.mxu0 %vm3816_vm2, %v10006_v26  ;;  %v10026_v59 = vmax.f32 %v3700_v51, 0.0 }
 0x5a9   : > { %v3435_v50 = vadd.f32 %v3434_v46, %v3245_v10  ;;  %v6575_v46 = vld [vmem:[%s12752_s5 + $0x90] sm:$0xff] }
 0x5aa   : > { %6520 = vmatmul.msk.f32.gmra.mxu1 %vm3816_vm2, %v10006_v26  ;;  %4310 = vmatpush.msrb.mxu2 %v6575_v46 }
 0x5ab   : > { %v3550_v62 = vadd.f32 %v3435_v50, %v3020_v4 }
 0x5ac   : > { %3295 = vmatmul.f32.gmra.mxu2 %v13729_v31  ;;  %v3023_v31 = vadd.f32 %v9679_v47, %v9677_v49  ;;  %v13832_v49 = vld [vmem:[#allocation99_spill] sm:$0xff] }
 0x5ad   : > { %v3606_v5 = vmax.f32 %v13826_v52, %v3550_v62  ;;  %3484 = vmatmul.f32.gmra.mxu3 %v13731_v33  ;;  %v10022_v30 = vpop.f32.mrf.mxu0  ;;  %v13831_v52 = vld [vmem:[#allocation36_spill] sm:$0xff] }
 0x5ae   : > { %v10024_v40 = vpop.f32.mrf.mxu1  ;;  %v3701_v50 = vadd.f32 %v9923_v22, %v13831_v52 }
 0x5af   : > { %v10029_v11 = vmax.f32 %v3606_v5, %v13830_v55  ;;  %v3248_v10 = vpop.f32.mrf.mxu2 }
 0x5b0   : > { %v3437_v4 = vpop.f32.mrf.mxu3  ;;  %6457 = vmatmul.msk.f32.gmra.mxu0 %vm3816_vm2, %v10026_v59  ;;  %v10049_v46 = vmax.f32 %v3701_v50, 0.0 }
 0x5b1   : > { %v3438_v33 = vadd.f32 %v3437_v4, %v3248_v10 }
 0x5b2   : > { %6521 = vmatmul.msk.f32.gmra.mxu1 %vm3816_vm2, %v10026_v59 }
 0x5b3   : > { %v3551_v35 = vadd.f32 %v3438_v33, %v3023_v31 }
 0x5b4   : > { %3298 = vmatmul.f32.gmra.mxu2 %v13736_v45  ;;  %v13834_v45 = vld [vmem:[#allocation42_spill] sm:$0xff] }
 0x5b5   : > { %v3607_v51 = vmax.f32 %v13828_v57, %v3551_v35  ;;  %3487 = vmatmul.f32.gmra.mxu3 %v13739_v23  ;;  %v10045_v62 = vpop.f32.mrf.mxu0  ;;  %v3026_v31 = vadd.f32 %v13834_v45, %v9691_v48  ;;  %v13835_v23 = vld [vmem:[#allocation39_spill] sm:$0xff] }
 0x5b6   : > { %v10047_v5 = vpop.f32.mrf.mxu1  ;;  %v3702_v33 = vadd.f32 %v9923_v22, %v13835_v23  ;;  %v13836_v48 = vld [vmem:[#allocation135_spill] sm:$0xff] }
 0x5b7   : > { %v10052_v47 = vmax.f32 %v3607_v51, %v13832_v49  ;;  %v3251_v10 = vpop.f32.mrf.mxu2 }
 0x5b8   : > { %v3440_v4 = vpop.f32.mrf.mxu3  ;;  %6458 = vmatmul.msk.f32.gmra.mxu0 %vm3816_vm2, %v10049_v46 }
 0x5b9   : > { %13833 = vst [vmem:[#allocation38_spill] sm:$0xff] %v10052_v47  ;;  %v3441_v57 = vadd.f32 %v3440_v4, %v3251_v10  ;;  %v10069_v47 = vmax.f32 %v3702_v33, 0.0 }
 0x5ba   : > { %6522 = vmatmul.msk.f32.gmra.mxu1 %vm3816_vm2, %v10049_v46 }
 0x5bb   : > { %v3552_v52 = vadd.f32 %v3441_v57, %v3026_v31 }
 0x5bc   : > { %3301 = vmatmul.f32.gmra.mxu2 %v13744_v53  ;;  %v13838_v53 = vld [vmem:[#allocation44_spill] sm:$0xff] }
 0x5bd   : > { %v3608_v50 = vmax.f32 %v13830_v55, %v3552_v52  ;;  %3490 = vmatmul.f32.gmra.mxu3 %v13747_v56  ;;  %v10065_v35 = vpop.f32.mrf.mxu0  ;;  %v3029_v31 = vadd.f32 %v13838_v53, %v9708_v39  ;;  %v13839_v56 = vld [vmem:[#allocation45_spill] sm:$0xff]  ;;  %v13842_v39 = vld [vmem:[#allocation102_spill] sm:$0xff] }
 0x5be   : > { %v10067_v51 = vpop.f32.mrf.mxu1  ;;  %v3703_v57 = vadd.f32 %v9923_v22, %v13839_v56 }
 0x5bf   : > { %v10072_v10 = vmax.f32 %v3608_v50, %v13836_v48  ;;  %v3254_v4 = vpop.f32.mrf.mxu2 }
 0x5c0   : > { %v3443_v45 = vpop.f32.mrf.mxu3  ;;  %6459 = vmatmul.msk.f32.gmra.mxu0 %vm3816_vm2, %v10069_v47 }
 0x5c1   : > { %13837 = vst [vmem:[#allocation90_spill] sm:$0xff] %v10072_v10  ;;  %v3444_v55 = vadd.f32 %v3443_v45, %v3254_v4  ;;  %v10089_v10 = vmax.f32 %v3703_v57, 0.0 }
 0x5c2   : > { %6523 = vmatmul.msk.f32.gmra.mxu1 %vm3816_vm2, %v10069_v47 }
 0x5c3   : > { %v3553_v23 = vadd.f32 %v3444_v55, %v3029_v31  ;;  %v13844_v31 = vld [vmem:[#allocation53_spill] sm:$0xff] }
 0x5c4   : > { %3304 = vmatmul.f32.gmra.mxu2 %v13752_v0  ;;  %v13845_v0 = vld [vmem:[#allocation48_spill] sm:$0xff] }
 0x5c5   : > { %v3609_v33 = vmax.f32 %v13832_v49, %v3553_v23  ;;  %3493 = vmatmul.f32.gmra.mxu3 %v13755_v24  ;;  %v10085_v52 = vpop.f32.mrf.mxu0  ;;  %v3032_v55 = vadd.f32 %v13845_v0, %v13844_v31  ;;  %v13846_v24 = vld [vmem:[#allocation43_spill] sm:$0xff] }
 0x5c6   : > { %13840 = vst [vmem:[#allocation116_spill] sm:$0xff] %v10085_v52  ;;  %v10087_v50 = vpop.f32.mrf.mxu1  ;;  %v3704_v56 = vadd.f32 %v9923_v22, %v13846_v24  ;;  %v13854_v24 = vld [vmem:[#allocation46_spill] sm:$0xff] }
 0x5c7   : > { %13841 = vst [vmem:[#allocation40_spill] sm:$0xff] %v10087_v50  ;;  %v10092_v4 = vmax.f32 %v3609_v33, %v13842_v39  ;;  %v3257_v45 = vpop.f32.mrf.mxu2  ;;  %v13847_v33 = vld [vmem:[#allocation144_spill] sm:$0xff] }
 0x5c8   : > { %v3446_v53 = vpop.f32.mrf.mxu3  ;;  %6460 = vmatmul.msk.f32.gmra.mxu0 %vm3816_vm2, %v10089_v10  ;;  %v10109_v52 = vmax.f32 %v3704_v56, 0.0 }
 0x5c9   : > { %13843 = vst [vmem:[#allocation117_spill] sm:$0xff] %v10092_v4  ;;  %v3447_v49 = vadd.f32 %v3446_v53, %v3257_v45  ;;  %v13850_v45 = vld [vmem:[#allocation142_spill] sm:$0xff] }
 0x5ca   : > { %6524 = vmatmul.msk.f32.gmra.mxu1 %vm3816_vm2, %v10089_v10 }
 0x5cb   : > { %v3554_v57 = vadd.f32 %v3447_v49, %v3032_v55  ;;  %v13852_v55 = vld [vmem:[#allocation57_spill] sm:$0xff] }
 0x5cc   : > { %3307 = vmatmul.f32.gmra.mxu2 %v13760_v63  ;;  %v13853_v63 = vld [vmem:[#allocation54_spill] sm:$0xff] }
 0x5cd   : > { %v3610_v23 = vmax.f32 %v13836_v48, %v3554_v57  ;;  %3496 = vmatmul.f32.gmra.mxu3 %v13847_v33  ;;  %v10105_v4 = vpop.f32.mrf.mxu0  ;;  %v3035_v49 = vadd.f32 %v13853_v63, %v13852_v55  ;;  %v3705_v57 = vadd.f32 %v9923_v22, %v13854_v24  ;;  %v13855_v33 = vld [vmem:[#allocation148_spill] sm:$0xff] }
 0x5ce   : > { %13848 = vst [vmem:[#allocation92_spill] sm:$0xff] %v10105_v4  ;;  %v10107_v50 = vpop.f32.mrf.mxu1  ;;  %v6638_v63 = vld [vmem:[%s12752_s5 + $0xc8] sm:$0xff] }
 0x5cf   : > { %13849 = vst [vmem:[#allocation49_spill] sm:$0xff] %v10107_v50  ;;  %v10112_v53 = vmax.f32 %v3610_v23, %v13850_v45  ;;  %v3260_v31 = vpop.f32.mrf.mxu2  ;;  %v10129_v4 = vmax.f32 %v3705_v57, 0.0  ;;  %4467 = vmatpush.msrb.mxu3 %v6638_v63  ;;  %v13861_v57 = vld [vmem:[#allocation51_spill] sm:$0xff] }
 0x5d0   : > { %v3449_v0 = vpop.f32.mrf.mxu3  ;;  %6461 = vmatmul.msk.f32.gmra.mxu0 %vm3816_vm2, %v10109_v52 }
 0x5d1   : > { %13851 = vst [vmem:[#allocation94_spill] sm:$0xff] %v10112_v53  ;;  %v3450_v48 = vadd.f32 %v3449_v0, %v3260_v31  ;;  %v13857_v31 = vld [vmem:[#allocation105_spill] sm:$0xff] }
 0x5d2   : > { %6525 = vmatmul.msk.f32.gmra.mxu1 %vm3816_vm2, %v10109_v52 }
 0x5d3   : > { %v3555_v56 = vadd.f32 %v3450_v48, %v3035_v49 }
 0x5d4   : > { %3310 = vmatmul.f32.gmra.mxu2 %v13855_v33 }
 0x5d5   : > { %v3611_v23 = vmax.f32 %v13842_v39, %v3555_v56  ;;  %3499 = vmatmul.f32.gmra.mxu3 %v13771_v28  ;;  %v10125_v53 = vpop.f32.mrf.mxu0  ;;  %v13859_v28 = vld [vmem:[#allocation56_spill] sm:$0xff]  ;;  %v13860_v39 = vld [vmem:[#allocation58_spill] sm:$0xff]  ;;  %v3706_v56 = vadd.f32 %v9923_v22, %v13861_v57 }
 0x5d6   : > { %v10127_v50 = vpop.f32.mrf.mxu1  ;;  %v3038_v48 = vadd.f32 %v13860_v39, %v13859_v28 }
 0x5d7   : > { %13856 = vst [vmem:[#allocation121_spill] sm:$0xff] %v10127_v50  ;;  %v10132_v0 = vmax.f32 %v3611_v23, %v13857_v31  ;;  %v3263_v55 = vpop.f32.mrf.mxu2  ;;  %v10152_v50 = vmax.f32 %v3706_v56, 0.0 }
 0x5d8   : > { %v3452_v49 = vpop.f32.mrf.mxu3  ;;  %6462 = vmatmul.msk.f32.gmra.mxu0 %vm3816_vm2, %v10129_v4 }
 0x5d9   : > { %13858 = vst [vmem:[#allocation47_spill] sm:$0xff] %v10132_v0  ;;  %v3453_v24 = vadd.f32 %v3452_v49, %v3263_v55  ;;  %v13864_v55 = vld [vmem:[#allocation149_spill] sm:$0xff] }
 0x5da   : > { %6526 = vmatmul.msk.f32.gmra.mxu1 %vm3816_vm2, %v10129_v4 }
 0x5db   : > { %v3556_v33 = vadd.f32 %v3453_v24, %v3038_v48  ;;  %v13866_v48 = vld [vmem:[#allocation60_spill] sm:$0xff] }
 0x5dc   : > { %3313 = vmatmul.f32.gmra.mxu2 %v13778_v43  ;;  %v13867_v43 = vld [vmem:[#allocation63_spill] sm:$0xff] }
 0x5dd   : > { %v3612_v23 = vmax.f32 %v13850_v45, %v3556_v33  ;;  %3502 = vmatmul.f32.gmra.mxu3 %v13781_v41  ;;  %v10148_v0 = vpop.f32.mrf.mxu0  ;;  %v3041_v24 = vadd.f32 %v13867_v43, %v13866_v48  ;;  %v13868_v41 = vld [vmem:[#allocation55_spill] sm:$0xff]  ;;  %v13869_v33 = vld [vmem:[#allocation153_spill] sm:$0xff] }
 0x5de   : > { %13862 = vst [vmem:[#allocation124_spill] sm:$0xff] %v10148_v0  ;;  %v10150_v63 = vpop.f32.mrf.mxu1  ;;  %v3707_v57 = vadd.f32 %v9923_v22, %v13868_v41  ;;  %v6574_v43 = vld [vmem:[%s12752_s5 + $0x88] sm:$0xff] }
 0x5df   : > { %13863 = vst [vmem:[#allocation50_spill] sm:$0xff] %v10150_v63  ;;  %v10155_v49 = vmax.f32 %v3612_v23, %v13864_v55  ;;  %v3266_v28 = vpop.f32.mrf.mxu2  ;;  %4311 = vmatpush.msrb.mxu2 %v6574_v43 }
 0x5e0   : > { %v3455_v39 = vpop.f32.mrf.mxu3  ;;  %6463 = vmatmul.msk.f32.gmra.mxu0 %vm3816_vm2, %v10152_v50  ;;  %v10172_v0 = vmax.f32 %v3707_v57, 0.0  ;;  %v13875_v57 = vld [vmem:[#allocation65_spill] sm:$0xff] }
 0x5e1   : > { %13865 = vst [vmem:[#allocation126_spill] sm:$0xff] %v10155_v49  ;;  %v3456_v45 = vadd.f32 %v3455_v39, %v3266_v28  ;;  %v13871_v28 = vld [vmem:[#allocation108_spill] sm:$0xff] }
 0x5e2   : > { %6527 = vmatmul.msk.f32.gmra.mxu1 %vm3816_vm2, %v10152_v50 }
 0x5e3   : > { %v3557_v56 = vadd.f32 %v3456_v45, %v3041_v24 }
 0x5e4   : > { %3316 = vmatmul.f32.gmra.mxu2 %v13869_v33 }
 0x5e5   : > { %v3613_v23 = vmax.f32 %v13857_v31, %v3557_v56  ;;  %3505 = vmatmul.f32.gmra.mxu3 %v13790_v12  ;;  %v10168_v49 = vpop.f32.mrf.mxu0  ;;  %v13873_v12 = vld [vmem:[#allocation66_spill] sm:$0xff]  ;;  %v13874_v31 = vld [vmem:[#allocation67_spill] sm:$0xff]  ;;  %v3708_v56 = vadd.f32 %v9923_v22, %v13875_v57 }
 0x5e6   : > { %v10170_v63 = vpop.f32.mrf.mxu1  ;;  %v3044_v45 = vadd.f32 %v13874_v31, %v13873_v12 }
 0x5e7   : > { %13870 = vst [vmem:[#allocation143_spill] sm:$0xff] %v10170_v63  ;;  %v10175_v39 = vmax.f32 %v3613_v23, %v13871_v28  ;;  %v3269_v48 = vpop.f32.mrf.mxu2  ;;  %v10195_v63 = vmax.f32 %v3708_v56, 0.0 }
 0x5e8   : > { %v3458_v24 = vpop.f32.mrf.mxu3  ;;  %6464 = vmatmul.msk.f32.gmra.mxu0 %vm3816_vm2, %v10172_v0 }
 0x5e9   : > { %13872 = vst [vmem:[#allocation145_spill] sm:$0xff] %v10175_v39  ;;  %v3459_v41 = vadd.f32 %v3458_v24, %v3269_v48  ;;  %v13877_v48 = vld [vmem:[#allocation156_spill] sm:$0xff] }
 0x5ea   : > { %6528 = vmatmul.msk.f32.gmra.mxu1 %vm3816_vm2, %v10172_v0 }
 0x5eb   : > { %v3558_v33 = vadd.f32 %v3459_v41, %v3044_v45  ;;  %v13879_v45 = vld [vmem:[#allocation70_spill] sm:$0xff] }
 0x5ec   : > { %3319 = vmatmul.f32.gmra.mxu2 %v13795_v32  ;;  %v13880_v32 = vld [vmem:[#allocation81_spill] sm:$0xff] }
 0x5ed   : > { %v3614_v23 = vmax.f32 %v13864_v55, %v3558_v33  ;;  %3508 = vmatmul.f32.gmra.mxu3 %v13798_v44  ;;  %v10191_v39 = vpop.f32.mrf.mxu0  ;;  %v3047_v41 = vadd.f32 %v13880_v32, %v13879_v45  ;;  %v13881_v44 = vld [vmem:[#allocation69_spill] sm:$0xff]  ;;  %v6573_v33 = vld [vmem:[%s12752_s5 + $0x80] sm:$0xff] }
 0x5ee   : > { %v3709_v57 = vadd.f32 %v9923_v22, %v13881_v44  ;;  %4312 = vmatpush.msrb.mxu2 %v6573_v33 }
 0x5ef   : > { %v10193_v43 = vpop.f32.mrf.mxu1  ;;  %v10198_v24 = vmax.f32 %v3614_v23, %v13877_v48  ;;  %v3272_v12 = vpop.f32.mrf.mxu2  ;;  %v6637_v23 = vld [vmem:[%s12752_s5 + $0xc0] sm:$0xff] }
 0x5f0   : > { %13876 = vst [vmem:[#allocation97_spill] sm:$0xff] %v10193_v43  ;;  %v3461_v31 = vpop.f32.mrf.mxu3  ;;  %6465 = vmatmul.msk.f32.gmra.mxu0 %vm3816_vm2, %v10195_v63  ;;  %4468 = vmatpush.msrb.mxu3 %v6637_v23  ;;  %v10221_v32 = vmax.f32 %v3709_v57, 0.0  ;;  %v13887_v23 = vld [vmem:[#allocation78_spill] sm:$0xff]  ;;  %v13889_v43 = vld [vmem:[#allocation161_spill] sm:$0xff] }
 0x5f1   : > { %13878 = vst [vmem:[#allocation52_spill] sm:$0xff] %v10198_v24  ;;  %v3462_v55 = vadd.f32 %v3461_v31, %v3272_v12 }
 0x5f2   : > { %6529 = vmatmul.msk.f32.gmra.mxu1 %vm3816_vm2, %v10195_v63 }
 0x5f3   : > { %v3559_v56 = vadd.f32 %v3462_v55, %v3047_v41  ;;  %v13884_v41 = vld [vmem:[#allocation111_spill] sm:$0xff] }
 0x5f4   : > { %3322 = vmatmul.f32.gmra.mxu2 %v13803_v18  ;;  %v13886_v18 = vld [vmem:[#allocation27_spill] sm:$0xff] }
 0x5f5   : > { %v3615_v12 = vmax.f32 %v13871_v28, %v3559_v56  ;;  %3511 = vmatmul.f32.gmra.mxu3 %v13806_v13  ;;  %v10217_v31 = vpop.f32.mrf.mxu0  ;;  %v3050_v28 = vadd.f32 %v13887_v23, %v13886_v18  ;;  %v13888_v13 = vld [vmem:[#allocation68_spill] sm:$0xff]  ;;  %v13890_v23 = vld [vmem:[#allocation29_spill] sm:$0xff] }
 0x5f6   : > { %13882 = vst [vmem:[#allocation98_spill] sm:$0xff] %v10217_v31  ;;  %v3710_v33 = vadd.f32 %v9923_v22, %v13888_v13 }
 0x5f7   : > { %v10219_v45 = vpop.f32.mrf.mxu1  ;;  %v10224_v55 = vmax.f32 %v3615_v12, %v13884_v41  ;;  %v3275_v44 = vpop.f32.mrf.mxu2 }
 0x5f8   : > { %13883 = vst [vmem:[#allocation147_spill] sm:$0xff] %v10219_v45  ;;  %v3464_v24 = vpop.f32.mrf.mxu3  ;;  %6466 = vmatmul.msk.f32.gmra.mxu0 %vm3816_vm2, %v10221_v32  ;;  %v10237_v31 = vmax.f32 %v3710_v33, 0.0 }
 0x5f9   : > { %13885 = vst [vmem:[#allocation131_spill] sm:$0xff] %v10224_v55  ;;  %v3465_v56 = vadd.f32 %v3464_v24, %v3275_v44 }
 0x5fa   : > { %6530 = vmatmul.msk.f32.gmra.mxu1 %vm3816_vm2, %v10221_v32 }
 0x5fb   : > { %v3560_v57 = vadd.f32 %v3465_v56, %v3050_v28  ;;  %v13891_v28 = vld [vmem:[#allocation30_spill] sm:$0xff] }
 0x5fc   : > { %3325 = vmatmul.f32.gmra.mxu2 %v13809_v15  ;;  %v3053_v56 = vadd.f32 %v13891_v28, %v13890_v23  ;;  %v13894_v28 = vld [vmem:[#allocation82_spill] sm:$0xff] }
 0x5fd   : > { %v3616_v12 = vmax.f32 %v13877_v48, %v3560_v57  ;;  %3514 = vmatmul.f32.gmra.mxu3 %v13810_v54  ;;  %v2920_v55 = vpop.f32.mrf.mxu0  ;;  %v13892_v54 = vld [vmem:[#allocation20_spill] sm:$0xff] }
 0x5fe   : > { %v3711_v48 = vadd.f32 %v9923_v22, %v13892_v54 }
 0x5ff   : > { %v3109_v45 = vpop.f32.mrf.mxu1  ;;  %v10240_v18 = vmax.f32 %v3616_v12, %v13889_v43  ;;  %v3278_v24 = vpop.f32.mrf.mxu2  ;;  %v13893_v12 = vld [vmem:[#allocation115_spill] sm:$0xff] }
 0x600   : > { %v3467_v44 = vpop.f32.mrf.mxu3  ;;  %6467 = vmatmul.msk.f32.gmra.mxu0 %vm3816_vm2, %v10237_v31  ;;  %v10253_v57 = vmax.f32 %v3711_v48, 0.0 }
 0x601   : > { %v3468_v15 = vadd.f32 %v3467_v44, %v3278_v24 }
 0x602   : > { %6531 = vmatmul.msk.f32.gmra.mxu1 %vm3816_vm2, %v10237_v31 }
 0x603   : > { %v3561_v45 = vadd.f32 %v3468_v15, %v3053_v56  ;;  %v13895_v56 = vld [vmem:[#allocation37_spill] sm:$0xff] }
 0x604   : > { %3328 = vmatmul.f32.gmra.mxu2 %v13813_v19  ;;  %v3056_v15 = vadd.f32 %v13895_v56, %v13894_v28 }
 0x605   : > { %v3617_v55 = vmax.f32 %v13884_v41, %v3561_v45  ;;  %3517 = vmatmul.f32.gmra.mxu3 %v13815_v16  ;;  %v2922_v13 = vpop.f32.mrf.mxu0  ;;  %v13896_v16 = vld [vmem:[#allocation79_spill] sm:$0xff] }
 0x606   : > { %v3712_v41 = vadd.f32 %v9923_v22, %v13896_v16 }
 0x607   : > { %v3111_v33 = vpop.f32.mrf.mxu1  ;;  %v10256_v23 = vmax.f32 %v3617_v55, %v13893_v12  ;;  %v3281_v24 = vpop.f32.mrf.mxu2 }
 0x608   : > { %v3470_v44 = vpop.f32.mrf.mxu3  ;;  %6468 = vmatmul.msk.f32.gmra.mxu0 %vm3816_vm2, %v10253_v57  ;;  %v10271_v13 = vmax.f32 %v3712_v41, 0.0  ;;  %v13897_v33 = vld [vmem:[#allocation122_spill] sm:$0xff] }
 0x609   : > { %v3471_v19 = vadd.f32 %v3470_v44, %v3281_v24 }
 0x60a   : > { %6532 = vmatmul.msk.f32.gmra.mxu1 %vm3816_vm2, %v10253_v57 }
 0x60b   : > { %v3562_v54 = vadd.f32 %v3471_v19, %v3056_v15 }
 0x60c   : > { %3331 = vmatmul.f32.gmra.mxu2 %v13819_v27  ;;  %v3059_v27 = vadd.f32 %v9892_v20, %v9890_v58  ;;  %v13899_v58 = vld [vmem:[#allocation127_spill] sm:$0xff] }
 0x60d   : > { %v3618_v48 = vmax.f32 %v13889_v43, %v3562_v54  ;;  %3520 = vmatmul.f32.gmra.mxu3 %v13820_v36  ;;  %v10269_v45 = vpop.f32.mrf.mxu0  ;;  %v13898_v36 = vld [vmem:[#allocation80_spill] sm:$0xff] }
 0x60e   : > { %v3713_v43 = vadd.f32 %v9923_v22, %v13898_v36 }
 0x60f   : > { %v4158_v55 = vpop.f32.mrf.mxu1  ;;  %v10274_v24 = vmax.f32 %v3618_v48, %v13897_v33  ;;  %v3284_v44 = vpop.f32.mrf.mxu2 }
 0x610   : > { %v3473_v28 = vpop.f32.mrf.mxu3  ;;  %6469 = vmatmul.msk.f32.gmra.mxu0 %vm3816_vm2, %v10271_v13  ;;  %v10291_v20 = vmax.f32 %v3713_v43, 0.0 }
 0x611   : > { %v3474_v56 = vadd.f32 %v3473_v28, %v3284_v44  ;;  %v3062_v44 = vadd.f32 %v9906_v37, %v9904_v60  ;;  %v13901_v37 = vld [vmem:[#allocation128_spill] sm:$0xff] }
 0x612   : > { %6533 = vmatmul.msk.f32.gmra.mxu1 %vm3816_vm2, %v10271_v13 }
 0x613   : > { %v3563_v15 = vadd.f32 %v3474_v56, %v3059_v27 }
 0x614   : > { %6581 = vmatmul.msk.f32.vlgmr.msrb.gmra.mxu2 %vm3816_vm2, %v9941_v3 }
 0x615   : > { %v3619_v19 = vmax.f32 %v13893_v12, %v3563_v15  ;;  %6645 = vmatmul.msk.f32.vlgmr.msrb.gmra.mxu3 %vm3816_vm2, %v9941_v3  ;;  %v10289_v16 = vpop.f32.mrf.mxu0  ;;  %v13900_v3 = vld [vmem:[#allocation89_spill] sm:$0xff] }
 0x616   : > { %v3714_v28 = vadd.f32 %v9923_v22, %v13900_v3 }
 0x617   : > { %v4160_v41 = vpop.f32.mrf.mxu1  ;;  %v10294_v54 = vmax.f32 %v3619_v19, %v13899_v58  ;;  %v3287_v48 = vpop.f32.mrf.mxu2 }
 0x618   : > { %v3476_v55 = vpop.f32.mrf.mxu3  ;;  %6470 = vmatmul.msk.f32.gmra.mxu0 %vm3816_vm2, %v10291_v20  ;;  %v10311_v60 = vmax.f32 %v3714_v28, 0.0 }
 0x619   : > { %v3477_v12 = vadd.f32 %v3476_v55, %v3287_v48  ;;  %v13902_v48 = vld [vmem:[#allocation87_spill] sm:$0xff] }
 0x61a   : > { %6534 = vmatmul.msk.f32.gmra.mxu1 %vm3816_vm2, %v10291_v20  ;;  %v3065_v55 = vadd.f32 %v13902_v48, %v9918_v29  ;;  %v3068_v48 = vadd.f32 %v9943_v25, %v9939_v9  ;;  %v13906_v25 = vld [vmem:[#allocation132_spill] sm:$0xff] }
 0x61b   : > { %v3564_v27 = vadd.f32 %v3477_v12, %v3062_v44 }
 0x61c   : > { %6582 = vmatmul.msk.f32.gmra.mxu2 %vm3816_vm2, %v9963_v17 }
 0x61d   : > { %v3620_v56 = vmax.f32 %v13897_v33, %v3564_v27  ;;  %6646 = vmatmul.msk.f32.gmra.mxu3 %vm3816_vm2, %v9963_v17  ;;  %v4008_v36 = vpop.f32.mrf.mxu0  ;;  %v13903_v17 = vld [vmem:[#allocation84_spill] sm:$0xff] }
 0x61e   : > { %v3715_v44 = vadd.f32 %v9923_v22, %v13903_v17 }
 0x61f   : > { %v10309_v43 = vpop.f32.mrf.mxu1  ;;  %v10314_v15 = vmax.f32 %v3620_v56, %v13901_v37  ;;  %v3290_v19 = vpop.f32.mrf.mxu2  ;;  %v13904_v56 = vld [vmem:[#allocation129_spill] sm:$0xff] }
 0x620   : > { %v3479_v41 = vpop.f32.mrf.mxu3  ;;  %6471 = vmatmul.msk.f32.gmra.mxu0 %vm3816_vm2, %v10311_v60  ;;  %v10331_v29 = vmax.f32 %v3715_v44, 0.0 }
 0x621   : > { %v3480_v33 = vadd.f32 %v3479_v41, %v3290_v19 }
 0x622   : > { %6535 = vmatmul.msk.f32.gmra.mxu1 %vm3816_vm2, %v10311_v60 }
 0x623   : > { %v3565_v12 = vadd.f32 %v3480_v33, %v3065_v55 }
 0x624   : > { %6583 = vmatmul.msk.f32.gmra.mxu2 %vm3816_vm2, %v9983_v14 }
 0x625   : > { %v3621_v3 = vmax.f32 %v13899_v58, %v3565_v12  ;;  %6647 = vmatmul.msk.f32.gmra.mxu3 %vm3816_vm2, %v9983_v14  ;;  %v4010_v28 = vpop.f32.mrf.mxu0  ;;  %v13905_v14 = vld [vmem:[#allocation35_spill] sm:$0xff] }
 0x626   : > { %v3716_v55 = vadd.f32 %v9923_v22, %v13905_v14 }
 0x627   : > { %v10329_v27 = vpop.f32.mrf.mxu1  ;;  %v10334_v36 = vmax.f32 %v3621_v3, %v13904_v56  ;;  %v3293_v19 = vpop.f32.mrf.mxu2 }
 0x628   : > { %v3482_v41 = vpop.f32.mrf.mxu3  ;;  %6472 = vmatmul.msk.f32.gmra.mxu0 %vm3816_vm2, %v10331_v29  ;;  %v10349_v3 = vmax.f32 %v3716_v55, 0.0 }
 0x629   : > { %v3483_v58 = vadd.f32 %v3482_v41, %v3293_v19  ;;  %v3071_v41 = vadd.f32 %v9961_v2, %v9959_v38  ;;  %v13908_v38 = vld [vmem:[#allocation133_spill] sm:$0xff] }
 0x62a   : > { %6536 = vmatmul.msk.f32.gmra.mxu1 %vm3816_vm2, %v10331_v29 }
 0x62b   : > { %v3566_v33 = vadd.f32 %v3483_v58, %v3068_v48 }
 0x62c   : > { %6584 = vmatmul.msk.f32.gmra.mxu2 %vm3816_vm2, %v10006_v26 }
 0x62d   : > { %v3622_v17 = vmax.f32 %v13901_v37, %v3566_v33  ;;  %6648 = vmatmul.msk.f32.gmra.mxu3 %vm3816_vm2, %v10006_v26  ;;  %v4012_v44 = vpop.f32.mrf.mxu0  ;;  %v13907_v26 = vld [vmem:[#allocation93_spill] sm:$0xff] }
 0x62e   : > { %v3717_v37 = vadd.f32 %v9923_v22, %v13907_v26 }
 0x62f   : > { %v4168_v12 = vpop.f32.mrf.mxu1  ;;  %v10352_v9 = vmax.f32 %v3622_v17, %v13906_v25  ;;  %v3296_v28 = vpop.f32.mrf.mxu2 }
 0x630   : > { %v3485_v19 = vpop.f32.mrf.mxu3  ;;  %6473 = vmatmul.msk.f32.gmra.mxu0 %vm3816_vm2, %v10349_v3  ;;  %v10367_v17 = vmax.f32 %v3717_v37, 0.0 }
 0x631   : > { %v3486_v48 = vadd.f32 %v3485_v19, %v3296_v28  ;;  %v3074_v28 = vadd.f32 %v9981_v42, %v9979_v34  ;;  %v13909_v42 = vld [vmem:[#allocation136_spill] sm:$0xff] }
 0x632   : > { %6537 = vmatmul.msk.f32.gmra.mxu1 %vm3816_vm2, %v10349_v3 }
 0x633   : > { %v3567_v58 = vadd.f32 %v3486_v48, %v3071_v41 }
 0x634   : > { %6585 = vmatmul.msk.f32.gmra.mxu2 %vm3816_vm2, %v10026_v59 }
 0x635   : > { %v3623_v14 = vmax.f32 %v13904_v56, %v3567_v58  ;;  %6649 = vmatmul.msk.f32.gmra.mxu3 %vm3816_vm2, %v10026_v59  ;;  %v4014_v55 = vpop.f32.mrf.mxu0  ;;  %v3718_v59 = vadd.f32 %v9923_v22, %v9946_v6  ;;  %v3077_v6 = vadd.f32 %v10004_v21, %v10002_v61  ;;  %v13910_v21 = vld [vmem:[#allocation137_spill] sm:$0xff] }
 0x637   : > { %v4170_v33 = vpop.f32.mrf.mxu1  ;;  %v10370_v2 = vmax.f32 %v3623_v14, %v13908_v38  ;;  %v3299_v44 = vpop.f32.mrf.mxu2  ;;  %v10387_v34 = vmax.f32 %v3718_v59, 0.0 }
 0x638   : > { %v3488_v12 = vpop.f32.mrf.mxu3  ;;  %6474 = vmatmul.msk.f32.gmra.mxu0 %vm3816_vm2, %v10367_v17 }
 0x639   : > { %v3489_v19 = vadd.f32 %v3488_v12, %v3299_v44 }
 0x63a   : > { %6538 = vmatmul.msk.f32.gmra.mxu1 %vm3816_vm2, %v10367_v17 }
 0x63b   : > { %v3568_v56 = vadd.f32 %v3489_v19, %v3074_v28 }
 0x63c   : > { %6586 = vmatmul.msk.f32.gmra.mxu2 %vm3816_vm2, %v10049_v46 }
 0x63d   : > { %v3624_v41 = vmax.f32 %v13906_v25, %v3568_v56  ;;  %6650 = vmatmul.msk.f32.gmra.mxu3 %vm3816_vm2, %v10049_v46  ;;  %v10385_v48 = vpop.f32.mrf.mxu0  ;;  %v3719_v46 = vadd.f32 %v9923_v22, %v9966_v7  ;;  %v3080_v7 = vadd.f32 %v10024_v40, %v10022_v30  ;;  %v13911_v40 = vld [vmem:[#allocation140_spill] sm:$0xff] }
 0x63f   : > { %v4172_v26 = vpop.f32.mrf.mxu1  ;;  %v10390_v37 = vmax.f32 %v3624_v41, %v13909_v42  ;;  %v3302_v58 = vpop.f32.mrf.mxu2  ;;  %v10407_v61 = vmax.f32 %v3719_v46, 0.0 }
 0x640   : > { %v3491_v14 = vpop.f32.mrf.mxu3  ;;  %6475 = vmatmul.msk.f32.gmra.mxu0 %vm3816_vm2, %v10387_v34 }
 0x641   : > { %v3492_v25 = vadd.f32 %v3491_v14, %v3302_v58 }
 0x642   : > { %6539 = vmatmul.msk.f32.gmra.mxu1 %vm3816_vm2, %v10387_v34 }
 0x643   : > { %v3569_v55 = vadd.f32 %v3492_v25, %v3077_v6 }
 0x644   : > { %6587 = vmatmul.msk.f32.gmra.mxu2 %vm3816_vm2, %v10069_v47 }
 0x645   : > { %v3625_v33 = vmax.f32 %v13908_v38, %v3569_v55  ;;  %6651 = vmatmul.msk.f32.gmra.mxu3 %vm3816_vm2, %v10069_v47  ;;  %v10405_v44 = vpop.f32.mrf.mxu0  ;;  %v3720_v47 = vadd.f32 %v9923_v22, %v9986_v8  ;;  %v3083_v8 = vadd.f32 %v10047_v5, %v10045_v62  ;;  %v13912_v5 = vld [vmem:[#allocation141_spill] sm:$0xff] }
 0x647   : > { %v4174_v12 = vpop.f32.mrf.mxu1  ;;  %v10410_v28 = vmax.f32 %v3625_v33, %v13910_v21  ;;  %v3305_v19 = vpop.f32.mrf.mxu2  ;;  %v10427_v30 = vmax.f32 %v3720_v47, 0.0 }
 0x648   : > { %v3494_v59 = vpop.f32.mrf.mxu3  ;;  %6476 = vmatmul.msk.f32.gmra.mxu0 %vm3816_vm2, %v10407_v61 }
 0x649   : > { %v3495_v38 = vadd.f32 %v3494_v59, %v3305_v19 }
 0x64a   : > { %6540 = vmatmul.msk.f32.gmra.mxu1 %vm3816_vm2, %v10407_v61 }
 0x64b   : > { %v3570_v56 = vadd.f32 %v3495_v38, %v3080_v7 }
 0x64c   : > { %6588 = vmatmul.msk.f32.gmra.mxu2 %vm3816_vm2, %v10089_v10 }
 0x64d   : > { %v3626_v41 = vmax.f32 %v13909_v42, %v3570_v56  ;;  %6652 = vmatmul.msk.f32.gmra.mxu3 %vm3816_vm2, %v10089_v10  ;;  %v4022_v26 = vpop.f32.mrf.mxu0  ;;  %v3721_v10 = vadd.f32 %v9923_v22, %v10009_v1  ;;  %v3086_v1 = vadd.f32 %v10067_v51, %v10065_v35  ;;  %v13913_v35 = vld [vmem:[#allocation146_spill] sm:$0xff] }
 0x64f   : > { %v10425_v58 = vpop.f32.mrf.mxu1  ;;  %v10430_v14 = vmax.f32 %v3626_v41, %v13911_v40  ;;  %v3308_v6 = vpop.f32.mrf.mxu2  ;;  %v10447_v62 = vmax.f32 %v3721_v10, 0.0 }
 0x650   : > { %v3497_v25 = vpop.f32.mrf.mxu3  ;;  %6477 = vmatmul.msk.f32.gmra.mxu0 %vm3816_vm2, %v10427_v30 }
 0x651   : > { %v3498_v42 = vadd.f32 %v3497_v25, %v3308_v6 }
 0x652   : > { %6541 = vmatmul.msk.f32.gmra.mxu1 %vm3816_vm2, %v10427_v30 }
 0x653   : > { %v3571_v46 = vadd.f32 %v3498_v42, %v3083_v8  ;;  %v13915_v8 = vld [vmem:[#allocation40_spill] sm:$0xff] }
 0x654   : > { %6589 = vmatmul.msk.f32.gmra.mxu2 %vm3816_vm2, %v10109_v52 }
 0x655   : > { %v3627_v55 = vmax.f32 %v13910_v21, %v3571_v46  ;;  %6653 = vmatmul.msk.f32.gmra.mxu3 %vm3816_vm2, %v10109_v52  ;;  %v4024_v33 = vpop.f32.mrf.mxu0  ;;  %v3722_v52 = vadd.f32 %v9923_v22, %v10029_v11  ;;  %v13914_v11 = vld [vmem:[#allocation116_spill] sm:$0xff] }
 0x656   : > { %v3089_v42 = vadd.f32 %v13915_v8, %v13914_v11 }
 0x657   : > { %v10445_v12 = vpop.f32.mrf.mxu1  ;;  %v10450_v19 = vmax.f32 %v3627_v55, %v13912_v5  ;;  %v3311_v59 = vpop.f32.mrf.mxu2  ;;  %v10465_v26 = vmax.f32 %v3722_v52, 0.0 }
 0x658   : > { %v3500_v7 = vpop.f32.mrf.mxu3  ;;  %6478 = vmatmul.msk.f32.gmra.mxu0 %vm3816_vm2, %v10447_v62 }
 0x659   : > { %v3501_v21 = vadd.f32 %v3500_v7, %v3311_v59 }
 0x65a   : > { %6542 = vmatmul.msk.f32.gmra.mxu1 %vm3816_vm2, %v10447_v62 }
 0x65b   : > { %v3572_v38 = vadd.f32 %v3501_v21, %v3086_v1  ;;  %v13917_v1 = vld [vmem:[#allocation7_spill] sm:$0xff] }
 0x65c   : > { %6590 = vmatmul.msk.f32.gmra.mxu2 %vm3816_vm2, %v10129_v4 }
 0x65d   : > { %v3628_v47 = vmax.f32 %v13911_v40, %v3572_v38  ;;  %6654 = vmatmul.msk.f32.gmra.mxu3 %vm3816_vm2, %v10129_v4  ;;  %v4026_v56 = vpop.f32.mrf.mxu0  ;;  %v13916_v4 = vld [vmem:[#allocation38_spill] sm:$0xff] }
 0x65e   : > { %v3723_v40 = vadd.f32 %v9923_v22, %v13916_v4  ;;  %v13919_v56 = vld [vmem:[#allocation49_spill] sm:$0xff]  ;;  %v13921_v4 = vld [vmem:[#allocation10_spill] sm:$0xff] }
 0x65f   : > { %v4182_v41 = vpop.f32.mrf.mxu1  ;;  %v10468_v51 = vmax.f32 %v3628_v47, %v13913_v35  ;;  %v3314_v6 = vpop.f32.mrf.mxu2  ;;  %v13918_v47 = vld [vmem:[#allocation92_spill] sm:$0xff] }
 0x660   : > { %v3503_v25 = vpop.f32.mrf.mxu3  ;;  %6479 = vmatmul.msk.f32.gmra.mxu0 %vm3816_vm2, %v10465_v26  ;;  %v10483_v7 = vmax.f32 %v3723_v40, 0.0  ;;  %v3092_v41 = vadd.f32 %v13919_v56, %v13918_v47 }
 0x661   : > { %v3504_v10 = vadd.f32 %v3503_v25, %v3314_v6 }
 0x662   : > { %6543 = vmatmul.msk.f32.gmra.mxu1 %vm3816_vm2, %v10465_v26 }
 0x663   : > { %v3573_v46 = vadd.f32 %v3504_v10, %v3089_v42 }
 0x664   : > { %6591 = vmatmul.msk.f32.gmra.mxu2 %vm3816_vm2, %v10152_v50 }
 0x665   : > { %v3629_v55 = vmax.f32 %v13912_v5, %v3573_v46  ;;  %6655 = vmatmul.msk.f32.gmra.mxu3 %vm3816_vm2, %v10152_v50  ;;  %v4028_v33 = vpop.f32.mrf.mxu0  ;;  %v13920_v50 = vld [vmem:[#allocation90_spill] sm:$0xff] }
 0x666   : > { %v3724_v5 = vadd.f32 %v9923_v22, %v13920_v50  ;;  %v13922_v33 = vld [vmem:[#allocation121_spill] sm:$0xff] }
 0x667   : > { %v4184_v59 = vpop.f32.mrf.mxu1  ;;  %v10486_v21 = vmax.f32 %v3629_v55, %v13917_v1  ;;  %v3317_v52 = vpop.f32.mrf.mxu2 }
 0x668   : > { %v3506_v38 = vpop.f32.mrf.mxu3  ;;  %6480 = vmatmul.msk.f32.gmra.mxu0 %vm3816_vm2, %v10483_v7  ;;  %v10503_v10 = vmax.f32 %v3724_v5, 0.0  ;;  %v3095_v59 = vadd.f32 %v13922_v33, %v10125_v53 }
 0x669   : > { %v3507_v6 = vadd.f32 %v3506_v38, %v3317_v52 }
 0x66a   : > { %6544 = vmatmul.msk.f32.gmra.mxu1 %vm3816_vm2, %v10483_v7 }
 0x66b   : > { %v3574_v25 = vadd.f32 %v3507_v6, %v3092_v41  ;;  %v13924_v6 = vld [vmem:[#allocation9_spill] sm:$0xff] }
 0x66c   : > { %6592 = vmatmul.msk.f32.gmra.mxu2 %vm3816_vm2, %v10172_v0 }
 0x66d   : > { %v3630_v11 = vmax.f32 %v13913_v35, %v3574_v25  ;;  %6656 = vmatmul.msk.f32.gmra.mxu3 %vm3816_vm2, %v10172_v0  ;;  %v10501_v8 = vpop.f32.mrf.mxu0  ;;  %v13923_v0 = vld [vmem:[#allocation117_spill] sm:$0xff] }
 0x66e   : > { %v3725_v52 = vadd.f32 %v9923_v22, %v13923_v0 }
 0x66f   : > { %v4186_v42 = vpop.f32.mrf.mxu1  ;;  %v10506_v40 = vmax.f32 %v3630_v11, %v13921_v4  ;;  %v3320_v46 = vpop.f32.mrf.mxu2  ;;  %v13925_v11 = vld [vmem:[#allocation124_spill] sm:$0xff] }
 0x670   : > { %v3509_v55 = vpop.f32.mrf.mxu3  ;;  %6481 = vmatmul.msk.f32.gmra.mxu0 %vm3816_vm2, %v10503_v10  ;;  %v10523_v53 = vmax.f32 %v3725_v52, 0.0  ;;  %v13926_v42 = vld [vmem:[#allocation50_spill] sm:$0xff] }
 0x671   : > { %v3510_v35 = vadd.f32 %v3509_v55, %v3320_v46  ;;  %v3098_v46 = vadd.f32 %v13926_v42, %v13925_v11 }
 0x672   : > { %6545 = vmatmul.msk.f32.gmra.mxu1 %vm3816_vm2, %v10503_v10 }
 0x673   : > { %v3575_v38 = vadd.f32 %v3510_v35, %v3095_v59 }
 0x674   : > { %6593 = vmatmul.msk.f32.gmra.mxu2 %vm3816_vm2, %v10195_v63 }
 0x675   : > { %v3631_v47 = vmax.f32 %v13917_v1, %v3575_v38  ;;  %6657 = vmatmul.msk.f32.gmra.mxu3 %vm3816_vm2, %v10195_v63  ;;  %v10521_v56 = vpop.f32.mrf.mxu0  ;;  %v13927_v63 = vld [vmem:[#allocation94_spill] sm:$0xff] }
 0x676   : > { %v3726_v55 = vadd.f32 %v9923_v22, %v13927_v63  ;;  %v13928_v38 = vld [vmem:[#allocation14_spill] sm:$0xff] }
 0x677   : > { %v4188_v41 = vpop.f32.mrf.mxu1  ;;  %v10526_v50 = vmax.f32 %v3631_v47, %v13924_v6  ;;  %v3323_v5 = vpop.f32.mrf.mxu2 }
 0x678   : > { %v3512_v25 = vpop.f32.mrf.mxu3  ;;  %6482 = vmatmul.msk.f32.gmra.mxu0 %vm3816_vm2, %v10523_v53  ;;  %v10543_v52 = vmax.f32 %v3726_v55, 0.0 }
 0x679   : > { %v3513_v1 = vadd.f32 %v3512_v25, %v3323_v5  ;;  %v13929_v25 = vld [vmem:[#allocation143_spill] sm:$0xff] }
 0x67a   : > { %6546 = vmatmul.msk.f32.gmra.mxu1 %vm3816_vm2, %v10523_v53  ;;  %v3101_v11 = vadd.f32 %v13929_v25, %v10168_v49 }
 0x67b   : > { %v3576_v33 = vadd.f32 %v3513_v1, %v3098_v46 }
 0x67c   : > { %6594 = vmatmul.msk.f32.gmra.mxu2 %vm3816_vm2, %v10221_v32 }
 0x67d   : > { %v3632_v59 = vmax.f32 %v13921_v4, %v3576_v33  ;;  %6658 = vmatmul.msk.f32.gmra.mxu3 %vm3816_vm2, %v10221_v32  ;;  %v4036_v35 = vpop.f32.mrf.mxu0  ;;  %v13930_v32 = vld [vmem:[#allocation47_spill] sm:$0xff]  ;;  %v13931_v33 = vld [vmem:[#allocation17_spill] sm:$0xff] }
 0x67e   : > { %v3727_v42 = vadd.f32 %v9923_v22, %v13930_v32 }
 0x67f   : > { %v10541_v0 = vpop.f32.mrf.mxu1  ;;  %v10546_v47 = vmax.f32 %v3632_v59, %v13928_v38  ;;  %v3326_v41 = vpop.f32.mrf.mxu2 }
 0x680   : > { %v3515_v5 = vpop.f32.mrf.mxu3  ;;  %6483 = vmatmul.msk.f32.gmra.mxu0 %vm3816_vm2, %v10543_v52  ;;  %v10563_v49 = vmax.f32 %v3727_v42, 0.0 }
 0x681   : > { %v3516_v4 = vadd.f32 %v3515_v5, %v3326_v41  ;;  %v13932_v5 = vld [vmem:[#allocation97_spill] sm:$0xff] }
 0x682   : > { %6547 = vmatmul.msk.f32.gmra.mxu1 %vm3816_vm2, %v10543_v52  ;;  %v3104_v25 = vadd.f32 %v13932_v5, %v10191_v39  ;;  %v13934_v39 = vld [vmem:[#allocation18_spill] sm:$0xff]  ;;  %v13936_v5 = vld [vmem:[#allocation147_spill] sm:$0xff] }
 0x683   : > { %v3577_v46 = vadd.f32 %v3516_v4, %v3101_v11 }
 0x684   : > { %6595 = vmatmul.msk.f32.gmra.mxu2 %vm3816_vm2, %v10237_v31 }
 0x685   : > { %v3633_v1 = vmax.f32 %v13924_v6, %v3577_v46  ;;  %6659 = vmatmul.msk.f32.gmra.mxu3 %vm3816_vm2, %v10237_v31  ;;  %v4038_v63 = vpop.f32.mrf.mxu0  ;;  %v13933_v31 = vld [vmem:[#allocation126_spill] sm:$0xff] }
 0x686   : > { %v3728_v11 = vadd.f32 %v9923_v22, %v13933_v31  ;;  %v13935_v22 = vld [vmem:[#allocation98_spill] sm:$0xff] }
 0x687   : > { %v10561_v55 = vpop.f32.mrf.mxu1  ;;  %v10566_v59 = vmax.f32 %v3633_v1, %v13931_v33  ;;  %v3329_v35 = vpop.f32.mrf.mxu2 }
 0x688   : > { %v3518_v41 = vpop.f32.mrf.mxu3  ;;  %6484 = vmatmul.msk.f32.gmra.mxu0 %vm3816_vm2, %v10563_v49  ;;  %v10581_v1 = vmax.f32 %v3728_v11, 0.0 }
 0x689   : > { %v3519_v6 = vadd.f32 %v3518_v41, %v3329_v35 }
 0x68a   : > { %6548 = vmatmul.msk.f32.gmra.mxu1 %vm3816_vm2, %v10563_v49 }
 0x68b   : > { %v3578_v4 = vadd.f32 %v3519_v6, %v3104_v25  ;;  %v3107_v25 = vadd.f32 %v13936_v5, %v13935_v22  ;;  %v13939_v5 = vld [vmem:[#allocation52_spill] sm:$0xff] }
 0x68c   : > { %6596 = vmatmul.msk.f32.gmra.mxu2 %vm3816_vm2, %v10253_v57 }
 0x68d   : > { %v3634_v32 = vmax.f32 %v13928_v38, %v3578_v4  ;;  %6660 = vmatmul.msk.f32.gmra.mxu3 %vm3816_vm2, %v10253_v57  ;;  %v4040_v42 = vpop.f32.mrf.mxu0  ;;  %v10595_v57 = vld [vmem:[%s12751_s4] ss:$0 sm:$0xff]  ;;  %v13937_v38 = vld [vmem:[#allocation145_spill] sm:$0xff] }
 0x68e   : > { %v3729_v31 = vadd.f32 %v10595_v57, %v13937_v38 }
 0x68f   : > { %v4196_v46 = vpop.f32.mrf.mxu1  ;;  %v10584_v63 = vmax.f32 %v3634_v32, %v13934_v39  ;;  %v3332_v35 = vpop.f32.mrf.mxu2  ;;  %v13938_v39 = vld [vmem:[#allocation21_spill] sm:$0xff] }
 0x690   : > { %v3521_v41 = vpop.f32.mrf.mxu3  ;;  %6485 = vmatmul.msk.f32.gmra.mxu0 %vm3816_vm2, %v10581_v1  ;;  %v10604_v46 = vmax.f32 %v3729_v31, 0.0 }
 0x691   : > { %v3522_v6 = vadd.f32 %v3521_v41, %v3332_v35 }
 0x692   : > { %6549 = vmatmul.msk.f32.gmra.mxu1 %vm3816_vm2, %v10581_v1 }
 0x693   : > { %v3579_v11 = vadd.f32 %v3522_v6, %v3107_v25 }
 0x694   : > { %6597 = vmatmul.msk.f32.gmra.mxu2 %vm3816_vm2, %v10271_v13 }
 0x695   : > { %v3635_v4 = vmax.f32 %v13931_v33, %v3579_v11  ;;  %6661 = vmatmul.msk.f32.gmra.mxu3 %vm3816_vm2, %v10271_v13  ;;  %v4042_v32 = vpop.f32.mrf.mxu0  ;;  %v3730_v33 = vadd.f32 %v10595_v57, %v13939_v5  ;;  %v13940_v11 = vld [vmem:[#allocation131_spill] sm:$0xff] }
 0x697   : > { %v4198_v42 = vpop.f32.mrf.mxu1  ;;  %v10607_v35 = vmax.f32 %v3635_v4, %v13938_v39  ;;  %v4314_v41 = vpop.f32.mrf.mxu2  ;;  %v10621_v6 = vmax.f32 %v3730_v33, 0.0  ;;  %v3731_v4 = vadd.f32 %v10595_v57, %v13940_v11 }
 0x698   : > { %v4470_v22 = vpop.f32.mrf.mxu3  ;;  %6486 = vmatmul.msk.f32.gmra.mxu0 %vm3816_vm2, %v10604_v46 }
 0x699   : > { %v10635_v42 = vmax.f32 %v3731_v4, 0.0  ;;  %v3732_v22 = vadd.f32 %v10595_v57, %v10240_v18  ;;  %v3733_v18 = vadd.f32 %v10595_v57, %v10256_v23  ;;  %v3734_v23 = vadd.f32 %v10595_v57, %v10274_v24 }
 0x69a   : > { %6550 = vmatmul.msk.f32.gmra.mxu1 %vm3816_vm2, %v10604_v46  ;;  %v3735_v24 = vadd.f32 %v10595_v57, %v10294_v54  ;;  %v3736_v54 = vadd.f32 %v10595_v57, %v10314_v15  ;;  %v3737_v15 = vadd.f32 %v10595_v57, %v10334_v36  ;;  %v3738_v36 = vadd.f32 %v10595_v57, %v10352_v9 }
 0x69b   : > { %v10649_v33 = vmax.f32 %v3732_v22, 0.0  ;;  %v10665_v4 = vmax.f32 %v3733_v18, 0.0  ;;  %v10679_v22 = vmax.f32 %v3734_v23, 0.0  ;;  %v3739_v9 = vadd.f32 %v10595_v57, %v10370_v2 }
 0x69c   : > { %6598 = vmatmul.msk.f32.gmra.mxu2 %vm3816_vm2, %v10291_v20  ;;  %v3740_v2 = vadd.f32 %v10595_v57, %v10390_v37  ;;  %v3741_v37 = vadd.f32 %v10595_v57, %v10410_v28  ;;  %v3742_v28 = vadd.f32 %v10595_v57, %v10430_v14 }
 0x69d   : > { %6662 = vmatmul.msk.f32.gmra.mxu3 %vm3816_vm2, %v10291_v20  ;;  %v10619_v13 = vpop.f32.mrf.mxu0 }
 0x69f   : > { %v4200_v25 = vpop.f32.mrf.mxu1  ;;  %v4316_v38 = vpop.f32.mrf.mxu2 }
 0x6a0   : > { %v4472_v31 = vpop.f32.mrf.mxu3  ;;  %6487 = vmatmul.msk.f32.gmra.mxu0 %vm3816_vm2, %v10621_v6 }
 0x6a1   : > { %v4600_v31 = vadd.f32 %v10309_v43, %v10269_v45  ;;  %v4601_v43 = vadd.f32 %v10329_v27, %v10289_v16 }
 0x6a2   : > { %6551 = vmatmul.msk.f32.gmra.mxu1 %vm3816_vm2, %v10621_v6 }
 0x6a4   : > { %6599 = vmatmul.msk.f32.gmra.mxu2 %vm3816_vm2, %v10311_v60 }
 0x6a5   : > { %6663 = vmatmul.msk.f32.gmra.mxu3 %vm3816_vm2, %v10311_v60  ;;  %v10633_v20 = vpop.f32.mrf.mxu0 }
 0x6a7   : > { %v4202_v32 = vpop.f32.mrf.mxu1  ;;  %v4318_v39 = vpop.f32.mrf.mxu2 }
 0x6a8   : > { %v4474_v41 = vpop.f32.mrf.mxu3  ;;  %6488 = vmatmul.msk.f32.gmra.mxu0 %vm3816_vm2, %v10635_v42 }
 0x6aa   : > { %6552 = vmatmul.msk.f32.gmra.mxu1 %vm3816_vm2, %v10635_v42 }
 0x6ac   : > { %6600 = vmatmul.msk.f32.gmra.mxu2 %vm3816_vm2, %v10331_v29 }
 0x6ad   : > { %6664 = vmatmul.msk.f32.gmra.mxu3 %vm3816_vm2, %v10331_v29  ;;  %v4050_v60 = vpop.f32.mrf.mxu0 }
 0x6af   : > { %v10647_v5 = vpop.f32.mrf.mxu1  ;;  %v4320_v25 = vpop.f32.mrf.mxu2 }
 0x6b0   : > { %v4476_v38 = vpop.f32.mrf.mxu3  ;;  %6489 = vmatmul.msk.f32.gmra.mxu0 %vm3816_vm2, %v10649_v33 }
 0x6b2   : > { %6553 = vmatmul.msk.f32.gmra.mxu1 %vm3816_vm2, %v10649_v33 }
 0x6b4   : > { %6601 = vmatmul.msk.f32.gmra.mxu2 %vm3816_vm2, %v10349_v3 }
 0x6b5   : > { %6665 = vmatmul.msk.f32.gmra.mxu3 %vm3816_vm2, %v10349_v3  ;;  %v4052_v29 = vpop.f32.mrf.mxu0 }
 0x6b7   : > { %v10663_v11 = vpop.f32.mrf.mxu1  ;;  %v4322_v32 = vpop.f32.mrf.mxu2 }
 0x6b8   : > { %v4602_v39 = vadd.f32 %v4600_v31, %v4322_v32  ;;  %v4478_v41 = vpop.f32.mrf.mxu3  ;;  %6490 = vmatmul.msk.f32.gmra.mxu0 %vm3816_vm2, %v10665_v4 }
 0x6b9   : > { %v10707_v41 = vmax.f32 %v3736_v54, 0.0  ;;  %v10753_v54 = vmax.f32 %v3739_v9, 0.0 }
 0x6ba   : > { %6554 = vmatmul.msk.f32.gmra.mxu1 %vm3816_vm2, %v10665_v4 }
 0x6bc   : > { %6602 = vmatmul.msk.f32.gmra.mxu2 %vm3816_vm2, %v10367_v17 }
 0x6bd   : > { %6666 = vmatmul.msk.f32.gmra.mxu3 %vm3816_vm2, %v10367_v17  ;;  %v4054_v45 = vpop.f32.mrf.mxu0  ;;  %v10691_v17 = vmax.f32 %v3735_v24, 0.0  ;;  %v10737_v24 = vmax.f32 %v3738_v36, 0.0 }
 0x6bf   : > { %v4210_v3 = vpop.f32.mrf.mxu1  ;;  %v4325_v60 = vpop.f32.mrf.mxu2 }
 0x6c0   : > { %v4603_v25 = vadd.f32 %v4601_v43, %v4325_v60  ;;  %v4480_v38 = vpop.f32.mrf.mxu3  ;;  %6491 = vmatmul.msk.f32.gmra.mxu0 %vm3816_vm2, %v10679_v22  ;;  %v10723_v3 = vmax.f32 %v3737_v15, 0.0  ;;  %v10767_v15 = vmax.f32 %v3740_v2, 0.0 }
 0x6c2   : > { %6555 = vmatmul.msk.f32.gmra.mxu1 %vm3816_vm2, %v10679_v22 }
 0x6c4   : > { %6603 = vmatmul.msk.f32.gmra.mxu2 %vm3816_vm2, %v10387_v34 }
 0x6c5   : > { %6667 = vmatmul.msk.f32.gmra.mxu3 %vm3816_vm2, %v10387_v34  ;;  %v4056_v16 = vpop.f32.mrf.mxu0 }
 0x6c7   : > { %v4212_v27 = vpop.f32.mrf.mxu1  ;;  %v4328_v18 = vpop.f32.mrf.mxu2 }
 0x6c8   : > { %v4482_v29 = vpop.f32.mrf.mxu3  ;;  %6492 = vmatmul.msk.f32.gmra.mxu0 %vm3816_vm2, %v10691_v17  ;;  %v4606_v18 = vadd.f32 %v10425_v58, %v10385_v48  ;;  %v4607_v58 = vadd.f32 %v10445_v12, %v10405_v44 }
 0x6c9   : > { %v10695_v31 = vadd.f32 %v4602_v39, %v4482_v29 }
 0x6ca   : > { %6556 = vmatmul.msk.f32.gmra.mxu1 %vm3816_vm2, %v10691_v17 }
 0x6cc   : > { %6604 = vmatmul.msk.f32.gmra.mxu2 %vm3816_vm2, %v10407_v61 }
 0x6cd   : > { %6668 = vmatmul.msk.f32.gmra.mxu3 %vm3816_vm2, %v10407_v61  ;;  %v10705_v34 = vpop.f32.mrf.mxu0 }
 0x6cf   : > { %v4214_v32 = vpop.f32.mrf.mxu1  ;;  %v4330_v23 = vpop.f32.mrf.mxu2 }
 0x6d0   : > { %v4485_v39 = vpop.f32.mrf.mxu3  ;;  %6493 = vmatmul.msk.f32.gmra.mxu0 %vm3816_vm2, %v10707_v41 }
 0x6d1   : > { %v10711_v45 = vadd.f32 %v4603_v25, %v4485_v39 }
 0x6d2   : > { %6557 = vmatmul.msk.f32.gmra.mxu1 %vm3816_vm2, %v10707_v41 }
 0x6d4   : > { %6605 = vmatmul.msk.f32.gmra.mxu2 %vm3816_vm2, %v10427_v30 }
 0x6d5   : > { %6669 = vmatmul.msk.f32.gmra.mxu3 %vm3816_vm2, %v10427_v30  ;;  %v10721_v61 = vpop.f32.mrf.mxu0 }
 0x6d7   : > { %v4216_v43 = vpop.f32.mrf.mxu1  ;;  %v4332_v60 = vpop.f32.mrf.mxu2 }
 0x6d8   : > { %v4488_v25 = vpop.f32.mrf.mxu3  ;;  %6494 = vmatmul.msk.f32.gmra.mxu0 %vm3816_vm2, %v10723_v3 }
 0x6da   : > { %6558 = vmatmul.msk.f32.gmra.mxu1 %vm3816_vm2, %v10723_v3 }
 0x6dc   : > { %6606 = vmatmul.msk.f32.gmra.mxu2 %vm3816_vm2, %v10447_v62 }
 0x6dd   : > { %6670 = vmatmul.msk.f32.gmra.mxu3 %vm3816_vm2, %v10447_v62  ;;  %v4064_v30 = vpop.f32.mrf.mxu0 }
 0x6df   : > { %v10735_v38 = vpop.f32.mrf.mxu1  ;;  %v4334_v16 = vpop.f32.mrf.mxu2 }
 0x6e0   : > { %v4490_v27 = vpop.f32.mrf.mxu3  ;;  %6495 = vmatmul.msk.f32.gmra.mxu0 %vm3816_vm2, %v10737_v24 }
 0x6e2   : > { %6559 = vmatmul.msk.f32.gmra.mxu1 %vm3816_vm2, %v10737_v24 }
 0x6e4   : > { %6607 = vmatmul.msk.f32.gmra.mxu2 %vm3816_vm2, %v10465_v26 }
 0x6e5   : > { %6671 = vmatmul.msk.f32.gmra.mxu3 %vm3816_vm2, %v10465_v26  ;;  %v4066_v62 = vpop.f32.mrf.mxu0 }
 0x6e6   : > { %v10797_v62 = vmax.f32 %v3742_v28, 0.0 }
 0x6e7   : > { %v10751_v29 = vpop.f32.mrf.mxu1  ;;  %v4336_v32 = vpop.f32.mrf.mxu2 }
 0x6e8   : > { %v4608_v23 = vadd.f32 %v4606_v18, %v4336_v32  ;;  %v4492_v39 = vpop.f32.mrf.mxu3  ;;  %6496 = vmatmul.msk.f32.gmra.mxu0 %vm3816_vm2, %v10753_v54 }
 0x6ea   : > { %6560 = vmatmul.msk.f32.gmra.mxu1 %vm3816_vm2, %v10753_v54 }
 0x6ec   : > { %6608 = vmatmul.msk.f32.gmra.mxu2 %vm3816_vm2, %v10483_v7 }
 0x6ed   : > { %6672 = vmatmul.msk.f32.gmra.mxu3 %vm3816_vm2, %v10483_v7  ;;  %v4068_v48 = vpop.f32.mrf.mxu0  ;;  %v10779_v7 = vmax.f32 %v3741_v37, 0.0 }
 0x6ef   : > { %v4224_v26 = vpop.f32.mrf.mxu1  ;;  %v4339_v43 = vpop.f32.mrf.mxu2 }
 0x6f0   : > { %v4609_v60 = vadd.f32 %v4607_v58, %v4339_v43  ;;  %v4494_v25 = vpop.f32.mrf.mxu3  ;;  %6497 = vmatmul.msk.f32.gmra.mxu0 %vm3816_vm2, %v10767_v15 }
 0x6f2   : > { %6561 = vmatmul.msk.f32.gmra.mxu1 %vm3816_vm2, %v10767_v15 }
 0x6f4   : > { %6609 = vmatmul.msk.f32.gmra.mxu2 %vm3816_vm2, %v10503_v10 }
 0x6f5   : > { %6673 = vmatmul.msk.f32.gmra.mxu3 %vm3816_vm2, %v10503_v10  ;;  %v4070_v44 = vpop.f32.mrf.mxu0 }
 0x6f6   : > { %v4612_v44 = vadd.f32 %v10541_v0, %v10501_v8  ;;  %v4613_v0 = vadd.f32 %v10561_v55, %v10521_v56 }
 0x6f7   : > { %v4226_v12 = vpop.f32.mrf.mxu1  ;;  %v4342_v36 = vpop.f32.mrf.mxu2 }
 0x6f8   : > { %v4496_v30 = vpop.f32.mrf.mxu3  ;;  %6498 = vmatmul.msk.f32.gmra.mxu0 %vm3816_vm2, %v10779_v7 }
 0x6f9   : > { %v10783_v16 = vadd.f32 %v4608_v23, %v4496_v30  ;;  %v3743_v23 = vadd.f32 %v10595_v57, %v10450_v19  ;;  %v3744_v19 = vadd.f32 %v10595_v57, %v10468_v51  ;;  %v3745_v51 = vadd.f32 %v10595_v57, %v10486_v21 }
 0x6fa   : > { %6562 = vmatmul.msk.f32.gmra.mxu1 %vm3816_vm2, %v10779_v7  ;;  %v3746_v21 = vadd.f32 %v10595_v57, %v10506_v40  ;;  %v3747_v40 = vadd.f32 %v10595_v57, %v10526_v50  ;;  %v3748_v50 = vadd.f32 %v10595_v57, %v10546_v47 }
 0x6fb   : > { %v4655_v10 = vmax.f32 %v10695_v31, %v10783_v16  ;;  %v10815_v48 = vmax.f32 %v3743_v23, 0.0  ;;  %v10845_v36 = vmax.f32 %v3745_v51, 0.0  ;;  %v3749_v31 = vadd.f32 %v10595_v57, %v10566_v59 }
 0x6fc   : > { %6610 = vmatmul.msk.f32.gmra.mxu2 %vm3816_vm2, %v10523_v53  ;;  %v3750_v59 = vadd.f32 %v10595_v57, %v10584_v63  ;;  %v3751_v63 = vadd.f32 %v10595_v57, %v10607_v35  ;;  %v4618_v35 = vadd.f32 %v10647_v5, %v10619_v13  ;;  %v4619_v5 = vadd.f32 %v10663_v11, %v10633_v20  ;;  %v4784_v20 = vld [vmem:[%s12754_s7 + $0x70] sm:$0xff] }
 0x6fd   : > { %6674 = vmatmul.msk.f32.gmra.mxu3 %vm3816_vm2, %v10523_v53  ;;  %v10795_v27 = vpop.f32.mrf.mxu0  ;;  %v4832_v11 = vld [vmem:[%s12754_s7 + $0x1f0] sm:$0xff] }
 0x6ff   : > { %v4228_v9 = vpop.f32.mrf.mxu1  ;;  %v4344_v18 = vpop.f32.mrf.mxu2 }
 0x700   : > { %v4499_v32 = vpop.f32.mrf.mxu3  ;;  %6499 = vmatmul.msk.f32.gmra.mxu0 %vm3816_vm2, %v10797_v62  ;;  %v10859_v18 = vmax.f32 %v3746_v21, 0.0 }
 0x701   : > { %v10801_v14 = vadd.f32 %v4609_v60, %v4499_v32  ;;  %v10829_v60 = vmax.f32 %v3744_v19, 0.0 }
 0x702   : > { %6563 = vmatmul.msk.f32.gmra.mxu1 %vm3816_vm2, %v10797_v62 }
 0x703   : > { %v4656_v53 = vmax.f32 %v10711_v45, %v10801_v14  ;;  %v10929_v14 = vmax.f32 %v3750_v59, 0.0 }
 0x704   : > { %6611 = vmatmul.msk.f32.gmra.mxu2 %vm3816_vm2, %v10543_v52 }
 0x705   : > { %6675 = vmatmul.msk.f32.gmra.mxu3 %vm3816_vm2, %v10543_v52  ;;  %v10813_v39 = vpop.f32.mrf.mxu0 }
 0x707   : > { %v4230_v2 = vpop.f32.mrf.mxu1  ;;  %v4346_v58 = vpop.f32.mrf.mxu2 }
 0x708   : > { %v4502_v26 = vpop.f32.mrf.mxu3  ;;  %6500 = vmatmul.msk.f32.gmra.mxu0 %vm3816_vm2, %v10815_v48 }
 0x70a   : > { %6564 = vmatmul.msk.f32.gmra.mxu1 %vm3816_vm2, %v10815_v48 }
 0x70c   : > { %6612 = vmatmul.msk.f32.gmra.mxu2 %vm3816_vm2, %v10563_v49 }
 0x70d   : > { %6676 = vmatmul.msk.f32.gmra.mxu3 %vm3816_vm2, %v10563_v49  ;;  %v4078_v52 = vpop.f32.mrf.mxu0 }
 0x70f   : > { %v10827_v43 = vpop.f32.mrf.mxu1  ;;  %v4348_v25 = vpop.f32.mrf.mxu2 }
 0x710   : > { %v4504_v37 = vpop.f32.mrf.mxu3  ;;  %6501 = vmatmul.msk.f32.gmra.mxu0 %vm3816_vm2, %v10829_v60 }
 0x711   : > { %v10893_v37 = vmax.f32 %v3748_v50, 0.0 }
 0x712   : > { %6565 = vmatmul.msk.f32.gmra.mxu1 %vm3816_vm2, %v10829_v60 }
 0x714   : > { %6613 = vmatmul.msk.f32.gmra.mxu2 %vm3816_vm2, %v10581_v1 }
 0x715   : > { %6677 = vmatmul.msk.f32.gmra.mxu3 %vm3816_vm2, %v10581_v1  ;;  %v4080_v49 = vpop.f32.mrf.mxu0 }
 0x717   : > { %v10843_v12 = vpop.f32.mrf.mxu1  ;;  %v4350_v30 = vpop.f32.mrf.mxu2 }
 0x718   : > { %v4614_v28 = vadd.f32 %v4612_v44, %v4350_v30  ;;  %v4506_v9 = vpop.f32.mrf.mxu3  ;;  %6502 = vmatmul.msk.f32.gmra.mxu0 %vm3816_vm2, %v10845_v36  ;;  %v10915_v44 = vmax.f32 %v3749_v31, 0.0 }
 0x71a   : > { %6566 = vmatmul.msk.f32.gmra.mxu1 %vm3816_vm2, %v10845_v36 }
 0x71c   : > { %6614 = vmatmul.msk.f32.gmra.mxu2 %vm3816_vm2, %v10604_v46 }
 0x71d   : > { %6678 = vmatmul.msk.f32.gmra.mxu3 %vm3816_vm2, %v10604_v46  ;;  %v4082_v8 = vpop.f32.mrf.mxu0  ;;  %v10871_v46 = vmax.f32 %v3747_v40, 0.0 }
 0x71e   : > { %v4833_v8 = vld [vmem:[%s12754_s7 + $0x1f8] sm:$0xff] }
 0x71f   : > { %v4238_v1 = vpop.f32.mrf.mxu1  ;;  %v4353_v32 = vpop.f32.mrf.mxu2  ;;  %5343 = vmatpush.msra.mxu3 %v4833_v8 }
 0x720   : > { %v4615_v23 = vadd.f32 %v4613_v0, %v4353_v32  ;;  %v4508_v2 = vpop.f32.mrf.mxu3  ;;  %6503 = vmatmul.msk.f32.gmra.mxu0 %vm3816_vm2, %v10859_v18  ;;  %v4801_v0 = vld [vmem:[%s12754_s7 + $0xf8] sm:$0xff]  ;;  %v10957_v32 = vmax.f32 %v3751_v63, 0.0 }
 0x721   : > { %5303 = vmatpush.msra.mxu1 %v4801_v0  ;;  %5344 = vmatpush.msra.mxu3 %v4832_v11 }
 0x722   : > { %6567 = vmatmul.msk.f32.gmra.mxu1 %vm3816_vm2, %v10859_v18 }
 0x724   : > { %6615 = vmatmul.msk.f32.gmra.mxu2 %vm3816_vm2, %v10621_v6 }
 0x725   : > { %6679 = vmatmul.msk.f32.gmra.mxu3 %vm3816_vm2, %v10621_v6  ;;  %v4084_v56 = vpop.f32.mrf.mxu0 }
 0x727   : > { %v4240_v55 = vpop.f32.mrf.mxu1  ;;  %v4356_v58 = vpop.f32.mrf.mxu2 }
 0x728   : > { %v4510_v26 = vpop.f32.mrf.mxu3  ;;  %6504 = vmatmul.msk.f32.gmra.mxu0 %vm3816_vm2, %v10871_v46 }
 0x729   : > { %v10875_v19 = vadd.f32 %v4614_v28, %v4510_v26 }
 0x72a   : > { %6568 = vmatmul.msk.f32.gmra.mxu1 %vm3816_vm2, %v10871_v46 }
 0x72b   : > { %v10885_v6 = vmax.f32 %v4655_v10, %v10875_v19 }
 0x72c   : > { %6616 = vmatmul.msk.f32.gmra.mxu2 %vm3816_vm2, %v10635_v42 }
 0x72d   : > { %6680 = vmatmul.msk.f32.gmra.mxu3 %vm3816_vm2, %v10635_v42  ;;  %v10891_v52 = vpop.f32.mrf.mxu0 }
 0x72f   : > { %v4242_v25 = vpop.f32.mrf.mxu1  ;;  %v4358_v51 = vpop.f32.mrf.mxu2 }
 0x730   : > { %v4513_v49 = vpop.f32.mrf.mxu3  ;;  %6505 = vmatmul.msk.f32.gmra.mxu0 %vm3816_vm2, %v10893_v37 }
 0x731   : > { %v10897_v47 = vadd.f32 %v4615_v23, %v4513_v49 }
 0x732   : > { %6569 = vmatmul.msk.f32.gmra.mxu1 %vm3816_vm2, %v10893_v37 }
 0x733   : > { %v10907_v42 = vmax.f32 %v4656_v53, %v10897_v47  ;;  %v4817_v53 = vld [vmem:[%s12754_s7 + $0x178] sm:$0xff] }
 0x734   : > { %6617 = vmatmul.msk.f32.gmra.mxu2 %vm3816_vm2, %v10649_v33 }
 0x735   : > { %6681 = vmatmul.msk.f32.gmra.mxu3 %vm3816_vm2, %v10649_v33  ;;  %v10913_v16 = vpop.f32.mrf.mxu0  ;;  %5323 = vmatpush.msra.mxu2 %v4817_v53 }
 0x737   : > { %v4244_v10 = vpop.f32.mrf.mxu1  ;;  %v4360_v30 = vpop.f32.mrf.mxu2 }
 0x738   : > { %v4516_v28 = vpop.f32.mrf.mxu3  ;;  %6506 = vmatmul.msk.f32.gmra.mxu0 %vm3816_vm2, %v10915_v44  ;;  %v4800_v30 = vld [vmem:[%s12754_s7 + $0xf0] sm:$0xff] }
 0x739   : > { %5304 = vmatpush.msra.mxu1 %v4800_v30 }
 0x73a   : > { %6570 = vmatmul.msk.f32.gmra.mxu1 %vm3816_vm2, %v10915_v44 }
 0x73c   : > { %6618 = vmatmul.msk.f32.gmra.mxu2 %vm3816_vm2, %v10665_v4 }
 0x73d   : > { %6682 = vmatmul.msk.f32.gmra.mxu3 %vm3816_vm2, %v10665_v4  ;;  %v4092_v33 = vpop.f32.mrf.mxu0  ;;  %v4785_v4 = vld [vmem:[%s12754_s7 + $0x78] sm:$0xff] }
 0x73e   : > { %5283 = vmatpush.msra.mxu0 %v4785_v4 }
 0x73f   : > { %v10927_v45 = vpop.f32.mrf.mxu1  ;;  %v4362_v9 = vpop.f32.mrf.mxu2 }
 0x740   : > { %v4518_v21 = vpop.f32.mrf.mxu3  ;;  %6507 = vmatmul.msk.f32.gmra.mxu0 %vm3816_vm2, %v10929_v14 }
 0x741   : > { %5284 = vmatpush.msra.mxu0 %v4784_v20 }
 0x742   : > { %6571 = vmatmul.msk.f32.gmra.mxu1 %vm3816_vm2, %v10929_v14 }
 0x744   : > { %6619 = vmatmul.msk.f32.gmra.mxu2 %vm3816_vm2, %v10679_v22 }
 0x745   : > { %6683 = vmatmul.msk.f32.gmra.mxu3 %vm3816_vm2, %v10679_v22  ;;  %v4094_v57 = vpop.f32.mrf.mxu0 }
 0x746   : > { %v4624_v57 = vadd.f32 %v10735_v38, %v10705_v34  ;;  %v4799_v34 = vld [vmem:[%s12754_s7 + $0xe8] sm:$0xff] }
 0x747   : > { %v10955_v1 = vpop.f32.mrf.mxu1  ;;  %v4364_v23 = vpop.f32.mrf.mxu2  ;;  %5305 = vmatpush.msra.mxu1 %v4799_v34 }
 0x748   : > { %v4620_v2 = vadd.f32 %v4618_v35, %v4364_v23  ;;  %v4520_v40 = vpop.f32.mrf.mxu3  ;;  %6508 = vmatmul.msk.f32.gmra.mxu0 %vm3816_vm2, %v10957_v32 }
 0x74a   : > { %6572 = vmatmul.msk.f32.gmra.mxu1 %vm3816_vm2, %v10957_v32 }
 0x74c   : > { %6620 = vmatmul.msk.f32.gmra.mxu2 %vm3816_vm2, %v10691_v17 }
 0x74d   : > { %6684 = vmatmul.msk.f32.gmra.mxu3 %vm3816_vm2, %v10691_v17  ;;  %v4096_v13 = vpop.f32.mrf.mxu0  ;;  %v4816_v17 = vld [vmem:[%s12754_s7 + $0x170] sm:$0xff] }
 0x74e   : > { %5324 = vmatpush.msra.mxu2 %v4816_v17 }
 0x74f   : > { %v4252_v22 = vpop.f32.mrf.mxu1  ;;  %v4367_v56 = vpop.f32.mrf.mxu2 }
 0x750   : > { %v4621_v55 = vadd.f32 %v4619_v5, %v4367_v56  ;;  %v4522_v58 = vpop.f32.mrf.mxu3  ;;  %v4783_v5 = vld [vmem:[%s12754_s7 + $0x68] sm:$0xff]  ;;  %v4625_v22 = vadd.f32 %v10751_v29, %v10721_v61 }
 0x751   : > { %5285 = vmatpush.msra.mxu0 %v4783_v5 }
 0x754   : > { %6621 = vmatmul.msk.f32.gmra.mxu2 %vm3816_vm2, %v10707_v41 }
 0x755   : > { %6685 = vmatmul.msk.f32.gmra.mxu3 %vm3816_vm2, %v10707_v41  ;;  %v4098_v26 = vpop.f32.mrf.mxu0 }
 0x757   : > { %v4254_v50 = vpop.f32.mrf.mxu1  ;;  %v4370_v25 = vpop.f32.mrf.mxu2 }
 0x758   : > { %v4524_v51 = vpop.f32.mrf.mxu3 }
 0x759   : > { %v4622_v49 = vadd.f32 %v4620_v2, %v4524_v51 }
 0x75b   : > { %v4666_v41 = vmax.f32 %v10875_v19, %v4622_v49 }
 0x75c   : > { %6622 = vmatmul.msk.f32.gmra.mxu2 %vm3816_vm2, %v10723_v3 }
 0x75d   : > { %6686 = vmatmul.msk.f32.gmra.mxu3 %vm3816_vm2, %v10723_v3  ;;  %v4100_v31 = vpop.f32.mrf.mxu0 }
 0x75f   : > { %v4256_v10 = vpop.f32.mrf.mxu1  ;;  %v4372_v28 = vpop.f32.mrf.mxu2 }
 0x760   : > { %v4527_v59 = vpop.f32.mrf.mxu3 }
 0x761   : > { %v4623_v33 = vadd.f32 %v4621_v55, %v4527_v59  ;;  %v4798_v59 = vld [vmem:[%s12754_s7 + $0xe0] sm:$0xff] }
 0x762   : > { %5306 = vmatpush.msra.mxu1 %v4798_v59 }
 0x763   : > { %v4667_v53 = vmax.f32 %v10897_v47, %v4623_v33 }
 0x764   : > { %6623 = vmatmul.msk.f32.gmra.mxu2 %vm3816_vm2, %v10737_v24 }
 0x765   : > { %6687 = vmatmul.msk.f32.gmra.mxu3 %vm3816_vm2, %v10737_v24  ;;  %v4103_v19 = vpop.f32.mrf.mxu0 }
 0x767   : > { %v4258_v3 = vpop.f32.mrf.mxu1  ;;  %v4374_v9 = vpop.f32.mrf.mxu2 }
 0x768   : > { %v4530_v21 = vpop.f32.mrf.mxu3 }
 0x76c   : > { %6624 = vmatmul.msk.f32.gmra.mxu2 %vm3816_vm2, %v10753_v54 }
 0x76d   : > { %6688 = vmatmul.msk.f32.gmra.mxu3 %vm3816_vm2, %v10753_v54  ;;  %v4106_v63 = vpop.f32.mrf.mxu0  ;;  %v4815_v54 = vld [vmem:[%s12754_s7 + $0x168] sm:$0xff] }
 0x76e   : > { %5325 = vmatpush.msra.mxu2 %v4815_v54 }
 0x76f   : > { %v4260_v4 = vpop.f32.mrf.mxu1  ;;  %v4376_v47 = vpop.f32.mrf.mxu2 }
 0x770   : > { %v10999_v8 = vadd.f32 %v4260_v4, %v4100_v31  ;;  %v4532_v0 = vpop.f32.mrf.mxu3  ;;  %v4782_v31 = vld [vmem:[%s12754_s7 + $0x60] sm:$0xff] }
 0x771   : > { %5286 = vmatpush.msra.mxu0 %v4782_v31 }
 0x774   : > { %6625 = vmatmul.msk.f32.gmra.mxu2 %vm3816_vm2, %v10767_v15 }
 0x775   : > { %6689 = vmatmul.msk.f32.gmra.mxu3 %vm3816_vm2, %v10767_v15  ;;  %v4108_v24 = vpop.f32.mrf.mxu0  ;;  %v4831_v15 = vld [vmem:[%s12754_s7 + $0x1e8] sm:$0xff] }
 0x776   : > { %5345 = vmatpush.msra.mxu3 %v4831_v15 }
 0x777   : > { %v4263_v35 = vpop.f32.mrf.mxu1  ;;  %v4378_v2 = vpop.f32.mrf.mxu2 }
 0x778   : > { %v11010_v23 = vadd.f32 %v4263_v35, %v4103_v19  ;;  %v4626_v40 = vadd.f32 %v4624_v57, %v4378_v2  ;;  %v4534_v13 = vpop.f32.mrf.mxu3  ;;  %v4813_v57 = vld [vmem:[%s12754_s7 + $0x158] sm:$0xff] }
 0x779   : > { %v4781_v2 = vld [vmem:[%s12754_s7 + $0x58] sm:$0xff]  ;;  %v4630_v13 = vadd.f32 %v10827_v43, %v10795_v27 }
 0x77a   : > { %5287 = vmatpush.msra.mxu0 %v4781_v2  ;;  %v4794_v2 = vld [vmem:[%s12754_s7 + $0xc0] sm:$0xff] }
 0x77c   : > { %6626 = vmatmul.msk.f32.gmra.mxu2 %vm3816_vm2, %v10779_v7 }
 0x77d   : > { %6690 = vmatmul.msk.f32.gmra.mxu3 %vm3816_vm2, %v10779_v7  ;;  %v4110_v38 = vpop.f32.mrf.mxu0 }
 0x77f   : > { %v4266_v56 = vpop.f32.mrf.mxu1  ;;  %v4381_v55 = vpop.f32.mrf.mxu2 }
 0x780   : > { %v4627_v58 = vadd.f32 %v4625_v22, %v4381_v55  ;;  %v4536_v26 = vpop.f32.mrf.mxu3 }
 0x784   : > { %6627 = vmatmul.msk.f32.gmra.mxu2 %vm3816_vm2, %v10797_v62 }
 0x785   : > { %6691 = vmatmul.msk.f32.gmra.mxu3 %vm3816_vm2, %v10797_v62  ;;  %v4112_v50 = vpop.f32.mrf.mxu0  ;;  %v4814_v62 = vld [vmem:[%s12754_s7 + $0x160] sm:$0xff] }
 0x786   : > { %5326 = vmatpush.msra.mxu2 %v4814_v62 }
 0x787   : > { %v4268_v25 = vpop.f32.mrf.mxu1  ;;  %v4384_v51 = vpop.f32.mrf.mxu2 }
 0x788   : > { %v4538_v17 = vpop.f32.mrf.mxu3  ;;  %5327 = vmatpush.msra.mxu2 %v4813_v57 }
 0x789   : > { %v11031_v20 = vadd.f32 %v4626_v40, %v4538_v17  ;;  %v4829_v40 = vld [vmem:[%s12754_s7 + $0x1d8] sm:$0xff] }
 0x78b   : > { %v11034_v7 = vmax.f32 %v4666_v41, %v11031_v20  ;;  %v4830_v41 = vld [vmem:[%s12754_s7 + $0x1e0] sm:$0xff] }
 0x78c   : > { %6628 = vmatmul.msk.f32.gmra.mxu2 %vm3816_vm2, %v10815_v48  ;;  %5346 = vmatpush.msra.mxu3 %v4830_v41 }
 0x78d   : > { %6692 = vmatmul.msk.f32.gmra.mxu3 %vm3816_vm2, %v10815_v48  ;;  %v4114_v61 = vpop.f32.mrf.mxu0 }
 0x78e   : > { %5347 = vmatpush.msra.mxu3 %v4829_v40 }
 0x78f   : > { %v4270_v29 = vpop.f32.mrf.mxu1  ;;  %v4386_v11 = vpop.f32.mrf.mxu2 }
 0x790   : > { %v4541_v49 = vpop.f32.mrf.mxu3  ;;  %v4780_v29 = vld [vmem:[%s12754_s7 + $0x50] sm:$0xff] }
 0x791   : > { %v11049_v10 = vadd.f32 %v4627_v58, %v4541_v49  ;;  %v4631_v58 = vadd.f32 %v10843_v12, %v10813_v39  ;;  %5288 = vmatpush.msra.mxu0 %v4780_v29  ;;  %v4824_v29 = vld [vmem:[%s12754_s7 + $0x1b0] sm:$0xff] }
 0x793   : > { %v11052_v48 = vmax.f32 %v4667_v53, %v11049_v10 }
 0x794   : > { %6629 = vmatmul.msk.f32.gmra.mxu2 %vm3816_vm2, %v10829_v60 }
 0x795   : > { %6693 = vmatmul.msk.f32.gmra.mxu3 %vm3816_vm2, %v10829_v60  ;;  %v4117_v30 = vpop.f32.mrf.mxu0 }
 0x797   : > { %v4272_v28 = vpop.f32.mrf.mxu1  ;;  %v4388_v33 = vpop.f32.mrf.mxu2 }
 0x798   : > { %v4544_v19 = vpop.f32.mrf.mxu3 }
 0x799   : > { %v4779_v19 = vld [vmem:[%s12754_s7 + $0x48] sm:$0xff] }
 0x79a   : > { %5289 = vmatpush.msra.mxu0 %v4779_v19  ;;  %v4789_v19 = vld [vmem:[%s12754_s7 + $0x98] sm:$0xff] }
 0x79c   : > { %6630 = vmatmul.msk.f32.gmra.mxu2 %vm3816_vm2, %v10845_v36 }
 0x79d   : > { %6694 = vmatmul.msk.f32.gmra.mxu3 %vm3816_vm2, %v10845_v36  ;;  %v4120_v53 = vpop.f32.mrf.mxu0 }
 0x79e   : > { %v4827_v53 = vld [vmem:[%s12754_s7 + $0x1c8] sm:$0xff] }
 0x79f   : > { %v4274_v3 = vpop.f32.mrf.mxu1  ;;  %v4390_v60 = vpop.f32.mrf.mxu2 }
 0x7a0   : > { %v11065_v9 = vadd.f32 %v4274_v3, %v4114_v61  ;;  %v4546_v21 = vpop.f32.mrf.mxu3  ;;  %v4812_v61 = vld [vmem:[%s12754_s7 + $0x150] sm:$0xff]  ;;  %v4795_v3 = vld [vmem:[%s12754_s7 + $0xc8] sm:$0xff] }
 0x7a1   : > { %5328 = vmatpush.msra.mxu2 %v4812_v61  ;;  %v4776_v61 = vld [vmem:[%s12754_s7 + $0x30] sm:$0xff] }
 0x7a4   : > { %6631 = vmatmul.msk.f32.gmra.mxu2 %vm3816_vm2, %v10859_v18 }
 0x7a5   : > { %6695 = vmatmul.msk.f32.gmra.mxu3 %vm3816_vm2, %v10859_v18  ;;  %v4122_v63 = vpop.f32.mrf.mxu0 }
 0x7a7   : > { %v4277_v4 = vpop.f32.mrf.mxu1  ;;  %v4392_v0 = vpop.f32.mrf.mxu2 }
 0x7a8   : > { %v11071_v47 = vadd.f32 %v4277_v4, %v4117_v30  ;;  %v4548_v24 = vpop.f32.mrf.mxu3  ;;  %v4632_v34 = vadd.f32 %v4630_v13, %v4392_v0  ;;  %v4636_v30 = vadd.f32 %v10927_v45, %v10891_v52  ;;  %v4637_v45 = vadd.f32 %v10955_v1, %v10913_v16  ;;  %v4778_v16 = vld [vmem:[%s12754_s7 + $0x40] sm:$0xff] }
 0x7a9   : > { %v4826_v1 = vld [vmem:[%s12754_s7 + $0x1c0] sm:$0xff]  ;;  %5290 = vmatpush.msra.mxu0 %v4778_v16 }
 0x7aa   : > { %v4770_v16 = vld [vmem:[%s12754_s7] sm:$0xff] }
 0x7ac   : > { %6632 = vmatmul.msk.f32.gmra.mxu2 %vm3816_vm2, %v10871_v46 }
 0x7ad   : > { %6696 = vmatmul.msk.f32.gmra.mxu3 %vm3816_vm2, %v10871_v46  ;;  %v4124_v36 = vpop.f32.mrf.mxu0  ;;  %v4797_v46 = vld [vmem:[%s12754_s7 + $0xd8] sm:$0xff] }
 0x7ae   : > { %5307 = vmatpush.msra.mxu1 %v4797_v46 }
 0x7af   : > { %v4280_v35 = vpop.f32.mrf.mxu1  ;;  %v4395_v18 = vpop.f32.mrf.mxu2 }
 0x7b0   : > { %v4550_v54 = vpop.f32.mrf.mxu3 }
 0x7b1   : > { %v4810_v54 = vld [vmem:[%s12754_s7 + $0x140] sm:$0xff] }
 0x7b4   : > { %6633 = vmatmul.msk.f32.gmra.mxu2 %vm3816_vm2, %v10893_v37 }
 0x7b5   : > { %6697 = vmatmul.msk.f32.gmra.mxu3 %vm3816_vm2, %v10893_v37  ;;  %v4126_v5 = vpop.f32.mrf.mxu0  ;;  %v4633_v37 = vadd.f32 %v4631_v58, %v4395_v18 }
 0x7b7   : > { %v4282_v15 = vpop.f32.mrf.mxu1  ;;  %v4398_v38 = vpop.f32.mrf.mxu2 }
 0x7b8   : > { %v4552_v22 = vpop.f32.mrf.mxu3 }
 0x7b9   : > { %v4634_v56 = vadd.f32 %v4632_v34, %v4552_v22  ;;  %v4809_v22 = vld [vmem:[%s12754_s7 + $0x138] sm:$0xff] }
 0x7bb   : > { %v4674_v55 = vmax.f32 %v11031_v20, %v4634_v56 }
 0x7bc   : > { %6634 = vmatmul.msk.f32.gmra.mxu2 %vm3816_vm2, %v10915_v44 }
 0x7bd   : > { %6698 = vmatmul.msk.f32.gmra.mxu3 %vm3816_vm2, %v10915_v44  ;;  %v4128_v27 = vpop.f32.mrf.mxu0 }
 0x7bf   : > { %v4284_v43 = vpop.f32.mrf.mxu1  ;;  %v4400_v26 = vpop.f32.mrf.mxu2 }
 0x7c0   : > { %v4555_v50 = vpop.f32.mrf.mxu3  ;;  %v4793_v26 = vld [vmem:[%s12754_s7 + $0xb8] sm:$0xff] }
 0x7c1   : > { %v4635_v25 = vadd.f32 %v4633_v37, %v4555_v50  ;;  %v4825_v37 = vld [vmem:[%s12754_s7 + $0x1b8] sm:$0xff] }
 0x7c3   : > { %v4675_v51 = vmax.f32 %v11049_v10, %v4635_v25  ;;  %v4811_v10 = vld [vmem:[%s12754_s7 + $0x148] sm:$0xff] }
 0x7c4   : > { %6635 = vmatmul.msk.f32.gmra.mxu2 %vm3816_vm2, %v10929_v14 }
 0x7c5   : > { %6699 = vmatmul.msk.f32.gmra.mxu3 %vm3816_vm2, %v10929_v14  ;;  %v4130_v17 = vpop.f32.mrf.mxu0  ;;  %v4828_v14 = vld [vmem:[%s12754_s7 + $0x1d0] sm:$0xff]  ;;  %5329 = vmatpush.msra.mxu2 %v4811_v10  ;;  %v4822_v10 = vld [vmem:[%s12754_s7 + $0x1a0] sm:$0xff] }
 0x7c6   : > { %5348 = vmatpush.msra.mxu3 %v4828_v14  ;;  %v4792_v14 = vld [vmem:[%s12754_s7 + $0xb0] sm:$0xff] }
 0x7c7   : > { %v4286_v20 = vpop.f32.mrf.mxu1  ;;  %v4402_v39 = vpop.f32.mrf.mxu2  ;;  %5330 = vmatpush.msra.mxu2 %v4810_v54  ;;  %v4802_v54 = vld [vmem:[%s12754_s7 + $0x100] sm:$0xff] }
 0x7c8   : > { %v4558_v12 = vpop.f32.mrf.mxu3  ;;  %5349 = vmatpush.msra.mxu3 %v4827_v53  ;;  %v4805_v53 = vld [vmem:[%s12754_s7 + $0x118] sm:$0xff] }
 0x7c9   : > { %5331 = vmatpush.msra.mxu2 %v4809_v22  ;;  %v4808_v12 = vld [vmem:[%s12754_s7 + $0x130] sm:$0xff]  ;;  %v11288_v22 = vld [vmem:[%s12753_s6] ss:$0 sm:$0xff] }
 0x7ca   : > { %5350 = vmatpush.msra.mxu3 %v4826_v1  ;;  %v4818_v1 = vld [vmem:[%s12754_s7 + $0x180] sm:$0xff] }
 0x7cb   : > { %5332 = vmatpush.msra.mxu2 %v4808_v12  ;;  %v4894_v12 = vld [vmem:[%s12754_s7 + $0x3e0] sm:$0xff] }
 0x7cc   : > { %6636 = vmatmul.msk.f32.gmra.mxu2 %vm3816_vm2, %v10957_v32  ;;  %5351 = vmatpush.msra.mxu3 %v4825_v37  ;;  %v4896_v37 = vld [vmem:[%s12754_s7 + $0x3f0] sm:$0xff] }
 0x7cd   : > { %6700 = vmatmul.msk.f32.gmra.mxu3 %vm3816_vm2, %v10957_v32  ;;  %v4796_v32 = vld [vmem:[%s12754_s7 + $0xd0] sm:$0xff] }
 0x7ce   : > { %5308 = vmatpush.msra.mxu1 %v4796_v32  ;;  %5352 = vmatpush.msra.mxu3 %v4824_v29  ;;  %v4775_v32 = vld [vmem:[%s12754_s7 + $0x28] sm:$0xff] }
 0x7cf   : > { %v4404_v44 = vpop.f32.mrf.mxu2 }
 0x7d0   : > { %v4560_v11 = vpop.f32.mrf.mxu3  ;;  %5309 = vmatpush.msra.mxu1 %v4795_v3  ;;  %v4821_v3 = vld [vmem:[%s12754_s7 + $0x198] sm:$0xff] }
 0x7d1   : > { %v4807_v11 = vld [vmem:[%s12754_s7 + $0x128] sm:$0xff] }
 0x7d2   : > { %5310 = vmatpush.msra.mxu1 %v4794_v2  ;;  %5333 = vmatpush.msra.mxu2 %v4807_v11  ;;  %v4786_v2 = vld [vmem:[%s12754_s7 + $0x80] sm:$0xff]  ;;  %v4861_v11 = vld [vmem:[%s12754_s7 + $0x2d8] sm:$0xff] }
 0x7d4   : > { %5311 = vmatpush.msra.mxu1 %v4793_v26 }
 0x7d6   : > { %5312 = vmatpush.msra.mxu1 %v4792_v14 }
 0x7d7   : > { %v4406_v49 = vpop.f32.mrf.mxu2 }
 0x7d8   : > { %v4562_v62 = vpop.f32.mrf.mxu3  ;;  %v4638_v28 = vadd.f32 %v4636_v30, %v4406_v49  ;;  %v4823_v49 = vld [vmem:[%s12754_s7 + $0x1a8] sm:$0xff]  ;;  %v4790_v30 = vld [vmem:[%s12754_s7 + $0xa0] sm:$0xff] }
 0x7d9   : > { %v4791_v62 = vld [vmem:[%s12754_s7 + $0xa8] sm:$0xff]  ;;  %5353 = vmatpush.msra.mxu3 %v4823_v49 }
 0x7da   : > { %5313 = vmatpush.msra.mxu1 %v4791_v62 }
 0x7db   : > { %5354 = vmatpush.msra.mxu3 %v4822_v10  ;;  %v4893_v10 = vld [vmem:[%s12754_s7 + $0x3d8] sm:$0xff] }
 0x7dc   : > { %5314 = vmatpush.msra.mxu1 %v4790_v30  ;;  %v4843_v30 = vld [vmem:[%s12754_s7 + $0x248] sm:$0xff] }
 0x7dd   : > { %5355 = vmatpush.msra.mxu3 %v4821_v3  ;;  %v4891_v3 = vld [vmem:[%s12754_s7 + $0x3c8] sm:$0xff] }
 0x7de   : > { %5315 = vmatpush.msra.mxu1 %v4789_v19  ;;  %v4859_v19 = vld [vmem:[%s12754_s7 + $0x2c8] sm:$0xff] }
 0x7df   : > { %v4409_v31 = vpop.f32.mrf.mxu2 }
 0x7e0   : > { %v4564_v41 = vpop.f32.mrf.mxu3  ;;  %v4639_v21 = vadd.f32 %v4637_v45, %v4409_v31  ;;  %v4806_v31 = vld [vmem:[%s12754_s7 + $0x120] sm:$0xff]  ;;  %v4772_v45 = vld [vmem:[%s12754_s7 + $0x10] sm:$0xff] }
 0x7e1   : > { %v4774_v41 = vld [vmem:[%s12754_s7 + $0x20] sm:$0xff]  ;;  %5334 = vmatpush.msra.mxu2 %v4806_v31 }
 0x7e3   : > { %5335 = vmatpush.msra.mxu2 %v4805_v53  ;;  %v4892_v53 = vld [vmem:[%s12754_s7 + $0x3d0] sm:$0xff] }
 0x7e7   : > { %v4412_v59 = vpop.f32.mrf.mxu2 }
 0x7e8   : > { %v4566_v33 = vpop.f32.mrf.mxu3  ;;  %v4773_v59 = vld [vmem:[%s12754_s7 + $0x18] sm:$0xff] }
 0x7e9   : > { %v11137_v60 = vadd.f32 %v4638_v28, %v4566_v33 }
 0x7eb   : > { %v11140_v52 = vmax.f32 %v4674_v55, %v11137_v60 }
 0x7ef   : > { %v4414_v63 = vpop.f32.mrf.mxu2 }
 0x7f0   : > { %v4569_v4 = vpop.f32.mrf.mxu3  ;;  %v4820_v63 = vld [vmem:[%s12754_s7 + $0x190] sm:$0xff] }
 0x7f1   : > { %v11144_v0 = vadd.f32 %v4639_v21, %v4569_v4  ;;  %v4804_v21 = vld [vmem:[%s12754_s7 + $0x110] sm:$0xff]  ;;  %5356 = vmatpush.msra.mxu3 %v4820_v63 }
 0x7f2   : > { %v4788_v4 = vld [vmem:[%s12754_s7 + $0x90] sm:$0xff]  ;;  %5336 = vmatpush.msra.mxu2 %v4804_v21  ;;  %v4874_v21 = vld [vmem:[%s12754_s7 + $0x340] sm:$0xff] }
 0x7f3   : > { %v11147_v24 = vmax.f32 %v4675_v51, %v11144_v0  ;;  %5316 = vmatpush.msra.mxu1 %v4788_v4 }
 0x7f7   : > { %v4416_v36 = vpop.f32.mrf.mxu2 }
 0x7f8   : > { %v4572_v57 = vpop.f32.mrf.mxu3  ;;  %v4803_v36 = vld [vmem:[%s12754_s7 + $0x108] sm:$0xff] }
 0x7f9   : > { %v4771_v57 = vld [vmem:[%s12754_s7 + $0x8] sm:$0xff]  ;;  %5337 = vmatpush.msra.mxu2 %v4803_v36  ;;  %v4857_v36 = vld [vmem:[%s12754_s7 + $0x2b8] sm:$0xff] }
 0x7fb   : > { %5338 = vmatpush.msra.mxu2 %v4802_v54  ;;  %v4856_v54 = vld [vmem:[%s12754_s7 + $0x2b0] sm:$0xff] }
 0x7ff   : > { %v4418_v35 = vpop.f32.mrf.mxu2 }
 0x800   : > { %v4574_v18 = vpop.f32.mrf.mxu3  ;;  %v4819_v35 = vld [vmem:[%s12754_s7 + $0x188] sm:$0xff] }
 0x801   : > { %v4787_v18 = vld [vmem:[%s12754_s7 + $0x88] sm:$0xff]  ;;  %5357 = vmatpush.msra.mxu3 %v4819_v35  ;;  %v4840_v35 = vld [vmem:[%s12754_s7 + $0x230] sm:$0xff] }
 0x802   : > { %5317 = vmatpush.msra.mxu1 %v4787_v18 }
 0x803   : > { %5358 = vmatpush.msra.mxu3 %v4818_v1  ;;  %v4889_v1 = vld [vmem:[%s12754_s7 + $0x3b8] sm:$0xff] }
 0x804   : > { %5318 = vmatpush.msra.mxu1 %v4786_v2  ;;  %v4839_v2 = vld [vmem:[%s12754_s7 + $0x228] sm:$0xff] }
 0x807   : > { %v4420_v40 = vpop.f32.mrf.mxu2 }
 0x808   : > { %v4576_v46 = vpop.f32.mrf.mxu3  ;;  %v4644_v15 = vadd.f32 %v10999_v8, %v4420_v40  ;;  %v4777_v8 = vld [vmem:[%s12754_s7 + $0x38] sm:$0xff] }
 0x809   : > { %5291 = vmatpush.msra.mxu0 %v4777_v8  ;;  %v4849_v40 = vld [vmem:[%s12754_s7 + $0x278] sm:$0xff]  ;;  %v4847_v8 = vld [vmem:[%s12754_s7 + $0x268] sm:$0xff] }
 0x80b   : > { %5292 = vmatpush.msra.mxu0 %v4776_v61 }
 0x80d   : > { %5293 = vmatpush.msra.mxu0 %v4775_v32  ;;  %v4877_v32 = vld [vmem:[%s12754_s7 + $0x358] sm:$0xff] }
 0x80f   : > { %v4423_v13 = vpop.f32.mrf.mxu2  ;;  %5294 = vmatpush.msra.mxu0 %v4774_v41  ;;  %v4860_v41 = vld [vmem:[%s12754_s7 + $0x2d0] sm:$0xff] }
 0x810   : > { %v4578_v5 = vpop.f32.mrf.mxu3  ;;  %v4645_v58 = vadd.f32 %v11010_v23, %v4423_v13 }
 0x811   : > { %5295 = vmatpush.msra.mxu0 %v4773_v59  ;;  %v4865_v5 = vld [vmem:[%s12754_s7 + $0x2f8] sm:$0xff]  ;;  %v4671_v59 = vadd.f32 %v11288_v22, %v11052_v48  ;;  %v4842_v48 = vld [vmem:[%s12754_s7 + $0x240] sm:$0xff] }
 0x812   : > { %5383 = vmatpush.msrb.mxu1 %v4865_v5  ;;  %v4838_v5 = vld [vmem:[%s12754_s7 + $0x220] sm:$0xff] }
 0x813   : > { %5296 = vmatpush.msra.mxu0 %v4772_v45  ;;  %v4841_v45 = vld [vmem:[%s12754_s7 + $0x238] sm:$0xff]  ;;  %v4673_v4 = vmax.f32 %v4671_v59, 0.0 }
 0x814   : > { %v4961_v59 = vld [vmem:[%s12754_s7 + $0x5f8] sm:$0xff] }
 0x815   : > { %5297 = vmatpush.msra.mxu0 %v4771_v57  ;;  %v4890_v57 = vld [vmem:[%s12754_s7 + $0x3c0] sm:$0xff] }
 0x817   : > { %v4426_v34 = vpop.f32.mrf.mxu2  ;;  %5298 = vmatpush.msra.mxu0 %v4770_v16  ;;  %v4873_v16 = vld [vmem:[%s12754_s7 + $0x338] sm:$0xff] }
 0x818   : > { %v4580_v38 = vpop.f32.mrf.mxu3 }
 0x819   : > { %v11165_v56 = vadd.f32 %v4644_v15, %v4580_v38  ;;  %v4881_v15 = vld [vmem:[%s12754_s7 + $0x378] sm:$0xff]  ;;  %v4848_v38 = vld [vmem:[%s12754_s7 + $0x270] sm:$0xff]  ;;  %5363 = vmatpush.msrb.mxu0 %v4849_v40  ;;  %v4855_v40 = vld [vmem:[%s12754_s7 + $0x2a8] sm:$0xff] }
 0x81a   : > { %5403 = vmatpush.msrb.mxu2 %v4881_v15  ;;  %v4854_v15 = vld [vmem:[%s12754_s7 + $0x2a0] sm:$0xff] }
 0x81b   : > { %v4682_v55 = vmax.f32 %v11137_v60, %v11165_v56  ;;  %5364 = vmatpush.msrb.mxu0 %v4848_v38  ;;  %v4846_v60 = vld [vmem:[%s12754_s7 + $0x260] sm:$0xff]  ;;  %v4887_v38 = vld [vmem:[%s12754_s7 + $0x3a8] sm:$0xff] }
 0x81d   : > { %5365 = vmatpush.msrb.mxu0 %v4847_v8  ;;  %v4836_v8 = vld [vmem:[%s12754_s7 + $0x210] sm:$0xff] }
 0x81f   : > { %v4428_v27 = vpop.f32.mrf.mxu2  ;;  %5366 = vmatpush.msrb.mxu0 %v4846_v60  ;;  %v4868_v60 = vld [vmem:[%s12754_s7 + $0x310] sm:$0xff] }
 0x820   : > { %v4583_v43 = vpop.f32.mrf.mxu3  ;;  %v4864_v27 = vld [vmem:[%s12754_s7 + $0x2f0] sm:$0xff] }
 0x821   : > { %v11179_v50 = vadd.f32 %v4645_v58, %v4583_v43  ;;  %v4880_v43 = vld [vmem:[%s12754_s7 + $0x370] sm:$0xff]  ;;  %5384 = vmatpush.msrb.mxu1 %v4864_v27  ;;  %v4870_v27 = vld [vmem:[%s12754_s7 + $0x320] sm:$0xff] }
 0x822   : > { %5404 = vmatpush.msrb.mxu2 %v4880_v43  ;;  %v4886_v43 = vld [vmem:[%s12754_s7 + $0x3a0] sm:$0xff] }
 0x823   : > { %v4683_v23 = vmax.f32 %v11144_v0, %v11179_v50  ;;  %v4875_v0 = vld [vmem:[%s12754_s7 + $0x348] sm:$0xff] }
 0x827   : > { %v4430_v25 = vpop.f32.mrf.mxu2 }
 0x828   : > { %v4586_v51 = vpop.f32.mrf.mxu3  ;;  %v4670_v25 = vadd.f32 %v11288_v22, %v11034_v7  ;;  %v4895_v7 = vld [vmem:[%s12754_s7 + $0x3e8] sm:$0xff] }
 0x829   : > { %v4863_v51 = vld [vmem:[%s12754_s7 + $0x2e8] sm:$0xff] }
 0x82a   : > { %5385 = vmatpush.msrb.mxu1 %v4863_v51  ;;  %v4672_v29 = vmax.f32 %v4670_v25, 0.0  ;;  %v4885_v25 = vld [vmem:[%s12754_s7 + $0x398] sm:$0xff]  ;;  %v4835_v51 = vld [vmem:[%s12754_s7 + $0x208] sm:$0xff] }
 0x82f   : > { %v4432_v17 = vpop.f32.mrf.mxu2 }
 0x830   : > { %v4588_v20 = vpop.f32.mrf.mxu3  ;;  %v4879_v17 = vld [vmem:[%s12754_s7 + $0x368] sm:$0xff] }
 0x831   : > { %v4878_v20 = vld [vmem:[%s12754_s7 + $0x360] sm:$0xff]  ;;  %5405 = vmatpush.msrb.mxu2 %v4879_v17  ;;  %v4851_v17 = vld [vmem:[%s12754_s7 + $0x288] sm:$0xff] }
 0x833   : > { %5406 = vmatpush.msrb.mxu2 %v4878_v20  ;;  %v4867_v20 = vld [vmem:[%s12754_s7 + $0x308] sm:$0xff] }
 0x835   : > { %5407 = vmatpush.msrb.mxu2 %v4877_v32 }
 0x837   : > { %v4434_v39 = vpop.f32.mrf.mxu2 }
 0x838   : > { %v4590_v44 = vpop.f32.mrf.mxu3  ;;  %v4650_v46 = vadd.f32 %v11065_v9, %v4434_v39  ;;  %v4897_v9 = vld [vmem:[%s12754_s7 + $0x3f8] sm:$0xff] }
 0x839   : > { %5423 = vmatpush.msrb.mxu3 %v4897_v9  ;;  %v4845_v39 = vld [vmem:[%s12754_s7 + $0x258] sm:$0xff] }
 0x83a   : > { %5367 = vmatpush.msrb.mxu0 %v4845_v39  ;;  %v4837_v9 = vld [vmem:[%s12754_s7 + $0x218] sm:$0xff]  ;;  %v4883_v39 = vld [vmem:[%s12754_s7 + $0x388] sm:$0xff] }
 0x83b   : > { %5424 = vmatpush.msrb.mxu3 %v4896_v37  ;;  %v4852_v37 = vld [vmem:[%s12754_s7 + $0x290] sm:$0xff] }
 0x83d   : > { %5425 = vmatpush.msrb.mxu3 %v4895_v7  ;;  %v4884_v7 = vld [vmem:[%s12754_s7 + $0x390] sm:$0xff] }
 0x83f   : > { %v11219_v28 = vpop.f32.mrf.mxu2  ;;  %5426 = vmatpush.msrb.mxu3 %v4894_v12  ;;  %v4866_v12 = vld [vmem:[%s12754_s7 + $0x300] sm:$0xff] }
 0x840   : > { %v4592_v33 = vpop.f32.mrf.mxu3  ;;  %v4651_v44 = vadd.f32 %v11071_v47, %v11219_v28  ;;  %v4844_v47 = vld [vmem:[%s12754_s7 + $0x250] sm:$0xff] }
 0x841   : > { %v4876_v28 = vld [vmem:[%s12754_s7 + $0x350] sm:$0xff]  ;;  %5368 = vmatpush.msrb.mxu0 %v4844_v47  ;;  %5427 = vmatpush.msrb.mxu3 %v4893_v10 }
 0x842   : > { %5408 = vmatpush.msrb.mxu2 %v4876_v28  ;;  %v4912_v10 = vld [vmem:[%s12754_s7 + $0x470] sm:$0xff]  ;;  %v4945_v28 = vld [vmem:[%s12754_s7 + $0x578] sm:$0xff] }
 0x843   : > { %5369 = vmatpush.msrb.mxu0 %v4843_v30  ;;  %5428 = vmatpush.msrb.mxu3 %v4892_v53  ;;  %v4928_v30 = vld [vmem:[%s12754_s7 + $0x4f0] sm:$0xff] }
 0x844   : > { %5409 = vmatpush.msrb.mxu2 %v4875_v0  ;;  %v4960_v53 = vld [vmem:[%s12754_s7 + $0x5f0] sm:$0xff]  ;;  %v4910_v0 = vld [vmem:[%s12754_s7 + $0x460] sm:$0xff] }
 0x845   : > { %5370 = vmatpush.msrb.mxu0 %v4842_v48  ;;  %5429 = vmatpush.msrb.mxu3 %v4891_v3  ;;  %v4944_v48 = vld [vmem:[%s12754_s7 + $0x570] sm:$0xff]  ;;  %v4959_v3 = vld [vmem:[%s12754_s7 + $0x5e8] sm:$0xff] }
 0x846   : > { %5410 = vmatpush.msrb.mxu2 %v4874_v21 }
 0x847   : > { %v4440_v13 = vpop.f32.mrf.mxu2  ;;  %5371 = vmatpush.msrb.mxu0 %v4841_v45  ;;  %5430 = vmatpush.msrb.mxu3 %v4890_v57  ;;  %v4958_v57 = vld [vmem:[%s12754_s7 + $0x5e0] sm:$0xff] }
 0x848   : > { %v4594_v34 = vpop.f32.mrf.mxu3  ;;  %5411 = vmatpush.msrb.mxu2 %v4873_v16  ;;  %v4888_v13 = vld [vmem:[%s12754_s7 + $0x3b0] sm:$0xff] }
 0x849   : > { %v4652_v58 = vadd.f32 %v4650_v46, %v4594_v34  ;;  %5372 = vmatpush.msrb.mxu0 %v4840_v35  ;;  %v4872_v46 = vld [vmem:[%s12754_s7 + $0x330] sm:$0xff]  ;;  %5431 = vmatpush.msrb.mxu3 %v4889_v1  ;;  %v4871_v34 = vld [vmem:[%s12754_s7 + $0x328] sm:$0xff]  ;;  %v4941_v1 = vld [vmem:[%s12754_s7 + $0x558] sm:$0xff] }
 0x84a   : > { %5412 = vmatpush.msrb.mxu2 %v4872_v46  ;;  %v4924_v16 = vld [vmem:[%s12754_s7 + $0x4d0] sm:$0xff]  ;;  %v4923_v46 = vld [vmem:[%s12754_s7 + $0x4c8] sm:$0xff] }
 0x84b   : > { %v4684_v26 = vmax.f32 %v4682_v55, %v4652_v58  ;;  %v4862_v55 = vld [vmem:[%s12754_s7 + $0x2e0] sm:$0xff]  ;;  %5373 = vmatpush.msrb.mxu0 %v4839_v2  ;;  %5432 = vmatpush.msrb.mxu3 %v4888_v13  ;;  %v4853_v58 = vld [vmem:[%s12754_s7 + $0x298] sm:$0xff]  ;;  %v4940_v13 = vld [vmem:[%s12754_s7 + $0x550] sm:$0xff] }
 0x84c   : > { %5386 = vmatpush.msrb.mxu1 %v4862_v55  ;;  %5413 = vmatpush.msrb.mxu2 %v4871_v34  ;;  %v4850_v55 = vld [vmem:[%s12754_s7 + $0x280] sm:$0xff]  ;;  %v4957_v2 = vld [vmem:[%s12754_s7 + $0x5d8] sm:$0xff] }
 0x84d   : > { %v4686_v56 = vadd.f32 %v11288_v22, %v4684_v26  ;;  %5374 = vmatpush.msrb.mxu0 %v4838_v5  ;;  %5433 = vmatpush.msrb.mxu3 %v4887_v38  ;;  %v4869_v26 = vld [vmem:[%s12754_s7 + $0x318] sm:$0xff]  ;;  %v4956_v5 = vld [vmem:[%s12754_s7 + $0x5d0] sm:$0xff]  ;;  %v4922_v34 = vld [vmem:[%s12754_s7 + $0x4c0] sm:$0xff] }
 0x84e   : > { %5387 = vmatpush.msrb.mxu1 %v4861_v11  ;;  %5414 = vmatpush.msrb.mxu2 %v4870_v27  ;;  %v4939_v38 = vld [vmem:[%s12754_s7 + $0x548] sm:$0xff]  ;;  %v4921_v27 = vld [vmem:[%s12754_s7 + $0x4b8] sm:$0xff] }
 0x84f   : > { %v4442_v61 = vpop.f32.mrf.mxu2  ;;  %v4688_v14 = vmax.f32 %v4686_v56, 0.0  ;;  %5375 = vmatpush.msrb.mxu0 %v4837_v9  ;;  %5434 = vmatpush.msrb.mxu3 %v4886_v43  ;;  %v4834_v56 = vld [vmem:[%s12754_s7 + $0x200] sm:$0xff]  ;;  %v4955_v9 = vld [vmem:[%s12754_s7 + $0x5c8] sm:$0xff] }
 0x850   : > { %v4597_v49 = vpop.f32.mrf.mxu3  ;;  %5388 = vmatpush.msrb.mxu1 %v4860_v41  ;;  %5415 = vmatpush.msrb.mxu2 %v4869_v26  ;;  %v4662_v61 = vadd.f32 %v11288_v22, %v10885_v6  ;;  %v4938_v43 = vld [vmem:[%s12754_s7 + $0x540] sm:$0xff]  ;;  %v4920_v26 = vld [vmem:[%s12754_s7 + $0x4b0] sm:$0xff] }
 0x851   : > { %v4653_v62 = vadd.f32 %v4651_v44, %v4597_v49  ;;  %v6746_v31 = vpack.i.bf16 %v4688_v14, %v4672_v29  ;;  %5376 = vmatpush.msrb.mxu0 %v4836_v8  ;;  %5435 = vmatpush.msrb.mxu3 %v4885_v25  ;;  %v4882_v44 = vld [vmem:[%s12754_s7 + $0x380] sm:$0xff]  ;;  %v4678_v29 = vadd.f32 %v11288_v22, %v11140_v52  ;;  %v4937_v25 = vld [vmem:[%s12754_s7 + $0x538] sm:$0xff] }
 0x852   : > { %5389 = vmatpush.msrb.mxu1 %v4859_v19  ;;  %5416 = vmatpush.msrb.mxu2 %v4868_v60  ;;  %v4664_v11 = vmax.f32 %v4662_v61, 0.0  ;;  %v4927_v19 = vld [vmem:[%s12754_s7 + $0x4e8] sm:$0xff]  ;;  %v4954_v8 = vld [vmem:[%s12754_s7 + $0x5c0] sm:$0xff]  ;;  %v4917_v61 = vld [vmem:[%s12754_s7 + $0x498] sm:$0xff] }
 0x853   : > { %v4685_v33 = vmax.f32 %v4683_v23, %v4653_v62  ;;  %6747 = vrot.lane.b32.xlu0 %v6746_v31, %s6882_s26  ;;  %v4858_v23 = vld [vmem:[%s12754_s7 + $0x2c0] sm:$0xff]  ;;  %5377 = vmatpush.msrb.mxu0 %v4835_v51  ;;  %v4680_v32 = vmax.f32 %v4678_v29, 0.0  ;;  %v4913_v62 = vld [vmem:[%s12754_s7 + $0x478] sm:$0xff]  ;;  %v4919_v60 = vld [vmem:[%s12754_s7 + $0x4a8] sm:$0xff] }
 0x854   : > { %5390 = vmatpush.msrb.mxu1 %v4858_v23  ;;  %5436 = vmatpush.msrb.mxu3 %v4884_v7  ;;  %v4929_v31 = vld [vmem:[%s12754_s7 + $0x4f8] sm:$0xff]  ;;  %v4943_v23 = vld [vmem:[%s12754_s7 + $0x568] sm:$0xff]  ;;  %v4936_v7 = vld [vmem:[%s12754_s7 + $0x530] sm:$0xff] }
 0x855   : > { %v4687_v50 = vadd.f32 %v11288_v22, %v4685_v33  ;;  %5378 = vmatpush.msrb.mxu0 %v4834_v56  ;;  %5417 = vmatpush.msrb.mxu2 %v4867_v20  ;;  %v4911_v33 = vld [vmem:[%s12754_s7 + $0x468] sm:$0xff]  ;;  %v4953_v51 = vld [vmem:[%s12754_s7 + $0x5b8] sm:$0xff]  ;;  %v4952_v56 = vld [vmem:[%s12754_s7 + $0x5b0] sm:$0xff] }
 0x856   : > { %5391 = vmatpush.msrb.mxu1 %v4857_v36  ;;  %5437 = vmatpush.msrb.mxu3 %v4883_v39  ;;  %v4942_v36 = vld [vmem:[%s12754_s7 + $0x560] sm:$0xff]  ;;  %v4935_v39 = vld [vmem:[%s12754_s7 + $0x528] sm:$0xff] }
 0x857   : > { %v4689_v63 = vmax.f32 %v4687_v50, 0.0  ;;  %5418 = vmatpush.msrb.mxu2 %v4866_v12  ;;  %v4926_v50 = vld [vmem:[%s12754_s7 + $0x4e0] sm:$0xff]  ;;  %v4951_v12 = vld [vmem:[%s12754_s7 + $0x5a8] sm:$0xff] }
 0x858   : > { %5392 = vmatpush.msrb.mxu1 %v4856_v54  ;;  %5438 = vmatpush.msrb.mxu3 %v4882_v44  ;;  %v4908_v54 = vld [vmem:[%s12754_s7 + $0x450] sm:$0xff]  ;;  %v4918_v20 = vld [vmem:[%s12754_s7 + $0x4a0] sm:$0xff]  ;;  %v4901_v44 = vld [vmem:[%s12754_s7 + $0x418] sm:$0xff] }
 0x859   : > { %v6751_v18 = vpack.i.bf16 %v4689_v63, %v4673_v4  ;;  %v4909_v63 = vld [vmem:[%s12754_s7 + $0x458] sm:$0xff]  ;;  %v4934_v29 = vld [vmem:[%s12754_s7 + $0x520] sm:$0xff] }
 0x85a   : > { %5393 = vmatpush.msrb.mxu1 %v4855_v40  ;;  %v4925_v4 = vld [vmem:[%s12754_s7 + $0x4d8] sm:$0xff]  ;;  %v4907_v40 = vld [vmem:[%s12754_s7 + $0x448] sm:$0xff] }
 0x85b   : > { %6752 = vrot.lane.b32.xlu0 %v6751_v18, %s6882_s26  ;;  %s377_s26 = sand.u32 1, %s6872_s18  }
 0x85c   : > { %5394 = vmatpush.msrb.mxu1 %v4854_v15  ;;  %v4906_v15 = vld [vmem:[%s12754_s7 + $0x440] sm:$0xff]  ;;  %s378_s29 = scalar_lea.vmem [#allocation2], %s377_s26  ;;  %s5963_s16 = scalar_lea.sflag [#allocation3], %s377_s26 }
 0x85d   : > { %s5973_s30 = sshll.u32 %s378_s29, 4  ;;  %s5974_s30 = int_to_ptr.vmem [resolvable:$true] %s5973_s30 }
 0x85e   : > { %5395 = vmatpush.msrb.mxu1 %v4853_v58  ;;  %v4905_v58 = vld [vmem:[%s12754_s7 + $0x438] sm:$0xff] }
 0x860   : > { %5396 = vmatpush.msrb.mxu1 %v4852_v37  ;;  %v4904_v37 = vld [vmem:[%s12754_s7 + $0x430] sm:$0xff] }
 0x862   : > { %5397 = vmatpush.msrb.mxu1 %v4851_v17  ;;  %v4903_v17 = vld [vmem:[%s12754_s7 + $0x428] sm:$0xff] }
 0x864   : > { %5398 = vmatpush.msrb.mxu1 %v4850_v55  ;;  %v4902_v55 = vld [vmem:[%s12754_s7 + $0x420] sm:$0xff] }
 0x8c5   : > { %v6748_v14 = vpop.permute.xlu0 %6747 }
 0x8c6   : > { %v6750_v49 = vunpack.i.h.bf16 %v6748_v14  ;;  %v6749_v47 = vunpack.i.l.bf16 %v6748_v14  ;;  %v4950_v14 = vld [vmem:[%s12754_s7 + $0x5a0] sm:$0xff] }
 0x8c8   : > { %v11494_v41 = vsel %vm3816_vm2, %v4680_v32, %v6750_v49  ;;  %v11497_v6 = vsel %vm3816_vm2, %v4664_v11, %v6749_v47  ;;  %v4900_v11 = vld [vmem:[%s12754_s7 + $0x410] sm:$0xff]  ;;  %v4933_v49 = vld [vmem:[%s12754_s7 + $0x518] sm:$0xff] }
 0x8c9   : > { %5299 = vmatmul.f32.vlgmr.msra.gmra.mxu0 %v11497_v6  ;;  %5319 = vmatmul.f32.vlgmr.msra.gmra.mxu1 %v11494_v41  ;;  %v4712_v52 = vrot.slane %v11497_v6, 1  ;;  %v4713_v22 = vrot.slane %v11494_v41, 1  ;;  %v4716_v45 = vrot.slane %v11497_v6, 2  ;;  %v4717_v21 = vrot.slane %v11494_v41, 2  ;;  %v4916_v32 = vld [vmem:[%s12754_s7 + $0x490] sm:$0xff]  ;;  %v4949_v47 = vld [vmem:[%s12754_s7 + $0x598] sm:$0xff] }
 0x8ca   : > { %5443 = vmatpush.msra.mxu0 %v4913_v62  ;;  %5463 = vmatpush.msra.mxu1 %v4929_v31  ;;  %v4720_v35 = vrot.slane %v11497_v6, 3  ;;  %v4721_v18 = vrot.slane %v11494_v41, 3  ;;  %v4899_v62 = vld [vmem:[%s12754_s7 + $0x408] sm:$0xff] }
 0x8cb   : > { %5339 = vmatmul.f32.vlgmr.msra.gmra.mxu2 %v4712_v52  ;;  %5359 = vmatmul.f32.vlgmr.msra.gmra.mxu3 %v4713_v22  ;;  %v4915_v31 = vld [vmem:[%s12754_s7 + $0x488] sm:$0xff]  ;;  %v4932_v52 = vld [vmem:[%s12754_s7 + $0x510] sm:$0xff] }
 0x8cc   : > { %5444 = vmatpush.msra.mxu0 %v4912_v10  ;;  %5464 = vmatpush.msra.mxu1 %v4928_v30  ;;  %v4948_v22 = vld [vmem:[%s12754_s7 + $0x590] sm:$0xff]  ;;  %v4898_v10 = vld [vmem:[%s12754_s7 + $0x400] sm:$0xff] }
 0x8cd   : > { %5483 = vmatpush.msra.mxu2 %v4945_v28  ;;  %5503 = vmatpush.msra.mxu3 %v4961_v59  ;;  %v4914_v30 = vld [vmem:[%s12754_s7 + $0x480] sm:$0xff]  ;;  %v4931_v28 = vld [vmem:[%s12754_s7 + $0x508] sm:$0xff] }
 0x8ce   : > { %5445 = vmatpush.msra.mxu0 %v4911_v33  ;;  %5465 = vmatpush.msra.mxu1 %v4927_v19  ;;  %v4947_v59 = vld [vmem:[%s12754_s7 + $0x588] sm:$0xff]  ;;  %v4724_v33 = vrot.slane %v11497_v6, 4  ;;  %v4725_v19 = vrot.slane %v11494_v41, 4 }
 0x8cf   : > { %5504 = vmatpush.msra.mxu3 %v4960_v53  ;;  %5484 = vmatpush.msra.mxu2 %v4944_v48  ;;  %v4977_v53 = vld [vmem:[%s12754_s7 + $0x678] sm:$0xff] }
 0x8d0   : > { %5446 = vmatpush.msra.mxu0 %v4910_v0  ;;  %5466 = vmatpush.msra.mxu1 %v4926_v50  ;;  %v4993_v48 = vld [vmem:[%s12754_s7 + $0x6f8] sm:$0xff]  ;;  %v4930_v0 = vld [vmem:[%s12754_s7 + $0x500] sm:$0xff] }
 0x8d1   : > { %5485 = vmatpush.msra.mxu2 %v4943_v23  ;;  %5505 = vmatpush.msra.mxu3 %v4959_v3  ;;  %v4946_v50 = vld [vmem:[%s12754_s7 + $0x580] sm:$0xff]  ;;  %v4728_v23 = vrot.slane %v11497_v6, 5  ;;  %v4729_v3 = vrot.slane %v11494_v41, 5 }
 0x8d2   : > { %5379 = vmatmul.f32.vlgmr.msrb.gmra.mxu0 %v4716_v45  ;;  %5399 = vmatmul.f32.vlgmr.msrb.gmra.mxu1 %v4717_v21  ;;  %v4976_v45 = vld [vmem:[%s12754_s7 + $0x670] sm:$0xff] }
 0x8d3   : > { %5447 = vmatpush.msra.mxu0 %v4909_v63  ;;  %5467 = vmatpush.msra.mxu1 %v4925_v4  ;;  %v4992_v21 = vld [vmem:[%s12754_s7 + $0x6f0] sm:$0xff]  ;;  %v5009_v63 = vld [vmem:[%s12754_s7 + $0x778] sm:$0xff] }
 0x8d4   : > { %5486 = vmatpush.msra.mxu2 %v4942_v36  ;;  %5506 = vmatpush.msra.mxu3 %v4958_v57  ;;  %v5025_v4 = vld [vmem:[%s12754_s7 + $0x7f8] sm:$0xff]  ;;  %v4975_v36 = vld [vmem:[%s12754_s7 + $0x668] sm:$0xff] }
 0x8d5   : > { %5419 = vmatmul.f32.vlgmr.msrb.gmra.mxu2 %v4720_v35  ;;  %5439 = vmatmul.f32.vlgmr.msrb.gmra.mxu3 %v4721_v18  ;;  %v4991_v57 = vld [vmem:[%s12754_s7 + $0x6e8] sm:$0xff]  ;;  %v5008_v35 = vld [vmem:[%s12754_s7 + $0x770] sm:$0xff] }
 0x8d6   : > { %5448 = vmatpush.msra.mxu0 %v4908_v54  ;;  %5468 = vmatpush.msra.mxu1 %v4924_v16  ;;  %v5024_v18 = vld [vmem:[%s12754_s7 + $0x7f0] sm:$0xff]  ;;  %v4974_v54 = vld [vmem:[%s12754_s7 + $0x660] sm:$0xff] }
 0x8d7   : > { %5487 = vmatpush.msra.mxu2 %v4941_v1  ;;  %5507 = vmatpush.msra.mxu3 %v4957_v2  ;;  %v4990_v16 = vld [vmem:[%s12754_s7 + $0x6e0] sm:$0xff]  ;;  %v5007_v1 = vld [vmem:[%s12754_s7 + $0x768] sm:$0xff] }
 0x8d8   : > { %5449 = vmatpush.msra.mxu0 %v4907_v40  ;;  %5469 = vmatpush.msra.mxu1 %v4923_v46  ;;  %v5023_v2 = vld [vmem:[%s12754_s7 + $0x7e8] sm:$0xff]  ;;  %v4973_v40 = vld [vmem:[%s12754_s7 + $0x658] sm:$0xff] }
 0x8d9   : > { %5488 = vmatpush.msra.mxu2 %v4940_v13  ;;  %5508 = vmatpush.msra.mxu3 %v4956_v5  ;;  %v4989_v46 = vld [vmem:[%s12754_s7 + $0x6d8] sm:$0xff]  ;;  %v5006_v13 = vld [vmem:[%s12754_s7 + $0x760] sm:$0xff] }
 0x8da   : > { %5450 = vmatpush.msra.mxu0 %v4906_v15  ;;  %5470 = vmatpush.msra.mxu1 %v4922_v34  ;;  %v5022_v5 = vld [vmem:[%s12754_s7 + $0x7e0] sm:$0xff]  ;;  %v4972_v15 = vld [vmem:[%s12754_s7 + $0x650] sm:$0xff] }
 0x8db   : > { %5489 = vmatpush.msra.mxu2 %v4939_v38  ;;  %5509 = vmatpush.msra.mxu3 %v4955_v9  ;;  %v4988_v34 = vld [vmem:[%s12754_s7 + $0x6d0] sm:$0xff]  ;;  %v5005_v38 = vld [vmem:[%s12754_s7 + $0x758] sm:$0xff] }
 0x8dc   : > { %5451 = vmatpush.msra.mxu0 %v4905_v58  ;;  %5471 = vmatpush.msra.mxu1 %v4921_v27  ;;  %v5021_v9 = vld [vmem:[%s12754_s7 + $0x7d8] sm:$0xff]  ;;  %v4971_v58 = vld [vmem:[%s12754_s7 + $0x648] sm:$0xff] }
 0x8dd   : > { %5490 = vmatpush.msra.mxu2 %v4938_v43  ;;  %5510 = vmatpush.msra.mxu3 %v4954_v8  ;;  %v4987_v27 = vld [vmem:[%s12754_s7 + $0x6c8] sm:$0xff]  ;;  %v5004_v43 = vld [vmem:[%s12754_s7 + $0x750] sm:$0xff] }
 0x8de   : > { %5452 = vmatpush.msra.mxu0 %v4904_v37  ;;  %5472 = vmatpush.msra.mxu1 %v4920_v26  ;;  %v5020_v8 = vld [vmem:[%s12754_s7 + $0x7d0] sm:$0xff]  ;;  %v4970_v37 = vld [vmem:[%s12754_s7 + $0x640] sm:$0xff] }
 0x8df   : > { %5491 = vmatpush.msra.mxu2 %v4937_v25  ;;  %5511 = vmatpush.msra.mxu3 %v4953_v51  ;;  %v4986_v26 = vld [vmem:[%s12754_s7 + $0x6c0] sm:$0xff]  ;;  %v5003_v25 = vld [vmem:[%s12754_s7 + $0x748] sm:$0xff] }
 0x8e0   : > { %5453 = vmatpush.msra.mxu0 %v4903_v17  ;;  %5473 = vmatpush.msra.mxu1 %v4919_v60  ;;  %v5019_v51 = vld [vmem:[%s12754_s7 + $0x7c8] sm:$0xff]  ;;  %v4969_v17 = vld [vmem:[%s12754_s7 + $0x638] sm:$0xff] }
 0x8e1   : > { %5492 = vmatpush.msra.mxu2 %v4936_v7  ;;  %5512 = vmatpush.msra.mxu3 %v4952_v56  ;;  %v4985_v60 = vld [vmem:[%s12754_s7 + $0x6b8] sm:$0xff]  ;;  %v5002_v7 = vld [vmem:[%s12754_s7 + $0x740] sm:$0xff] }
 0x8e2   : > { %5454 = vmatpush.msra.mxu0 %v4902_v55  ;;  %5474 = vmatpush.msra.mxu1 %v4918_v20  ;;  %v5018_v56 = vld [vmem:[%s12754_s7 + $0x7c0] sm:$0xff]  ;;  %v4968_v55 = vld [vmem:[%s12754_s7 + $0x630] sm:$0xff] }
 0x8e3   : > { %5493 = vmatpush.msra.mxu2 %v4935_v39  ;;  %5513 = vmatpush.msra.mxu3 %v4951_v12  ;;  %v4984_v20 = vld [vmem:[%s12754_s7 + $0x6b0] sm:$0xff]  ;;  %v5001_v39 = vld [vmem:[%s12754_s7 + $0x738] sm:$0xff] }
 0x8e4   : > { %5455 = vmatpush.msra.mxu0 %v4901_v44  ;;  %5475 = vmatpush.msra.mxu1 %v4917_v61  ;;  %v5017_v12 = vld [vmem:[%s12754_s7 + $0x7b8] sm:$0xff]  ;;  %v4967_v44 = vld [vmem:[%s12754_s7 + $0x628] sm:$0xff] }
 0x8e5   : > { %5494 = vmatpush.msra.mxu2 %v4934_v29  ;;  %5514 = vmatpush.msra.mxu3 %v4950_v14  ;;  %v4983_v61 = vld [vmem:[%s12754_s7 + $0x6a8] sm:$0xff]  ;;  %v5000_v29 = vld [vmem:[%s12754_s7 + $0x730] sm:$0xff] }
 0x8e6   : > { %5456 = vmatpush.msra.mxu0 %v4900_v11  ;;  %5476 = vmatpush.msra.mxu1 %v4916_v32  ;;  %v5016_v14 = vld [vmem:[%s12754_s7 + $0x7b0] sm:$0xff]  ;;  %v4966_v11 = vld [vmem:[%s12754_s7 + $0x620] sm:$0xff] }
 0x8e7   : > { %5495 = vmatpush.msra.mxu2 %v4933_v49  ;;  %5515 = vmatpush.msra.mxu3 %v4949_v47  ;;  %v4982_v32 = vld [vmem:[%s12754_s7 + $0x6a0] sm:$0xff]  ;;  %v4999_v49 = vld [vmem:[%s12754_s7 + $0x728] sm:$0xff] }
 0x8e8   : > { %5457 = vmatpush.msra.mxu0 %v4899_v62  ;;  %5477 = vmatpush.msra.mxu1 %v4915_v31  ;;  %v5015_v47 = vld [vmem:[%s12754_s7 + $0x7a8] sm:$0xff]  ;;  %v4965_v62 = vld [vmem:[%s12754_s7 + $0x618] sm:$0xff] }
 0x8e9   : > { %5496 = vmatpush.msra.mxu2 %v4932_v52  ;;  %5516 = vmatpush.msra.mxu3 %v4948_v22  ;;  %v4981_v31 = vld [vmem:[%s12754_s7 + $0x698] sm:$0xff]  ;;  %v4998_v52 = vld [vmem:[%s12754_s7 + $0x720] sm:$0xff] }
 0x8ea   : > { %5458 = vmatpush.msra.mxu0 %v4898_v10  ;;  %5478 = vmatpush.msra.mxu1 %v4914_v30  ;;  %v5014_v22 = vld [vmem:[%s12754_s7 + $0x7a0] sm:$0xff]  ;;  %v4964_v10 = vld [vmem:[%s12754_s7 + $0x610] sm:$0xff] }
 0x8eb   : > { %5497 = vmatpush.msra.mxu2 %v4931_v28  ;;  %5517 = vmatpush.msra.mxu3 %v4947_v59  ;;  %v4980_v30 = vld [vmem:[%s12754_s7 + $0x690] sm:$0xff]  ;;  %v4997_v28 = vld [vmem:[%s12754_s7 + $0x718] sm:$0xff] }
 0x8ec   : > { %5459 = vmatmul.f32.vlgmr.msra.gmra.mxu0 %v4724_v33  ;;  %5479 = vmatmul.f32.vlgmr.msra.gmra.mxu1 %v4725_v19  ;;  %v5013_v59 = vld [vmem:[%s12754_s7 + $0x798] sm:$0xff]  ;;  %v4963_v33 = vld [vmem:[%s12754_s7 + $0x608] sm:$0xff] }
 0x8ed   : > { %5523 = vmatpush.msrb.mxu0 %v4977_v53  ;;  %5543 = vmatpush.msrb.mxu1 %v4993_v48  ;;  %v4979_v19 = vld [vmem:[%s12754_s7 + $0x688] sm:$0xff]  ;;  %v4996_v53 = vld [vmem:[%s12754_s7 + $0x710] sm:$0xff] }
 0x8ee   : > { %5498 = vmatpush.msra.mxu2 %v4930_v0  ;;  %5518 = vmatpush.msra.mxu3 %v4946_v50  ;;  %v5012_v48 = vld [vmem:[%s12754_s7 + $0x790] sm:$0xff]  ;;  %v4962_v0 = vld [vmem:[%s12754_s7 + $0x600] sm:$0xff] }
 0x8ef   : > { %5499 = vmatmul.f32.vlgmr.msra.gmra.mxu2 %v4728_v23  ;;  %5519 = vmatmul.f32.vlgmr.msra.gmra.mxu3 %v4729_v3  ;;  %v4978_v50 = vld [vmem:[%s12754_s7 + $0x680] sm:$0xff]  ;;  %v4995_v23 = vld [vmem:[%s12754_s7 + $0x708] sm:$0xff] }
 0x8f0   : > { %5524 = vmatpush.msrb.mxu0 %v4976_v45  ;;  %5544 = vmatpush.msrb.mxu1 %v4992_v21  ;;  %v5011_v3 = vld [vmem:[%s12754_s7 + $0x788] sm:$0xff]  ;;  %v4732_v45 = vrot.slane %v11497_v6, 6  ;;  %v4733_v21 = vrot.slane %v11494_v41, 6 }
 0x8f1   : > { %5563 = vmatpush.msrb.mxu2 %v5009_v63  ;;  %5583 = vmatpush.msrb.mxu3 %v5025_v4  ;;  %v5041_v63 = vld [vmem:[%s12754_s7 + $0x878] sm:$0xff] }
 0x8f2   : > { %5525 = vmatpush.msrb.mxu0 %v4975_v36  ;;  %5545 = vmatpush.msrb.mxu1 %v4991_v57  ;;  %v5057_v4 = vld [vmem:[%s12754_s7 + $0x8f8] sm:$0xff]  ;;  %v4994_v36 = vld [vmem:[%s12754_s7 + $0x700] sm:$0xff] }
 0x8f3   : > { %5564 = vmatpush.msrb.mxu2 %v5008_v35  ;;  %5584 = vmatpush.msrb.mxu3 %v5024_v18  ;;  %v5010_v57 = vld [vmem:[%s12754_s7 + $0x780] sm:$0xff]  ;;  %v4736_v35 = vrot.slane %v11497_v6, 7  ;;  %v4737_v18 = vrot.slane %v11494_v41, 7  ;;  %v5089_v6 = vld [vmem:[%s12754_s7 + $0x9f8] sm:$0xff]  ;;  %v5039_v41 = vld [vmem:[%s12754_s7 + $0x868] sm:$0xff] }
 0x8f4   : > { %5526 = vmatpush.msrb.mxu0 %v4974_v54  ;;  %5546 = vmatpush.msrb.mxu1 %v4990_v16  ;;  %v5040_v54 = vld [vmem:[%s12754_s7 + $0x870] sm:$0xff] }
 0x8f5   : > { %5565 = vmatpush.msrb.mxu2 %v5007_v1  ;;  %5585 = vmatpush.msrb.mxu3 %v5023_v2  ;;  %v5056_v16 = vld [vmem:[%s12754_s7 + $0x8f0] sm:$0xff]  ;;  %v5073_v1 = vld [vmem:[%s12754_s7 + $0x978] sm:$0xff]  ;;  %v5055_v2 = vld [vmem:[%s12754_s7 + $0x8e8] sm:$0xff] }
 0x8f6   : > { %5527 = vmatpush.msrb.mxu0 %v4973_v40  ;;  %5547 = vmatpush.msrb.mxu1 %v4989_v46  ;;  %v5072_v40 = vld [vmem:[%s12754_s7 + $0x970] sm:$0xff] }
 0x8f7   : > { %5566 = vmatpush.msrb.mxu2 %v5006_v13  ;;  %5586 = vmatpush.msrb.mxu3 %v5022_v5  ;;  %v5088_v46 = vld [vmem:[%s12754_s7 + $0x9f0] sm:$0xff]  ;;  %v5038_v13 = vld [vmem:[%s12754_s7 + $0x860] sm:$0xff] }
 0x8f8   : > { %5528 = vmatpush.msrb.mxu0 %v4972_v15  ;;  %5548 = vmatpush.msrb.mxu1 %v4988_v34  ;;  %v5054_v5 = vld [vmem:[%s12754_s7 + $0x8e0] sm:$0xff]  ;;  %v5071_v15 = vld [vmem:[%s12754_s7 + $0x968] sm:$0xff] }
 0x8f9   : > { %5567 = vmatpush.msrb.mxu2 %v5005_v38  ;;  %5587 = vmatpush.msrb.mxu3 %v5021_v9  ;;  %v5087_v34 = vld [vmem:[%s12754_s7 + $0x9e8] sm:$0xff]  ;;  %v5037_v38 = vld [vmem:[%s12754_s7 + $0x858] sm:$0xff] }
 0x8fa   : > { %5529 = vmatpush.msrb.mxu0 %v4971_v58  ;;  %5549 = vmatpush.msrb.mxu1 %v4987_v27  ;;  %v5053_v9 = vld [vmem:[%s12754_s7 + $0x8d8] sm:$0xff]  ;;  %v5070_v58 = vld [vmem:[%s12754_s7 + $0x960] sm:$0xff] }
 0x8fb   : > { %5568 = vmatpush.msrb.mxu2 %v5004_v43  ;;  %5588 = vmatpush.msrb.mxu3 %v5020_v8  ;;  %v5086_v27 = vld [vmem:[%s12754_s7 + $0x9e0] sm:$0xff]  ;;  %v5036_v43 = vld [vmem:[%s12754_s7 + $0x850] sm:$0xff] }
 0x8fc   : > { %5530 = vmatpush.msrb.mxu0 %v4970_v37  ;;  %5550 = vmatpush.msrb.mxu1 %v4986_v26  ;;  %v5052_v8 = vld [vmem:[%s12754_s7 + $0x8d0] sm:$0xff]  ;;  %v5069_v37 = vld [vmem:[%s12754_s7 + $0x958] sm:$0xff] }
 0x8fd   : > { %5569 = vmatpush.msrb.mxu2 %v5003_v25  ;;  %5589 = vmatpush.msrb.mxu3 %v5019_v51  ;;  %v5085_v26 = vld [vmem:[%s12754_s7 + $0x9d8] sm:$0xff]  ;;  %v5035_v25 = vld [vmem:[%s12754_s7 + $0x848] sm:$0xff] }
 0x8fe   : > { %5531 = vmatpush.msrb.mxu0 %v4969_v17  ;;  %5551 = vmatpush.msrb.mxu1 %v4985_v60  ;;  %v5051_v51 = vld [vmem:[%s12754_s7 + $0x8c8] sm:$0xff]  ;;  %v5068_v17 = vld [vmem:[%s12754_s7 + $0x950] sm:$0xff] }
 0x8ff   : > { %5570 = vmatpush.msrb.mxu2 %v5002_v7  ;;  %5590 = vmatpush.msrb.mxu3 %v5018_v56  ;;  %v5084_v60 = vld [vmem:[%s12754_s7 + $0x9d0] sm:$0xff]  ;;  %v5034_v7 = vld [vmem:[%s12754_s7 + $0x840] sm:$0xff] }
 0x900   : > { %5532 = vmatpush.msrb.mxu0 %v4968_v55  ;;  %5552 = vmatpush.msrb.mxu1 %v4984_v20  ;;  %v5050_v56 = vld [vmem:[%s12754_s7 + $0x8c0] sm:$0xff]  ;;  %v5067_v55 = vld [vmem:[%s12754_s7 + $0x948] sm:$0xff] }
 0x901   : > { %5571 = vmatpush.msrb.mxu2 %v5001_v39  ;;  %5591 = vmatpush.msrb.mxu3 %v5017_v12  ;;  %v5083_v20 = vld [vmem:[%s12754_s7 + $0x9c8] sm:$0xff]  ;;  %v5033_v39 = vld [vmem:[%s12754_s7 + $0x838] sm:$0xff] }
 0x902   : > { %5533 = vmatpush.msrb.mxu0 %v4967_v44  ;;  %5553 = vmatpush.msrb.mxu1 %v4983_v61  ;;  %v5049_v12 = vld [vmem:[%s12754_s7 + $0x8b8] sm:$0xff]  ;;  %v5066_v44 = vld [vmem:[%s12754_s7 + $0x940] sm:$0xff] }
 0x903   : > { %5572 = vmatpush.msrb.mxu2 %v5000_v29  ;;  %5592 = vmatpush.msrb.mxu3 %v5016_v14  ;;  %v5082_v61 = vld [vmem:[%s12754_s7 + $0x9c0] sm:$0xff]  ;;  %v5032_v29 = vld [vmem:[%s12754_s7 + $0x830] sm:$0xff] }
 0x904   : > { %5534 = vmatpush.msrb.mxu0 %v4966_v11  ;;  %5554 = vmatpush.msrb.mxu1 %v4982_v32  ;;  %v5048_v14 = vld [vmem:[%s12754_s7 + $0x8b0] sm:$0xff]  ;;  %v5065_v11 = vld [vmem:[%s12754_s7 + $0x938] sm:$0xff] }
 0x905   : > { %5573 = vmatpush.msrb.mxu2 %v4999_v49  ;;  %5593 = vmatpush.msrb.mxu3 %v5015_v47  ;;  %v5081_v32 = vld [vmem:[%s12754_s7 + $0x9b8] sm:$0xff]  ;;  %v5031_v49 = vld [vmem:[%s12754_s7 + $0x828] sm:$0xff] }
 0x906   : > { %5535 = vmatpush.msrb.mxu0 %v4965_v62  ;;  %5555 = vmatpush.msrb.mxu1 %v4981_v31  ;;  %v5047_v47 = vld [vmem:[%s12754_s7 + $0x8a8] sm:$0xff]  ;;  %v5064_v62 = vld [vmem:[%s12754_s7 + $0x930] sm:$0xff] }
 0x907   : > { %5574 = vmatpush.msrb.mxu2 %v4998_v52  ;;  %5594 = vmatpush.msrb.mxu3 %v5014_v22  ;;  %v5080_v31 = vld [vmem:[%s12754_s7 + $0x9b0] sm:$0xff]  ;;  %v5030_v52 = vld [vmem:[%s12754_s7 + $0x820] sm:$0xff] }
 0x908   : > { %5536 = vmatpush.msrb.mxu0 %v4964_v10  ;;  %5556 = vmatpush.msrb.mxu1 %v4980_v30  ;;  %v5046_v22 = vld [vmem:[%s12754_s7 + $0x8a0] sm:$0xff]  ;;  %v5063_v10 = vld [vmem:[%s12754_s7 + $0x928] sm:$0xff] }
 0x909   : > { %5575 = vmatpush.msrb.mxu2 %v4997_v28  ;;  %5595 = vmatpush.msrb.mxu3 %v5013_v59  ;;  %v5079_v30 = vld [vmem:[%s12754_s7 + $0x9a8] sm:$0xff]  ;;  %v5029_v28 = vld [vmem:[%s12754_s7 + $0x818] sm:$0xff] }
 0x90a   : > { %5537 = vmatpush.msrb.mxu0 %v4963_v33  ;;  %5557 = vmatpush.msrb.mxu1 %v4979_v19  ;;  %v5045_v59 = vld [vmem:[%s12754_s7 + $0x898] sm:$0xff]  ;;  %v5062_v33 = vld [vmem:[%s12754_s7 + $0x920] sm:$0xff] }
 0x90b   : > { %5576 = vmatpush.msrb.mxu2 %v4996_v53  ;;  %5596 = vmatpush.msrb.mxu3 %v5012_v48  ;;  %v5078_v19 = vld [vmem:[%s12754_s7 + $0x9a0] sm:$0xff]  ;;  %v6753_v53 = vpop.permute.xlu0 %6752  ;;  %v5028_v48 = vld [vmem:[%s12754_s7 + $0x810] sm:$0xff] }
 0x90c   : > { %5538 = vmatpush.msrb.mxu0 %v4962_v0  ;;  %5558 = vmatpush.msrb.mxu1 %v4978_v50  ;;  %v5044_v0 = vld [vmem:[%s12754_s7 + $0x890] sm:$0xff]  ;;  %v6817_v50 = vld [vmem:[%s12753_s6] ss:$0 sm:$0xff] }
 0x90d   : > { %5577 = vmatpush.msrb.mxu2 %v4995_v23  ;;  %5597 = vmatpush.msrb.mxu3 %v5011_v3  ;;  %v4663_v23 = vadd.f32 %v6817_v50, %v10907_v42  ;;  %v4679_v3 = vadd.f32 %v6817_v50, %v11147_v24  ;;  %v5043_v42 = vld [vmem:[%s12754_s7 + $0x888] sm:$0xff]  ;;  %v6755_v24 = vunpack.i.h.bf16 %v6753_v53  ;;  %v5144_v50 = vld [vmem:[%s12754_s7 + $0xbb0] sm:$0xff] }
 0x90e   : > { %5539 = vmatmul.f32.vlgmr.msrb.gmra.mxu0 %v4732_v45  ;;  %5559 = vmatmul.f32.vlgmr.msrb.gmra.mxu1 %v4733_v21  ;;  %v5061_v45 = vld [vmem:[%s12754_s7 + $0x918] sm:$0xff] }
 0x90f   : > { %5603 = vmatpush.msra.mxu0 %v5041_v63  ;;  %5623 = vmatpush.msra.mxu1 %v5057_v4  ;;  %v5077_v21 = vld [vmem:[%s12754_s7 + $0x998] sm:$0xff]  ;;  %v5027_v63 = vld [vmem:[%s12754_s7 + $0x808] sm:$0xff]  ;;  %v6754_v4 = vunpack.i.l.bf16 %v6753_v53 }
 0x910   : > { %5578 = vmatpush.msrb.mxu2 %v4994_v36  ;;  %5598 = vmatpush.msrb.mxu3 %v5010_v57  ;;  %v5060_v36 = vld [vmem:[%s12754_s7 + $0x910] sm:$0xff]  ;;  %v5095_v53 = vld [vmem:[%s12754_s7 + $0xa28] sm:$0xff] }
 0x911   : > { %5579 = vmatmul.f32.vlgmr.msrb.gmra.mxu2 %v4736_v35  ;;  %5599 = vmatmul.f32.vlgmr.msrb.gmra.mxu3 %v4737_v18  ;;  %v5076_v57 = vld [vmem:[%s12754_s7 + $0x990] sm:$0xff]  ;;  %v5026_v35 = vld [vmem:[%s12754_s7 + $0x800] sm:$0xff] }
 0x912   : > { %5604 = vmatpush.msra.mxu0 %v5040_v54  ;;  %5624 = vmatpush.msra.mxu1 %v5056_v16  ;;  %v5042_v18 = vld [vmem:[%s12754_s7 + $0x880] sm:$0xff]  ;;  %v4665_v54 = vmax.f32 %v4663_v23, 0.0  ;;  %v4681_v16 = vmax.f32 %v4679_v3, 0.0 }
 0x913   : > { %5643 = vmatpush.msra.mxu2 %v5073_v1  ;;  %5663 = vmatpush.msra.mxu3 %v5089_v6  ;;  %v5059_v1 = vld [vmem:[%s12754_s7 + $0x908] sm:$0xff]  ;;  %v5094_v23 = vld [vmem:[%s12754_s7 + $0xa20] sm:$0xff] }
 0x914   : > { %5605 = vmatpush.msra.mxu0 %v5039_v41  ;;  %5625 = vmatpush.msra.mxu1 %v5055_v2  ;;  %v5075_v6 = vld [vmem:[%s12754_s7 + $0x988] sm:$0xff]  ;;  %v12085_v41 = vsel %vm3816_vm2, %v4681_v16, %v6755_v24  ;;  %v12088_v2 = vsel %vm3816_vm2, %v4665_v54, %v6754_v4  ;;  %v5110_v3 = vld [vmem:[%s12754_s7 + $0xaa0] sm:$0xff] }
 0x915   : > { %5644 = vmatpush.msra.mxu2 %v5072_v40  ;;  %5664 = vmatpush.msra.mxu3 %v5088_v46  ;;  %v5105_v40 = vld [vmem:[%s12754_s7 + $0xa78] sm:$0xff]  ;;  %v5126_v24 = vld [vmem:[%s12754_s7 + $0xb20] sm:$0xff]  ;;  %v5091_v54 = vld [vmem:[%s12754_s7 + $0xa08] sm:$0xff] }
 0x916   : > { %5606 = vmatpush.msra.mxu0 %v5038_v13  ;;  %5626 = vmatpush.msra.mxu1 %v5054_v5  ;;  %v5121_v46 = vld [vmem:[%s12754_s7 + $0xaf8] sm:$0xff]  ;;  %v5058_v13 = vld [vmem:[%s12754_s7 + $0x900] sm:$0xff]  ;;  %v5107_v16 = vld [vmem:[%s12754_s7 + $0xa88] sm:$0xff] }
 0x917   : > { %5645 = vmatpush.msra.mxu2 %v5071_v15  ;;  %5665 = vmatpush.msra.mxu3 %v5087_v34  ;;  %v5074_v5 = vld [vmem:[%s12754_s7 + $0x980] sm:$0xff]  ;;  %v4742_v15 = vrot.slane %v12088_v2, 1  ;;  %v4743_v34 = vrot.slane %v12085_v41, 1 }
 0x918   : > { %5607 = vmatpush.msra.mxu0 %v5037_v38  ;;  %5627 = vmatpush.msra.mxu1 %v5053_v9  ;;  %v5104_v38 = vld [vmem:[%s12754_s7 + $0xa70] sm:$0xff]  ;;  %v5142_v4 = vld [vmem:[%s12754_s7 + $0xba0] sm:$0xff] }
 0x919   : > { %5646 = vmatpush.msra.mxu2 %v5070_v58  ;;  %5666 = vmatpush.msra.mxu3 %v5086_v27  ;;  %v5120_v9 = vld [vmem:[%s12754_s7 + $0xaf0] sm:$0xff]  ;;  %v5137_v58 = vld [vmem:[%s12754_s7 + $0xb78] sm:$0xff] }
 0x91a   : > { %5608 = vmatpush.msra.mxu0 %v5036_v43  ;;  %5628 = vmatpush.msra.mxu1 %v5052_v8  ;;  %v5153_v27 = vld [vmem:[%s12754_s7 + $0xbf8] sm:$0xff]  ;;  %v5103_v43 = vld [vmem:[%s12754_s7 + $0xa68] sm:$0xff] }
 0x91b   : > { %5647 = vmatpush.msra.mxu2 %v5069_v37  ;;  %5667 = vmatpush.msra.mxu3 %v5085_v26  ;;  %v5119_v8 = vld [vmem:[%s12754_s7 + $0xae8] sm:$0xff]  ;;  %v5136_v37 = vld [vmem:[%s12754_s7 + $0xb70] sm:$0xff] }
 0x91c   : > { %5609 = vmatpush.msra.mxu0 %v5035_v25  ;;  %5629 = vmatpush.msra.mxu1 %v5051_v51  ;;  %v5152_v26 = vld [vmem:[%s12754_s7 + $0xbf0] sm:$0xff]  ;;  %v5102_v25 = vld [vmem:[%s12754_s7 + $0xa60] sm:$0xff] }
 0x91d   : > { %5648 = vmatpush.msra.mxu2 %v5068_v17  ;;  %5668 = vmatpush.msra.mxu3 %v5084_v60  ;;  %v5118_v51 = vld [vmem:[%s12754_s7 + $0xae0] sm:$0xff]  ;;  %v5135_v17 = vld [vmem:[%s12754_s7 + $0xb68] sm:$0xff] }
 0x91e   : > { %5610 = vmatpush.msra.mxu0 %v5034_v7  ;;  %5630 = vmatpush.msra.mxu1 %v5050_v56  ;;  %v5151_v60 = vld [vmem:[%s12754_s7 + $0xbe8] sm:$0xff]  ;;  %v5101_v7 = vld [vmem:[%s12754_s7 + $0xa58] sm:$0xff] }
 0x91f   : > { %5649 = vmatpush.msra.mxu2 %v5067_v55  ;;  %5669 = vmatpush.msra.mxu3 %v5083_v20  ;;  %v5117_v56 = vld [vmem:[%s12754_s7 + $0xad8] sm:$0xff]  ;;  %v5134_v55 = vld [vmem:[%s12754_s7 + $0xb60] sm:$0xff] }
 0x920   : > { %5611 = vmatpush.msra.mxu0 %v5033_v39  ;;  %5631 = vmatpush.msra.mxu1 %v5049_v12  ;;  %v5150_v20 = vld [vmem:[%s12754_s7 + $0xbe0] sm:$0xff]  ;;  %v5100_v39 = vld [vmem:[%s12754_s7 + $0xa50] sm:$0xff] }
 0x921   : > { %5650 = vmatpush.msra.mxu2 %v5066_v44  ;;  %5670 = vmatpush.msra.mxu3 %v5082_v61  ;;  %v5116_v12 = vld [vmem:[%s12754_s7 + $0xad0] sm:$0xff]  ;;  %v5133_v44 = vld [vmem:[%s12754_s7 + $0xb58] sm:$0xff] }
 0x922   : > { %5612 = vmatpush.msra.mxu0 %v5032_v29  ;;  %5632 = vmatpush.msra.mxu1 %v5048_v14  ;;  %v5149_v61 = vld [vmem:[%s12754_s7 + $0xbd8] sm:$0xff]  ;;  %v5099_v29 = vld [vmem:[%s12754_s7 + $0xa48] sm:$0xff] }
 0x923   : > { %5651 = vmatpush.msra.mxu2 %v5065_v11  ;;  %5671 = vmatpush.msra.mxu3 %v5081_v32  ;;  %v5115_v14 = vld [vmem:[%s12754_s7 + $0xac8] sm:$0xff]  ;;  %v5132_v11 = vld [vmem:[%s12754_s7 + $0xb50] sm:$0xff] }
 0x924   : > { %5613 = vmatpush.msra.mxu0 %v5031_v49  ;;  %5633 = vmatpush.msra.mxu1 %v5047_v47  ;;  %v5148_v32 = vld [vmem:[%s12754_s7 + $0xbd0] sm:$0xff]  ;;  %v5098_v49 = vld [vmem:[%s12754_s7 + $0xa40] sm:$0xff] }
 0x925   : > { %5652 = vmatpush.msra.mxu2 %v5064_v62  ;;  %5672 = vmatpush.msra.mxu3 %v5080_v31  ;;  %v5114_v47 = vld [vmem:[%s12754_s7 + $0xac0] sm:$0xff]  ;;  %v5131_v62 = vld [vmem:[%s12754_s7 + $0xb48] sm:$0xff] }
 0x926   : > { %5614 = vmatpush.msra.mxu0 %v5030_v52  ;;  %5634 = vmatpush.msra.mxu1 %v5046_v22  ;;  %v5147_v31 = vld [vmem:[%s12754_s7 + $0xbc8] sm:$0xff]  ;;  %v5097_v52 = vld [vmem:[%s12754_s7 + $0xa38] sm:$0xff] }
 0x927   : > { %5653 = vmatpush.msra.mxu2 %v5063_v10  ;;  %5673 = vmatpush.msra.mxu3 %v5079_v30  ;;  %v5113_v22 = vld [vmem:[%s12754_s7 + $0xab8] sm:$0xff]  ;;  %v5130_v10 = vld [vmem:[%s12754_s7 + $0xb40] sm:$0xff] }
 0x928   : > { %5615 = vmatpush.msra.mxu0 %v5029_v28  ;;  %5635 = vmatpush.msra.mxu1 %v5045_v59  ;;  %v5146_v30 = vld [vmem:[%s12754_s7 + $0xbc0] sm:$0xff]  ;;  %v5096_v28 = vld [vmem:[%s12754_s7 + $0xa30] sm:$0xff] }
 0x929   : > { %5654 = vmatpush.msra.mxu2 %v5062_v33  ;;  %5674 = vmatpush.msra.mxu3 %v5078_v19  ;;  %v5112_v59 = vld [vmem:[%s12754_s7 + $0xab0] sm:$0xff]  ;;  %v5129_v33 = vld [vmem:[%s12754_s7 + $0xb38] sm:$0xff] }
 0x92a   : > { %5616 = vmatpush.msra.mxu0 %v5028_v48  ;;  %5636 = vmatpush.msra.mxu1 %v5044_v0  ;;  %v5145_v19 = vld [vmem:[%s12754_s7 + $0xbb8] sm:$0xff]  ;;  %v5111_v48 = vld [vmem:[%s12754_s7 + $0xaa8] sm:$0xff]  ;;  %v5128_v0 = vld [vmem:[%s12754_s7 + $0xb30] sm:$0xff] }
 0x92b   : > { %5655 = vmatpush.msra.mxu2 %v5061_v45  ;;  %5675 = vmatpush.msra.mxu3 %v5077_v21  ;;  %v5127_v45 = vld [vmem:[%s12754_s7 + $0xb28] sm:$0xff] }
 0x92c   : > { %5617 = vmatpush.msra.mxu0 %v5027_v63  ;;  %5637 = vmatpush.msra.mxu1 %v5043_v42  ;;  %v5143_v21 = vld [vmem:[%s12754_s7 + $0xba8] sm:$0xff]  ;;  %v5093_v63 = vld [vmem:[%s12754_s7 + $0xa18] sm:$0xff] }
 0x92d   : > { %5656 = vmatpush.msra.mxu2 %v5060_v36  ;;  %5676 = vmatpush.msra.mxu3 %v5076_v57  ;;  %v5109_v42 = vld [vmem:[%s12754_s7 + $0xa98] sm:$0xff]  ;;  %v5092_v36 = vld [vmem:[%s12754_s7 + $0xa10] sm:$0xff] }
 0x92e   : > { %5618 = vmatpush.msra.mxu0 %v5026_v35  ;;  %5638 = vmatpush.msra.mxu1 %v5042_v18  ;;  %v5108_v57 = vld [vmem:[%s12754_s7 + $0xa90] sm:$0xff]  ;;  %v5125_v35 = vld [vmem:[%s12754_s7 + $0xb18] sm:$0xff] }
 0x92f   : > { %5657 = vmatpush.msra.mxu2 %v5059_v1  ;;  %5677 = vmatpush.msra.mxu3 %v5075_v6  ;;  %v5141_v18 = vld [vmem:[%s12754_s7 + $0xb98] sm:$0xff]  ;;  %v5124_v1 = vld [vmem:[%s12754_s7 + $0xb10] sm:$0xff] }
 0x930   : > { %5619 = vmatmul.f32.vlgmr.msra.gmra.mxu0 %v12088_v2  ;;  %5639 = vmatmul.f32.vlgmr.msra.gmra.mxu1 %v12085_v41  ;;  %v5140_v6 = vld [vmem:[%s12754_s7 + $0xb90] sm:$0xff] }
 0x931   : > { %5683 = vmatpush.msrb.mxu0 %v5105_v40  ;;  %5703 = vmatpush.msrb.mxu1 %v5121_v46  ;;  %v5090_v40 = vld [vmem:[%s12754_s7 + $0xa00] sm:$0xff] }
 0x932   : > { %5658 = vmatpush.msra.mxu2 %v5058_v13  ;;  %5678 = vmatpush.msra.mxu3 %v5074_v5  ;;  %v5106_v46 = vld [vmem:[%s12754_s7 + $0xa80] sm:$0xff]  ;;  %v5123_v13 = vld [vmem:[%s12754_s7 + $0xb08] sm:$0xff] }
 0x933   : > { %5659 = vmatmul.f32.vlgmr.msra.gmra.mxu2 %v4742_v15  ;;  %5679 = vmatmul.f32.vlgmr.msra.gmra.mxu3 %v4743_v34  ;;  %v5139_v5 = vld [vmem:[%s12754_s7 + $0xb88] sm:$0xff]  ;;  %v4746_v15 = vrot.slane %v12088_v2, 2  ;;  %v4747_v34 = vrot.slane %v12085_v41, 2 }
 0x934   : > { %5684 = vmatpush.msrb.mxu0 %v5104_v38  ;;  %5704 = vmatpush.msrb.mxu1 %v5120_v9  ;;  %v5169_v38 = vld [vmem:[%s12754_s7 + $0xc78] sm:$0xff] }
 0x935   : > { %5723 = vmatpush.msrb.mxu2 %v5137_v58  ;;  %5743 = vmatpush.msrb.mxu3 %v5153_v27  ;;  %v5185_v9 = vld [vmem:[%s12754_s7 + $0xcf8] sm:$0xff]  ;;  %v5122_v58 = vld [vmem:[%s12754_s7 + $0xb00] sm:$0xff] }
 0x936   : > { %5685 = vmatpush.msrb.mxu0 %v5103_v43  ;;  %5705 = vmatpush.msrb.mxu1 %v5119_v8  ;;  %v5138_v27 = vld [vmem:[%s12754_s7 + $0xb80] sm:$0xff]  ;;  %v4750_v43 = vrot.slane %v12088_v2, 3  ;;  %v4751_v8 = vrot.slane %v12085_v41, 3 }
 0x937   : > { %5724 = vmatpush.msrb.mxu2 %v5136_v37  ;;  %5744 = vmatpush.msrb.mxu3 %v5152_v26  ;;  %v5168_v37 = vld [vmem:[%s12754_s7 + $0xc70] sm:$0xff] }
 0x938   : > { %5686 = vmatpush.msrb.mxu0 %v5102_v25  ;;  %5706 = vmatpush.msrb.mxu1 %v5118_v51  ;;  %v5184_v26 = vld [vmem:[%s12754_s7 + $0xcf0] sm:$0xff]  ;;  %v5201_v25 = vld [vmem:[%s12754_s7 + $0xd78] sm:$0xff] }
 0x939   : > { %5725 = vmatpush.msrb.mxu2 %v5135_v17  ;;  %5745 = vmatpush.msrb.mxu3 %v5151_v60  ;;  %v5217_v51 = vld [vmem:[%s12754_s7 + $0xdf8] sm:$0xff]  ;;  %v5167_v17 = vld [vmem:[%s12754_s7 + $0xc68] sm:$0xff] }
 0x93a   : > { %5687 = vmatpush.msrb.mxu0 %v5101_v7  ;;  %5707 = vmatpush.msrb.mxu1 %v5117_v56  ;;  %v5183_v60 = vld [vmem:[%s12754_s7 + $0xce8] sm:$0xff]  ;;  %v5200_v7 = vld [vmem:[%s12754_s7 + $0xd70] sm:$0xff] }
 0x93b   : > { %5726 = vmatpush.msrb.mxu2 %v5134_v55  ;;  %5746 = vmatpush.msrb.mxu3 %v5150_v20  ;;  %v5216_v56 = vld [vmem:[%s12754_s7 + $0xdf0] sm:$0xff]  ;;  %v5166_v55 = vld [vmem:[%s12754_s7 + $0xc60] sm:$0xff] }
 0x93c   : > { %5688 = vmatpush.msrb.mxu0 %v5100_v39  ;;  %5708 = vmatpush.msrb.mxu1 %v5116_v12  ;;  %v5182_v20 = vld [vmem:[%s12754_s7 + $0xce0] sm:$0xff]  ;;  %v5199_v39 = vld [vmem:[%s12754_s7 + $0xd68] sm:$0xff] }
 0x93d   : > { %5727 = vmatpush.msrb.mxu2 %v5133_v44  ;;  %5747 = vmatpush.msrb.mxu3 %v5149_v61  ;;  %v5215_v12 = vld [vmem:[%s12754_s7 + $0xde8] sm:$0xff]  ;;  %v5165_v44 = vld [vmem:[%s12754_s7 + $0xc58] sm:$0xff] }
 0x93e   : > { %5689 = vmatpush.msrb.mxu0 %v5099_v29  ;;  %5709 = vmatpush.msrb.mxu1 %v5115_v14  ;;  %v5181_v61 = vld [vmem:[%s12754_s7 + $0xcd8] sm:$0xff]  ;;  %v5198_v29 = vld [vmem:[%s12754_s7 + $0xd60] sm:$0xff] }
 0x93f   : > { %5728 = vmatpush.msrb.mxu2 %v5132_v11  ;;  %5748 = vmatpush.msrb.mxu3 %v5148_v32  ;;  %v5214_v14 = vld [vmem:[%s12754_s7 + $0xde0] sm:$0xff]  ;;  %v5164_v11 = vld [vmem:[%s12754_s7 + $0xc50] sm:$0xff] }
 0x940   : > { %5690 = vmatpush.msrb.mxu0 %v5098_v49  ;;  %5710 = vmatpush.msrb.mxu1 %v5114_v47  ;;  %v5180_v32 = vld [vmem:[%s12754_s7 + $0xcd0] sm:$0xff]  ;;  %v5197_v49 = vld [vmem:[%s12754_s7 + $0xd58] sm:$0xff] }
 0x941   : > { %5729 = vmatpush.msrb.mxu2 %v5131_v62  ;;  %5749 = vmatpush.msrb.mxu3 %v5147_v31  ;;  %v5213_v47 = vld [vmem:[%s12754_s7 + $0xdd8] sm:$0xff]  ;;  %v5163_v62 = vld [vmem:[%s12754_s7 + $0xc48] sm:$0xff] }
 0x942   : > { %5691 = vmatpush.msrb.mxu0 %v5097_v52  ;;  %5711 = vmatpush.msrb.mxu1 %v5113_v22  ;;  %v5179_v31 = vld [vmem:[%s12754_s7 + $0xcc8] sm:$0xff]  ;;  %v5196_v52 = vld [vmem:[%s12754_s7 + $0xd50] sm:$0xff] }
 0x943   : > { %5730 = vmatpush.msrb.mxu2 %v5130_v10  ;;  %5750 = vmatpush.msrb.mxu3 %v5146_v30  ;;  %v5212_v22 = vld [vmem:[%s12754_s7 + $0xdd0] sm:$0xff]  ;;  %v5162_v10 = vld [vmem:[%s12754_s7 + $0xc40] sm:$0xff] }
 0x944   : > { %5692 = vmatpush.msrb.mxu0 %v5096_v28  ;;  %5712 = vmatpush.msrb.mxu1 %v5112_v59  ;;  %v5178_v30 = vld [vmem:[%s12754_s7 + $0xcc0] sm:$0xff]  ;;  %v5195_v28 = vld [vmem:[%s12754_s7 + $0xd48] sm:$0xff] }
 0x945   : > { %5731 = vmatpush.msrb.mxu2 %v5129_v33  ;;  %5751 = vmatpush.msrb.mxu3 %v5145_v19  ;;  %v5211_v59 = vld [vmem:[%s12754_s7 + $0xdc8] sm:$0xff]  ;;  %v5161_v33 = vld [vmem:[%s12754_s7 + $0xc38] sm:$0xff] }
 0x946   : > { %5693 = vmatpush.msrb.mxu0 %v5095_v53  ;;  %5713 = vmatpush.msrb.mxu1 %v5111_v48  ;;  %v5177_v19 = vld [vmem:[%s12754_s7 + $0xcb8] sm:$0xff]  ;;  %v5194_v53 = vld [vmem:[%s12754_s7 + $0xd40] sm:$0xff] }
 0x947   : > { %5732 = vmatpush.msrb.mxu2 %v5128_v0  ;;  %5752 = vmatpush.msrb.mxu3 %v5144_v50  ;;  %v5210_v48 = vld [vmem:[%s12754_s7 + $0xdc0] sm:$0xff]  ;;  %v5160_v0 = vld [vmem:[%s12754_s7 + $0xc30] sm:$0xff] }
 0x948   : > { %5694 = vmatpush.msrb.mxu0 %v5094_v23  ;;  %5714 = vmatpush.msrb.mxu1 %v5110_v3  ;;  %v5176_v50 = vld [vmem:[%s12754_s7 + $0xcb0] sm:$0xff]  ;;  %v5193_v23 = vld [vmem:[%s12754_s7 + $0xd38] sm:$0xff] }
 0x949   : > { %5733 = vmatpush.msrb.mxu2 %v5127_v45  ;;  %5753 = vmatpush.msrb.mxu3 %v5143_v21  ;;  %v5209_v3 = vld [vmem:[%s12754_s7 + $0xdb8] sm:$0xff]  ;;  %v5159_v45 = vld [vmem:[%s12754_s7 + $0xc28] sm:$0xff] }
 0x94a   : > { %5695 = vmatpush.msrb.mxu0 %v5093_v63  ;;  %5715 = vmatpush.msrb.mxu1 %v5109_v42  ;;  %v5175_v21 = vld [vmem:[%s12754_s7 + $0xca8] sm:$0xff]  ;;  %v5192_v63 = vld [vmem:[%s12754_s7 + $0xd30] sm:$0xff] }
 0x94b   : > { %5734 = vmatpush.msrb.mxu2 %v5126_v24  ;;  %5754 = vmatpush.msrb.mxu3 %v5142_v4  ;;  %v5208_v42 = vld [vmem:[%s12754_s7 + $0xdb0] sm:$0xff]  ;;  %v5158_v24 = vld [vmem:[%s12754_s7 + $0xc20] sm:$0xff] }
 0x94c   : > { %5696 = vmatpush.msrb.mxu0 %v5092_v36  ;;  %5716 = vmatpush.msrb.mxu1 %v5108_v57  ;;  %v5174_v4 = vld [vmem:[%s12754_s7 + $0xca0] sm:$0xff]  ;;  %v5191_v36 = vld [vmem:[%s12754_s7 + $0xd28] sm:$0xff] }
 0x94d   : > { %5735 = vmatpush.msrb.mxu2 %v5125_v35  ;;  %5755 = vmatpush.msrb.mxu3 %v5141_v18  ;;  %v5207_v57 = vld [vmem:[%s12754_s7 + $0xda8] sm:$0xff]  ;;  %v5157_v35 = vld [vmem:[%s12754_s7 + $0xc18] sm:$0xff] }
 0x94e   : > { %5697 = vmatpush.msrb.mxu0 %v5091_v54  ;;  %5717 = vmatpush.msrb.mxu1 %v5107_v16  ;;  %v5173_v18 = vld [vmem:[%s12754_s7 + $0xc98] sm:$0xff]  ;;  %v5190_v54 = vld [vmem:[%s12754_s7 + $0xd20] sm:$0xff] }
 0x94f   : > { %5736 = vmatpush.msrb.mxu2 %v5124_v1  ;;  %5756 = vmatpush.msrb.mxu3 %v5140_v6  ;;  %v5206_v16 = vld [vmem:[%s12754_s7 + $0xda0] sm:$0xff]  ;;  %v5156_v1 = vld [vmem:[%s12754_s7 + $0xc10] sm:$0xff] }
 0x950   : > { %5698 = vmatpush.msrb.mxu0 %v5090_v40  ;;  %5718 = vmatpush.msrb.mxu1 %v5106_v46  ;;  %v5172_v6 = vld [vmem:[%s12754_s7 + $0xc90] sm:$0xff]  ;;  %v5189_v40 = vld [vmem:[%s12754_s7 + $0xd18] sm:$0xff] }
 0x951   : > { %5737 = vmatpush.msrb.mxu2 %v5123_v13  ;;  %5757 = vmatpush.msrb.mxu3 %v5139_v5  ;;  %v5205_v46 = vld [vmem:[%s12754_s7 + $0xd98] sm:$0xff]  ;;  %v5155_v13 = vld [vmem:[%s12754_s7 + $0xc08] sm:$0xff] }
 0x952   : > { %5699 = vmatmul.f32.vlgmr.msrb.gmra.mxu0 %v4746_v15  ;;  %5719 = vmatmul.f32.vlgmr.msrb.gmra.mxu1 %v4747_v34  ;;  %v5171_v5 = vld [vmem:[%s12754_s7 + $0xc88] sm:$0xff]  ;;  %v5188_v15 = vld [vmem:[%s12754_s7 + $0xd10] sm:$0xff] }
 0x953   : > { %5763 = vmatpush.msra.mxu0 %v5169_v38  ;;  %5783 = vmatpush.msra.mxu1 %v5185_v9  ;;  %v5204_v34 = vld [vmem:[%s12754_s7 + $0xd90] sm:$0xff]  ;;  %v5154_v38 = vld [vmem:[%s12754_s7 + $0xc00] sm:$0xff] }
 0x954   : > { %5738 = vmatpush.msrb.mxu2 %v5122_v58  ;;  %5758 = vmatpush.msrb.mxu3 %v5138_v27  ;;  %v5170_v9 = vld [vmem:[%s12754_s7 + $0xc80] sm:$0xff]  ;;  %v5187_v58 = vld [vmem:[%s12754_s7 + $0xd08] sm:$0xff] }
 0x955   : > { %5739 = vmatmul.f32.vlgmr.msrb.gmra.mxu2 %v4750_v43  ;;  %5759 = vmatmul.f32.vlgmr.msrb.gmra.mxu3 %v4751_v8  ;;  %v5203_v27 = vld [vmem:[%s12754_s7 + $0xd88] sm:$0xff]  ;;  %v4754_v43 = vrot.slane %v12088_v2, 4  ;;  %v4755_v8 = vrot.slane %v12085_v41, 4 }
 0x956   : > { %5764 = vmatpush.msra.mxu0 %v5168_v37  ;;  %5784 = vmatpush.msra.mxu1 %v5184_v26  ;;  %v5233_v37 = vld [vmem:[%s12754_s7 + $0xe78] sm:$0xff] }
 0x957   : > { %5803 = vmatpush.msra.mxu2 %v5201_v25  ;;  %5823 = vmatpush.msra.mxu3 %v5217_v51  ;;  %v5249_v26 = vld [vmem:[%s12754_s7 + $0xef8] sm:$0xff]  ;;  %v5186_v25 = vld [vmem:[%s12754_s7 + $0xd00] sm:$0xff] }
 0x958   : > { %5765 = vmatpush.msra.mxu0 %v5167_v17  ;;  %5785 = vmatpush.msra.mxu1 %v5183_v60  ;;  %v5202_v51 = vld [vmem:[%s12754_s7 + $0xd80] sm:$0xff]  ;;  %v4758_v17 = vrot.slane %v12088_v2, 5  ;;  %v4759_v60 = vrot.slane %v12085_v41, 5 }
 0x959   : > { %5804 = vmatpush.msra.mxu2 %v5200_v7  ;;  %5824 = vmatpush.msra.mxu3 %v5216_v56  ;;  %v5232_v7 = vld [vmem:[%s12754_s7 + $0xe70] sm:$0xff] }
 0x95a   : > { %5766 = vmatpush.msra.mxu0 %v5166_v55  ;;  %5786 = vmatpush.msra.mxu1 %v5182_v20  ;;  %v5248_v56 = vld [vmem:[%s12754_s7 + $0xef0] sm:$0xff]  ;;  %v5265_v55 = vld [vmem:[%s12754_s7 + $0xf78] sm:$0xff] }
 0x95b   : > { %5805 = vmatpush.msra.mxu2 %v5199_v39  ;;  %5825 = vmatpush.msra.mxu3 %v5215_v12  ;;  %v5281_v20 = vld [vmem:[%s12754_s7 + $0xff8] sm:$0xff]  ;;  %v5231_v39 = vld [vmem:[%s12754_s7 + $0xe68] sm:$0xff] }
 0x95c   : > { %5767 = vmatpush.msra.mxu0 %v5165_v44  ;;  %5787 = vmatpush.msra.mxu1 %v5181_v61  ;;  %v5247_v12 = vld [vmem:[%s12754_s7 + $0xee8] sm:$0xff]  ;;  %v5264_v44 = vld [vmem:[%s12754_s7 + $0xf70] sm:$0xff] }
 0x95d   : > { %5806 = vmatpush.msra.mxu2 %v5198_v29  ;;  %5826 = vmatpush.msra.mxu3 %v5214_v14  ;;  %v5280_v61 = vld [vmem:[%s12754_s7 + $0xff0] sm:$0xff]  ;;  %v5230_v29 = vld [vmem:[%s12754_s7 + $0xe60] sm:$0xff] }
 0x95e   : > { %5768 = vmatpush.msra.mxu0 %v5164_v11  ;;  %5788 = vmatpush.msra.mxu1 %v5180_v32  ;;  %v5246_v14 = vld [vmem:[%s12754_s7 + $0xee0] sm:$0xff]  ;;  %v5263_v11 = vld [vmem:[%s12754_s7 + $0xf68] sm:$0xff] }
 0x95f   : > { %5807 = vmatpush.msra.mxu2 %v5197_v49  ;;  %5827 = vmatpush.msra.mxu3 %v5213_v47  ;;  %v5279_v32 = vld [vmem:[%s12754_s7 + $0xfe8] sm:$0xff]  ;;  %v5229_v49 = vld [vmem:[%s12754_s7 + $0xe58] sm:$0xff] }
 0x960   : > { %5769 = vmatpush.msra.mxu0 %v5163_v62  ;;  %5789 = vmatpush.msra.mxu1 %v5179_v31  ;;  %v5245_v47 = vld [vmem:[%s12754_s7 + $0xed8] sm:$0xff]  ;;  %v5262_v62 = vld [vmem:[%s12754_s7 + $0xf60] sm:$0xff] }
 0x961   : > { %5808 = vmatpush.msra.mxu2 %v5196_v52  ;;  %5828 = vmatpush.msra.mxu3 %v5212_v22  ;;  %v5278_v31 = vld [vmem:[%s12754_s7 + $0xfe0] sm:$0xff]  ;;  %v5228_v52 = vld [vmem:[%s12754_s7 + $0xe50] sm:$0xff] }
 0x962   : > { %5770 = vmatpush.msra.mxu0 %v5162_v10  ;;  %5790 = vmatpush.msra.mxu1 %v5178_v30  ;;  %v5244_v22 = vld [vmem:[%s12754_s7 + $0xed0] sm:$0xff]  ;;  %v5261_v10 = vld [vmem:[%s12754_s7 + $0xf58] sm:$0xff] }
 0x963   : > { %5809 = vmatpush.msra.mxu2 %v5195_v28  ;;  %5829 = vmatpush.msra.mxu3 %v5211_v59  ;;  %v5277_v30 = vld [vmem:[%s12754_s7 + $0xfd8] sm:$0xff]  ;;  %v5227_v28 = vld [vmem:[%s12754_s7 + $0xe48] sm:$0xff] }
 0x964   : > { %5771 = vmatpush.msra.mxu0 %v5161_v33  ;;  %5791 = vmatpush.msra.mxu1 %v5177_v19  ;;  %v5243_v59 = vld [vmem:[%s12754_s7 + $0xec8] sm:$0xff]  ;;  %v5260_v33 = vld [vmem:[%s12754_s7 + $0xf50] sm:$0xff] }
 0x965   : > { %5810 = vmatpush.msra.mxu2 %v5194_v53  ;;  %5830 = vmatpush.msra.mxu3 %v5210_v48  ;;  %v5276_v19 = vld [vmem:[%s12754_s7 + $0xfd0] sm:$0xff]  ;;  %v5226_v53 = vld [vmem:[%s12754_s7 + $0xe40] sm:$0xff] }
 0x966   : > { %5772 = vmatpush.msra.mxu0 %v5160_v0  ;;  %5792 = vmatpush.msra.mxu1 %v5176_v50  ;;  %v5242_v48 = vld [vmem:[%s12754_s7 + $0xec0] sm:$0xff]  ;;  %v5259_v0 = vld [vmem:[%s12754_s7 + $0xf48] sm:$0xff] }
 0x967   : > { %5811 = vmatpush.msra.mxu2 %v5193_v23  ;;  %5831 = vmatpush.msra.mxu3 %v5209_v3  ;;  %v5275_v50 = vld [vmem:[%s12754_s7 + $0xfc8] sm:$0xff]  ;;  %v5225_v23 = vld [vmem:[%s12754_s7 + $0xe38] sm:$0xff] }
 0x968   : > { %5773 = vmatpush.msra.mxu0 %v5159_v45  ;;  %5793 = vmatpush.msra.mxu1 %v5175_v21  ;;  %v5241_v3 = vld [vmem:[%s12754_s7 + $0xeb8] sm:$0xff]  ;;  %v5258_v45 = vld [vmem:[%s12754_s7 + $0xf40] sm:$0xff] }
 0x969   : > { %5812 = vmatpush.msra.mxu2 %v5192_v63  ;;  %5832 = vmatpush.msra.mxu3 %v5208_v42  ;;  %v5274_v21 = vld [vmem:[%s12754_s7 + $0xfc0] sm:$0xff]  ;;  %v5224_v63 = vld [vmem:[%s12754_s7 + $0xe30] sm:$0xff] }
 0x96a   : > { %5774 = vmatpush.msra.mxu0 %v5158_v24  ;;  %5794 = vmatpush.msra.mxu1 %v5174_v4  ;;  %v5240_v42 = vld [vmem:[%s12754_s7 + $0xeb0] sm:$0xff]  ;;  %v5257_v24 = vld [vmem:[%s12754_s7 + $0xf38] sm:$0xff] }
 0x96b   : > { %5813 = vmatpush.msra.mxu2 %v5191_v36  ;;  %5833 = vmatpush.msra.mxu3 %v5207_v57  ;;  %v5273_v4 = vld [vmem:[%s12754_s7 + $0xfb8] sm:$0xff]  ;;  %v5223_v36 = vld [vmem:[%s12754_s7 + $0xe28] sm:$0xff] }
 0x96c   : > { %5775 = vmatpush.msra.mxu0 %v5157_v35  ;;  %5795 = vmatpush.msra.mxu1 %v5173_v18  ;;  %v5239_v57 = vld [vmem:[%s12754_s7 + $0xea8] sm:$0xff]  ;;  %v5256_v35 = vld [vmem:[%s12754_s7 + $0xf30] sm:$0xff] }
 0x96d   : > { %5814 = vmatpush.msra.mxu2 %v5190_v54  ;;  %5834 = vmatpush.msra.mxu3 %v5206_v16  ;;  %v5272_v18 = vld [vmem:[%s12754_s7 + $0xfb0] sm:$0xff]  ;;  %v5222_v54 = vld [vmem:[%s12754_s7 + $0xe20] sm:$0xff] }
 0x96e   : > { %5776 = vmatpush.msra.mxu0 %v5156_v1  ;;  %5796 = vmatpush.msra.mxu1 %v5172_v6  ;;  %v5238_v16 = vld [vmem:[%s12754_s7 + $0xea0] sm:$0xff]  ;;  %v5255_v1 = vld [vmem:[%s12754_s7 + $0xf28] sm:$0xff] }
 0x96f   : > { %5815 = vmatpush.msra.mxu2 %v5189_v40  ;;  %5835 = vmatpush.msra.mxu3 %v5205_v46  ;;  %v5271_v6 = vld [vmem:[%s12754_s7 + $0xfa8] sm:$0xff]  ;;  %v5221_v40 = vld [vmem:[%s12754_s7 + $0xe18] sm:$0xff] }
 0x970   : > { %5777 = vmatpush.msra.mxu0 %v5155_v13  ;;  %5797 = vmatpush.msra.mxu1 %v5171_v5  ;;  %v5237_v46 = vld [vmem:[%s12754_s7 + $0xe98] sm:$0xff]  ;;  %v5254_v13 = vld [vmem:[%s12754_s7 + $0xf20] sm:$0xff] }
 0x971   : > { %5816 = vmatpush.msra.mxu2 %v5188_v15  ;;  %5836 = vmatpush.msra.mxu3 %v5204_v34  ;;  %v5270_v5 = vld [vmem:[%s12754_s7 + $0xfa0] sm:$0xff]  ;;  %v5220_v15 = vld [vmem:[%s12754_s7 + $0xe10] sm:$0xff] }
 0x972   : > { %5778 = vmatpush.msra.mxu0 %v5154_v38  ;;  %5798 = vmatpush.msra.mxu1 %v5170_v9  ;;  %v5236_v34 = vld [vmem:[%s12754_s7 + $0xe90] sm:$0xff]  ;;  %v5253_v38 = vld [vmem:[%s12754_s7 + $0xf18] sm:$0xff] }
 0x973   : > { %5817 = vmatpush.msra.mxu2 %v5187_v58  ;;  %5837 = vmatpush.msra.mxu3 %v5203_v27  ;;  %v5269_v9 = vld [vmem:[%s12754_s7 + $0xf98] sm:$0xff]  ;;  %v5219_v58 = vld [vmem:[%s12754_s7 + $0xe08] sm:$0xff] }
 0x974   : > { %5779 = vmatmul.f32.vlgmr.msra.gmra.mxu0 %v4754_v43  ;;  %5799 = vmatmul.f32.vlgmr.msra.gmra.mxu1 %v4755_v8  ;;  %v5235_v27 = vld [vmem:[%s12754_s7 + $0xe88] sm:$0xff]  ;;  %v5252_v43 = vld [vmem:[%s12754_s7 + $0xf10] sm:$0xff] }
 0x975   : > { %5843 = vmatpush.msrb.mxu0 %v5233_v37  ;;  %5863 = vmatpush.msrb.mxu1 %v5249_v26  ;;  %v5268_v8 = vld [vmem:[%s12754_s7 + $0xf90] sm:$0xff]  ;;  %v5218_v37 = vld [vmem:[%s12754_s7 + $0xe00] sm:$0xff] }
 0x976   : > { %5818 = vmatpush.msra.mxu2 %v5186_v25  ;;  %5838 = vmatpush.msra.mxu3 %v5202_v51  ;;  %v5234_v26 = vld [vmem:[%s12754_s7 + $0xe80] sm:$0xff]  ;;  %v5251_v25 = vld [vmem:[%s12754_s7 + $0xf08] sm:$0xff] }
 0x977   : > { %5819 = vmatmul.f32.vlgmr.msra.gmra.mxu2 %v4758_v17  ;;  %5839 = vmatmul.f32.vlgmr.msra.gmra.mxu3 %v4759_v60  ;;  %v5267_v51 = vld [vmem:[%s12754_s7 + $0xf88] sm:$0xff]  ;;  %v4762_v17 = vrot.slane %v12088_v2, 6  ;;  %v4763_v60 = vrot.slane %v12085_v41, 6 }
 0x978   : > { %5844 = vmatpush.msrb.mxu0 %v5232_v7  ;;  %5864 = vmatpush.msrb.mxu1 %v5248_v56  ;;  %v5250_v7 = vld [vmem:[%s12754_s7 + $0xf00] sm:$0xff] }
 0x979   : > { %5883 = vmatpush.msrb.mxu2 %v5265_v55  ;;  %5903 = vmatpush.msrb.mxu3 %v5281_v20  ;;  %v5266_v56 = vld [vmem:[%s12754_s7 + $0xf80] sm:$0xff]  ;;  %v4766_v55 = vrot.slane %v12088_v2, 7  ;;  %v4767_v20 = vrot.slane %v12085_v41, 7 }
 0x97a   : > { %5845 = vmatpush.msrb.mxu0 %v5231_v39  ;;  %5865 = vmatpush.msrb.mxu1 %v5247_v12  ;;  %v5282_v39 = vld [vmem:[%s12755_s8] sm:$0x1]  ;;  %v5300_v12 = vpop.f32.mrf.mxu0 }
 0x97b   : > { %5884 = vmatpush.msrb.mxu2 %v5264_v44  ;;  %5904 = vmatpush.msrb.mxu3 %v5280_v61  ;;  %v5301_v44 = vadd.f32 %v5300_v12, %v5282_v39  ;;  %v5320_v61 = vpop.f32.mrf.mxu1 }
 0x97c   : > { %5846 = vmatpush.msrb.mxu0 %v5230_v29  ;;  %5866 = vmatpush.msrb.mxu1 %v5246_v14  ;;  %v5340_v29 = vpop.f32.mrf.mxu2 }
 0x97d   : > { %5885 = vmatpush.msrb.mxu2 %v5263_v11  ;;  %5905 = vmatpush.msrb.mxu3 %v5279_v32  ;;  %v5321_v14 = vadd.f32 %v5320_v61, %v5301_v44  ;;  %v5360_v32 = vpop.f32.mrf.mxu3 }
 0x97e   : > { %5847 = vmatpush.msrb.mxu0 %v5229_v49  ;;  %5867 = vmatpush.msrb.mxu1 %v5245_v47 }
 0x97f   : > { %5886 = vmatpush.msrb.mxu2 %v5262_v62  ;;  %5906 = vmatpush.msrb.mxu3 %v5278_v31  ;;  %v5341_v11 = vadd.f32 %v5340_v29, %v5321_v14 }
 0x980   : > { %5848 = vmatpush.msrb.mxu0 %v5228_v52  ;;  %5868 = vmatpush.msrb.mxu1 %v5244_v22 }
 0x981   : > { %5887 = vmatpush.msrb.mxu2 %v5261_v10  ;;  %5907 = vmatpush.msrb.mxu3 %v5277_v30  ;;  %v5361_v49 = vadd.f32 %v5360_v32, %v5341_v11 }
 0x982   : > { %5849 = vmatpush.msrb.mxu0 %v5227_v28  ;;  %5869 = vmatpush.msrb.mxu1 %v5243_v59  ;;  %v5380_v47 = vpop.f32.mrf.mxu0 }
 0x983   : > { %5888 = vmatpush.msrb.mxu2 %v5260_v33  ;;  %5908 = vmatpush.msrb.mxu3 %v5276_v19  ;;  %v5381_v2 = vadd.f32 %v5380_v47, %v5361_v49  ;;  %v5400_v62 = vpop.f32.mrf.mxu1  ;;  %v5931_v47 = vld [vmem:[%s12757_s10] sm:$0x1] }
 0x984   : > { %5850 = vmatpush.msrb.mxu0 %v5226_v53  ;;  %5870 = vmatpush.msrb.mxu1 %v5242_v48  ;;  %v5420_v31 = vpop.f32.mrf.mxu2 }
 0x985   : > { %5889 = vmatpush.msrb.mxu2 %v5259_v0  ;;  %5909 = vmatpush.msrb.mxu3 %v5275_v50  ;;  %v5401_v41 = vadd.f32 %v5400_v62, %v5381_v2  ;;  %v5440_v22 = vpop.f32.mrf.mxu3 }
 0x986   : > { %5851 = vmatpush.msrb.mxu0 %v5225_v23  ;;  %5871 = vmatpush.msrb.mxu1 %v5241_v3 }
 0x987   : > { %5890 = vmatpush.msrb.mxu2 %v5258_v45  ;;  %5910 = vmatpush.msrb.mxu3 %v5274_v21  ;;  %v5421_v52 = vadd.f32 %v5420_v31, %v5401_v41 }
 0x988   : > { %5852 = vmatpush.msrb.mxu0 %v5224_v63  ;;  %5872 = vmatpush.msrb.mxu1 %v5240_v42 }
 0x989   : > { %5891 = vmatpush.msrb.mxu2 %v5257_v24  ;;  %5911 = vmatpush.msrb.mxu3 %v5273_v4  ;;  %v5441_v30 = vadd.f32 %v5440_v22, %v5421_v52 }
 0x98a   : > { %5853 = vmatpush.msrb.mxu0 %v5223_v36  ;;  %5873 = vmatpush.msrb.mxu1 %v5239_v57  ;;  %v5460_v10 = vpop.f32.mrf.mxu0  ;;  %v5930_v57 = vld [vmem:[%s12756_s9 + $0x30] sm:$0x3] }
 0x98b   : > { %5892 = vmatpush.msrb.mxu2 %v5256_v35  ;;  %5912 = vmatpush.msrb.mxu3 %v5272_v18  ;;  %v5461_v28 = vadd.f32 %v5460_v10, %v5441_v30  ;;  %v5480_v59 = vpop.f32.mrf.mxu1 }
 0x98c   : > { %5854 = vmatpush.msrb.mxu0 %v5222_v54  ;;  %5874 = vmatpush.msrb.mxu1 %v5238_v16  ;;  %v5500_v33 = vpop.f32.mrf.mxu2  ;;  %v5929_v16 = vld [vmem:[%s12756_s9 + $0x28] sm:$0xff] }
 0x98d   : > { %5893 = vmatpush.msrb.mxu2 %v5255_v1  ;;  %5913 = vmatpush.msrb.mxu3 %v5271_v6  ;;  %v5481_v19 = vadd.f32 %v5480_v59, %v5461_v28  ;;  %v5520_v48 = vpop.f32.mrf.mxu3  ;;  %v5928_v1 = vld [vmem:[%s12756_s9 + $0x20] sm:$0xff] }
 0x98e   : > { %5855 = vmatpush.msrb.mxu0 %v5221_v40  ;;  %5875 = vmatpush.msrb.mxu1 %v5237_v46  ;;  %v5927_v40 = vld [vmem:[%s12756_s9 + $0x18] sm:$0xff] }
 0x98f   : > { %5894 = vmatpush.msrb.mxu2 %v5254_v13  ;;  %5914 = vmatpush.msrb.mxu3 %v5270_v5  ;;  %v5501_v53 = vadd.f32 %v5500_v33, %v5481_v19 }
 0x990   : > { %5856 = vmatpush.msrb.mxu0 %v5220_v15  ;;  %5876 = vmatpush.msrb.mxu1 %v5236_v34  ;;  %v5926_v15 = vld [vmem:[%s12756_s9 + $0x10] sm:$0xff] }
 0x991   : > { %5895 = vmatpush.msrb.mxu2 %v5253_v38  ;;  %5915 = vmatpush.msrb.mxu3 %v5269_v9  ;;  %v5521_v50 = vadd.f32 %v5520_v48, %v5501_v53  ;;  %v5925_v38 = vld [vmem:[%s12756_s9 + $0x8] sm:$0xff]  ;;  %v5924_v9 = vld [vmem:[%s12756_s9] sm:$0xff] }
 0x992   : > { %5857 = vmatpush.msrb.mxu0 %v5219_v58  ;;  %5877 = vmatpush.msrb.mxu1 %v5235_v27  ;;  %v5540_v0 = vpop.f32.mrf.mxu0 }
 0x993   : > { %5896 = vmatpush.msrb.mxu2 %v5252_v43  ;;  %5916 = vmatpush.msrb.mxu3 %v5268_v8  ;;  %v5541_v23 = vadd.f32 %v5540_v0, %v5521_v50  ;;  %v5560_v3 = vpop.f32.mrf.mxu1 }
 0x994   : > { %5858 = vmatpush.msrb.mxu0 %v5218_v37  ;;  %5878 = vmatpush.msrb.mxu1 %v5234_v26  ;;  %v5580_v45 = vpop.f32.mrf.mxu2 }
 0x995   : > { %5897 = vmatpush.msrb.mxu2 %v5251_v25  ;;  %5917 = vmatpush.msrb.mxu3 %v5267_v51  ;;  %v5561_v21 = vadd.f32 %v5560_v3, %v5541_v23  ;;  %v5600_v42 = vpop.f32.mrf.mxu3 }
 0x996   : > { %5859 = vmatmul.f32.vlgmr.msrb.gmra.mxu0 %v4762_v17  ;;  %5879 = vmatmul.f32.vlgmr.msrb.gmra.mxu1 %v4763_v60 }
 0x997   : > { %5898 = vmatpush.msrb.mxu2 %v5250_v7  ;;  %5918 = vmatpush.msrb.mxu3 %v5266_v56  ;;  %v5581_v63 = vadd.f32 %v5580_v45, %v5561_v21 }
 0x998   : > { %5899 = vmatmul.f32.vlgmr.msrb.gmra.mxu2 %v4766_v55  ;;  %5919 = vmatmul.f32.vlgmr.msrb.gmra.mxu3 %v4767_v20 }
 0x999   : > { %v5601_v4 = vadd.f32 %v5600_v42, %v5581_v63  ;;  %6701 = vmatpush.msk.msra.mxu0 %vm5936_vm3, %v5930_v57 }
 0x99b   : > { %5950 = vmatpush.msra.mxu0 %v5929_v16 }
 0x99d   : > { %5951 = vmatpush.msra.mxu0 %v5928_v1 }
 0x99f   : > { %5952 = vmatpush.msra.mxu0 %v5927_v40 }
 0x9a1   : > { %5953 = vmatpush.msra.mxu0 %v5926_v15 }
 0x9a3   : > { %5954 = vmatpush.msra.mxu0 %v5925_v38 }
 0x9a5   : > { %5955 = vmatpush.msra.mxu0 %v5924_v9 }
 0x9ad   : > { %v5620_v24 = vpop.f32.mrf.mxu0  ;;  %v5640_v35 = vpop.f32.mrf.mxu1 }
 0x9ae   : > { %v5621_v36 = vadd.f32 %v5620_v24, %v5601_v4 }
 0x9b0   : > { %v5641_v54 = vadd.f32 %v5640_v35, %v5621_v36 }
 0x9b6   : > { %v5660_v18 = vpop.f32.mrf.mxu2  ;;  %v5680_v46 = vpop.f32.mrf.mxu3 }
 0x9b7   : > { %v5661_v6 = vadd.f32 %v5660_v18, %v5641_v54 }
 0x9b9   : > { %v5681_v5 = vadd.f32 %v5680_v46, %v5661_v6 }
 0x9cf   : > { %v5700_v13 = vpop.f32.mrf.mxu0  ;;  %v5720_v58 = vpop.f32.mrf.mxu1 }
 0x9d0   : > { %v5701_v34 = vadd.f32 %v5700_v13, %v5681_v5 }
 0x9d2   : > { %v5721_v43 = vadd.f32 %v5720_v58, %v5701_v34 }
 0x9d8   : > { %v5740_v27 = vpop.f32.mrf.mxu2  ;;  %v5760_v37 = vpop.f32.mrf.mxu3 }
 0x9d9   : > { %v5741_v8 = vadd.f32 %v5740_v27, %v5721_v43 }
 0x9db   : > { %v5761_v25 = vadd.f32 %v5760_v37, %v5741_v8 }
 0x9f1   : > { %v5780_v26 = vpop.f32.mrf.mxu0  ;;  %v5800_v17 = vpop.f32.mrf.mxu1 }
 0x9f2   : > { %v5781_v51 = vadd.f32 %v5780_v26, %v5761_v25 }
 0x9f4   : > { %v5801_v7 = vadd.f32 %v5800_v17, %v5781_v51 }
 0x9fa   : > { %v5820_v60 = vpop.f32.mrf.mxu2  ;;  %v5840_v55 = vpop.f32.mrf.mxu3 }
 0x9fb   : > { %v5821_v56 = vadd.f32 %v5820_v60, %v5801_v7 }
 0x9fd   : > { %v5841_v39 = vadd.f32 %v5840_v55, %v5821_v56 }
 0xa13   : > { %v5860_v20 = vpop.f32.mrf.mxu0  ;;  %v5880_v44 = vpop.f32.mrf.mxu1 }
 0xa14   : > { %v5861_v12 = vadd.f32 %v5860_v20, %v5841_v39 }
 0xa16   : > { %v5881_v61 = vadd.f32 %v5880_v44, %v5861_v12 }
 0xa1b   : > { %v5900_v29 = vpop.f32.mrf.mxu2  ;;  %v5920_v11 = vpop.f32.mrf.mxu3 }
 0xa1c   : > { %v5901_v14 = vadd.f32 %v5900_v29, %v5881_v61 }
 0xa1e   : > { %v5921_v32 = vadd.f32 %v5920_v11, %v5901_v14 }
 0xa20   : > { %v5923_v49 = vmax.f32 %v5921_v32, 0.0 }
 0xa22   : > { %6702 = vmatmul.msk.f32.vlgmr.msra.gmra.mxu0 %vm5932_vm4, %v5923_v49 }
 0xa9f   : > { %v5957_v2 = vpop.f32.mrf.mxu0 }
 0xaa0   : > { %v5958_v62 = vadd.f32 %v5957_v2, %v5931_v47 }
 0xaa2   : > { %5961 = vst.msk [vmem:[%s378_s29] sm:$0x1] %vm5960_vm5, %v5958_v62 }
 0xaa3   : > { %6845 = shalt.err (!%p6842_p3)
}
 0xaa4   : > { %6706 = dma.vmem_to_hbm [thread:$0]  (%p6981_p5), %s5974_s30, 16, %s5976_s12, %s5963_s16  }
 0xaa5 PF: > { %p6712_p4 = scmp.ge.s32.totalorder %s6880_s20, 2  ;;  %s5987_s26 = sand.u32 1, %s6868_s17  }
 0xaa6   : > { %s5988_s25 = scalar_lea.sflag [#allocation3], %s5987_s26 }
 0xaa7   : > { %p6709_p7 = pnand %p6712_p4, %p6985_p6 }
 0xaa9   : > { %p6710_p8 = pneg %p6709_p7 }
 0xaab   : > { %6863 = dma.done.wait (%p6710_p8), %s5988_s25, 16  }
 0xaac   : > { %6865 = vsyncadd (%p6710_p8), %s5988_s25, 4294967280  ;;  %s13941_s29 = sld [smem:[#allocation5_spill]]  ;;  %p21_p9 = scmp.ge.s32.totalorder %s6968_s23, 4  }
 0xaad   : > { %s13942_s19 = sld [smem:[#allocation6_spill]]  ;;  %s13943_s17 = smov %s6872_s18 }
 0xaae   : > { %s13945_s20 = smov %s6968_s23  ;;  %23 = sbr.rel (!%p21_p9) target bundleno = 3 (0x3), region = 104 }
 0xab2   : > { %s13944_s18 = smov %s13941_s29 }
 0xab3   :  { %5993 = vsyncpa [#allocation3], 1 }
 0xab4   :  { %5995 = vsyncpa [#allocation3 + $0x1], 1 }

</bundles_post_ra>
